<compile_context>
chip_gen: v7x
topology: tpu7x:2x2x1
jax: 0.10.0
libtpu: 0.0.40
codegen_flags: <defaults>
</compile_context>

<pallas_src>
import jax
import jax.numpy as jnp
from jax.experimental import pallas as pl
from jax.experimental.pallas import tpu as pltpu

# Module-consistent shapes (n_embed is the module's stated default).
N_EMBED = 256
N_HEAD = 4
HEAD_SIZE = N_EMBED // N_HEAD      # 64
SEQ = 128                          # <= block_size (256)
BATCH = 2
EPS = 1e-5                         # nn.LayerNorm default
NEG_BIG = -1e30                    # finite "masked" bias (avoids -inf NaN hazards)


def make_block_kernel(ffn_elementwise_bf16: bool):
    """Build the Block kernel. `ffn_elementwise_bf16` keeps the FFN hidden
    activation (128x1024) in bf16 on bf16-VPU chips (v6e/v7x)."""

    def block_kernel(x_ref,
                     ln1_g_ref, ln1_b_ref,
                     wqkv_ref,                 # (C, 3C) bf16, scale folded into q
                     wp_ref, bp_ref,           # (C, C) bf16, (1, C) f32
                     ln2_g_ref, ln2_b_ref,
                     w1_ref, b1_ref,           # (C, 4C) bf16, (1, 4C) f32
                     w2_ref, b2_ref,           # (4C, C) bf16, (1, C) f32
                     out_ref):
        # x_ref block: (1, T, C) -> one batch element per grid step.
        x = x_ref[0].astype(jnp.float32)                # (T, C)
        T, C = x.shape

        # ---------------- LayerNorm 1 (f32) ----------------
        mu = jnp.mean(x, axis=-1, keepdims=True)
        var = jnp.mean((x - mu) ** 2, axis=-1, keepdims=True)
        h = (x - mu) * jax.lax.rsqrt(var + EPS)
        h = h * ln1_g_ref[...] + ln1_b_ref[...]         # (T, C)
        h_bf = h.astype(jnp.bfloat16)                   # bf16 operand for the MXU

        # ---------------- Multi-head causal self-attention ----------------
        # Single fused QKV projection: (T, C) x (C, 3C) -> (T, 3C), f32 accumulate.
        qkv = jnp.dot(h_bf, wqkv_ref[...],
                      preferred_element_type=jnp.float32)             # (T, 3C)
        # Cast BEFORE the head-major relayouts so the reshape/transpose move bf16.
        qkv_bf = qkv.astype(jnp.bfloat16)
        q3 = qkv_bf[:, 0 * C:1 * C].reshape(T, N_HEAD, HEAD_SIZE).transpose(1, 0, 2)
        k3 = qkv_bf[:, 1 * C:2 * C].reshape(T, N_HEAD, HEAD_SIZE).transpose(1, 0, 2)
        v3 = qkv_bf[:, 2 * C:3 * C].reshape(T, N_HEAD, HEAD_SIZE).transpose(1, 0, 2)

        # Scores: scale (C**-0.5, module quirk: n_embed not head_size) is already
        # folded into the q columns of wqkv -> no post-multiply here.
        scores = jnp.einsum('htd,hsd->hts', q3, k3,
                            preferred_element_type=jnp.float32)       # (H, T, T)

        # Causal mask as one additive bias, broadcast over heads.
        row = jax.lax.broadcasted_iota(jnp.int32, (T, T), 0)
        col = jax.lax.broadcasted_iota(jnp.int32, (T, T), 1)
        bias = jnp.where(row >= col, jnp.float32(0.0), jnp.float32(NEG_BIG))
        scores = scores + bias[None, :, :]

        # Softmax (row max for safety; reciprocal on the EUP slot).
        m = jnp.max(scores, axis=-1, keepdims=True)
        e = jnp.exp(scores - m)
        denom = jnp.sum(e, axis=-1, keepdims=True)
        p = e * pl.reciprocal(denom, approx=True)                     # (H, T, T)
        # dropout(p) -> identity (inference)

        att = jnp.einsum('hts,hsd->htd', p.astype(jnp.bfloat16), v3,
                         preferred_element_type=jnp.float32)          # (H, T, hs)
        # Cast before the relayout back to (T, C).
        sa_in = att.astype(jnp.bfloat16).transpose(1, 0, 2).reshape(T, C)

        sa = jnp.dot(sa_in, wp_ref[...],
                     preferred_element_type=jnp.float32) + bp_ref[...]
        # dropout(sa) -> identity (inference)

        x1 = x + sa                                                   # residual 1

        # ---------------- LayerNorm 2 (f32) ----------------
        mu2 = jnp.mean(x1, axis=-1, keepdims=True)
        var2 = jnp.mean((x1 - mu2) ** 2, axis=-1, keepdims=True)
        h2 = (x1 - mu2) * jax.lax.rsqrt(var2 + EPS)
        h2 = h2 * ln2_g_ref[...] + ln2_b_ref[...]

        # ---------------- FeedForward: Linear -> ReLU -> Linear ----------------
        f1 = jnp.dot(h2.astype(jnp.bfloat16), w1_ref[...],
                     preferred_element_type=jnp.float32)              # (T, 4C)
        if ffn_elementwise_bf16:
            # bf16 bias-add + ReLU (v6e/v7x: bf16-native VALU, halves live vregs).
            f1_bf = jnp.maximum(
                f1.astype(jnp.bfloat16) + b1_ref[...].astype(jnp.bfloat16), 0)
        else:
            # v5e path: keep elementwise math in f32 (no bf16 VPU).
            f1_bf = jnp.maximum(f1 + b1_ref[...], 0.0).astype(jnp.bfloat16)
        f2 = jnp.dot(f1_bf, w2_ref[...],
                     preferred_element_type=jnp.float32) + b2_ref[...]
        # dropout(f2) -> identity (inference)

        out_ref[0] = (x1 + f2).astype(out_ref.dtype)                  # residual 2

    return block_kernel


def _ffn_elementwise_bf16_default():
    """bf16 elementwise FFN only on chips with a bf16-native VPU (v6e/v7x)."""
    try:
        kind = jax.devices()[0].device_kind.lower()
        return ("v6" in kind) or ("v7" in kind)
    except Exception:
        return False


def block_forward(x, params, ffn_elementwise_bf16=None):
    if ffn_elementwise_bf16 is None:
        ffn_elementwise_bf16 = _ffn_elementwise_bf16_default()

    B, T, C = x.shape

    # Parameter prep (outside the kernel):
    #   * fuse wq|wk|wv into one (C, 3C) weight,
    #   * fold the attention scale (power of two -> bf16-exact) into the q part,
    #   * store all matmul weights as bf16 to halve weight-DMA bytes.
    scale = jnp.float32(C ** (-0.5))
    wqkv = jnp.concatenate(
        [params["wq"] * scale, params["wk"], params["wv"]], axis=1
    ).astype(jnp.bfloat16)                                   # (C, 3C)
    wp = params["wp"].astype(jnp.bfloat16)                   # (C, C)
    w1 = params["w1"].astype(jnp.bfloat16)                   # (C, 4C)
    w2 = params["w2"].astype(jnp.bfloat16)                   # (4C, C)

    param_list = [
        params["ln1_g"], params["ln1_b"],
        wqkv, wp, params["bp"],
        params["ln2_g"], params["ln2_b"],
        w1, params["b1"], w2, params["b2"],
    ]

    def full_spec(p):
        nd = p.ndim
        return pl.BlockSpec(p.shape, lambda b, _nd=nd: (0,) * _nd)

    in_specs = [pl.BlockSpec((1, T, C), lambda b: (b, 0, 0))]
    in_specs += [full_spec(p) for p in param_list]

    return pl.pallas_call(
        make_block_kernel(ffn_elementwise_bf16),
        out_shape=jax.ShapeDtypeStruct((B, T, C), x.dtype),
        grid_spec=pltpu.PrefetchScalarGridSpec(
            num_scalar_prefetch=0,
            grid=(B,),
            in_specs=in_specs,
            out_specs=pl.BlockSpec((1, T, C), lambda b: (b, 0, 0)),
        ),
        compiler_params=pltpu.CompilerParams(
            dimension_semantics=("parallel",),   # shards batch across v7x's 2 TCs
        ),
    )(x, *param_list)


def block_reference(x, p):
    """Pure-JAX (f32) reference for correctness checking."""
    x = x.astype(jnp.float32)

    def ln(z, g, b):
        mu = jnp.mean(z, axis=-1, keepdims=True)
        var = jnp.mean((z - mu) ** 2, axis=-1, keepdims=True)
        return (z - mu) * jax.lax.rsqrt(var + EPS) * g + b

    B, T, C = x.shape
    h = ln(x, p["ln1_g"], p["ln1_b"])
    q = (h @ p["wq"]).reshape(B, T, N_HEAD, HEAD_SIZE).transpose(0, 2, 1, 3)
    k = (h @ p["wk"]).reshape(B, T, N_HEAD, HEAD_SIZE).transpose(0, 2, 1, 3)
    v = (h @ p["wv"]).reshape(B, T, N_HEAD, HEAD_SIZE).transpose(0, 2, 1, 3)
    w = jnp.einsum('bhtd,bhsd->bhts', q, k) * C ** (-0.5)
    mask = jnp.tril(jnp.ones((T, T), bool))
    w = jnp.where(mask, w, -jnp.inf)
    w = jax.nn.softmax(w, axis=-1)
    att = jnp.einsum('bhts,bhsd->bhtd', w, v)
    sa = att.transpose(0, 2, 1, 3).reshape(B, T, C) @ p["wp"] + p["bp"]
    x1 = x + sa
    h2 = ln(x1, p["ln2_g"], p["ln2_b"])
    f2 = jax.nn.relu(h2 @ p["w1"] + p["b1"]) @ p["w2"] + p["b2"]
    return x1 + f2


def init_params(key):
    ks = jax.random.split(key, 8)
    s = 0.02
    C, H = N_EMBED, 4 * N_EMBED
    return {
        "ln1_g": jnp.ones((1, C), jnp.float32),
        "ln1_b": jnp.zeros((1, C), jnp.float32),
        "wq": s * jax.random.normal(ks[0], (C, C), jnp.float32),
        "wk": s * jax.random.normal(ks[1], (C, C), jnp.float32),
        "wv": s * jax.random.normal(ks[2], (C, C), jnp.float32),
        "wp": s * jax.random.normal(ks[3], (C, C), jnp.float32),
        "bp": jnp.zeros((1, C), jnp.float32),
        "ln2_g": jnp.ones((1, C), jnp.float32),
        "ln2_b": jnp.zeros((1, C), jnp.float32),
        "w1": s * jax.random.normal(ks[4], (C, H), jnp.float32),
        "b1": jnp.zeros((1, H), jnp.float32),
        "w2": s * jax.random.normal(ks[5], (H, C), jnp.float32),
        "b2": jnp.zeros((1, C), jnp.float32),
    }


if __name__ == "__main__":
    key = jax.random.PRNGKey(0)
    kx, kp = jax.random.split(key)
    x = jax.random.normal(kx, (BATCH, SEQ, N_EMBED), jnp.float32)
    params = init_params(kp)

    out = block_forward(x, params)
    out = jax.block_until_ready(out)

    ref = block_reference(x, params)
    assert out.shape == (BATCH, SEQ, N_EMBED)
    # bf16 MXU weights/operands + approx reciprocal -> compare against the f32
    # reference with a correspondingly relaxed tolerance.
    assert jnp.allclose(out, ref, atol=1e-2, rtol=1e-2), "mismatch vs reference"

    # TODO(synk): dropout (p=0.5) is modeled as identity (eval mode); add
    # pltpu.prng_random_bits-based masking if training-mode semantics are needed.
    print("KERNEL_OK")
</pallas_src>

<mosaic_0001>
module attributes {stable_mosaic.version = 11 : i64} {
  func.func @block_kernel(%arg0: i32, %arg1: memref<1x128x256xf32, #tpu.memory_space<vmem>>, %arg2: memref<1x256xf32, #tpu.memory_space<vmem>>, %arg3: memref<1x256xf32, #tpu.memory_space<vmem>>, %arg4: memref<256x768xbf16, #tpu.memory_space<vmem>>, %arg5: memref<256x256xbf16, #tpu.memory_space<vmem>>, %arg6: memref<1x256xf32, #tpu.memory_space<vmem>>, %arg7: memref<1x256xf32, #tpu.memory_space<vmem>>, %arg8: memref<1x256xf32, #tpu.memory_space<vmem>>, %arg9: memref<256x1024xbf16, #tpu.memory_space<vmem>>, %arg10: memref<1x1024xf32, #tpu.memory_space<vmem>>, %arg11: memref<1024x256xbf16, #tpu.memory_space<vmem>>, %arg12: memref<1x256xf32, #tpu.memory_space<vmem>>, %arg13: memref<1x128x256xf32, #tpu.memory_space<vmem>>) attributes {dimension_semantics = [#tpu.dimension_semantics<parallel>], iteration_bounds = array<i64: 2>, scalar_prefetch = 0 : i64, scratch_operands = 0 : i64, tpu.core_type = #tpu.core_type<tc>, window_params = [{transform_indices = @transform_0, window_bounds = array<i64: 1, 128, 256>}, {pipeline_mode = #tpu.pipeline_mode<synchronous>, transform_indices = @transform_1, window_bounds = array<i64: 1, 256>}, {pipeline_mode = #tpu.pipeline_mode<synchronous>, transform_indices = @transform_2, window_bounds = array<i64: 1, 256>}, {pipeline_mode = #tpu.pipeline_mode<synchronous>, transform_indices = @transform_3, window_bounds = array<i64: 256, 768>}, {pipeline_mode = #tpu.pipeline_mode<synchronous>, transform_indices = @transform_4, window_bounds = array<i64: 256, 256>}, {pipeline_mode = #tpu.pipeline_mode<synchronous>, transform_indices = @transform_5, window_bounds = array<i64: 1, 256>}, {pipeline_mode = #tpu.pipeline_mode<synchronous>, transform_indices = @transform_6, window_bounds = array<i64: 1, 256>}, {pipeline_mode = #tpu.pipeline_mode<synchronous>, transform_indices = @transform_7, window_bounds = array<i64: 1, 256>}, {pipeline_mode = #tpu.pipeline_mode<synchronous>, transform_indices = @transform_8, window_bounds = array<i64: 256, 1024>}, {pipeline_mode = #tpu.pipeline_mode<synchronous>, transform_indices = @transform_9, window_bounds = array<i64: 1, 1024>}, {pipeline_mode = #tpu.pipeline_mode<synchronous>, transform_indices = @transform_10, window_bounds = array<i64: 1024, 256>}, {pipeline_mode = #tpu.pipeline_mode<synchronous>, transform_indices = @transform_11, window_bounds = array<i64: 1, 256>}, {transform_indices = @transform_12, window_bounds = array<i64: 1, 128, 256>}]} {
    %c0 = arith.constant 0 : index
    %c0_0 = arith.constant 0 : index
    %c0_1 = arith.constant 0 : index
    %0 = vector.load %arg1[%c0, %c0_0, %c0_1] : memref<1x128x256xf32, #tpu.memory_space<vmem>>, vector<1x128x256xf32>
    %1 = vector.shape_cast %0 : vector<1x128x256xf32> to vector<128x256xf32>
    %cst = arith.constant dense<0.000000e+00> : vector<128xf32>
    %2 = vector.multi_reduction <add>, %1, %cst [1] : vector<128x256xf32> to vector<128xf32>
    %3 = vector.shape_cast %2 : vector<128xf32> to vector<128x1xf32>
    %cst_2 = arith.constant 2.560000e+02 : f32
    %4 = vector.broadcast %cst_2 : f32 to vector<128x1xf32>
    %5 = arith.divf %3, %4 : vector<128x1xf32>
    %6 = vector.broadcast %5 : vector<128x1xf32> to vector<128x256xf32>
    %7 = arith.subf %1, %6 : vector<128x256xf32>
    %8 = arith.mulf %7, %7 : vector<128x256xf32>
    %cst_3 = arith.constant dense<0.000000e+00> : vector<128xf32>
    %9 = vector.multi_reduction <add>, %8, %cst_3 [1] : vector<128x256xf32> to vector<128xf32>
    %10 = vector.shape_cast %9 : vector<128xf32> to vector<128x1xf32>
    %cst_4 = arith.constant 2.560000e+02 : f32
    %11 = vector.broadcast %cst_4 : f32 to vector<128x1xf32>
    %12 = arith.divf %10, %11 : vector<128x1xf32>
    %13 = vector.broadcast %5 : vector<128x1xf32> to vector<128x256xf32>
    %14 = arith.subf %1, %13 : vector<128x256xf32>
    %cst_5 = arith.constant 9.99999974E-6 : f32
    %15 = vector.broadcast %cst_5 : f32 to vector<128x1xf32>
    %16 = arith.addf %12, %15 : vector<128x1xf32>
    %17 = math.rsqrt %16 : vector<128x1xf32>
    %18 = vector.broadcast %17 : vector<128x1xf32> to vector<128x256xf32>
    %19 = arith.mulf %14, %18 : vector<128x256xf32>
    %c0_6 = arith.constant 0 : index
    %c0_7 = arith.constant 0 : index
    %20 = vector.load %arg2[%c0_6, %c0_7] : memref<1x256xf32, #tpu.memory_space<vmem>>, vector<1x256xf32>
    %21 = vector.broadcast %20 : vector<1x256xf32> to vector<128x256xf32>
    %22 = arith.mulf %19, %21 : vector<128x256xf32>
    %c0_8 = arith.constant 0 : index
    %c0_9 = arith.constant 0 : index
    %23 = vector.load %arg3[%c0_8, %c0_9] : memref<1x256xf32, #tpu.memory_space<vmem>>, vector<1x256xf32>
    %24 = vector.broadcast %23 : vector<1x256xf32> to vector<128x256xf32>
    %25 = arith.addf %22, %24 : vector<128x256xf32>
    %26 = arith.truncf %25 : vector<128x256xf32> to vector<128x256xbf16>
    %c0_10 = arith.constant 0 : index
    %c0_11 = arith.constant 0 : index
    %27 = vector.load %arg4[%c0_10, %c0_11] : memref<256x768xbf16, #tpu.memory_space<vmem>>, vector<256x768xbf16>
    %cst_12 = arith.constant dense<0.000000e+00> : vector<128x768xf32>
    %28 = tpu.matmul %26, %27, %cst_12 {dimension_numbers = #tpu.dot_dimension_numbers<[1], [0], [0], [1], [0, 0, 1, 1], [], []>} : vector<128x256xbf16>, vector<256x768xbf16>, vector<128x768xf32> -> vector<128x768xf32>
    %29 = arith.truncf %28 : vector<128x768xf32> to vector<128x768xbf16>
    %30 = vector.extract_strided_slice %29 {offsets = [0, 0], sizes = [128, 256], strides = [1, 1]} : vector<128x768xbf16> to vector<128x256xbf16>
    %31 = vector.shape_cast %30 : vector<128x256xbf16> to vector<128x4x64xbf16>
    %32 = tpu.transpose %31, [1, 0, 2] : vector<128x4x64xbf16> -> vector<4x128x64xbf16>
    %33 = vector.extract_strided_slice %29 {offsets = [0, 256], sizes = [128, 256], strides = [1, 1]} : vector<128x768xbf16> to vector<128x256xbf16>
    %34 = vector.shape_cast %33 : vector<128x256xbf16> to vector<128x4x64xbf16>
    %35 = tpu.transpose %34, [1, 0, 2] : vector<128x4x64xbf16> -> vector<4x128x64xbf16>
    %36 = vector.extract_strided_slice %29 {offsets = [0, 512], sizes = [128, 256], strides = [1, 1]} : vector<128x768xbf16> to vector<128x256xbf16>
    %37 = vector.shape_cast %36 : vector<128x256xbf16> to vector<128x4x64xbf16>
    %38 = tpu.transpose %37, [1, 0, 2] : vector<128x4x64xbf16> -> vector<4x128x64xbf16>
    "tpu.trace_start"() <{level = 10 : i32, message = "htd,hsd->hts"}> : () -> ()
    %cst_13 = arith.constant dense<0.000000e+00> : vector<4x128x128xf32>
    %39 = tpu.matmul %32, %35, %cst_13 {dimension_numbers = #tpu.dot_dimension_numbers<[2], [2], [1], [1], [0, 0, 0, 1, 1, 1], [0], [0]>} : vector<4x128x64xbf16>, vector<4x128x64xbf16>, vector<4x128x128xf32> -> vector<4x128x128xf32>
    "tpu.trace_stop"() : () -> ()
    %40 = tpu.iota {dimensions = array<i32: 0>} : vector<128x128xi32>
    %41 = tpu.iota {dimensions = array<i32: 1>} : vector<128x128xi32>
    %42 = arith.cmpi sge, %40, %41 : vector<128x128xi32>
    %cst_14 = arith.constant 0.000000e+00 : f32
    %cst_15 = arith.constant -1.000000e+30 : f32
    %43 = vector.broadcast %cst_14 : f32 to vector<128x128xf32>
    %44 = vector.broadcast %cst_15 : f32 to vector<128x128xf32>
    %45 = arith.select %42, %43, %44 : vector<128x128xi1>, vector<128x128xf32>
    %46 = vector.shape_cast %45 : vector<128x128xf32> to vector<1x128x128xf32>
    %47 = vector.broadcast %46 : vector<1x128x128xf32> to vector<4x128x128xf32>
    %48 = arith.addf %39, %47 : vector<4x128x128xf32>
    %cst_16 = arith.constant dense<0xFF800000> : vector<4x128xf32>
    %49 = vector.multi_reduction <maximumf>, %48, %cst_16 [2] : vector<4x128x128xf32> to vector<4x128xf32>
    %50 = vector.shape_cast %49 : vector<4x128xf32> to vector<4x128x1xf32>
    %51 = vector.broadcast %50 : vector<4x128x1xf32> to vector<4x128x128xf32>
    %52 = arith.subf %48, %51 : vector<4x128x128xf32>
    %53 = math.exp %52 : vector<4x128x128xf32>
    %cst_17 = arith.constant dense<0.000000e+00> : vector<4x128xf32>
    %54 = vector.multi_reduction <add>, %53, %cst_17 [2] : vector<4x128x128xf32> to vector<4x128xf32>
    %55 = vector.shape_cast %54 : vector<4x128xf32> to vector<4x128x1xf32>
    %56 = tpu.reciprocal %55 {approx = true} : vector<4x128x1xf32> -> vector<4x128x1xf32>
    %57 = vector.broadcast %56 : vector<4x128x1xf32> to vector<4x128x128xf32>
    %58 = arith.mulf %53, %57 : vector<4x128x128xf32>
    %59 = arith.truncf %58 : vector<4x128x128xf32> to vector<4x128x128xbf16>
    "tpu.trace_start"() <{level = 10 : i32, message = "hts,hsd->htd"}> : () -> ()
    %cst_18 = arith.constant dense<0.000000e+00> : vector<4x128x64xf32>
    %60 = tpu.matmul %59, %38, %cst_18 {dimension_numbers = #tpu.dot_dimension_numbers<[2], [1], [1], [2], [0, 0, 0, 1, 1, 2], [0], [0]>} : vector<4x128x128xbf16>, vector<4x128x64xbf16>, vector<4x128x64xf32> -> vector<4x128x64xf32>
    "tpu.trace_stop"() : () -> ()
    %61 = arith.truncf %60 : vector<4x128x64xf32> to vector<4x128x64xbf16>
    %62 = tpu.transpose %61, [1, 0, 2] : vector<4x128x64xbf16> -> vector<128x4x64xbf16>
    %63 = vector.shape_cast %62 : vector<128x4x64xbf16> to vector<128x256xbf16>
    %c0_19 = arith.constant 0 : index
    %c0_20 = arith.constant 0 : index
    %64 = vector.load %arg5[%c0_19, %c0_20] : memref<256x256xbf16, #tpu.memory_space<vmem>>, vector<256x256xbf16>
    %cst_21 = arith.constant dense<0.000000e+00> : vector<128x256xf32>
    %65 = tpu.matmul %63, %64, %cst_21 {dimension_numbers = #tpu.dot_dimension_numbers<[1], [0], [0], [1], [0, 0, 1, 1], [], []>} : vector<128x256xbf16>, vector<256x256xbf16>, vector<128x256xf32> -> vector<128x256xf32>
    %c0_22 = arith.constant 0 : index
    %c0_23 = arith.constant 0 : index
    %66 = vector.load %arg6[%c0_22, %c0_23] : memref<1x256xf32, #tpu.memory_space<vmem>>, vector<1x256xf32>
    %67 = vector.broadcast %66 : vector<1x256xf32> to vector<128x256xf32>
    %68 = arith.addf %65, %67 : vector<128x256xf32>
    %69 = arith.addf %1, %68 : vector<128x256xf32>
    %cst_24 = arith.constant dense<0.000000e+00> : vector<128xf32>
    %70 = vector.multi_reduction <add>, %69, %cst_24 [1] : vector<128x256xf32> to vector<128xf32>
    %71 = vector.shape_cast %70 : vector<128xf32> to vector<128x1xf32>
    %cst_25 = arith.constant 2.560000e+02 : f32
    %72 = vector.broadcast %cst_25 : f32 to vector<128x1xf32>
    %73 = arith.divf %71, %72 : vector<128x1xf32>
    %74 = vector.broadcast %73 : vector<128x1xf32> to vector<128x256xf32>
    %75 = arith.subf %69, %74 : vector<128x256xf32>
    %76 = arith.mulf %75, %75 : vector<128x256xf32>
    %cst_26 = arith.constant dense<0.000000e+00> : vector<128xf32>
    %77 = vector.multi_reduction <add>, %76, %cst_26 [1] : vector<128x256xf32> to vector<128xf32>
    %78 = vector.shape_cast %77 : vector<128xf32> to vector<128x1xf32>
    %cst_27 = arith.constant 2.560000e+02 : f32
    %79 = vector.broadcast %cst_27 : f32 to vector<128x1xf32>
    %80 = arith.divf %78, %79 : vector<128x1xf32>
    %81 = vector.broadcast %73 : vector<128x1xf32> to vector<128x256xf32>
    %82 = arith.subf %69, %81 : vector<128x256xf32>
    %cst_28 = arith.constant 9.99999974E-6 : f32
    %83 = vector.broadcast %cst_28 : f32 to vector<128x1xf32>
    %84 = arith.addf %80, %83 : vector<128x1xf32>
    %85 = math.rsqrt %84 : vector<128x1xf32>
    %86 = vector.broadcast %85 : vector<128x1xf32> to vector<128x256xf32>
    %87 = arith.mulf %82, %86 : vector<128x256xf32>
    %c0_29 = arith.constant 0 : index
    %c0_30 = arith.constant 0 : index
    %88 = vector.load %arg7[%c0_29, %c0_30] : memref<1x256xf32, #tpu.memory_space<vmem>>, vector<1x256xf32>
    %89 = vector.broadcast %88 : vector<1x256xf32> to vector<128x256xf32>
    %90 = arith.mulf %87, %89 : vector<128x256xf32>
    %c0_31 = arith.constant 0 : index
    %c0_32 = arith.constant 0 : index
    %91 = vector.load %arg8[%c0_31, %c0_32] : memref<1x256xf32, #tpu.memory_space<vmem>>, vector<1x256xf32>
    %92 = vector.broadcast %91 : vector<1x256xf32> to vector<128x256xf32>
    %93 = arith.addf %90, %92 : vector<128x256xf32>
    %94 = arith.truncf %93 : vector<128x256xf32> to vector<128x256xbf16>
    %c0_33 = arith.constant 0 : index
    %c0_34 = arith.constant 0 : index
    %95 = vector.load %arg9[%c0_33, %c0_34] : memref<256x1024xbf16, #tpu.memory_space<vmem>>, vector<256x1024xbf16>
    %cst_35 = arith.constant dense<0.000000e+00> : vector<128x1024xf32>
    %96 = tpu.matmul %94, %95, %cst_35 {dimension_numbers = #tpu.dot_dimension_numbers<[1], [0], [0], [1], [0, 0, 1, 1], [], []>} : vector<128x256xbf16>, vector<256x1024xbf16>, vector<128x1024xf32> -> vector<128x1024xf32>
    %c0_36 = arith.constant 0 : index
    %c0_37 = arith.constant 0 : index
    %97 = vector.load %arg10[%c0_36, %c0_37] : memref<1x1024xf32, #tpu.memory_space<vmem>>, vector<1x1024xf32>
    %98 = vector.broadcast %97 : vector<1x1024xf32> to vector<128x1024xf32>
    %99 = arith.addf %96, %98 : vector<128x1024xf32>
    %cst_38 = arith.constant 0.000000e+00 : f32
    %100 = vector.broadcast %cst_38 : f32 to vector<128x1024xf32>
    %101 = arith.maximumf %99, %100 : vector<128x1024xf32>
    %102 = arith.truncf %101 : vector<128x1024xf32> to vector<128x1024xbf16>
    %c0_39 = arith.constant 0 : index
    %c0_40 = arith.constant 0 : index
    %103 = vector.load %arg11[%c0_39, %c0_40] : memref<1024x256xbf16, #tpu.memory_space<vmem>>, vector<1024x256xbf16>
    %cst_41 = arith.constant dense<0.000000e+00> : vector<128x256xf32>
    %104 = tpu.matmul %102, %103, %cst_41 {dimension_numbers = #tpu.dot_dimension_numbers<[1], [0], [0], [1], [0, 0, 1, 1], [], []>} : vector<128x1024xbf16>, vector<1024x256xbf16>, vector<128x256xf32> -> vector<128x256xf32>
    %c0_42 = arith.constant 0 : index
    %c0_43 = arith.constant 0 : index
    %105 = vector.load %arg12[%c0_42, %c0_43] : memref<1x256xf32, #tpu.memory_space<vmem>>, vector<1x256xf32>
    %106 = vector.broadcast %105 : vector<1x256xf32> to vector<128x256xf32>
    %107 = arith.addf %104, %106 : vector<128x256xf32>
    %108 = arith.addf %69, %107 : vector<128x256xf32>
    %c0_44 = arith.constant 0 : index
    %c0_45 = arith.constant 0 : index
    %c0_46 = arith.constant 0 : index
    %109 = vector.load %arg13[%c0_44, %c0_45, %c0_46] : memref<1x128x256xf32, #tpu.memory_space<vmem>>, vector<1x128x256xf32>
    %110 = vector.shape_cast %109 : vector<1x128x256xf32> to vector<128x256xf32>
    %111 = vector.shape_cast %108 : vector<128x256xf32> to vector<1x128x256xf32>
    tpu.vector_store %arg13[%c0_44, %c0_45, %c0_46], %111 {strides = array<i32>} : memref<1x128x256xf32, #tpu.memory_space<vmem>>, vector<1x128x256xf32>,
    return
  }
  func.func @transform_0(%arg0: i32) -> (i32, i32, i32) {
    %c0_i32 = arith.constant 0 : i32
    %c0_i32_0 = arith.constant 0 : i32
    %c0_i32_1 = arith.constant 0 : i32
    return %arg0, %c0_i32, %c0_i32_0 : i32, i32, i32
  }
  func.func @transform_1(%arg0: i32) -> (i32, i32) {
    %c0_i32 = arith.constant 0 : i32
    %c0_i32_0 = arith.constant 0 : i32
    %c0_i32_1 = arith.constant 0 : i32
    return %c0_i32, %c0_i32_0 : i32, i32
  }
  func.func @transform_2(%arg0: i32) -> (i32, i32) {
    %c0_i32 = arith.constant 0 : i32
    %c0_i32_0 = arith.constant 0 : i32
    %c0_i32_1 = arith.constant 0 : i32
    return %c0_i32, %c0_i32_0 : i32, i32
  }
  func.func @transform_3(%arg0: i32) -> (i32, i32) {
    %c0_i32 = arith.constant 0 : i32
    %c0_i32_0 = arith.constant 0 : i32
    %c0_i32_1 = arith.constant 0 : i32
    return %c0_i32, %c0_i32_0 : i32, i32
  }
  func.func @transform_4(%arg0: i32) -> (i32, i32) {
    %c0_i32 = arith.constant 0 : i32
    %c0_i32_0 = arith.constant 0 : i32
    %c0_i32_1 = arith.constant 0 : i32
    return %c0_i32, %c0_i32_0 : i32, i32
  }
  func.func @transform_5(%arg0: i32) -> (i32, i32) {
    %c0_i32 = arith.constant 0 : i32
    %c0_i32_0 = arith.constant 0 : i32
    %c0_i32_1 = arith.constant 0 : i32
    return %c0_i32, %c0_i32_0 : i32, i32
  }
  func.func @transform_6(%arg0: i32) -> (i32, i32) {
    %c0_i32 = arith.constant 0 : i32
    %c0_i32_0 = arith.constant 0 : i32
    %c0_i32_1 = arith.constant 0 : i32
    return %c0_i32, %c0_i32_0 : i32, i32
  }
  func.func @transform_7(%arg0: i32) -> (i32, i32) {
    %c0_i32 = arith.constant 0 : i32
    %c0_i32_0 = arith.constant 0 : i32
    %c0_i32_1 = arith.constant 0 : i32
    return %c0_i32, %c0_i32_0 : i32, i32
  }
  func.func @transform_8(%arg0: i32) -> (i32, i32) {
    %c0_i32 = arith.constant 0 : i32
    %c0_i32_0 = arith.constant 0 : i32
    %c0_i32_1 = arith.constant 0 : i32
    return %c0_i32, %c0_i32_0 : i32, i32
  }
  func.func @transform_9(%arg0: i32) -> (i32, i32) {
    %c0_i32 = arith.constant 0 : i32
    %c0_i32_0 = arith.constant 0 : i32
    %c0_i32_1 = arith.constant 0 : i32
    return %c0_i32, %c0_i32_0 : i32, i32
  }
  func.func @transform_10(%arg0: i32) -> (i32, i32) {
    %c0_i32 = arith.constant 0 : i32
    %c0_i32_0 = arith.constant 0 : i32
    %c0_i32_1 = arith.constant 0 : i32
    return %c0_i32, %c0_i32_0 : i32, i32
  }
  func.func @transform_11(%arg0: i32) -> (i32, i32) {
    %c0_i32 = arith.constant 0 : i32
    %c0_i32_0 = arith.constant 0 : i32
    %c0_i32_1 = arith.constant 0 : i32
    return %c0_i32, %c0_i32_0 : i32, i32
  }
  func.func @transform_12(%arg0: i32) -> (i32, i32, i32) {
    %c0_i32 = arith.constant 0 : i32
    %c0_i32_0 = arith.constant 0 : i32
    %c0_i32_1 = arith.constant 0 : i32
    return %arg0, %c0_i32, %c0_i32_0 : i32, i32, i32
  }
}

</mosaic_0001>

<bundles_post_ra>
// kernel: tpu_custom_call.1
= control target key start
LH: loop header
LB: loop body
LE: loop exit
PB: predicated region body
PF: predicated region fallthrough
CT: control target
= control target key end

     0   :  { %s24221_s0 = inlined_call_operand.hbm [shape: f32[2,128,256], index: 0, kind: input, shape index: {}]   ;;  %s24222_s1 = inlined_call_operand.vmem [shape: f32[1,256], index: 1, kind: input, shape index: {}]   ;;  %s24223_s2 = inlined_call_operand.vmem [shape: f32[1,256], index: 2, kind: input, shape index: {}]   ;;  %s24224_s3 = inlined_call_operand.hbm [shape: bf16[256,768], index: 3, kind: input, shape index: {}]   ;;  %s24225_s4 = inlined_call_operand.hbm [shape: bf16[256,256], index: 4, kind: input, shape index: {}]   ;;  %s24226_s5 = inlined_call_operand.vmem [shape: f32[1,256], index: 5, kind: input, shape index: {}]   ;;  %s24227_s6 = inlined_call_operand.vmem [shape: f32[1,256], index: 6, kind: input, shape index: {}]   ;;  %s24228_s7 = inlined_call_operand.vmem [shape: f32[1,256], index: 7, kind: input, shape index: {}]   ;;  %s24229_s8 = inlined_call_operand.hbm [shape: bf16[256,1024], index: 8, kind: input, shape index: {}]   ;;  %s24230_s9 = inlined_call_operand.vmem [shape: f32[1,1024], index: 9, kind: input, shape index: {}]   ;;  %s24231_s10 = inlined_call_operand.hbm [shape: bf16[1024,256], index: 10, kind: input, shape index: {}]   ;;  %s24232_s11 = inlined_call_operand.vmem [shape: f32[1,256], index: 11, kind: input, shape index: {}]   ;;  %s24233_s12 = inlined_call_operand.hbm [shape: f32[2,128,256], index: 12, kind: output, shape index: {}]  }
   0x1   :  { %24530 = sst [smem:[#allocation90_spill]] %s24224_s3 }
   0x2   :  { %24531 = sst [smem:[#allocation91_spill]] %s24230_s9 }
   0x3   :  { %24532 = sst [smem:[#allocation92_spill]] %s24232_s11 }
   0x4   :  { %24533 = sst [smem:[#allocation93_spill]] %s24233_s12 }
   0x5   :  { %17 = vsyncpa [#allocation3], 0 }
   0x6   :  { %19 = vsyncpa [#allocation3 + $0x1], 0 }
   0x7   :  { %20 = vsyncpa [#allocation6], 0 }
   0x8   :  { %21 = vsyncpa [#allocation9], 0 }
   0x9   :  { %22 = vsyncpa [#allocation4], 0 }
   0xa   :  { %24 = vsyncpa [#allocation4 + $0x1], 0  ;;  %s17943_s21 = smov 0   ;;  %s17945_s22 = smov 0  }
   0xb   :  { %s17947_s23 = smov 0   ;;  %s17949_s24 = smov 0  }
   0xc LB: > { %24534 = sst [smem:[#allocation16_spill]] %s17843_s21  ;;  %s17964_s25 = sadd.s32 4294967295, %s17855_s24   ;;  %s17855_s24 = sphi %s17949_s24, %s25221_s24   ;;  %s17851_s23 = sphi %s17947_s23, %s25220_s23   ;;  %s17847_s22 = sphi %s17945_s22, %s25219_s22   ;;  %s17843_s21 = sphi %s17943_s21, %s25218_s21  }
   0xd   : > { %s15689_s26 = sadd.s32 4294967294, %s17855_s24   ;;  %p50_p0 = scmp.ne.s32.totalorder %s17847_s22, %s17843_s21 }
   0xe   : > { %p24235_p1 = scmp.eq.s32.totalorder %s17964_s25, 0  ;;  %p311_p3 = scmp.eq.s32.totalorder %s15689_s26, 1 }
   0xf   : > { %p15690_p5 = scmp.ge.s32.totalorder %s17855_s24, 1  ;;  %p318_p7 = scmp.lt.s32.totalorder %s17855_s24, 3 }
  0x10   : > { %p17973_p4 = por %p24235_p1, %p50_p0  ;;  %p17978_p6 = por %p311_p3, %p50_p0 }
  0x11   : > { %p17983_p8 = pnand %p15690_p5, %p318_p7  ;;  %s17857_s30 = smov [#allocation5]  }
  0x12   : > { %s24535_s27 = scalar_select %p17973_p4, 1, 0 }
  0x13   : > { %s24536_s28 = scalar_select %p17978_p6, 1, 0 }
  0x14   : > { %s24538_s29 = scalar_select %p17983_p8, 1, 0 }
  0x15   : > { %24537 = sst [smem:[#allocation17_spill]] %s24536_s28  ;;  %s336_s13 = sshll.u32 %s17857_s30, 4  ;;  %s17987_s13 = int_to_ptr.vmem [resolvable:$true] %s336_s13 }
  0x16   : > { %p16821_p9 = pneg %p17983_p8  ;;  %s17858_s15 = smov [#allocation8]  }
  0x17   : > { %s371_s16 = sshll.u32 %s17858_s15, 4  ;;  %s24540_s3 = sld [smem:[#allocation90_spill]]  ;;  %s17998_s16 = int_to_ptr.vmem [resolvable:$true] %s371_s16 }
  0x18   : > { %p17994_p11 = pnand %p16821_p9, %p24235_p1 }
  0x1a   : > { %p18008_p13 = pneg %p17994_p11 }
  0x1d   : > { %s17639_s19 = scalar_lea.hbm %s24540_s3, 12288 }
  0x1e   : > { %p17640_p12 = scmp.ne.s32.totalorder %s24540_s3, %s17639_s19  ;;  %p17646_p5 = scmp.lt.u32.totalorder %s17639_s19, %s24540_s3 }
  0x20   : > { %p17642_p0 = pnand %p18008_p13, %p17640_p12 }
  0x22   : > { %p17643_p3 = pneg %p17642_p0 }
  0x24   : > { %p17648_p7 = pnand %p17646_p5, %p17643_p3 }
  0x26   : > { %17651 = shalt.err (!%p17648_p7)
}
  0x27   : > { %s17652_s17 = scalar_lea.vmem %s17987_s13, 12288  ;;  %p17660_p2 = scmp.lt.s32.totalorder %s17987_s13, %s17987_s13 }
  0x28   : > { %p17653_p9 = scmp.ne.s32.totalorder %s17987_s13, %s17652_s17  ;;  %p17661_p6 = scmp.lt.s32.totalorder %s17652_s17, %s17652_s17 }
  0x2a   : > { %p17655_p10 = pnand %p17653_p9, %p18008_p13  ;;  %p17662_p12 = por %p17661_p6, %p17660_p2 }
  0x2c   : > { %p17656_p1 = pneg %p17655_p10 }
  0x2e   : > { %p17663_p0 = pnand %p17662_p12, %p17656_p1 }
  0x30   : > { %17666 = shalt.err (!%p17663_p0)
}
  0x31   : > { %s17859_s18 = smov 384   ;;  %s17860_s28 = smov 24  }
  0x32   : > { %16824 = dma.hbm_to_vmem [thread:$0]  (!%p17994_p11), %s24540_s3, 12288, %s17987_s13, [#allocation6], %s17859_s18, %s17859_s18, %s17860_s28  }
  0x33   : > { %s17667_s21 = scalar_lea.hbm %s24229_s8, 16384 }
  0x34   : > { %p17668_p2 = scmp.ne.s32.totalorder %s24229_s8, %s17667_s21  ;;  %p17674_p10 = scmp.lt.u32.totalorder %s17667_s21, %s24229_s8 }
  0x36   : > { %p17670_p1 = pnand %p17668_p2, %p18008_p13 }
  0x38   : > { %p17671_p6 = pneg %p17670_p1 }
  0x3a   : > { %p17676_p3 = pnand %p17674_p10, %p17671_p6 }
  0x3c   : > { %17679 = shalt.err (!%p17676_p3)
}
  0x3d   : > { %s17680_s13 = scalar_lea.vmem %s17998_s16, 16384  ;;  %p17688_p12 = scmp.lt.s32.totalorder %s17998_s16, %s17998_s16 }
  0x3e   : > { %p17681_p5 = scmp.ne.s32.totalorder %s17998_s16, %s17680_s13  ;;  %p17689_p0 = scmp.lt.s32.totalorder %s17680_s13, %s17680_s13 }
  0x40   : > { %p17683_p7 = pnand %p17681_p5, %p18008_p13  ;;  %p17690_p2 = por %p17689_p0, %p17688_p12 }
  0x42   : > { %p17684_p9 = pneg %p17683_p7 }
  0x44   : > { %p17691_p1 = pnand %p17690_p2, %p17684_p9 }
  0x46   : > { %17694 = shalt.err (!%p17691_p1)
}
  0x47   : > { %s17861_s11 = smov 512   ;;  %s17862_s9 = smov 32  }
  0x48   : > { %16830 = dma.hbm_to_vmem [thread:$0]  (!%p17994_p11), %s24229_s8, 16384, %s17998_s16, [#allocation9], %s17861_s11, %s17861_s11, %s17862_s9  }
  0x49   : > { %s17863_s18 = smov [#allocation7]   ;;  %s17695_s26 = scalar_lea.hbm %s24225_s4, 4096 }
  0x4a   : > { %s349_s28 = sshll.u32 %s17863_s18, 4  ;;  %p17696_p6 = scmp.ne.s32.totalorder %s24225_s4, %s17695_s26  ;;  %s350_s28 = int_to_ptr.vmem [resolvable:$true] %s349_s28 }
  0x4b   : > { %p17702_p5 = scmp.lt.u32.totalorder %s17695_s26, %s24225_s4 }
  0x4c   : > { %p17698_p10 = pnand %p17696_p6, %p18008_p13 }
  0x4e   : > { %p17699_p3 = pneg %p17698_p10 }
  0x50   : > { %p17704_p7 = pnand %p17702_p5, %p17699_p3 }
  0x52   : > { %17707 = shalt.err (!%p17704_p7)
}
  0x53   : > { %s17708_s16 = scalar_lea.vmem %s350_s28, 4096  ;;  %p17716_p2 = scmp.lt.s32.totalorder %s350_s28, %s350_s28 }
  0x54   : > { %p17709_p9 = scmp.ne.s32.totalorder %s350_s28, %s17708_s16  ;;  %p17717_p1 = scmp.lt.s32.totalorder %s17708_s16, %s17708_s16 }
  0x56   : > { %p17711_p12 = pnand %p17709_p9, %p18008_p13  ;;  %p17718_p4 = por %p17717_p1, %p17716_p2 }
  0x58   : > { %p17712_p0 = pneg %p17711_p12 }
  0x5a   : > { %p17719_p8 = pnand %p17718_p4, %p17712_p0 }
  0x5c   : > { %17722 = shalt.err (!%p17719_p8)
}
  0x5d   : > { %s17864_s11 = smov 128   ;;  %s17865_s9 = smov 8  }
  0x5e   : > { %16827 = dma.hbm_to_vmem [thread:$0]  (!%p17994_p11), %s24225_s4, 4096, %s350_s28, [#allocation6], %s17864_s11, %s17864_s11, %s17865_s9  }
  0x5f   : > { %s17866_s21 = smov [#allocation10]   ;;  %s17723_s26 = scalar_lea.hbm %s24231_s10, 16384 }
  0x60   : > { %s387_s18 = sshll.u32 %s17866_s21, 4  ;;  %p17724_p4 = scmp.ne.s32.totalorder %s24231_s10, %s17723_s26  ;;  %s388_s18 = int_to_ptr.vmem [resolvable:$true] %s387_s18 }
  0x61   : > { %p17730_p10 = scmp.lt.u32.totalorder %s17723_s26, %s24231_s10 }
  0x62   : > { %p17726_p8 = pnand %p17724_p4, %p18008_p13 }
  0x64   : > { %p17727_p6 = pneg %p17726_p8 }
  0x66   : > { %p17732_p3 = pnand %p17730_p10, %p17727_p6 }
  0x68   : > { %17735 = shalt.err (!%p17732_p3)
}
  0x69   : > { %s17736_s28 = scalar_lea.vmem %s388_s18, 16384  ;;  %p17744_p12 = scmp.lt.s32.totalorder %s388_s18, %s388_s18 }
  0x6a   : > { %p17737_p5 = scmp.ne.s32.totalorder %s388_s18, %s17736_s28  ;;  %p17745_p0 = scmp.lt.s32.totalorder %s17736_s28, %s17736_s28 }
  0x6c   : > { %p17739_p7 = pnand %p17737_p5, %p18008_p13  ;;  %p17746_p2 = por %p17745_p0, %p17744_p12 }
  0x6e   : > { %p17740_p9 = pneg %p17739_p7 }
  0x70   : > { %p17747_p1 = pnand %p17746_p2, %p17740_p9 }
  0x72   : > { %17750 = shalt.err (!%p17747_p1)
}
  0x73   : > { %16833 = dma.hbm_to_vmem [thread:$0]  (!%p17994_p11), %s24231_s10, 16384, %s388_s18, [#allocation9], %s17864_s11, %s17864_s11, %s17865_s9  }
  0x74   : > { %s18089_s30 = sadd.s32 1, %s17855_s24   ;;  %s37_s21 = sadd.s32 1, %s17851_s23 }
  0x75   : > { %s34_s14 = ssub.s32 %s17855_s24, %s18089_s30  ;;  %p44_p13 = scmp.ne.s32.totalorder %s17851_s23, %s17847_s22 }
  0x76   : > { %p35_p4 = scmp.eq.s32.totalorder %s34_s14, 0  ;;  %p45_p8 = scmp.eq.s32.totalorder %s17855_s24, 0 }
  0x77   : > { %p24542_p6 = scmp.eq.s32.totalorder %s17964_s25, 1  ;;  %p16846_p3 = scmp.lt.s32.totalorder %s17855_s24, 2 }
  0x78   : > { %s18105_s20 = scalar_select %p35_p4, %s17851_s23, %s37_s21  }
  0x79   : > { %p18099_p10 = por %p24542_p6, %p44_p13  ;;  %p46_p5 = por %p45_p8, %p44_p13 }
  0x7a   : > { %s404_s26 = sand.u32 1, %s17851_s23   ;;  %s16255_s11 = sshll.u32 %s17855_s24, 12 }
  0x7b   : > { %s15696_s15 = sshll.u32 %s404_s26, 8  ;;  %s18112_s17 = scalar_lea.hbm %s24221_s0, %s16255_s11 }
  0x7c   : > { %s408_s13 = scalar_lea.vmem [#allocation2], %s15696_s15  ;;  %p18116_p11 = pnand %p16846_p3, %p46_p5 }
  0x7d   : > { %s415_s16 = sshll.u32 %s408_s13, 4  ;;  %s18120_s3 = scalar_lea.sflag [#allocation3], %s404_s26  ;;  %s18114_s16 = int_to_ptr.vmem [resolvable:$true] %s415_s16 }
  0x7e   : > { %s17751_s12 = scalar_lea.hbm %s18112_s17, 4096  ;;  %p17753_p9 = pneg %p18116_p11 }
  0x7f   : > { %p17752_p7 = scmp.ne.s32.totalorder %s18112_s17, %s17751_s12  ;;  %s17756_s15 = scalar_lea.hbm %s24221_s0, 8192 }
  0x80   : > { %p17757_p2 = scmp.lt.u32.totalorder %s18112_s17, %s24221_s0  ;;  %p17758_p1 = scmp.lt.u32.totalorder %s17756_s15, %s17751_s12 }
  0x81   : > { %p17754_p12 = pnand %p17753_p9, %p17752_p7  ;;  %p17760_p4 = scmp.lt.u32.totalorder %s17751_s12, %s18112_s17 }
  0x82   : > { %p17759_p13 = por %p17758_p1, %p17757_p2 }
  0x83   : > { %p17755_p0 = pneg %p17754_p12 }
  0x84   : > { %p17761_p8 = por %p17760_p4, %p17759_p13 }
  0x86   : > { %p17762_p6 = pnand %p17761_p8, %p17755_p0 }
  0x88   : > { %17765 = shalt.err (!%p17762_p6)
}
  0x89   : > { %s17766_s26 = scalar_lea.vmem %s18114_s16, 4096  ;;  %s17867_s18 = smov [#allocation2]  }
  0x8a   : > { %p17767_p3 = scmp.ne.s32.totalorder %s18114_s16, %s17766_s26  ;;  %s17771_s13 = sshll.u32 %s17867_s18, 4  ;;  %s17772_s13 = int_to_ptr.vmem [resolvable:$false] %s17771_s13 }
  0x8b   : > { %s17773_s21 = scalar_lea.vmem %s17772_s13, 8192  ;;  %p17774_p12 = scmp.lt.s32.totalorder %s18114_s16, %s17772_s13 }
  0x8c   : > { %p17769_p5 = pnand %p17767_p3, %p17753_p9  ;;  %p17775_p2 = scmp.lt.s32.totalorder %s17773_s21, %s17766_s26 }
  0x8e   : > { %p17770_p7 = pneg %p17769_p5  ;;  %p17776_p1 = por %p17775_p2, %p17774_p12 }
  0x90   : > { %p17777_p13 = pnand %p17776_p1, %p17770_p7 }
  0x92   : > { %17780 = shalt.err (!%p17777_p13)
}
  0x93   : > { %s17868_s12 = smov 256   ;;  %s17869_s14 = smov 16  }
  0x94   : > { %16837 = dma.hbm_to_vmem [thread:$0]  (!%p18116_p11), %s18112_s17, 4096, %s18114_s16, %s18120_s3, %s17868_s12, %s17868_s12, %s17869_s14  }
  0x95   : > { %p24545_p9 = scmp.ne.s32.totalorder %s24538_s29, 0 }
  0x97   : > { %427 = sbr.rel (%p24545_p9) target bundleno = 3485 (0xd9d), region = 68 }
  0x9e   : > { %s18151_s15 = sand.u32 1, %s17847_s22   ;;  %p24546_p0 = scmp.ne.s32.totalorder %s24535_s27, 0 }
  0x9f   : > { %s15700_s11 = sshll.u32 %s18151_s15, 8  ;;  %s430_s9 = scalar_lea.sflag [#allocation3], %s18151_s15 }
  0xa0   : > { %s18157_s26 = scalar_lea.vmem [#allocation2], %s15700_s11 }
  0xa1   : > { %17826 = dma.done.wait (%p24546_p0), %s430_s9, 4096  }
  0xa2   : > { %17828 = vsyncadd (%p24546_p0), %s430_s9, 4294963200  ;;  %p24547_p11 = scmp.eq.s32.totalorder %s17964_s25, 0 }
  0xa4   : > { %17830 = dma.done.wait (%p24547_p11), [#allocation6], 16384   ;;  %p24548_p4 = pmov %p24547_p11 }
  0xa6   : > { %17832 = vsyncadd (%p24548_p4), [#allocation6], 4294950912  ;;  %p24549_p8 = pmov %p24548_p4 }
  0xa7   : > { %p24550_p6 = pmov %p24548_p4 }
  0xa8   : > { %17834 = dma.done.wait (%p24549_p8), [#allocation9], 32768  }
  0xa9   : > { %17836 = vsyncadd (%p24550_p6), [#allocation9], 4294934528  ;;  %v18172_v0 = vld [vmem:[%s18157_s26] sm:$0xff]  ;;  %v18175_v1 = vld [vmem:[%s18157_s26 + $0x8] sm:$0xff]  ;;  %s17870_s28 = smov 64   ;;  %vm8320_vm0 = vcmask 523264  }
  0xaa   : > { %v18178_v2 = vld [vmem:[%s18157_s26 + $0x20] sm:$0xff]  ;;  %v523_v3 = vadd.f32 %v18175_v1, %v18172_v0  ;;  %v18183_v4 = vld [vmem:[%s18157_s26 + $0x28] sm:$0xff]  ;;  %v18186_v5 = vld [vmem:[%s18157_s26 + $0x10] sm:$0xff]  ;;  %s25178_s27 = sld [smem:[#allocation91_spill]]  ;;  %s25179_s16 = sld [smem:[#allocation92_spill]] }
  0xab   : > { %v18189_v6 = vld [vmem:[%s18157_s26 + $0x18] sm:$0xff]  ;;  %v529_v7 = vadd.f32 %v18183_v4, %v18178_v2  ;;  %v18194_v8 = vld [vmem:[%s18157_s26 + $0x30] sm:$0xff]  ;;  %v18204_v12 = vld [vmem:[%s18157_s26 + $0x40] sm:$0xff]  ;;  %s25211_s21 = sld [smem:[#allocation93_spill]] }
  0xac   : > { %v18197_v9 = vld [vmem:[%s18157_s26 + $0x38] sm:$0xff]  ;;  %524 = vadd.xlane.f32.xlu0 %v523_v3  ;;  %v526_v10 = vadd.f32 %v18189_v6, %v18186_v5  ;;  %v18207_v13 = vld [vmem:[%s18157_s26 + $0x48] sm:$0xff]  ;;  %v18210_v14 = vld [vmem:[%s18157_s26 + $0x50] sm:$0xff] }
  0xad   : > { %530 = vadd.xlane.f32.xlu1 %v529_v7  ;;  %v532_v11 = vadd.f32 %v18197_v9, %v18194_v8  ;;  %v18213_v15 = vld [vmem:[%s18157_s26 + $0x58] sm:$0xff]  ;;  %v535_v16 = vadd.f32 %v18207_v13, %v18204_v12  ;;  %v18220_v18 = vld [vmem:[%s18157_s26 + $0x60] sm:$0xff]  ;;  %v18223_v19 = vld [vmem:[%s18157_s26 + $0x68] sm:$0xff] }
  0xae   : > { %v538_v17 = vadd.f32 %v18213_v15, %v18210_v14  ;;  %v18226_v20 = vld [vmem:[%s18157_s26 + $0x70] sm:$0xff]  ;;  %v18229_v21 = vld [vmem:[%s18157_s26 + $0x78] sm:$0xff]  ;;  %v18232_v22 = vld [vmem:[%s18157_s26 + $0x80] sm:$0xff]  ;;  %v541_v24 = vadd.f32 %v18223_v19, %v18220_v18 }
  0xaf   : > { %v18235_v23 = vld [vmem:[%s18157_s26 + $0x88] sm:$0xff]  ;;  %v18240_v25 = vld [vmem:[%s18157_s26 + $0x90] sm:$0xff]  ;;  %v18243_v26 = vld [vmem:[%s18157_s26 + $0x98] sm:$0xff]  ;;  %v544_v27 = vadd.f32 %v18229_v21, %v18226_v20 }
  0xb0   : > { %527 = vadd.xlane.f32.xlu0 %v526_v10  ;;  %v18248_v28 = vld [vmem:[%s18157_s26 + $0xa0] sm:$0xff]  ;;  %v18251_v29 = vld [vmem:[%s18157_s26 + $0xa8] sm:$0xff]  ;;  %v547_v30 = vadd.f32 %v18235_v23, %v18232_v22  ;;  %v18256_v31 = vld [vmem:[%s18157_s26 + $0xb0] sm:$0xff]  ;;  %v550_v33 = vadd.f32 %v18243_v26, %v18240_v25 }
  0xb1   : > { %533 = vadd.xlane.f32.xlu1 %v532_v11  ;;  %v18259_v32 = vld [vmem:[%s18157_s26 + $0xb8] sm:$0xff]  ;;  %v18264_v34 = vld [vmem:[%s18157_s26 + $0xc0] sm:$0xff]  ;;  %v18267_v35 = vld [vmem:[%s18157_s26 + $0xc8] sm:$0xff]  ;;  %v553_v36 = vadd.f32 %v18251_v29, %v18248_v28  ;;  %s25212_s12 = smov %s25211_s21 }
  0xb2   : > { %v18272_v37 = vld [vmem:[%s18157_s26 + $0xd0] sm:$0xff]  ;;  %v18275_v38 = vld [vmem:[%s18157_s26 + $0xd8] sm:$0xff]  ;;  %v556_v39 = vadd.f32 %v18259_v32, %v18256_v31  ;;  %v18280_v40 = vld [vmem:[%s18157_s26 + $0xe0] sm:$0xff]  ;;  %v559_v42 = vadd.f32 %v18267_v35, %v18264_v34 }
  0xb3   : > { %v18283_v41 = vld [vmem:[%s18157_s26 + $0xe8] sm:$0xff]  ;;  %v18288_v43 = vld [vmem:[%s18157_s26 + $0xf0] sm:$0xff]  ;;  %v18291_v44 = vld [vmem:[%s18157_s26 + $0xf8] sm:$0xff]  ;;  %v562_v45 = vadd.f32 %v18275_v38, %v18272_v37 }
  0xb4   : > { %536 = vadd.xlane.f32.xlu0 %v535_v16  ;;  %v565_v46 = vadd.f32 %v18283_v41, %v18280_v40  ;;  %v568_v47 = vadd.f32 %v18291_v44, %v18288_v43  ;;  %v16903_v48 = vld [vmem:[#allocation5 + $0x4] ss:$24 sps:$4 sm:$0xff]   ;;  %v16905_v49 = vld [vmem:[#allocation5] ss:$24 sps:$4 sm:$0xff]   ;;  %v16906_v50 = vld [vmem:[#allocation5 + $0x34] ss:$24 sps:$4 sm:$0xff]  }
  0xb5   : > { %539 = vadd.xlane.f32.xlu1 %v538_v17  ;;  %1460 = vmatprep.subr.bf16.mxu0 %v16903_v48  ;;  %v16908_v51 = vld [vmem:[#allocation5 + $0x30] ss:$24 sps:$4 sm:$0xff]   ;;  %v16909_v52 = vld [vmem:[#allocation5 + $0x64] ss:$24 sps:$4 sm:$0xff]   ;;  %v16911_v53 = vld [vmem:[#allocation5 + $0x60] ss:$24 sps:$4 sm:$0xff]  }
  0xb6   : > { %1461 = vmatpush1.bf16.msra.mxu0 %v16905_v49  ;;  %v16912_v54 = vld [vmem:[#allocation5 + $0x94] ss:$24 sps:$4 sm:$0xff]   ;;  %v16914_v55 = vld [vmem:[#allocation5 + $0x90] ss:$24 sps:$4 sm:$0xff]   ;;  %v16915_v56 = vld [vmem:[#allocation5 + $0xc4] ss:$24 sps:$4 sm:$0xff]  }
  0xb7   : > { %1462 = vmatprep.subr.bf16.mxu0 %v16906_v50  ;;  %v16917_v57 = vld [vmem:[#allocation5 + $0xc0] ss:$24 sps:$4 sm:$0xff]   ;;  %v16918_v58 = vld [vmem:[#allocation5 + $0xf4] ss:$24 sps:$4 sm:$0xff]   ;;  %v16920_v59 = vld [vmem:[#allocation5 + $0xf0] ss:$24 sps:$4 sm:$0xff]  }
  0xb8   : > { %542 = vadd.xlane.f32.xlu0 %v541_v24  ;;  %v16921_v60 = vld [vmem:[#allocation5 + $0x124] ss:$24 sps:$4 sm:$0xff]   ;;  %v16923_v61 = vld [vmem:[#allocation5 + $0x120] ss:$24 sps:$4 sm:$0xff]   ;;  %v16924_v62 = vld [vmem:[#allocation5 + $0x154] ss:$24 sps:$4 sm:$0xff]  }
  0xb9   : > { %545 = vadd.xlane.f32.xlu1 %v544_v27  ;;  %v16926_v63 = vld [vmem:[#allocation5 + $0x150] ss:$24 sps:$4 sm:$0xff]   ;;  %v16927_v3 = vld [vmem:[#allocation5 + $0x184] ss:$24 sps:$4 sm:$0xff]   ;;  %v16929_v7 = vld [vmem:[#allocation5 + $0x180] ss:$24 sps:$4 sm:$0xff]  }
  0xba   : > { %1463 = vmatpush1.bf16.msra.mxu0 %v16908_v51  ;;  %v16930_v10 = vld [vmem:[#allocation5 + $0x1b4] ss:$24 sps:$4 sm:$0xff]  }
  0xbb   : > { %1464 = vmatprep.subr.bf16.mxu0 %v16909_v52 }
  0xbc   : > { %548 = vadd.xlane.f32.xlu0 %v547_v30 }
  0xbd   : > { %551 = vadd.xlane.f32.xlu1 %v550_v33 }
  0xbe   : > { %1465 = vmatpush1.bf16.msra.mxu0 %v16911_v53 }
  0xbf   : > { %1466 = vmatprep.subr.bf16.mxu0 %v16912_v54 }
  0xc0   : > { %554 = vadd.xlane.f32.xlu0 %v553_v36 }
  0xc1   : > { %557 = vadd.xlane.f32.xlu1 %v556_v39 }
  0xc2   : > { %1467 = vmatpush1.bf16.msra.mxu0 %v16914_v55 }
  0xc3   : > { %1468 = vmatprep.subr.bf16.mxu0 %v16915_v56 }
  0xc4   : > { %560 = vadd.xlane.f32.xlu0 %v559_v42 }
  0xc5   : > { %563 = vadd.xlane.f32.xlu1 %v562_v45 }
  0xc6   : > { %1469 = vmatpush1.bf16.msra.mxu0 %v16917_v57 }
  0xc7   : > { %1470 = vmatprep.subr.bf16.mxu0 %v16918_v58 }
  0xc8   : > { %566 = vadd.xlane.f32.xlu0 %v565_v46 }
  0xc9   : > { %569 = vadd.xlane.f32.xlu1 %v568_v47 }
  0xca   : > { %1471 = vmatpush1.bf16.msra.mxu0 %v16920_v59 }
  0xcb   : > { %1472 = vmatprep.subr.bf16.mxu0 %v16921_v60 }
  0xce   : > { %1473 = vmatpush1.bf16.msra.mxu0 %v16923_v61 }
  0xcf   : > { %1474 = vmatprep.subr.bf16.mxu0 %v16924_v62 }
  0xd2   : > { %1475 = vmatpush1.bf16.msra.mxu0 %v16926_v63 }
  0xd3   : > { %1476 = vmatprep.subr.bf16.mxu0 %v16927_v3 }
  0xd6   : > { %1477 = vmatpush1.bf16.msra.mxu0 %v16929_v7 }
  0xd7   : > { %1478 = vmatprep.subr.bf16.mxu0 %v16930_v10 }
 0x139   : > { %v525_v11 = vpop.xlane.xlu0 %524 }
 0x13a   : > { %v572_v16 = vmul.f32 0.00390625, %v525_v11  ;;  %v531_v17 = vpop.xlane.xlu1 %530 }
 0x13b   : > { %v574_v24 = vmul.f32 0.00390625, %v531_v17 }
 0x13c   : > { %v18300_v27 = vsub.f32 %v18172_v0, %v572_v16  ;;  %v18303_v30 = vsub.f32 %v18175_v1, %v572_v16 }
 0x13d   : > { %v18306_v33 = vsub.f32 %v18178_v2, %v574_v24  ;;  %v18309_v36 = vsub.f32 %v18183_v4, %v574_v24  ;;  %v528_v39 = vpop.xlane.xlu0 %527 }
 0x13e   : > { %v573_v42 = vmul.f32 0.00390625, %v528_v39  ;;  %v534_v45 = vpop.xlane.xlu1 %533  ;;  %v620_v46 = vmul.f32 %v18300_v27, %v18300_v27  ;;  %v621_v47 = vmul.f32 %v18303_v30, %v18303_v30 }
 0x13f   : > { %v575_v0 = vmul.f32 0.00390625, %v534_v45  ;;  %v624_v1 = vmul.f32 %v18306_v33, %v18306_v33  ;;  %v625_v2 = vmul.f32 %v18309_v36, %v18309_v36 }
 0x140   : > { %v18320_v48 = vsub.f32 %v18186_v5, %v573_v42  ;;  %v18323_v4 = vsub.f32 %v18189_v6, %v573_v42  ;;  %v652_v49 = vadd.f32 %v621_v47, %v620_v46 }
 0x141   : > { %v18326_v50 = vsub.f32 %v18194_v8, %v575_v0  ;;  %v18329_v51 = vsub.f32 %v18197_v9, %v575_v0  ;;  %v537_v52 = vpop.xlane.xlu0 %536  ;;  %v658_v55 = vadd.f32 %v625_v2, %v624_v1 }
 0x142   : > { %v576_v53 = vmul.f32 0.00390625, %v537_v52  ;;  %653 = vadd.xlane.f32.xlu0 %v652_v49  ;;  %v540_v54 = vpop.xlane.xlu1 %539  ;;  %v622_v56 = vmul.f32 %v18320_v48, %v18320_v48  ;;  %v623_v5 = vmul.f32 %v18323_v4, %v18323_v4 }
 0x143   : > { %v577_v6 = vmul.f32 0.00390625, %v540_v54  ;;  %v626_v57 = vmul.f32 %v18326_v50, %v18326_v50  ;;  %v627_v8 = vmul.f32 %v18329_v51, %v18329_v51 }
 0x144   : > { %v18340_v9 = vsub.f32 %v18204_v12, %v576_v53  ;;  %v18343_v58 = vsub.f32 %v18207_v13, %v576_v53  ;;  %v655_v59 = vadd.f32 %v623_v5, %v622_v56 }
 0x145   : > { %v18346_v60 = vsub.f32 %v18210_v14, %v577_v6  ;;  %v18349_v61 = vsub.f32 %v18213_v15, %v577_v6  ;;  %v543_v62 = vpop.xlane.xlu0 %542  ;;  %v661_v7 = vadd.f32 %v627_v8, %v626_v57  ;;  %v16932_v57 = vld [vmem:[#allocation5 + $0x1b0] ss:$24 sps:$4 sm:$0xff]  }
 0x146   : > { %v578_v63 = vmul.f32 0.00390625, %v543_v62  ;;  %659 = vadd.xlane.f32.xlu0 %v658_v55  ;;  %656 = vadd.xlane.f32.xlu1 %v655_v59  ;;  %v546_v3 = vpop.xlane.xlu1 %545  ;;  %v628_v12 = vmul.f32 %v18340_v9, %v18340_v9  ;;  %v629_v13 = vmul.f32 %v18343_v58, %v18343_v58 }
 0x147   : > { %v579_v10 = vmul.f32 0.00390625, %v546_v3  ;;  %v630_v14 = vmul.f32 %v18346_v60, %v18346_v60  ;;  %v631_v15 = vmul.f32 %v18349_v61, %v18349_v61  ;;  %1479 = vmatpush1.bf16.msra.mxu0 %v16932_v57  ;;  %v16939_v57 = vld [vmem:[#allocation5 + $0x244] ss:$24 sps:$4 sm:$0xff]  }
 0x148   : > { %v18360_v11 = vsub.f32 %v18220_v18, %v578_v63  ;;  %v18363_v16 = vsub.f32 %v18223_v19, %v578_v63  ;;  %v664_v17 = vadd.f32 %v629_v13, %v628_v12 }
 0x149   : > { %v18366_v24 = vsub.f32 %v18226_v20, %v579_v10  ;;  %v18369_v39 = vsub.f32 %v18229_v21, %v579_v10  ;;  %v549_v42 = vpop.xlane.xlu0 %548  ;;  %v667_v47 = vadd.f32 %v631_v15, %v630_v14  ;;  %v16933_v14 = vld [vmem:[#allocation5 + $0x1e4] ss:$24 sps:$4 sm:$0xff]  }
 0x14a   : > { %v580_v45 = vmul.f32 0.00390625, %v549_v42  ;;  %662 = vadd.xlane.f32.xlu1 %v661_v7  ;;  %665 = vadd.xlane.f32.xlu0 %v664_v17  ;;  %v552_v46 = vpop.xlane.xlu1 %551  ;;  %v632_v18 = vmul.f32 %v18360_v11, %v18360_v11  ;;  %v633_v19 = vmul.f32 %v18363_v16, %v18363_v16 }
 0x14b   : > { %v581_v0 = vmul.f32 0.00390625, %v552_v46  ;;  %v634_v20 = vmul.f32 %v18366_v24, %v18366_v24  ;;  %v635_v21 = vmul.f32 %v18369_v39, %v18369_v39  ;;  %1480 = vmatprep.subr.bf16.mxu0 %v16933_v14  ;;  %v16935_v46 = vld [vmem:[#allocation5 + $0x1e0] ss:$24 sps:$4 sm:$0xff]   ;;  %v16950_v14 = vld [vmem:[#allocation5 + $0x2d0] ss:$24 sps:$4 sm:$0xff]  }
 0x14c   : > { %v18380_v1 = vsub.f32 %v18232_v22, %v580_v45  ;;  %v18383_v2 = vsub.f32 %v18235_v23, %v580_v45  ;;  %v670_v49 = vadd.f32 %v633_v19, %v632_v18  ;;  %1481 = vmatpush1.bf16.msra.mxu0 %v16935_v46  ;;  %v24240_v46 = vlaneseq }
 0x14d   : > { %v18386_v52 = vsub.f32 %v18240_v25, %v581_v0  ;;  %v18389_v53 = vsub.f32 %v18243_v26, %v581_v0  ;;  %v555_v54 = vpop.xlane.xlu0 %554  ;;  %v673_v5 = vadd.f32 %v635_v21, %v634_v20 }
 0x14e   : > { %v582_v55 = vmul.f32 0.00390625, %v555_v54  ;;  %668 = vadd.xlane.f32.xlu1 %v667_v47  ;;  %671 = vadd.xlane.f32.xlu0 %v670_v49  ;;  %v558_v56 = vpop.xlane.xlu1 %557  ;;  %v636_v22 = vmul.f32 %v18380_v1, %v18380_v1  ;;  %v637_v23 = vmul.f32 %v18383_v2, %v18383_v2  ;;  %v16936_v54 = vld [vmem:[#allocation5 + $0x214] ss:$24 sps:$4 sm:$0xff]  }
 0x14f   : > { %v583_v6 = vmul.f32 0.00390625, %v558_v56  ;;  %v638_v25 = vmul.f32 %v18386_v52, %v18386_v52  ;;  %v639_v26 = vmul.f32 %v18389_v53, %v18389_v53  ;;  %1482 = vmatprep.subr.bf16.mxu0 %v16936_v54 }
 0x150   : > { %v18400_v8 = vsub.f32 %v18248_v28, %v582_v55  ;;  %v18403_v59 = vsub.f32 %v18251_v29, %v582_v55  ;;  %v676_v62 = vadd.f32 %v637_v23, %v636_v22  ;;  %v16938_v22 = vld [vmem:[#allocation5 + $0x210] ss:$24 sps:$4 sm:$0xff]  }
 0x151   : > { %v18406_v63 = vsub.f32 %v18256_v31, %v583_v6  ;;  %v18409_v3 = vsub.f32 %v18259_v32, %v583_v6  ;;  %v561_v7 = vpop.xlane.xlu0 %560  ;;  %v679_v10 = vadd.f32 %v639_v26, %v638_v25  ;;  %1483 = vmatpush1.bf16.msra.mxu0 %v16938_v22 }
 0x152   : > { %v584_v12 = vmul.f32 0.00390625, %v561_v7  ;;  %674 = vadd.xlane.f32.xlu1 %v673_v5  ;;  %677 = vadd.xlane.f32.xlu0 %v676_v62  ;;  %v564_v13 = vpop.xlane.xlu1 %563  ;;  %v640_v28 = vmul.f32 %v18400_v8, %v18400_v8  ;;  %v641_v29 = vmul.f32 %v18403_v59, %v18403_v59  ;;  %v16941_v62 = vld [vmem:[#allocation5 + $0x240] ss:$24 sps:$4 sm:$0xff]  }
 0x153   : > { %v585_v15 = vmul.f32 0.00390625, %v564_v13  ;;  %v642_v31 = vmul.f32 %v18406_v63, %v18406_v63  ;;  %v643_v32 = vmul.f32 %v18409_v3, %v18409_v3  ;;  %1484 = vmatprep.subr.bf16.mxu0 %v16939_v57  ;;  %v16944_v13 = vld [vmem:[#allocation5 + $0x270] ss:$24 sps:$4 sm:$0xff]   ;;  %v780_v57 = vld [vmem:[%s24222_s1] sm:$0x3] }
 0x154   : > { %v18420_v17 = vsub.f32 %v18264_v34, %v584_v12  ;;  %v18423_v42 = vsub.f32 %v18267_v35, %v584_v12  ;;  %v682_v45 = vadd.f32 %v641_v29, %v640_v28  ;;  %v16942_v12 = vld [vmem:[#allocation5 + $0x274] ss:$24 sps:$4 sm:$0xff]   ;;  %v16947_v28 = vld [vmem:[#allocation5 + $0x2a0] ss:$24 sps:$4 sm:$0xff]  }
 0x155   : > { %v18426_v47 = vsub.f32 %v18272_v37, %v585_v15  ;;  %v18429_v18 = vsub.f32 %v18275_v38, %v585_v15  ;;  %v567_v19 = vpop.xlane.xlu0 %566  ;;  %v685_v21 = vadd.f32 %v643_v32, %v642_v31  ;;  %1485 = vmatpush1.bf16.msra.mxu0 %v16941_v62  ;;  %v16948_v29 = vld [vmem:[#allocation5 + $0x2d4] ss:$24 sps:$4 sm:$0xff]  }
 0x156   : > { %v586_v0 = vmul.f32 0.00390625, %v567_v19  ;;  %680 = vadd.xlane.f32.xlu1 %v679_v10  ;;  %683 = vadd.xlane.f32.xlu0 %v682_v45  ;;  %v570_v20 = vpop.xlane.xlu1 %569  ;;  %v644_v34 = vmul.f32 %v18420_v17, %v18420_v17  ;;  %v645_v35 = vmul.f32 %v18423_v42, %v18423_v42  ;;  %v16945_v10 = vld [vmem:[#allocation5 + $0x2a4] ss:$24 sps:$4 sm:$0xff]  }
 0x157   : > { %v587_v49 = vmul.f32 0.00390625, %v570_v20  ;;  %v646_v37 = vmul.f32 %v18426_v47, %v18426_v47  ;;  %v647_v38 = vmul.f32 %v18429_v18, %v18429_v18  ;;  %1486 = vmatprep.subr.bf16.mxu0 %v16942_v12  ;;  %v16953_v15 = vld [vmem:[#allocation5 + $0xc] ss:$24 sps:$4 sm:$0xff]  }
 0x158   : > { %v18440_v55 = vsub.f32 %v18280_v40, %v586_v0  ;;  %v18443_v56 = vsub.f32 %v18283_v41, %v586_v0  ;;  %v688_v5 = vadd.f32 %v645_v35, %v644_v34 }
 0x159   : > { %v18446_v23 = vsub.f32 %v18288_v43, %v587_v49  ;;  %v18449_v6 = vsub.f32 %v18291_v44, %v587_v49  ;;  %v691_v25 = vadd.f32 %v647_v38, %v646_v37  ;;  %1487 = vmatpush1.bf16.msra.mxu0 %v16944_v13  ;;  %v18460_v49 = vshrl.u32 %v24240_v46, 7 }
 0x15a   : > { %686 = vadd.xlane.f32.xlu1 %v685_v21  ;;  %689 = vadd.xlane.f32.xlu0 %v688_v5  ;;  %v648_v26 = vmul.f32 %v18440_v55, %v18440_v55  ;;  %v649_v40 = vmul.f32 %v18443_v56, %v18443_v56 }
 0x15b   : > { %v650_v41 = vmul.f32 %v18446_v23, %v18446_v23  ;;  %v651_v43 = vmul.f32 %v18449_v6, %v18449_v6  ;;  %1488 = vmatprep.subr.bf16.mxu0 %v16945_v10  ;;  %24551 = vst [vmem:[#allocation18_spill] sm:$0xff] %v18460_v49  ;;  %v824_v10 = vld [vmem:[%s24223_s2] sm:$0x3] }
 0x15c   : > { %v694_v44 = vadd.f32 %v649_v40, %v648_v26  ;;  %v18463_v26 = vsub.s32 1, %v18460_v49  ;;  %v18466_v40 = vsub.s32 0, %v18460_v49 }
 0x15d   : > { %v697_v7 = vadd.f32 %v651_v43, %v650_v41  ;;  %1489 = vmatpush1.bf16.msra.mxu0 %v16947_v28 }
 0x15e   : > { %692 = vadd.xlane.f32.xlu1 %v691_v25  ;;  %695 = vadd.xlane.f32.xlu0 %v694_v44  ;;  %24552 = vst [vmem:[#allocation19_spill] sm:$0xff] %v18463_v26  ;;  %24553 = vst [vmem:[#allocation20_spill] sm:$0xff] %v18466_v40  ;;  %v18472_v13 = vrot.slane %v780_v57, %v18463_v26  ;;  %v18478_v28 = vrot.slane %v780_v57, %v18466_v40 }
 0x15f   : > { %1490 = vmatprep.subr.bf16.mxu0 %v16948_v29 }
 0x161   : > { %1491 = vmatpush1.bf16.msra.mxu0 %v16950_v14 }
 0x162   : > { %698 = vadd.xlane.f32.xlu1 %v697_v7  ;;  %1573 = vmatprep.subr.bf16.mxu0 %v16953_v15 }
 0x1cf   : > { %v654_v31 = vpop.xlane.xlu0 %653 }
 0x1d0   : > { %v700_v32 = vmul.f32 0.00390625, %v654_v31 }
 0x1d2   : > { %v716_v45 = vadd.f32 1e-05, %v700_v32 }
 0x1d3   : > { %v657_v19 = vpop.xlane.xlu1 %656  ;;  %v660_v0 = vpop.xlane.xlu0 %659 }
 0x1d4   : > { %17287 = vrsqrt.f32 %v716_v45  ;;  %v701_v20 = vmul.f32 0.00390625, %v657_v19  ;;  %v702_v21 = vmul.f32 0.00390625, %v660_v0  ;;  %v18483_v19 = vrot.slane %v824_v10, %v18463_v26 }
 0x1d6   : > { %v717_v34 = vadd.f32 1e-05, %v701_v20  ;;  %v718_v35 = vadd.f32 1e-05, %v702_v21 }
 0x1d7   : > { %v663_v37 = vpop.xlane.xlu1 %662  ;;  %v666_v38 = vpop.xlane.xlu0 %665 }
 0x1d8   : > { %17289 = vrsqrt.f32 %v717_v34  ;;  %v703_v54 = vmul.f32 0.00390625, %v663_v37  ;;  %v704_v5 = vmul.f32 0.00390625, %v666_v38 }
 0x1d9   : > { %17291 = vrsqrt.f32 %v718_v35  ;;  %v18488_v35 = vrot.slane %v824_v10, %v18466_v40 }
 0x1da   : > { %v719_v22 = vadd.f32 1e-05, %v703_v54  ;;  %v720_v25 = vadd.f32 1e-05, %v704_v5 }
 0x1db   : > { %v669_v41 = vpop.xlane.xlu1 %668  ;;  %v672_v43 = vpop.xlane.xlu0 %671 }
 0x1dc   : > { %17293 = vrsqrt.f32 %v719_v22  ;;  %v705_v44 = vmul.f32 0.00390625, %v669_v41  ;;  %v706_v62 = vmul.f32 0.00390625, %v672_v43 }
 0x1dd   : > { %17295 = vrsqrt.f32 %v720_v25 }
 0x1de   : > { %v17288_v7 = vpop.eup %17287  ;;  %v721_v12 = vadd.f32 1e-05, %v705_v44  ;;  %v722_v29 = vadd.f32 1e-05, %v706_v62 }
 0x1df   : > { %v675_v14 = vpop.xlane.xlu1 %674  ;;  %v749_v15 = vmul.f32 %v17288_v7, %v18303_v30  ;;  %v748_v31 = vmul.f32 %v17288_v7, %v18300_v27  ;;  %v678_v45 = vpop.xlane.xlu0 %677 }
 0x1e0   : > { %17297 = vrsqrt.f32 %v721_v12  ;;  %v707_v32 = vmul.f32 0.00390625, %v675_v14  ;;  %v708_v54 = vmul.f32 0.00390625, %v678_v45 }
 0x1e1   : > { %v793_v21 = vmul.f32 %v18472_v13, %v749_v15  ;;  %v792_v34 = vmul.f32 %v18478_v28, %v748_v31  ;;  %17299 = vrsqrt.f32 %v722_v29 }
 0x1e2   : > { %v17290_v0 = vpop.eup %17289  ;;  %v723_v20 = vadd.f32 1e-05, %v707_v32  ;;  %v724_v14 = vadd.f32 1e-05, %v708_v54  ;;  %v16951_v32 = vld [vmem:[#allocation5 + $0x8] ss:$24 sps:$4 sm:$0xff]  }
 0x1e3   : > { %v17292_v37 = vpop.eup %17291  ;;  %v681_v30 = vpop.xlane.xlu1 %680  ;;  %v751_v27 = vmul.f32 %v17290_v0, %v18323_v4  ;;  %v750_v38 = vmul.f32 %v17290_v0, %v18320_v48  ;;  %v837_v44 = vadd.f32 %v18483_v19, %v793_v21  ;;  %v836_v62 = vadd.f32 %v18488_v35, %v792_v34 }
 0x1e4   : > { %17301 = vrsqrt.f32 %v723_v20  ;;  %v709_v5 = vmul.f32 0.00390625, %v681_v30  ;;  %v753_v22 = vmul.f32 %v17292_v37, %v18309_v36  ;;  %v752_v15 = vmul.f32 %v17292_v37, %v18306_v33  ;;  %v684_v31 = vpop.xlane.xlu0 %683  ;;  %v16956_v30 = vld [vmem:[#allocation5 + $0x3c] ss:$24 sps:$4 sm:$0xff]  }
 0x1e5   : > { %v795_v25 = vmul.f32 %v18472_v13, %v751_v27  ;;  %v794_v41 = vmul.f32 %v18478_v28, %v750_v38  ;;  %v710_v38 = vmul.f32 0.00390625, %v684_v31 }
 0x1e6   : > { %v17294_v43 = vpop.eup %17293  ;;  %v725_v57 = vadd.f32 1e-05, %v709_v5  ;;  %v797_v7 = vmul.f32 %v18472_v13, %v753_v22  ;;  %v796_v54 = vmul.f32 %v18478_v28, %v752_v15 }
 0x1e7   : > { %v687_v4 = vpop.xlane.xlu1 %686  ;;  %v839_v48 = vadd.f32 %v18483_v19, %v795_v25  ;;  %v838_v12 = vadd.f32 %v18488_v35, %v794_v41  ;;  %v755_v10 = vmul.f32 %v17294_v43, %v18329_v51  ;;  %v754_v36 = vmul.f32 %v17294_v43, %v18326_v50  ;;  %v17296_v29 = vpop.eup %17295  ;;  %v16954_v25 = vld [vmem:[#allocation5 + $0x38] ss:$24 sps:$4 sm:$0xff]  }
 0x1e8   : > { %17303 = vrsqrt.f32 %v725_v57  ;;  %v711_v34 = vmul.f32 0.00390625, %v687_v4  ;;  %v841_v50 = vadd.f32 %v18483_v19, %v797_v7  ;;  %v757_v37 = vmul.f32 %v17296_v29, %v18343_v58 }
 0x1e9   : > { %v18503_v45 = vpack.c.bf16 %v839_v48, %v837_v44  ;;  %v18505_v0 = vpack.c.bf16 %v838_v12, %v836_v62  ;;  %v799_v20 = vmul.f32 %v18472_v13, %v755_v10  ;;  %v798_v51 = vmul.f32 %v18478_v28, %v754_v36  ;;  %v16959_v44 = vld [vmem:[#allocation5 + $0x6c] ss:$24 sps:$4 sm:$0xff]   ;;  %v690_v36 = vpop.xlane.xlu0 %689 }
 0x1ea   : > { %v17298_v21 = vpop.eup %17297  ;;  %17305 = vrsqrt.f32 %v724_v14  ;;  %v801_v41 = vmul.f32 %v18472_v13, %v757_v37  ;;  %v727_v57 = vadd.f32 1e-05, %v711_v34  ;;  %v726_v4 = vadd.f32 1e-05, %v710_v38  ;;  %v16957_v14 = vld [vmem:[#allocation5 + $0x68] ss:$24 sps:$4 sm:$0xff]  }
 0x1eb   : > { %1492 = vmatprep.mubr.bf16.mxu0 %v18503_v45  ;;  %v843_v33 = vadd.f32 %v18483_v19, %v799_v20  ;;  %v759_v27 = vmul.f32 %v17298_v21, %v18349_v61  ;;  %v17300_v5 = vpop.eup %17299  ;;  %v842_v58 = vadd.f32 %v18488_v35, %v798_v51  ;;  %v758_v62 = vmul.f32 %v17298_v21, %v18346_v60  ;;  %v693_v7 = vpop.xlane.xlu1 %692  ;;  %v16962_v21 = vld [vmem:[#allocation5 + $0x9c] ss:$24 sps:$4 sm:$0xff]  }
 0x1ec   : > { %1493 = vmatmul.mubr.bf16.vlgmr.msra.gmra.mrb[0].mxu0 %v18505_v0  ;;  %v840_v48 = vadd.f32 %v18488_v35, %v796_v54  ;;  %v756_v10 = vmul.f32 %v17296_v29, %v18340_v9  ;;  %v845_v15 = vadd.f32 %v18483_v19, %v801_v41  ;;  %v761_v31 = vmul.f32 %v17300_v5, %v18363_v16 }
 0x1ed   : > { %1574 = vmatpush1.bf16.msra.mxu0 %v16951_v32  ;;  %v18516_v22 = vpack.c.bf16 %v843_v33, %v841_v50  ;;  %v803_v61 = vmul.f32 %v18472_v13, %v759_v27  ;;  %17307 = vrsqrt.f32 %v727_v57  ;;  %v713_v60 = vmul.f32 0.00390625, %v693_v7  ;;  %v16965_v27 = vld [vmem:[#allocation5 + $0xcc] ss:$24 sps:$4 sm:$0xff]   ;;  %v16963_v7 = vld [vmem:[#allocation5 + $0xc8] ss:$24 sps:$4 sm:$0xff]  }
 0x1ee   : > { %v17302_v43 = vpop.eup %17301  ;;  %1575 = vmatprep.subr.bf16.mxu0 %v16956_v30  ;;  %v18529_v20 = vpack.c.bf16 %v842_v58, %v840_v48  ;;  %v802_v34 = vmul.f32 %v18478_v28, %v758_v62  ;;  %17309 = vrsqrt.f32 %v726_v4  ;;  %v712_v51 = vmul.f32 0.00390625, %v690_v36  ;;  %v696_v62 = vpop.xlane.xlu0 %695 }
 0x1ef   : > { %1502 = vmatprep.mubr.bf16.mxu0 %v18516_v22  ;;  %v847_v12 = vadd.f32 %v18483_v19, %v803_v61  ;;  %v763_v32 = vmul.f32 %v17302_v43, %v18369_v39  ;;  %v800_v16 = vmul.f32 %v18478_v28, %v756_v10  ;;  %v16960_v39 = vld [vmem:[#allocation5 + $0x98] ss:$24 sps:$4 sm:$0xff]   ;;  %v805_v50 = vmul.f32 %v18472_v13, %v761_v31 }
 0x1f0   : > { %v729_v37 = vadd.f32 1e-05, %v713_v60  ;;  %v846_v38 = vadd.f32 %v18488_v35, %v802_v34  ;;  %v762_v54 = vmul.f32 %v17302_v43, %v18366_v24  ;;  %v760_v61 = vmul.f32 %v17300_v5, %v18360_v11  ;;  %v16968_v43 = vld [vmem:[#allocation5 + $0xfc] ss:$24 sps:$4 sm:$0xff]   ;;  %v16971_v60 = vld [vmem:[#allocation5 + $0x12c] ss:$24 sps:$4 sm:$0xff]  }
 0x1f1   : > { %1576 = vmatpush1.bf16.msra.mxu0 %v16954_v25  ;;  %v18532_v30 = vpack.c.bf16 %v847_v12, %v845_v15  ;;  %v807_v9 = vmul.f32 %v18472_v13, %v763_v32  ;;  %v699_v25 = vpop.xlane.xlu1 %698  ;;  %v844_v58 = vadd.f32 %v18488_v35, %v800_v16  ;;  %v849_v4 = vadd.f32 %v18483_v19, %v805_v50 }
 0x1f2   : > { %1577 = vmatprep.subr.bf16.mxu0 %v16959_v44  ;;  %v17304_v29 = vpop.eup %17303  ;;  %v728_v44 = vadd.f32 1e-05, %v712_v51  ;;  %17311 = vrsqrt.f32 %v729_v37  ;;  %v715_v12 = vmul.f32 0.00390625, %v699_v25  ;;  %v714_v5 = vmul.f32 0.00390625, %v696_v62  ;;  %v16969_v37 = vld [vmem:[#allocation5 + $0x128] ss:$24 sps:$4 sm:$0xff]  }
 0x1f3   : > { %v851_v41 = vadd.f32 %v18483_v19, %v807_v9  ;;  %v767_v57 = vmul.f32 %v17304_v29, %v18389_v53  ;;  %v18547_v24 = vpack.c.bf16 %v846_v38, %v844_v58  ;;  %v806_v53 = vmul.f32 %v18478_v28, %v762_v54 }
 0x1f4   : > { %1503 = vmatmul.mubr.bf16.gmra.mrb[4].mxu0 %v18529_v20  ;;  %v17306_v33 = vpop.eup %17305  ;;  %17313 = vrsqrt.f32 %v728_v44  ;;  %v731_v32 = vadd.f32 1e-05, %v715_v12  ;;  %v766_v34 = vmul.f32 %v17304_v29, %v18386_v52  ;;  %v730_v16 = vadd.f32 1e-05, %v714_v5  ;;  %v16974_v52 = vld [vmem:[#allocation5 + $0x15c] ss:$24 sps:$4 sm:$0xff]  }
 0x1f5   : > { %1578 = vmatpush1.bf16.msra.mxu0 %v16957_v14  ;;  %1512 = vmatprep.mubr.bf16.mxu0 %v18532_v30  ;;  %v765_v48 = vmul.f32 %v17306_v33, %v18383_v2  ;;  %v18550_v10 = vpack.c.bf16 %v851_v41, %v849_v4  ;;  %v811_v36 = vmul.f32 %v18472_v13, %v767_v57  ;;  %v16966_v2 = vld [vmem:[#allocation5 + $0xf8] ss:$24 sps:$4 sm:$0xff]   ;;  %v16977_v44 = vld [vmem:[#allocation5 + $0x18c] ss:$24 sps:$4 sm:$0xff]   ;;  %v16975_v12 = vld [vmem:[#allocation5 + $0x188] ss:$24 sps:$4 sm:$0xff]  }
 0x1f6   : > { %1579 = vmatprep.subr.bf16.mxu0 %v16962_v21  ;;  %v804_v14 = vmul.f32 %v18478_v28, %v760_v61  ;;  %v850_v21 = vadd.f32 %v18488_v35, %v806_v53  ;;  %v764_v50 = vmul.f32 %v17306_v33, %v18380_v1  ;;  %17315 = vrsqrt.f32 %v731_v32  ;;  %v16980_v5 = vld [vmem:[#allocation5 + $0x1bc] ss:$24 sps:$4 sm:$0xff]  }
 0x1f7   : > { %v17308_v11 = vpop.eup %17307  ;;  %v809_v15 = vmul.f32 %v18472_v13, %v765_v48  ;;  %v855_v9 = vadd.f32 %v18483_v19, %v811_v36  ;;  %v810_v29 = vmul.f32 %v18478_v28, %v766_v34  ;;  %17317 = vrsqrt.f32 %v730_v16  ;;  %v16981_v16 = vld [vmem:[#allocation5 + $0x1e8] ss:$24 sps:$4 sm:$0xff]  }
 0x1f8   : > { %v17310_v31 = vpop.eup %17309  ;;  %v771_v51 = vmul.f32 %v17308_v11, %v18409_v3  ;;  %v808_v1 = vmul.f32 %v18478_v28, %v764_v50  ;;  %v770_v61 = vmul.f32 %v17308_v11, %v18406_v63 }
 0x1f9   : > { %1580 = vmatpush1.bf16.msra.mxu0 %v16960_v39  ;;  %v848_v39 = vadd.f32 %v18488_v35, %v804_v14  ;;  %v769_v38 = vmul.f32 %v17310_v31, %v18403_v59  ;;  %v16972_v59 = vld [vmem:[#allocation5 + $0x158] ss:$24 sps:$4 sm:$0xff]   ;;  %v854_v58 = vadd.f32 %v18488_v35, %v810_v29  ;;  %v768_v48 = vmul.f32 %v17310_v31, %v18400_v8  ;;  %v16983_v31 = vld [vmem:[#allocation5 + $0x1ec] ss:$24 sps:$4 sm:$0xff]  }
 0x1fa   : > { %1581 = vmatprep.subr.bf16.mxu0 %v16965_v27  ;;  %v853_v27 = vadd.f32 %v18483_v19, %v809_v15  ;;  %v815_v3 = vmul.f32 %v18472_v13, %v771_v51  ;;  %v852_v4 = vadd.f32 %v18488_v35, %v808_v1  ;;  %v814_v63 = vmul.f32 %v18478_v28, %v770_v61  ;;  %v16989_v29 = vld [vmem:[#allocation5 + $0x24c] ss:$24 sps:$4 sm:$0xff]  }
 0x1fb   : > { %v18565_v54 = vpack.c.bf16 %v850_v21, %v848_v39  ;;  %v813_v33 = vmul.f32 %v18472_v13, %v769_v38  ;;  %v812_v8 = vmul.f32 %v18478_v28, %v768_v48  ;;  %v16993_v48 = vld [vmem:[#allocation5 + $0x2a8] ss:$24 sps:$4 sm:$0xff]  }
 0x1fc   : > { %1513 = vmatmul.mubr.bf16.gmra.mrb[8].mxu0 %v18547_v24  ;;  %v18568_v25 = vpack.c.bf16 %v855_v9, %v853_v27  ;;  %v17312_v41 = vpop.eup %17311  ;;  %v859_v62 = vadd.f32 %v18483_v19, %v815_v3  ;;  %v18583_v36 = vpack.c.bf16 %v854_v58, %v852_v4  ;;  %v858_v32 = vadd.f32 %v18488_v35, %v814_v63  ;;  %v16986_v27 = vld [vmem:[#allocation5 + $0x21c] ss:$24 sps:$4 sm:$0xff]  }
 0x1fd   : > { %1582 = vmatpush1.bf16.msra.mxu0 %v16963_v7  ;;  %1522 = vmatprep.mubr.bf16.mxu0 %v18550_v10  ;;  %v775_v7 = vmul.f32 %v17312_v41, %v18429_v18  ;;  %v856_v9 = vadd.f32 %v18488_v35, %v812_v8  ;;  %v17004_v63 = vld [vmem:[#allocation5 + $0x44] ss:$24 sps:$4 sm:$0xff]  }
 0x1fe   : > { %1583 = vmatprep.subr.bf16.mxu0 %v16968_v43  ;;  %v17314_v57 = vpop.eup %17313  ;;  %v857_v43 = vadd.f32 %v18483_v19, %v813_v33  ;;  %v17010_v8 = vld [vmem:[#allocation5 + $0xa4] ss:$24 sps:$4 sm:$0xff]  }
 0x1ff   : > { %v773_v53 = vmul.f32 %v17314_v57, %v18423_v42  ;;  %v819_v18 = vmul.f32 %v18472_v13, %v775_v7  ;;  %v772_v51 = vmul.f32 %v17314_v57, %v18420_v17  ;;  %v16987_v57 = vld [vmem:[#allocation5 + $0x248] ss:$24 sps:$4 sm:$0xff]   ;;  %v16995_v7 = vld [vmem:[#allocation5 + $0x2ac] ss:$24 sps:$4 sm:$0xff]  }
 0x200   : > { %v18586_v11 = vpack.c.bf16 %v859_v62, %v857_v43  ;;  %v17316_v14 = vpop.eup %17315  ;;  %v16998_v43 = vld [vmem:[#allocation5 + $0x2dc] ss:$24 sps:$4 sm:$0xff]  }
 0x201   : > { %1584 = vmatpush1.bf16.msra.mxu0 %v16966_v2  ;;  %v16978_v2 = vld [vmem:[#allocation5 + $0x1b8] ss:$24 sps:$4 sm:$0xff]   ;;  %v817_v42 = vmul.f32 %v18472_v13, %v773_v53  ;;  %v17318_v15 = vpop.eup %17317  ;;  %v863_v21 = vadd.f32 %v18483_v19, %v819_v18  ;;  %v779_v34 = vmul.f32 %v17316_v14, %v18449_v6  ;;  %v816_v17 = vmul.f32 %v18478_v28, %v772_v51  ;;  %v17001_v53 = vld [vmem:[#allocation5 + $0x14] ss:$24 sps:$4 sm:$0xff]  }
 0x202   : > { %1585 = vmatprep.subr.bf16.mxu0 %v16971_v60  ;;  %v774_v60 = vmul.f32 %v17312_v41, %v18426_v47  ;;  %v777_v50 = vmul.f32 %v17318_v15, %v18443_v56  ;;  %v778_v41 = vmul.f32 %v17316_v14, %v18446_v23  ;;  %v776_v33 = vmul.f32 %v17318_v15, %v18440_v55  ;;  %v16990_v55 = vld [vmem:[#allocation5 + $0x278] ss:$24 sps:$4 sm:$0xff]   ;;  %v17007_v18 = vld [vmem:[#allocation5 + $0x74] ss:$24 sps:$4 sm:$0xff]  }
 0x203   : > { %v861_v39 = vadd.f32 %v18483_v19, %v817_v42  ;;  %v823_v6 = vmul.f32 %v18472_v13, %v779_v34  ;;  %v17005_v14 = vld [vmem:[#allocation5 + $0x70] ss:$24 sps:$4 sm:$0xff]   ;;  %v17013_v42 = vld [vmem:[#allocation5 + $0xd4] ss:$24 sps:$4 sm:$0xff]   ;;  %v17022_v34 = vld [vmem:[#allocation5 + $0x164] ss:$24 sps:$4 sm:$0xff]  }
 0x204   : > { %1523 = vmatmul.mubr.bf16.gmra.mrb[12].mxu0 %v18565_v54  ;;  %v818_v47 = vmul.f32 %v18478_v28, %v774_v60  ;;  %v821_v56 = vmul.f32 %v18472_v13, %v777_v50  ;;  %v16992_v13 = vld [vmem:[#allocation5 + $0x27c] ss:$24 sps:$4 sm:$0xff]   ;;  %v822_v61 = vmul.f32 %v18478_v28, %v778_v41  ;;  %v820_v23 = vmul.f32 %v18478_v28, %v776_v33  ;;  %v16996_v28 = vld [vmem:[#allocation5 + $0x2d8] ss:$24 sps:$4 sm:$0xff]  }
 0x205   : > { %1586 = vmatpush1.bf16.msra.mxu0 %v16969_v37  ;;  %1532 = vmatprep.mubr.bf16.mxu0 %v18568_v25  ;;  %v18601_v37 = vpack.c.bf16 %v858_v32, %v856_v9  ;;  %v18604_v38 = vpack.c.bf16 %v863_v21, %v861_v39  ;;  %v867_v1 = vadd.f32 %v18483_v19, %v823_v6  ;;  %v17011_v15 = vld [vmem:[#allocation5 + $0xd0] ss:$24 sps:$4 sm:$0xff]   ;;  %v17014_v32 = vld [vmem:[#allocation5 + $0x100] ss:$24 sps:$4 sm:$0xff]   ;;  %v17019_v60 = vld [vmem:[#allocation5 + $0x134] ss:$24 sps:$4 sm:$0xff]  }
 0x206   : > { %1587 = vmatprep.subr.bf16.mxu0 %v16974_v52  ;;  %v16984_v52 = vld [vmem:[#allocation5 + $0x218] ss:$24 sps:$4 sm:$0xff]   ;;  %v862_v3 = vadd.f32 %v18488_v35, %v818_v47  ;;  %v864_v4 = vadd.f32 %v18488_v35, %v820_v23  ;;  %v17025_v51 = vld [vmem:[#allocation5 + $0x194] ss:$24 sps:$4 sm:$0xff]   ;;  %v17028_v39 = vld [vmem:[#allocation5 + $0x1c4] ss:$24 sps:$4 sm:$0xff]  }
 0x207   : > { %v17017_v21 = vld [vmem:[#allocation5 + $0x130] ss:$24 sps:$4 sm:$0xff]   ;;  %v17020_v9 = vld [vmem:[#allocation5 + $0x160] ss:$24 sps:$4 sm:$0xff]   ;;  %v17034_v6 = vld [vmem:[#allocation5 + $0x224] ss:$24 sps:$4 sm:$0xff]  }
 0x208   : > { %v17026_v50 = vld [vmem:[#allocation5 + $0x1c0] ss:$24 sps:$4 sm:$0xff]   ;;  %v17029_v47 = vld [vmem:[#allocation5 + $0x1f0] ss:$24 sps:$4 sm:$0xff]   ;;  %v17043_v41 = vld [vmem:[#allocation5 + $0x2b4] ss:$24 sps:$4 sm:$0xff]  }
 0x209   : > { %1588 = vmatpush1.bf16.msra.mxu0 %v16972_v59  ;;  %v860_v59 = vadd.f32 %v18488_v35, %v816_v17  ;;  %v17032_v17 = vld [vmem:[#allocation5 + $0x220] ss:$24 sps:$4 sm:$0xff]  }
 0x20a   : > { %1589 = vmatprep.subr.bf16.mxu0 %v16977_v44  ;;  %v865_v44 = vadd.f32 %v18483_v19, %v821_v56  ;;  %v866_v19 = vadd.f32 %v18488_v35, %v822_v61  ;;  %v17002_v35 = vld [vmem:[#allocation5 + $0x40] ss:$24 sps:$4 sm:$0xff]   ;;  %v17035_v56 = vld [vmem:[#allocation5 + $0x250] ss:$24 sps:$4 sm:$0xff]  }
 0x20b   : > { %v18617_v58 = vpack.c.bf16 %v862_v3, %v860_v59  ;;  %v17038_v3 = vld [vmem:[#allocation5 + $0x280] ss:$24 sps:$4 sm:$0xff]   ;;  %v17046_v59 = vld [vmem:[#allocation5 + $0x2e4] ss:$24 sps:$4 sm:$0xff]  }
 0x20c   : > { %1533 = vmatmul.mubr.bf16.gmra.mrb[16].mxu0 %v18583_v36  ;;  %v18620_v62 = vpack.c.bf16 %v867_v1, %v865_v44  ;;  %v17041_v1 = vld [vmem:[#allocation5 + $0x2b0] ss:$24 sps:$4 sm:$0xff]   ;;  %v17044_v33 = vld [vmem:[#allocation5 + $0x2e0] ss:$24 sps:$4 sm:$0xff]  }
 0x20d   : > { %1590 = vmatpush1.bf16.msra.mxu0 %v16975_v12  ;;  %1542 = vmatprep.mubr.bf16.mxu0 %v18586_v11  ;;  %v18627_v12 = vpack.c.bf16 %v866_v19, %v864_v4 }
 0x20e   : > { %1591 = vmatprep.subr.bf16.mxu0 %v16980_v5  ;;  %v16999_v5 = vld [vmem:[#allocation5 + $0x10] ss:$24 sps:$4 sm:$0xff]  }
 0x211   : > { %1592 = vmatpush1.bf16.msra.mxu0 %v16978_v2  ;;  %v17008_v2 = vld [vmem:[#allocation5 + $0xa0] ss:$24 sps:$4 sm:$0xff]  }
 0x212   : > { %1593 = vmatprep.subr.bf16.mxu0 %v16983_v31  ;;  %v17016_v31 = vld [vmem:[#allocation5 + $0x104] ss:$24 sps:$4 sm:$0xff]  }
 0x214   : > { %1543 = vmatmul.mubr.bf16.gmra.mrb[20].mxu0 %v18601_v37 }
 0x215   : > { %1594 = vmatpush1.bf16.msra.mxu0 %v16981_v16  ;;  %1552 = vmatprep.mubr.bf16.mxu0 %v18604_v38  ;;  %v17023_v16 = vld [vmem:[#allocation5 + $0x190] ss:$24 sps:$4 sm:$0xff]  }
 0x216   : > { %1595 = vmatprep.subr.bf16.mxu0 %v16986_v27  ;;  %v17031_v27 = vld [vmem:[#allocation5 + $0x1f4] ss:$24 sps:$4 sm:$0xff]  }
 0x219   : > { %1596 = vmatpush1.bf16.msra.mxu0 %v16984_v52  ;;  %v17037_v52 = vld [vmem:[#allocation5 + $0x254] ss:$24 sps:$4 sm:$0xff]  }
 0x21a   : > { %1597 = vmatprep.subr.bf16.mxu0 %v16989_v29  ;;  %v17040_v29 = vld [vmem:[#allocation5 + $0x284] ss:$24 sps:$4 sm:$0xff]  }
 0x21c   : > { %1553 = vmatmul.mubr.bf16.gmra.mrb[24].mxu0 %v18617_v58 }
 0x21d   : > { %1598 = vmatpush1.bf16.msra.mxu0 %v16987_v57  ;;  %1562 = vmatprep.mubr.bf16.mxu0 %v18620_v62 }
 0x21e   : > { %1599 = vmatprep.subr.bf16.mxu0 %v16992_v13 }
 0x221   : > { %1600 = vmatpush1.bf16.msra.mxu0 %v16990_v55 }
 0x222   : > { %1601 = vmatprep.subr.bf16.mxu0 %v16995_v7 }
 0x224   : > { %1563 = vmatmul.mubr.bf16.gmra.mrb[28].mxu0 %v18627_v12 }
 0x225   : > { %1602 = vmatpush1.bf16.msra.mxu0 %v16993_v48  ;;  %1605 = vmatprep.mubr.bf16.mxu0 %v18503_v45 }
 0x226   : > { %1603 = vmatprep.subr.bf16.mxu0 %v16998_v43 }
 0x229   : > { %1604 = vmatpush1.bf16.msra.mxu0 %v16996_v28 }
 0x22a   : > { %1686 = vmatprep.subr.bf16.mxu0 %v17001_v53 }
 0x22c   : > { %1606 = vmatmul.mubr.bf16.vlgmr.msra.gmra.mrb[32].mxu0 %v18505_v0 }
 0x22d   : > { %1615 = vmatprep.mubr.bf16.mxu0 %v18516_v22  ;;  %1687 = vmatpush1.bf16.msra.mxu0 %v16999_v5 }
 0x22e   : > { %1688 = vmatprep.subr.bf16.mxu0 %v17004_v63 }
 0x231   : > { %1689 = vmatpush1.bf16.msra.mxu0 %v17002_v35 }
 0x232   : > { %1690 = vmatprep.subr.bf16.mxu0 %v17007_v18 }
 0x234   : > { %1616 = vmatmul.mubr.bf16.gmra.mrb[36].mxu0 %v18529_v20 }
 0x235   : > { %1625 = vmatprep.mubr.bf16.mxu0 %v18532_v30  ;;  %1691 = vmatpush1.bf16.msra.mxu0 %v17005_v14 }
 0x236   : > { %1692 = vmatprep.subr.bf16.mxu0 %v17010_v8 }
 0x239   : > { %1693 = vmatpush1.bf16.msra.mxu0 %v17008_v2 }
 0x23a   : > { %1694 = vmatprep.subr.bf16.mxu0 %v17013_v42 }
 0x23c   : > { %1626 = vmatmul.mubr.bf16.gmra.mrb[40].mxu0 %v18547_v24 }
 0x23d   : > { %1635 = vmatprep.mubr.bf16.mxu0 %v18550_v10  ;;  %1695 = vmatpush1.bf16.msra.mxu0 %v17011_v15 }
 0x23e   : > { %1696 = vmatprep.subr.bf16.mxu0 %v17016_v31 }
 0x241   : > { %1697 = vmatpush1.bf16.msra.mxu0 %v17014_v32 }
 0x242   : > { %1698 = vmatprep.subr.bf16.mxu0 %v17019_v60 }
 0x244   : > { %1636 = vmatmul.mubr.bf16.gmra.mrb[44].mxu0 %v18565_v54 }
 0x245   : > { %1645 = vmatprep.mubr.bf16.mxu0 %v18568_v25  ;;  %1699 = vmatpush1.bf16.msra.mxu0 %v17017_v21 }
 0x246   : > { %1700 = vmatprep.subr.bf16.mxu0 %v17022_v34 }
 0x249   : > { %1701 = vmatpush1.bf16.msra.mxu0 %v17020_v9 }
 0x24a   : > { %1702 = vmatprep.subr.bf16.mxu0 %v17025_v51 }
 0x24c   : > { %1646 = vmatmul.mubr.bf16.gmra.mrb[48].mxu0 %v18583_v36 }
 0x24d   : > { %1655 = vmatprep.mubr.bf16.mxu0 %v18586_v11  ;;  %1703 = vmatpush1.bf16.msra.mxu0 %v17023_v16 }
 0x24e   : > { %1704 = vmatprep.subr.bf16.mxu0 %v17028_v39 }
 0x251   : > { %1705 = vmatpush1.bf16.msra.mxu0 %v17026_v50 }
 0x252   : > { %1706 = vmatprep.subr.bf16.mxu0 %v17031_v27 }
 0x254   : > { %1656 = vmatmul.mubr.bf16.gmra.mrb[52].mxu0 %v18601_v37 }
 0x255   : > { %1665 = vmatprep.mubr.bf16.mxu0 %v18604_v38  ;;  %1707 = vmatpush1.bf16.msra.mxu0 %v17029_v47 }
 0x256   : > { %1708 = vmatprep.subr.bf16.mxu0 %v17034_v6 }
 0x259   : > { %1709 = vmatpush1.bf16.msra.mxu0 %v17032_v17 }
 0x25a   : > { %1710 = vmatprep.subr.bf16.mxu0 %v17037_v52 }
 0x25c   : > { %1666 = vmatmul.mubr.bf16.gmra.mrb[56].mxu0 %v18617_v58 }
 0x25d   : > { %1675 = vmatprep.mubr.bf16.mxu0 %v18620_v62  ;;  %1711 = vmatpush1.bf16.msra.mxu0 %v17035_v56 }
 0x25e   : > { %1712 = vmatprep.subr.bf16.mxu0 %v17040_v29 }
 0x261   : > { %1713 = vmatpush1.bf16.msra.mxu0 %v17038_v3 }
 0x262   : > { %1714 = vmatprep.subr.bf16.mxu0 %v17043_v41 }
 0x264   : > { %1676 = vmatmul.mubr.bf16.gmra.mrb[60].mxu0 %v18627_v12 }
 0x265   : > { %1715 = vmatpush1.bf16.msra.mxu0 %v17041_v1  ;;  %1718 = vmatprep.mubr.bf16.mxu0 %v18503_v45 }
 0x266   : > { %1716 = vmatprep.subr.bf16.mxu0 %v17046_v59 }
 0x269   : > { %1717 = vmatpush1.bf16.msra.mxu0 %v17044_v33 }
 0x26c   : > { %1719 = vmatmul.mubr.bf16.vlgmr.msra.gmra.mrb[64].mxu0 %v18505_v0 }
 0x26d   : > { %1728 = vmatprep.mubr.bf16.mxu0 %v18516_v22 }
 0x274   : > { %1729 = vmatmul.mubr.bf16.gmra.mrb[68].mxu0 %v18529_v20 }
 0x275   : > { %1738 = vmatprep.mubr.bf16.mxu0 %v18532_v30 }
 0x27c   : > { %1739 = vmatmul.mubr.bf16.gmra.mrb[72].mxu0 %v18547_v24 }
 0x27d   : > { %1748 = vmatprep.mubr.bf16.mxu0 %v18550_v10 }
 0x284   : > { %1749 = vmatmul.mubr.bf16.gmra.mrb[76].mxu0 %v18565_v54 }
 0x285   : > { %1758 = vmatprep.mubr.bf16.mxu0 %v18568_v25 }
 0x28c   : > { %1759 = vmatmul.mubr.bf16.gmra.mrb[80].mxu0 %v18583_v36 }
 0x28d   : > { %1768 = vmatprep.mubr.bf16.mxu0 %v18586_v11 }
 0x294   : > { %1769 = vmatmul.mubr.bf16.gmra.mrb[84].mxu0 %v18601_v37 }
 0x295   : > { %1778 = vmatprep.mubr.bf16.mxu0 %v18604_v38 }
 0x29c   : > { %1779 = vmatmul.mubr.bf16.gmra.mrb[88].mxu0 %v18617_v58 }
 0x29d   : > { %1788 = vmatprep.mubr.bf16.mxu0 %v18620_v62 }
 0x2a4   : > { %1789 = vmatmul.mubr.bf16.gmra.mrb[92].mxu0 %v18627_v12 }
 0x2bf   : > { %v1494_v45 = vpop.f32.mrb[0].mxu0 }
 0x2c0   : > { %v1496_v0 = vpop.f32.mrb[1].mxu0 }
 0x2c1   : > { %v1498_v22 = vpop.f32.mrb[2].mxu0 }
 0x2c2   : > { %v18662_v20 = vpack.c.bf16 %v1498_v22, %v1494_v45  ;;  %v1500_v30 = vpop.f32.mrb[3].mxu0 }
 0x2c3   : > { %v18664_v24 = vpack.c.bf16 %v1500_v30, %v1496_v0 }
 0x2c7   : > { %v1504_v10 = vpop.f32.mrb[4].mxu0 }
 0x2c8   : > { %v1506_v54 = vpop.f32.mrb[5].mxu0 }
 0x2c9   : > { %v1508_v25 = vpop.f32.mrb[6].mxu0 }
 0x2ca   : > { %v18666_v36 = vpack.c.bf16 %v1508_v25, %v1504_v10  ;;  %v1510_v11 = vpop.f32.mrb[7].mxu0 }
 0x2cb   : > { %v18668_v37 = vpack.c.bf16 %v1510_v11, %v1506_v54 }
 0x2cf   : > { %v1514_v38 = vpop.f32.mrb[8].mxu0 }
 0x2d0   : > { %v1516_v57 = vpop.f32.mrb[9].mxu0 }
 0x2d1   : > { %v1518_v44 = vpop.f32.mrb[10].mxu0 }
 0x2d2   : > { %v18670_v58 = vpack.c.bf16 %v1518_v44, %v1514_v38  ;;  %v1520_v13 = vpop.f32.mrb[11].mxu0 }
 0x2d3   : > { %v18672_v61 = vpack.c.bf16 %v1520_v13, %v1516_v57 }
 0x2d5   : > { %24554 = vst [vmem:[#allocation21_spill] sm:$0xff] %v18672_v61 }
 0x2d7   : > { %v1524_v62 = vpop.f32.mrb[12].mxu0 }
 0x2d8   : > { %v1526_v23 = vpop.f32.mrb[13].mxu0 }
 0x2d9   : > { %v1528_v55 = vpop.f32.mrb[14].mxu0 }
 0x2da   : > { %v18674_v7 = vpack.c.bf16 %v1528_v55, %v1524_v62  ;;  %v1530_v19 = vpop.f32.mrb[15].mxu0 }
 0x2db   : > { %v18676_v4 = vpack.c.bf16 %v1530_v19, %v1526_v23 }
 0x2dc   : > { %24555 = vst [vmem:[#allocation22_spill] sm:$0xff] %v18674_v7 }
 0x2dd   : > { %24556 = vst [vmem:[#allocation23_spill] sm:$0xff] %v18676_v4 }
 0x2df   : > { %v1534_v48 = vpop.f32.mrb[16].mxu0 }
 0x2e0   : > { %v1536_v12 = vpop.f32.mrb[17].mxu0 }
 0x2e1   : > { %v1538_v43 = vpop.f32.mrb[18].mxu0 }
 0x2e2   : > { %v18678_v28 = vpack.c.bf16 %v1538_v43, %v1534_v48  ;;  %v1540_v53 = vpop.f32.mrb[19].mxu0 }
 0x2e3   : > { %v18680_v5 = vpack.c.bf16 %v1540_v53, %v1536_v12 }
 0x2e4   : > { %24557 = vst [vmem:[#allocation24_spill] sm:$0xff] %v18678_v28 }
 0x2e5   : > { %24558 = vst [vmem:[#allocation25_spill] sm:$0xff] %v18680_v5 }
 0x2e7   : > { %v1544_v63 = vpop.f32.mrb[20].mxu0 }
 0x2e8   : > { %v1546_v35 = vpop.f32.mrb[21].mxu0 }
 0x2e9   : > { %v1548_v18 = vpop.f32.mrb[22].mxu0 }
 0x2ea   : > { %v18682_v14 = vpack.c.bf16 %v1548_v18, %v1544_v63  ;;  %v1550_v8 = vpop.f32.mrb[23].mxu0 }
 0x2eb   : > { %v18684_v2 = vpack.c.bf16 %v1550_v8, %v1546_v35 }
 0x2ec   : > { %24559 = vst [vmem:[#allocation26_spill] sm:$0xff] %v18682_v14 }
 0x2ed   : > { %24560 = vst [vmem:[#allocation27_spill] sm:$0xff] %v18684_v2 }
 0x2ef   : > { %v1554_v42 = vpop.f32.mrb[24].mxu0 }
 0x2f0   : > { %v1556_v15 = vpop.f32.mrb[25].mxu0 }
 0x2f1   : > { %v1558_v31 = vpop.f32.mrb[26].mxu0 }
 0x2f2   : > { %v18686_v32 = vpack.c.bf16 %v1558_v31, %v1554_v42  ;;  %v1560_v60 = vpop.f32.mrb[27].mxu0 }
 0x2f3   : > { %v18688_v21 = vpack.c.bf16 %v1560_v60, %v1556_v15 }
 0x2f4   : > { %24561 = vst [vmem:[#allocation28_spill] sm:$0xff] %v18686_v32 }
 0x2f5   : > { %24562 = vst [vmem:[#allocation29_spill] sm:$0xff] %v18688_v21 }
 0x2f7   : > { %v1564_v34 = vpop.f32.mrb[28].mxu0 }
 0x2f8   : > { %v1566_v9 = vpop.f32.mrb[29].mxu0 }
 0x2f9   : > { %v1568_v51 = vpop.f32.mrb[30].mxu0 }
 0x2fa   : > { %v18690_v16 = vpack.c.bf16 %v1568_v51, %v1564_v34  ;;  %v1570_v39 = vpop.f32.mrb[31].mxu0 }
 0x2fb   : > { %v18692_v50 = vpack.c.bf16 %v1570_v39, %v1566_v9 }
 0x2fc   : > { %24563 = vst [vmem:[#allocation30_spill] sm:$0xff] %v18690_v16 }
 0x2fd   : > { %24564 = vst [vmem:[#allocation31_spill] sm:$0xff] %v18692_v50 }
 0x2ff   : > { %v1607_v27 = vpop.f32.mrb[32].mxu0 }
 0x300   : > { %v1609_v47 = vpop.f32.mrb[33].mxu0 }
 0x301   : > { %v1611_v6 = vpop.f32.mrb[34].mxu0 }
 0x302   : > { %v18694_v17 = vpack.c.bf16 %v1611_v6, %v1607_v27  ;;  %v1613_v52 = vpop.f32.mrb[35].mxu0 }
 0x303   : > { %v18696_v56 = vpack.c.bf16 %v1613_v52, %v1609_v47 }
 0x304   : > { %3989 = vrot.lane.b32.xlu0 %v18694_v17, %s17870_s28 }
 0x305   : > { %4013 = vrot.lane.b32.xlu1 %v18696_v56, %s17870_s28 }
 0x307   : > { %v1617_v29 = vpop.f32.mrb[36].mxu0 }
 0x308   : > { %v1619_v3 = vpop.f32.mrb[37].mxu0 }
 0x309   : > { %v1621_v41 = vpop.f32.mrb[38].mxu0 }
 0x30a   : > { %v18702_v1 = vpack.c.bf16 %v1621_v41, %v1617_v29  ;;  %v1623_v59 = vpop.f32.mrb[39].mxu0 }
 0x30b   : > { %v18704_v33 = vpack.c.bf16 %v1623_v59, %v1619_v3 }
 0x30c   : > { %3991 = vrot.lane.b32.xlu1 %v18702_v1, %s17870_s28 }
 0x30f   : > { %v1627_v45 = vpop.f32.mrb[40].mxu0 }
 0x310   : > { %4015 = vrot.lane.b32.xlu1 %v18704_v33, %s17870_s28  ;;  %v1629_v0 = vpop.f32.mrb[41].mxu0 }
 0x311   : > { %v1631_v22 = vpop.f32.mrb[42].mxu0 }
 0x312   : > { %v18710_v30 = vpack.c.bf16 %v1631_v22, %v1627_v45  ;;  %v1633_v10 = vpop.f32.mrb[43].mxu0 }
 0x313   : > { %v18712_v54 = vpack.c.bf16 %v1633_v10, %v1629_v0 }
 0x314   : > { %3993 = vrot.lane.b32.xlu0 %v18710_v30, %s17870_s28 }
 0x315   : > { %4017 = vrot.lane.b32.xlu1 %v18712_v54, %s17870_s28 }
 0x317   : > { %v1637_v25 = vpop.f32.mrb[44].mxu0 }
 0x318   : > { %v1639_v11 = vpop.f32.mrb[45].mxu0 }
 0x319   : > { %v1641_v38 = vpop.f32.mrb[46].mxu0 }
 0x31a   : > { %v18718_v57 = vpack.c.bf16 %v1641_v38, %v1637_v25  ;;  %v1643_v44 = vpop.f32.mrb[47].mxu0 }
 0x31b   : > { %v18720_v13 = vpack.c.bf16 %v1643_v44, %v1639_v11 }
 0x31c   : > { %3995 = vrot.lane.b32.xlu0 %v18718_v57, %s17870_s28 }
 0x31d   : > { %4019 = vrot.lane.b32.xlu1 %v18720_v13, %s17870_s28 }
 0x31f   : > { %v1647_v62 = vpop.f32.mrb[48].mxu0 }
 0x320   : > { %v1649_v23 = vpop.f32.mrb[49].mxu0 }
 0x321   : > { %v1651_v55 = vpop.f32.mrb[50].mxu0 }
 0x322   : > { %v18726_v19 = vpack.c.bf16 %v1651_v55, %v1647_v62  ;;  %v1653_v48 = vpop.f32.mrb[51].mxu0 }
 0x323   : > { %v18728_v12 = vpack.c.bf16 %v1653_v48, %v1649_v23 }
 0x324   : > { %3997 = vrot.lane.b32.xlu0 %v18726_v19, %s17870_s28 }
 0x325   : > { %4021 = vrot.lane.b32.xlu1 %v18728_v12, %s17870_s28 }
 0x327   : > { %v1657_v43 = vpop.f32.mrb[52].mxu0 }
 0x328   : > { %v1659_v53 = vpop.f32.mrb[53].mxu0 }
 0x329   : > { %v1661_v63 = vpop.f32.mrb[54].mxu0 }
 0x32a   : > { %v18734_v35 = vpack.c.bf16 %v1661_v63, %v1657_v43  ;;  %v1663_v18 = vpop.f32.mrb[55].mxu0 }
 0x32b   : > { %v18736_v8 = vpack.c.bf16 %v1663_v18, %v1659_v53 }
 0x32c   : > { %3999 = vrot.lane.b32.xlu0 %v18734_v35, %s17870_s28 }
 0x32d   : > { %4023 = vrot.lane.b32.xlu1 %v18736_v8, %s17870_s28 }
 0x32f   : > { %v1667_v42 = vpop.f32.mrb[56].mxu0 }
 0x330   : > { %v1669_v15 = vpop.f32.mrb[57].mxu0 }
 0x331   : > { %v1671_v31 = vpop.f32.mrb[58].mxu0 }
 0x332   : > { %v18742_v60 = vpack.c.bf16 %v1671_v31, %v1667_v42  ;;  %v1673_v34 = vpop.f32.mrb[59].mxu0 }
 0x333   : > { %v18744_v9 = vpack.c.bf16 %v1673_v34, %v1669_v15 }
 0x334   : > { %4001 = vrot.lane.b32.xlu0 %v18742_v60, %s17870_s28 }
 0x335   : > { %4025 = vrot.lane.b32.xlu1 %v18744_v9, %s17870_s28 }
 0x337   : > { %v1677_v51 = vpop.f32.mrb[60].mxu0 }
 0x338   : > { %v1679_v39 = vpop.f32.mrb[61].mxu0 }
 0x339   : > { %v1681_v27 = vpop.f32.mrb[62].mxu0 }
 0x33a   : > { %v18750_v47 = vpack.c.bf16 %v1681_v27, %v1677_v51  ;;  %v1683_v6 = vpop.f32.mrb[63].mxu0 }
 0x33b   : > { %v18752_v52 = vpack.c.bf16 %v1683_v6, %v1679_v39 }
 0x33c   : > { %4003 = vrot.lane.b32.xlu0 %v18750_v47, %s17870_s28 }
 0x33d   : > { %4027 = vrot.lane.b32.xlu1 %v18752_v52, %s17870_s28 }
 0x33f   : > { %v1720_v29 = vpop.f32.mrb[64].mxu0 }
 0x340   : > { %1855 = vrot.lane.b32.xlu0 %v18662_v20, %s17870_s28  ;;  %v1722_v3 = vpop.f32.mrb[65].mxu0 }
 0x341   : > { %1879 = vrot.lane.b32.xlu1 %v18664_v24, %s17870_s28  ;;  %v1724_v41 = vpop.f32.mrb[66].mxu0 }
 0x342   : > { %v18762_v59 = vpack.c.bf16 %v1724_v41, %v1720_v29  ;;  %v1726_v45 = vpop.f32.mrb[67].mxu0 }
 0x343   : > { %v18764_v0 = vpack.c.bf16 %v1726_v45, %v1722_v3  ;;  %v17871_v45 = vmov 1983009808  }
 0x344   : > { %24565 = vst [vmem:[#allocation32_spill] sm:$0xff] %v18762_v59  ;;  %1857 = vrot.lane.b32.xlu0 %v18666_v36, %s17870_s28 }
 0x345   : > { %24566 = vst [vmem:[#allocation33_spill] sm:$0xff] %v18764_v0  ;;  %1881 = vrot.lane.b32.xlu1 %v18668_v37, %s17870_s28 }
 0x347   : > { %v1730_v22 = vpop.f32.mrb[68].mxu0 }
 0x348   : > { %1859 = vrot.lane.b32.xlu0 %v18670_v58, %s17870_s28  ;;  %v1732_v10 = vpop.f32.mrb[69].mxu0 }
 0x349   : > { %1883 = vrot.lane.b32.xlu1 %v18672_v61, %s17870_s28  ;;  %v1734_v25 = vpop.f32.mrb[70].mxu0 }
 0x34a   : > { %v18774_v11 = vpack.c.bf16 %v1734_v25, %v1730_v22  ;;  %v1736_v38 = vpop.f32.mrb[71].mxu0  ;;  %v2031_v22 = vunpack.c.l.s4 %v17871_v45  ;;  %v17872_v25 = vmov 1934713408  }
 0x34b   : > { %v18776_v44 = vpack.c.bf16 %v1736_v38, %v1732_v10  ;;  %v2062_v38 = vunpack.c.l.s4 %v17872_v25 }
 0x34c   : > { %24567 = vst [vmem:[#allocation34_spill] sm:$0xff] %v18774_v11  ;;  %1861 = vrot.lane.b32.xlu0 %v18674_v7, %s17870_s28 }
 0x34d   : > { %24568 = vst [vmem:[#allocation35_spill] sm:$0xff] %v18776_v44  ;;  %1885 = vrot.lane.b32.xlu1 %v18676_v4, %s17870_s28 }
 0x34f   : > { %v1740_v62 = vpop.f32.mrb[72].mxu0 }
 0x350   : > { %1863 = vrot.lane.b32.xlu0 %v18678_v28, %s17870_s28  ;;  %v1742_v23 = vpop.f32.mrb[73].mxu0 }
 0x351   : > { %1887 = vrot.lane.b32.xlu1 %v18680_v5, %s17870_s28  ;;  %v1744_v55 = vpop.f32.mrb[74].mxu0 }
 0x352   : > { %v18786_v48 = vpack.c.bf16 %v1744_v55, %v1740_v62  ;;  %v1746_v43 = vpop.f32.mrb[75].mxu0 }
 0x353   : > { %v18788_v53 = vpack.c.bf16 %v1746_v43, %v1742_v23 }
 0x354   : > { %24569 = vst [vmem:[#allocation36_spill] sm:$0xff] %v18786_v48  ;;  %1865 = vrot.lane.b32.xlu0 %v18682_v14, %s17870_s28 }
 0x355   : > { %24570 = vst [vmem:[#allocation37_spill] sm:$0xff] %v18788_v53  ;;  %1889 = vrot.lane.b32.xlu1 %v18684_v2, %s17870_s28 }
 0x357   : > { %v1750_v63 = vpop.f32.mrb[76].mxu0 }
 0x358   : > { %1867 = vrot.lane.b32.xlu0 %v18686_v32, %s17870_s28  ;;  %v1752_v18 = vpop.f32.mrb[77].mxu0 }
 0x359   : > { %1891 = vrot.lane.b32.xlu1 %v18688_v21, %s17870_s28  ;;  %v1754_v42 = vpop.f32.mrb[78].mxu0 }
 0x35a   : > { %v18798_v15 = vpack.c.bf16 %v1754_v42, %v1750_v63  ;;  %v1756_v31 = vpop.f32.mrb[79].mxu0  ;;  %v2032_v42 = vunpack.c.0.s8 %v2031_v22 }
 0x35b   : > { %v18800_v34 = vpack.c.bf16 %v1756_v31, %v1752_v18 }
 0x35c   : > { %24571 = vst [vmem:[#allocation38_spill] sm:$0xff] %v18798_v15  ;;  %1869 = vrot.lane.b32.xlu0 %v18690_v16, %s17870_s28  ;;  %v18847_v45 = vsub.s32 %v2032_v42, %v18460_v49 }
 0x35d   : > { %24572 = vst [vmem:[#allocation39_spill] sm:$0xff] %v18800_v34  ;;  %1893 = vrot.lane.b32.xlu1 %v18692_v50, %s17870_s28 }
 0x35e   : > { %24578 = vst [vmem:[#allocation45_spill] sm:$0xff] %v18847_v45 }
 0x35f   : > { %v1760_v51 = vpop.f32.mrb[80].mxu0 }
 0x360   : > { %6117 = vrot.lane.b32.xlu0 %v18762_v59, %s17870_s28  ;;  %v1762_v39 = vpop.f32.mrb[81].mxu0 }
 0x361   : > { %6141 = vrot.lane.b32.xlu1 %v18764_v0, %s17870_s28  ;;  %v1764_v27 = vpop.f32.mrb[82].mxu0 }
 0x362   : > { %v18810_v6 = vpack.c.bf16 %v1764_v27, %v1760_v51  ;;  %v1766_v29 = vpop.f32.mrb[83].mxu0 }
 0x363   : > { %v18812_v3 = vpack.c.bf16 %v1766_v29, %v1762_v39  ;;  %v2063_v39 = vunpack.c.0.s8 %v2062_v38  ;;  %v17873_v29 = vmov 0   ;;  %v4041_v38 = vshrl.u32 %v18696_v56, 16 }
 0x364   : > { %24573 = vst [vmem:[#allocation40_spill] sm:$0xff] %v18810_v6  ;;  %6121 = vrot.lane.b32.xlu0 %v18786_v48, %s17870_s28 }
 0x365   : > { %24574 = vst [vmem:[#allocation41_spill] sm:$0xff] %v18812_v3  ;;  %6119 = vrot.lane.b32.xlu1 %v18774_v11, %s17870_s28 }
 0x367   : > { %v1770_v41 = vpop.f32.mrb[84].mxu0 }
 0x368   : > { %6125 = vrot.lane.b32.xlu0 %v18810_v6, %s17870_s28  ;;  %v1772_v10 = vpop.f32.mrb[85].mxu0 }
 0x369   : > { %6143 = vrot.lane.b32.xlu1 %v18776_v44, %s17870_s28  ;;  %v1774_v62 = vpop.f32.mrb[86].mxu0 }
 0x36a   : > { %v18822_v23 = vpack.c.bf16 %v1774_v62, %v1770_v41  ;;  %v1776_v55 = vpop.f32.mrb[87].mxu0  ;;  %v18844_v41 = vpack.i.b16 %v17873_v29, %v17873_v29  ;;  %v18853_v62 = vsub.s32 %v2063_v39, %v18460_v49 }
 0x36b   : > { %v18826_v18 = vpack.c.bf16 %v1776_v55, %v1772_v10  ;;  %v4033_v10 = vshrl.u32 %v18694_v17, 16 }
 0x36c   : > { %24575 = vst [vmem:[#allocation42_spill] sm:$0xff] %v18822_v23  ;;  %6127 = vrot.lane.b32.xlu0 %v18822_v23, %s17870_s28  ;;  %24577 = vst [vmem:[#allocation44_spill] sm:$0xff] %v18844_v41 }
 0x36d   : > { %24576 = vst [vmem:[#allocation43_spill] sm:$0xff] %v18826_v18  ;;  %6145 = vrot.lane.b32.xlu1 %v18788_v53, %s17870_s28  ;;  %24579 = vst [vmem:[#allocation46_spill] sm:$0xff] %v18853_v62 }
 0x36f   : > { %v1780_v46 = vpop.f32.mrb[88].mxu0 }
 0x370   : > { %v1782_v25 = vpop.f32.mrb[89].mxu0 }
 0x371   : > { %6123 = vrot.lane.b32.xlu1 %v18798_v15, %s17870_s28  ;;  %v1784_v42 = vpop.f32.mrb[90].mxu0 }
 0x372   : > { %v18864_v39 = vpack.c.bf16 %v1784_v42, %v1780_v46  ;;  %v1786_v63 = vpop.f32.mrb[91].mxu0 }
 0x373   : > { %v18869_v51 = vpack.c.bf16 %v1786_v63, %v1782_v25 }
 0x374   : > { %24580 = vst [vmem:[#allocation47_spill] sm:$0xff] %v18864_v39  ;;  %6129 = vrot.lane.b32.xlu0 %v18864_v39, %s17870_s28 }
 0x375   : > { %24581 = vst [vmem:[#allocation48_spill] sm:$0xff] %v18869_v51  ;;  %6147 = vrot.lane.b32.xlu1 %v18800_v34, %s17870_s28 }
 0x376   : > { %v3990_v26 = vpop.permute.xlu0 %3989 }
 0x377   : > { %v4031_v55 = vpack.i.b16 %v3990_v26, %v18694_v17  ;;  %v4034_v29 = vshrl.u32 %v3990_v26, 16  ;;  %v4014_v63 = vpop.permute.xlu1 %4013  ;;  %v1790_v43 = vpop.f32.mrb[92].mxu0 }
 0x378   : > { %v4039_v22 = vpack.i.b16 %v4014_v63, %v18696_v56  ;;  %v4042_v49 = vshrl.u32 %v4014_v63, 16  ;;  %v1792_v27 = vpop.f32.mrb[93].mxu0 }
 0x379   : > { %v4035_v15 = vpack.i.b16 %v4034_v29, %v4033_v10  ;;  %v4157_v46 = vcombine.high %v4031_v55, %v18844_v41  ;;  %v4164_v42 = vrot.slane %v4031_v55, %v18847_v45  ;;  %6149 = vrot.lane.b32.xlu1 %v18812_v3, %s17870_s28  ;;  %v1794_v26 = vpop.f32.mrb[94].mxu0 }
 0x37a   : > { %v4043_v17 = vpack.i.b16 %v4042_v49, %v4041_v38  ;;  %v4172_v31 = vcombine.high %v4039_v22, %v18844_v41  ;;  %v4179_v25 = vrot.slane %v4039_v22, %v18847_v45  ;;  %v18900_v34 = vpack.c.bf16 %v1794_v26, %v1790_v43  ;;  %v1796_v56 = vpop.f32.mrb[95].mxu0 }
 0x37b   : > { %v4171_v63 = vrot.slane %v4157_v46, %v18847_v45  ;;  %v4223_v10 = vcombine.high %v4035_v15, %v18844_v41  ;;  %v4230_v29 = vrot.slane %v4035_v15, %v18847_v45  ;;  %v18905_v40 = vpack.c.bf16 %v1796_v56, %v1792_v27 }
 0x37c   : > { %24582 = vst [vmem:[#allocation49_spill] sm:$0xff] %v18900_v34  ;;  %v4186_v55 = vrot.slane %v4172_v31, %v18847_v45  ;;  %v4187_v3 = vcombine.low %v4164_v42, %v4179_v25  ;;  %v4188_v53 = vcombine.high %v4164_v42, %v4179_v25  ;;  %v4238_v49 = vcombine.high %v4043_v17, %v18844_v41 }
 0x37d   : > { %24583 = vst [vmem:[#allocation50_spill] sm:$0xff] %v18905_v40  ;;  %v4237_v22 = vrot.slane %v4223_v10, %v18847_v45  ;;  %v4245_v46 = vrot.slane %v4043_v17, %v18847_v45  ;;  %6151 = vrot.lane.b32.xlu1 %v18826_v18, %s17870_s28 }
 0x37e   : > { %v4195_v15 = vrot.slane %v4187_v3, %v18853_v62  ;;  %v4202_v27 = vrot.slane %v4188_v53, %v18853_v62  ;;  %v4203_v31 = vcombine.low %v4171_v63, %v4186_v55  ;;  %v4204_v26 = vcombine.high %v4171_v63, %v4186_v55  ;;  %v3992_v42 = vpop.permute.xlu1 %3991 }
 0x37f   : > { %v4252_v25 = vrot.slane %v4238_v49, %v18847_v45  ;;  %v4253_v56 = vcombine.low %v4230_v29, %v4245_v46  ;;  %v4254_v38 = vcombine.high %v4230_v29, %v4245_v46  ;;  %v4047_v43 = vpack.i.b16 %v3992_v42, %v18702_v1 }
 0x380   : > { %v4050_v39 = vshrl.u32 %v3992_v42, 16  ;;  %v5213_v23 = vcombine.low %v4195_v15, %v4202_v27  ;;  %v18922_v18 = vrot.slane %v4203_v31, %v18853_v62  ;;  %v18925_v53 = vrot.slane %v4204_v26, %v18853_v62 }
 0x381   : > { %v4269_v3 = vcombine.low %v4237_v22, %v4252_v25  ;;  %v4270_v63 = vcombine.high %v4237_v22, %v4252_v25  ;;  %6153 = vrot.lane.b32.xlu1 %v18869_v51, %s17870_s28  ;;  %v18930_v29 = vrot.slane %v4253_v56, %v18853_v62  ;;  %v18933_v55 = vrot.slane %v4254_v38, %v18853_v62 }
 0x382   : > { %v24584_v49 = vshrl.u32 %v18702_v1, 16  ;;  %v4289_v31 = vcombine.high %v4047_v43, %v18844_v41  ;;  %v4016_v42 = vpop.permute.xlu1 %4015  ;;  %v4296_v26 = vrot.slane %v4047_v43, %v18847_v45  ;;  %v18941_v25 = vrot.slane %v5213_v23, %v18847_v45 }
 0x383   : > { %v4055_v17 = vpack.i.b16 %v4016_v42, %v18704_v33  ;;  %v4058_v22 = vshrl.u32 %v4016_v42, 16  ;;  %v18945_v10 = vrot.slane %v4269_v3, %v18853_v62  ;;  %v18948_v38 = vrot.slane %v4270_v63, %v18853_v62 }
 0x384   : > { %v4051_v46 = vpack.i.b16 %v4050_v39, %v24584_v49  ;;  %v15834_v1 = vcombine.high %v4195_v15, %v4202_v27  ;;  %v4303_v39 = vrot.slane %v4289_v31, %v18847_v45  ;;  %v24585_v49 = vshrl.u32 %v18704_v33, 16 }
 0x385   : > { %v4304_v51 = vcombine.high %v4055_v17, %v18844_v41  ;;  %v4311_v42 = vrot.slane %v4055_v17, %v18847_v45  ;;  %6131 = vrot.lane.b32.xlu1 %v18900_v34, %s17870_s28 }
 0x386   : > { %v4355_v56 = vcombine.high %v4051_v46, %v18844_v41  ;;  %v4059_v43 = vpack.i.b16 %v4058_v22, %v24585_v49  ;;  %v4362_v23 = vrot.slane %v4051_v46, %v18847_v45  ;;  %v3994_v44 = vpop.permute.xlu0 %3993  ;;  %v18960_v63 = vrot.slane %v15834_v1, %v18847_v45 }
 0x387   : > { %v4318_v33 = vrot.slane %v4304_v51, %v18847_v45  ;;  %v4319_v27 = vcombine.low %v4296_v26, %v4311_v42  ;;  %v4320_v31 = vcombine.high %v4296_v26, %v4311_v42  ;;  %v4018_v22 = vpop.permute.xlu1 %4017  ;;  %v4063_v46 = vpack.i.b16 %v3994_v44, %v18710_v30 }
 0x388   : > { %v4369_v3 = vrot.slane %v4355_v56, %v18847_v45  ;;  %v4370_v17 = vcombine.high %v4059_v43, %v18844_v41  ;;  %v4377_v49 = vrot.slane %v4059_v43, %v18847_v45  ;;  %v4066_v34 = vshrl.u32 %v3994_v44, 16 }
 0x389   : > { %v4071_v56 = vpack.i.b16 %v4018_v22, %v18712_v54  ;;  %v4327_v1 = vrot.slane %v4319_v27, %v18853_v62  ;;  %v4334_v6 = vrot.slane %v4320_v31, %v18853_v62  ;;  %v4335_v11 = vcombine.low %v4303_v39, %v4318_v33  ;;  %6155 = vrot.lane.b32.xlu1 %v18905_v40, %s17870_s28 }
 0x38a   : > { %v4336_v15 = vcombine.high %v4303_v39, %v4318_v33  ;;  %v4384_v51 = vrot.slane %v4370_v17, %v18847_v45  ;;  %v4385_v26 = vcombine.low %v4362_v23, %v4377_v49  ;;  %v4386_v42 = vcombine.high %v4362_v23, %v4377_v49 }
 0x38b   : > { %v24586_v43 = vshrl.u32 %v18710_v30, 16  ;;  %v18977_v44 = vrot.slane %v4335_v11, %v18853_v62  ;;  %v5313_v27 = vcombine.low %v4327_v1, %v4334_v6  ;;  %v15838_v31 = vcombine.high %v4327_v1, %v4334_v6 }
 0x38c   : > { %v18980_v0 = vrot.slane %v4336_v15, %v18853_v62  ;;  %v18983_v39 = vrot.slane %v4385_v26, %v18853_v62  ;;  %v18986_v33 = vrot.slane %v4386_v42, %v18853_v62  ;;  %v4401_v17 = vcombine.low %v4369_v3, %v4384_v51 }
 0x38d   : > { %v4067_v48 = vpack.i.b16 %v4066_v34, %v24586_v43  ;;  %v4402_v40 = vcombine.high %v4369_v3, %v4384_v51  ;;  %v18989_v23 = vrot.slane %v5313_v27, %v18847_v45  ;;  %v18992_v30 = vrot.slane %v15838_v31, %v18847_v45 }
 0x38e   : > { %v18999_v6 = vrot.slane %v4401_v17, %v18853_v62  ;;  %v3996_v1 = vpop.permute.xlu0 %3995  ;;  %v4421_v26 = vcombine.high %v4063_v46, %v18844_v41  ;;  %v4428_v42 = vrot.slane %v4063_v46, %v18847_v45  ;;  %v4074_v31 = vshrl.u32 %v4018_v22, 16 }
 0x38f   : > { %v19002_v15 = vrot.slane %v4402_v40, %v18853_v62  ;;  %v4487_v43 = vcombine.high %v4067_v48, %v18844_v41  ;;  %v4494_v27 = vrot.slane %v4067_v48, %v18847_v45  ;;  %v4436_v17 = vcombine.high %v4071_v56, %v18844_v41  ;;  %v4020_v3 = vpop.permute.xlu1 %4019 }
 0x390   : > { %v4435_v51 = vrot.slane %v4421_v26, %v18847_v45  ;;  %v4443_v34 = vrot.slane %v4071_v56, %v18847_v45  ;;  %v4079_v46 = vpack.i.b16 %v3996_v1, %v18718_v57  ;;  %v24587_v40 = vshrl.u32 %v18712_v54, 16 }
 0x391   : > { %v4450_v48 = vrot.slane %v4436_v17, %v18847_v45  ;;  %v4082_v22 = vshrl.u32 %v3996_v1, 16  ;;  %v4501_v50 = vrot.slane %v4487_v43, %v18847_v45  ;;  %v4087_v49 = vpack.i.b16 %v4020_v3, %v18720_v13 }
 0x392   : > { %v4075_v59 = vpack.i.b16 %v4074_v31, %v24587_v40  ;;  %v4451_v16 = vcombine.low %v4428_v42, %v4443_v34  ;;  %v4452_v21 = vcombine.high %v4428_v42, %v4443_v34  ;;  %v24588_v40 = vshrl.u32 %v18718_v57, 16 }
 0x393   : > { %v4467_v26 = vcombine.low %v4435_v51, %v4450_v48  ;;  %v4468_v32 = vcombine.high %v4435_v51, %v4450_v48  ;;  %v4553_v1 = vcombine.high %v4079_v46, %v18844_v41 }
 0x394   : > { %v4502_v56 = vcombine.high %v4075_v59, %v18844_v41  ;;  %v4509_v2 = vrot.slane %v4075_v59, %v18847_v45  ;;  %v4459_v11 = vrot.slane %v4451_v16, %v18853_v62  ;;  %v4466_v54 = vrot.slane %v4452_v21, %v18853_v62 }
 0x395   : > { %v4083_v31 = vpack.i.b16 %v4082_v22, %v24588_v40  ;;  %v19037_v43 = vrot.slane %v4467_v26, %v18853_v62  ;;  %v19040_v34 = vrot.slane %v4468_v32, %v18853_v62  ;;  %v4560_v40 = vrot.slane %v4079_v46, %v18847_v45 }
 0x396   : > { %v4516_v51 = vrot.slane %v4502_v56, %v18847_v45  ;;  %v4517_v42 = vcombine.low %v4494_v27, %v4509_v2  ;;  %v4518_v17 = vcombine.high %v4494_v27, %v4509_v2  ;;  %v5413_v59 = vcombine.low %v4459_v11, %v4466_v54 }
 0x397   : > { %v15842_v48 = vcombine.high %v4459_v11, %v4466_v54  ;;  %v4619_v16 = vcombine.high %v4083_v31, %v18844_v41  ;;  %v4567_v11 = vrot.slane %v4553_v1, %v18847_v45  ;;  %v4626_v54 = vrot.slane %v4083_v31, %v18847_v45 }
 0x398   : > { %v19045_v21 = vrot.slane %v4517_v42, %v18853_v62  ;;  %v4533_v57 = vcombine.low %v4501_v50, %v4516_v51  ;;  %v4534_v22 = vcombine.high %v4501_v50, %v4516_v51  ;;  %v19049_v26 = vrot.slane %v4518_v17, %v18853_v62 }
 0x399   : > { %v19052_v32 = vrot.slane %v5413_v59, %v18847_v45  ;;  %v19064_v50 = vrot.slane %v15842_v48, %v18847_v45  ;;  %v4633_v51 = vrot.slane %v4619_v16, %v18847_v45  ;;  %v4090_v42 = vshrl.u32 %v4020_v3, 16 }
 0x39a   : > { %v19058_v27 = vrot.slane %v4533_v57, %v18853_v62  ;;  %v19061_v56 = vrot.slane %v4534_v22, %v18853_v62  ;;  %v4568_v17 = vcombine.high %v4087_v49, %v18844_v41  ;;  %v4575_v57 = vrot.slane %v4087_v49, %v18847_v45 }
 0x39b   : > { %v24589_v48 = vcombine.low %v18922_v18, %v18925_v53  ;;  %v24590_v3 = vshrl.u32 %v18720_v13, 16  ;;  %v24591_v1 = vcombine.high %v18922_v18, %v18925_v53  ;;  %v15836_v53 = vcombine.high %v18930_v29, %v18933_v55 }
 0x39c   : > { %v4582_v46 = vrot.slane %v4568_v17, %v18847_v45  ;;  %v4583_v2 = vcombine.low %v4560_v40, %v4575_v57  ;;  %v4584_v14 = vcombine.high %v4560_v40, %v4575_v57 }
 0x39d   : > { %v5236_v22 = vrot.slane %v24589_v48, %v18847_v45  ;;  %v4091_v16 = vpack.i.b16 %v4090_v42, %v24590_v3  ;;  %v5244_v59 = vrot.slane %v24591_v1, %v18847_v45  ;;  %v5245_v48 = vcombine.low %v18941_v25, %v18960_v63 }
 0x39e   : > { %v4599_v5 = vcombine.low %v4567_v11, %v4582_v46  ;;  %v4600_v31 = vcombine.high %v4567_v11, %v4582_v46  ;;  %v4591_v17 = vrot.slane %v4583_v2, %v18853_v62  ;;  %v4598_v3 = vrot.slane %v4584_v14, %v18853_v62 }
 0x39f   : > { %v4634_v13 = vcombine.high %v4091_v16, %v18844_v41  ;;  %v4641_v42 = vrot.slane %v4091_v16, %v18847_v45  ;;  %v5253_v18 = vcombine.low %v5236_v22, %v5244_v59  ;;  %v5252_v16 = vrot.slane %v5245_v48, %v18853_v62 }
 0x3a0   : > { %v19100_v1 = vrot.slane %v4599_v5, %v18853_v62  ;;  %v19103_v40 = vrot.slane %v4600_v31, %v18853_v62  ;;  %v5513_v46 = vcombine.low %v4591_v17, %v4598_v3  ;;  %v15846_v57 = vcombine.high %v4591_v17, %v4598_v3 }
 0x3a1   : > { %v4648_v25 = vrot.slane %v4634_v13, %v18847_v45  ;;  %v4649_v63 = vcombine.low %v4626_v54, %v4641_v42  ;;  %v4650_v11 = vcombine.high %v4626_v54, %v4641_v42  ;;  %v5260_v2 = vrot.slane %v5253_v18, %v18853_v62  ;;  %v3998_v18 = vpop.permute.xlu0 %3997 }
 0x3a2   : > { %v19115_v31 = vrot.slane %v5513_v46, %v18847_v45  ;;  %v24592_v13 = vcombine.low %v18930_v29, %v18933_v55  ;;  %v19124_v17 = vrot.slane %v15846_v57, %v18847_v45  ;;  %v5279_v29 = vcombine.low %v18945_v10, %v18948_v38  ;;  %v4022_v55 = vpop.permute.xlu1 %4021 }
 0x3a3   : > { %v19108_v14 = vrot.slane %v4649_v63, %v18853_v62  ;;  %v4665_v59 = vcombine.low %v4633_v51, %v4648_v25  ;;  %v4666_v22 = vcombine.high %v4633_v51, %v4648_v25  ;;  %v19112_v5 = vrot.slane %v4650_v11, %v18853_v62 }
 0x3a4   : > { %v5270_v42 = vrot.slane %v24592_v13, %v18847_v45  ;;  %v5261_v48 = vcombine.low %v5252_v16, %v5260_v2  ;;  %v19128_v3 = vcombine.high %v5252_v16, %v5260_v2  ;;  %v5278_v11 = vrot.slane %v15836_v53, %v18847_v45 }
 0x3a5   : > { %v19131_v25 = vrot.slane %v4665_v59, %v18853_v62  ;;  %v19134_v63 = vrot.slane %v4666_v22, %v18853_v62  ;;  %v15837_v2 = vcombine.high %v18945_v10, %v18948_v38  ;;  %v5286_v16 = vrot.slane %v5279_v29, %v18847_v45 }
 0x3a6   : > { %24593 = vst [vmem:[#allocation51_spill] sm:$0xff] %v19128_v3  ;;  %v6016_v59 = vshrl.u32 %v5261_v48, 16  ;;  %v5295_v22 = vcombine.low %v5270_v42, %v5278_v11  ;;  %v4095_v53 = vpack.i.b16 %v3998_v18, %v18726_v19  ;;  %v4098_v13 = vshrl.u32 %v3998_v18, 16 }
 0x3a7   : > { %v5294_v51 = vrot.slane %v15837_v2, %v18847_v45  ;;  %v4103_v54 = vpack.i.b16 %v4022_v55, %v18728_v12  ;;  %v4106_v49 = vshrl.u32 %v4022_v55, 16  ;;  %v24594_v57 = vcombine.low %v18977_v44, %v18980_v0 }
 0x3a8   : > { %v5302_v10 = vrot.slane %v5295_v22, %v18853_v62  ;;  %v24595_v38 = vshrl.u32 %v18726_v19, 16  ;;  %v4685_v11 = vcombine.high %v4095_v53, %v18844_v41  ;;  %v4692_v18 = vrot.slane %v4095_v53, %v18847_v45 }
 0x3a9   : > { %v19153_v46 = vrot.slane %v24594_v57, %v18847_v45  ;;  %v5303_v29 = vcombine.low %v5286_v16, %v5294_v51  ;;  %v24596_v2 = vshrl.u32 %v18728_v12, 16  ;;  %v4700_v55 = vcombine.high %v4103_v54, %v18844_v41 }
 0x3aa   : > { %v4099_v42 = vpack.i.b16 %v4098_v13, %v24595_v38  ;;  %v4707_v28 = vrot.slane %v4103_v54, %v18847_v45  ;;  %v4699_v57 = vrot.slane %v4685_v11, %v18847_v45  ;;  %v24597_v19 = vcombine.high %v18977_v44, %v18980_v0 }
 0x3ab   : > { %v4107_v3 = vpack.i.b16 %v4106_v49, %v24596_v2  ;;  %v5310_v51 = vrot.slane %v5303_v29, %v18853_v62  ;;  %v4714_v12 = vrot.slane %v4700_v55, %v18847_v45 }
 0x3ac   : > { %v4751_v4 = vcombine.high %v4099_v42, %v18844_v41  ;;  %v4758_v22 = vrot.slane %v4099_v42, %v18847_v45  ;;  %v5344_v13 = vrot.slane %v24597_v19, %v18847_v45  ;;  %v4715_v49 = vcombine.low %v4692_v18, %v4707_v28 }
 0x3ad   : > { %v4716_v16 = vcombine.high %v4692_v18, %v4707_v28  ;;  %v4766_v54 = vcombine.high %v4107_v3, %v18844_v41  ;;  %v4773_v38 = vrot.slane %v4107_v3, %v18847_v45  ;;  %v5345_v42 = vcombine.low %v18989_v23, %v18992_v30 }
 0x3ae   : > { %v4765_v53 = vrot.slane %v4751_v4, %v18847_v45  ;;  %v5311_v11 = vcombine.low %v5302_v10, %v5310_v51  ;;  %v19178_v2 = vcombine.high %v5302_v10, %v5310_v51  ;;  %v4723_v0 = vrot.slane %v4715_v49, %v18853_v62 }
 0x3af   : > { %v4730_v44 = vrot.slane %v4716_v16, %v18853_v62  ;;  %v4731_v29 = vcombine.low %v4699_v57, %v4714_v12  ;;  %v4732_v55 = vcombine.high %v4699_v57, %v4714_v12  ;;  %v4780_v28 = vrot.slane %v4766_v54, %v18847_v45 }
 0x3b0   : > { %v4781_v18 = vcombine.low %v4758_v22, %v4773_v38  ;;  %v6015_v4 = vpack.i.b16 %v5311_v11, %v5261_v48  ;;  %v6017_v19 = vshrl.u32 %v5311_v11, 16  ;;  %v4782_v7 = vcombine.high %v4758_v22, %v4773_v38  ;;  %v4000_v11 = vpop.permute.xlu0 %3999 }
 0x3b1   : > { %v5613_v61 = vcombine.low %v4723_v0, %v4730_v44  ;;  %v19184_v3 = vrot.slane %v4731_v29, %v18853_v62  ;;  %v19187_v23 = vrot.slane %v4732_v55, %v18853_v62  ;;  %v4797_v10 = vcombine.low %v4765_v53, %v4780_v28 }
 0x3b2   : > { %v19190_v30 = vrot.slane %v4781_v18, %v18853_v62  ;;  %16769 = vmatprep.subr.msk.bf16.mxu1 %vm8320_vm0, %v6015_v4  ;;  %v8346_v57 = vsel %vm8320_vm0, %v6015_v4, 0  ;;  %v6018_v51 = vpack.i.b16 %v6017_v19, %v6016_v59  ;;  %v19195_v48 = vrot.slane %v4782_v7, %v18853_v62 }
 0x3b3   : > { %v4798_v22 = vcombine.high %v4765_v53, %v4780_v28  ;;  %16386 = vmatpush3.bf16.xpose.msra.mxu1 %v8346_v57  ;;  %v19202_v16 = vrot.slane %v4797_v10, %v18853_v62  ;;  %v15850_v54 = vcombine.high %v4723_v0, %v4730_v44  ;;  %v19210_v7 = vrot.slane %v5613_v61, %v18847_v45  ;;  %v4024_v28 = vpop.permute.xlu1 %4023 }
 0x3b4   : > { %16777 = vmatprep.subr.msk.bf16.mxu0 %vm8320_vm0, %v6018_v51  ;;  %v8491_v38 = vsel %vm8320_vm0, %v6018_v51, 0  ;;  %v5353_v55 = vcombine.low %v19153_v46, %v5344_v13  ;;  %v19225_v18 = vrot.slane %v5345_v42, %v18853_v62  ;;  %v24599_v4 = vcombine.low %v18983_v39, %v18986_v33 }
 0x3b5   : > { %v19207_v59 = vrot.slane %v4798_v22, %v18853_v62  ;;  %16418 = vmatpush3.bf16.xpose.msra.mxu0 %v8491_v38  ;;  %v19215_v29 = vrot.slane %v15850_v54, %v18847_v45  ;;  %v24600_v10 = vcombine.high %v18983_v39, %v18986_v33  ;;  %v24602_v46 = vcombine.low %v18999_v6, %v19002_v15 }
 0x3b6   : > { %24598 = vst [vmem:[#allocation52_spill] sm:$0xff] %v19225_v18  ;;  %v5370_v19 = vrot.slane %v24599_v4, %v18847_v45  ;;  %v19236_v51 = vrot.slane %v5353_v55, %v18853_v62  ;;  %v24603_v42 = vcombine.high %v18999_v6, %v19002_v15  ;;  %v4111_v54 = vpack.i.b16 %v4000_v11, %v18734_v35 }
 0x3b7   : > { %v5378_v57 = vrot.slane %v24600_v10, %v18847_v45  ;;  %v5386_v13 = vrot.slane %v24602_v46, %v18847_v45  ;;  %v4114_v4 = vshrl.u32 %v4000_v11, 16  ;;  %v4119_v39 = vpack.i.b16 %v4024_v28, %v18736_v8 }
 0x3b8   : > { %24601 = vst [vmem:[#allocation53_spill] sm:$0xff] %v19236_v51  ;;  %v5394_v22 = vrot.slane %v24603_v42, %v18847_v45  ;;  %v4122_v33 = vshrl.u32 %v4024_v28, 16  ;;  %v5361_v55 = vcombine.low %v19225_v18, %v19236_v51  ;;  %v4817_v61 = vcombine.high %v4111_v54, %v18844_v41 }
 0x3b9   : > { %v5395_v38 = vcombine.low %v5370_v19, %v5378_v57  ;;  %v4824_v46 = vrot.slane %v4111_v54, %v18847_v45  ;;  %v24605_v6 = vshrl.u32 %v18734_v35, 16  ;;  %v24606_v19 = vshrl.u32 %v18736_v8, 16 }
 0x3ba   : > { %v5403_v10 = vcombine.low %v5386_v13, %v5394_v22  ;;  %v4832_v57 = vcombine.high %v4119_v39, %v18844_v41  ;;  %v6028_v42 = vshrl.u32 %v5361_v55, 16  ;;  %v4831_v13 = vrot.slane %v4817_v61, %v18847_v45 }
 0x3bb   : > { %v19253_v44 = vrot.slane %v5395_v38, %v18853_v62  ;;  %v4115_v15 = vpack.i.b16 %v4114_v4, %v24605_v6  ;;  %v4123_v11 = vpack.i.b16 %v4122_v33, %v24606_v19  ;;  %v4839_v22 = vrot.slane %v4119_v39, %v18847_v45 }
 0x3bc   : > { %v19261_v28 = vrot.slane %v5403_v10, %v18853_v62  ;;  %v4846_v35 = vrot.slane %v4832_v57, %v18847_v45 }
 0x3bd   : > { %24604 = vst [vmem:[#allocation54_spill] sm:$0xff] %v19253_v44  ;;  %v4883_v54 = vcombine.high %v4115_v15, %v18844_v41  ;;  %v4890_v38 = vrot.slane %v4115_v15, %v18847_v45  ;;  %v4898_v4 = vcombine.high %v4123_v11, %v18844_v41  ;;  %v4847_v33 = vcombine.low %v4824_v46, %v4839_v22 }
 0x3be   : > { %24607 = vst [vmem:[#allocation55_spill] sm:$0xff] %v19261_v28  ;;  %v5411_v8 = vcombine.low %v19253_v44, %v19261_v28  ;;  %v4848_v6 = vcombine.high %v4824_v46, %v4839_v22  ;;  %v4905_v10 = vrot.slane %v4123_v11, %v18847_v45  ;;  %v4863_v61 = vcombine.low %v4831_v13, %v4846_v35 }
 0x3bf   : > { %v4897_v19 = vrot.slane %v4883_v54, %v18847_v45  ;;  %v4864_v0 = vcombine.high %v4831_v13, %v4846_v35  ;;  %v4912_v39 = vrot.slane %v4898_v4, %v18847_v45  ;;  %v4855_v15 = vrot.slane %v4847_v33, %v18853_v62 }
 0x3c0   : > { %v6027_v53 = vpack.i.b16 %v5411_v8, %v5361_v55  ;;  %v6029_v49 = vshrl.u32 %v5411_v8, 16  ;;  %v4862_v57 = vrot.slane %v4848_v6, %v18853_v62  ;;  %v19277_v12 = vrot.slane %v4863_v61, %v18853_v62  ;;  %v4002_v61 = vpop.permute.xlu0 %4001 }
 0x3c1   : > { %v19280_v44 = vrot.slane %v4864_v0, %v18853_v62  ;;  %v4913_v46 = vcombine.low %v4890_v38, %v4905_v10  ;;  %v4914_v11 = vcombine.high %v4890_v38, %v4905_v10  ;;  %v4929_v54 = vcombine.low %v4897_v19, %v4912_v39 }
 0x3c2   : > { %16770 = vmatprep.subr.msk.bf16.mxu1 %vm8320_vm0, %v6027_v53  ;;  %v8349_v13 = vsel %vm8320_vm0, %v6027_v53, 0  ;;  %v6030_v22 = vpack.i.b16 %v6029_v49, %v6028_v42  ;;  %v4930_v55 = vcombine.high %v4897_v19, %v4912_v39  ;;  %v5713_v8 = vcombine.low %v4855_v15, %v4862_v57 }
 0x3c3   : > { %16388 = vmatpush3.bf16.xpose.msra.mxu1 %v8349_v13  ;;  %v19285_v35 = vrot.slane %v4913_v46, %v18853_v62  ;;  %v19288_v4 = vrot.slane %v4914_v11, %v18853_v62  ;;  %v15854_v33 = vcombine.high %v4855_v15, %v4862_v57  ;;  %v19297_v53 = vrot.slane %v4929_v54, %v18853_v62  ;;  %v4026_v13 = vpop.permute.xlu1 %4025 }
 0x3c4   : > { %16778 = vmatprep.subr.msk.bf16.mxu0 %vm8320_vm0, %v6030_v22  ;;  %v8494_v49 = vsel %vm8320_vm0, %v6030_v22, 0  ;;  %v19300_v42 = vrot.slane %v4930_v55, %v18853_v62  ;;  %v19303_v6 = vrot.slane %v5713_v8, %v18847_v45  ;;  %v24608_v46 = vcombine.low %v19037_v43, %v19040_v34 }
 0x3c5   : > { %16420 = vmatpush3.bf16.xpose.msra.mxu0 %v8494_v49  ;;  %v19306_v10 = vrot.slane %v15854_v33, %v18847_v45  ;;  %v24609_v22 = vcombine.high %v19037_v43, %v19040_v34  ;;  %v5445_v55 = vcombine.low %v19052_v32, %v19064_v50  ;;  %v24610_v8 = vcombine.low %v19045_v21, %v19049_v26 }
 0x3c6   : > { %v5436_v11 = vrot.slane %v24608_v46, %v18847_v45  ;;  %v24611_v49 = vcombine.high %v19045_v21, %v19049_v26  ;;  %v24612_v46 = vcombine.low %v19058_v27, %v19061_v56  ;;  %v24613_v43 = vcombine.high %v19058_v27, %v19061_v56 }
 0x3c7   : > { %v5444_v54 = vrot.slane %v24609_v22, %v18847_v45  ;;  %v5470_v33 = vrot.slane %v24610_v8, %v18847_v45  ;;  %v4127_v32 = vpack.i.b16 %v4002_v61, %v18742_v60  ;;  %v4130_v50 = vshrl.u32 %v4002_v61, 16 }
 0x3c8   : > { %v5478_v57 = vrot.slane %v24611_v49, %v18847_v45  ;;  %v5486_v15 = vrot.slane %v24612_v46, %v18847_v45  ;;  %v5494_v34 = vrot.slane %v24613_v43, %v18847_v45  ;;  %v19344_v22 = vrot.slane %v5445_v55, %v18853_v62 }
 0x3c9   : > { %v5453_v8 = vcombine.low %v5436_v11, %v5444_v54  ;;  %v4135_v21 = vpack.i.b16 %v4026_v13, %v18744_v9  ;;  %v24615_v49 = vshrl.u32 %v18742_v60, 16  ;;  %v4949_v46 = vcombine.high %v4127_v32, %v18844_v41 }
 0x3ca   : > { %24614 = vst [vmem:[#allocation56_spill] sm:$0xff] %v19344_v22  ;;  %v5495_v39 = vcombine.low %v5470_v33, %v5478_v57  ;;  %v5503_v26 = vcombine.low %v5486_v15, %v5494_v34  ;;  %v4956_v38 = vrot.slane %v4127_v32, %v18847_v45  ;;  %v4138_v61 = vshrl.u32 %v4026_v13, 16 }
 0x3cb   : > { %v4131_v19 = vpack.i.b16 %v4130_v50, %v24615_v49  ;;  %v19352_v27 = vrot.slane %v5453_v8, %v18853_v62  ;;  %v4964_v11 = vcombine.high %v4135_v21, %v18844_v41  ;;  %v4963_v15 = vrot.slane %v4949_v46, %v18847_v45 }
 0x3cc   : > { %v19355_v56 = vrot.slane %v5495_v39, %v18853_v62  ;;  %v19359_v57 = vrot.slane %v5503_v26, %v18853_v62  ;;  %v24619_v33 = vshrl.u32 %v18744_v9, 16  ;;  %v4971_v39 = vrot.slane %v4135_v21, %v18847_v45 }
 0x3cd   : > { %24616 = vst [vmem:[#allocation57_spill] sm:$0xff] %v19352_v27  ;;  %v5015_v60 = vcombine.high %v4131_v19, %v18844_v41  ;;  %v5022_v54 = vrot.slane %v4131_v19, %v18847_v45  ;;  %v5461_v55 = vcombine.low %v19344_v22, %v19352_v27  ;;  %v4978_v13 = vrot.slane %v4964_v11, %v18847_v45 }
 0x3ce   : > { %24617 = vst [vmem:[#allocation58_spill] sm:$0xff] %v19355_v56  ;;  %24618 = vst [vmem:[#allocation59_spill] sm:$0xff] %v19359_v57  ;;  %v4139_v43 = vpack.i.b16 %v4138_v61, %v24619_v33  ;;  %v5511_v34 = vcombine.low %v19355_v56, %v19359_v57  ;;  %v24620_v50 = vcombine.low %v19100_v1, %v19103_v40 }
 0x3cf   : > { %v5029_v32 = vrot.slane %v5015_v60, %v18847_v45  ;;  %v24621_v8 = vcombine.high %v19100_v1, %v19103_v40  ;;  %v6040_v26 = vshrl.u32 %v5461_v55, 16  ;;  %v4979_v49 = vcombine.low %v4956_v38, %v4971_v39 }
 0x3d0   : > { %v5536_v19 = vrot.slane %v24620_v50, %v18847_v45  ;;  %v4980_v21 = vcombine.high %v4956_v38, %v4971_v39  ;;  %v4995_v46 = vcombine.low %v4963_v15, %v4978_v13  ;;  %v6039_v61 = vpack.i.b16 %v5511_v34, %v5461_v55 }
 0x3d1   : > { %v5544_v9 = vrot.slane %v24621_v8, %v18847_v45  ;;  %v6041_v11 = vshrl.u32 %v5511_v34, 16  ;;  %v4996_v33 = vcombine.high %v4963_v15, %v4978_v13  ;;  %v5030_v0 = vcombine.high %v4139_v43, %v18844_v41 }
 0x3d2   : > { %v4987_v60 = vrot.slane %v4979_v49, %v18853_v62  ;;  %v4994_v56 = vrot.slane %v4980_v21, %v18853_v62  ;;  %v19385_v50 = vrot.slane %v4995_v46, %v18853_v62  ;;  %v5037_v57 = vrot.slane %v4139_v43, %v18847_v45  ;;  %16771 = vmatprep.subr.msk.bf16.mxu1 %vm8320_vm0, %v6039_v61 }
 0x3d3   : > { %v6042_v1 = vpack.i.b16 %v6041_v11, %v6040_v26  ;;  %v8352_v40 = vsel %vm8320_vm0, %v6039_v61, 0  ;;  %v19391_v38 = vrot.slane %v4996_v33, %v18853_v62  ;;  %v5044_v15 = vrot.slane %v5030_v0, %v18847_v45  ;;  %v4004_v11 = vpop.permute.xlu0 %4003 }
 0x3d4   : > { %16390 = vmatpush3.bf16.xpose.msra.mxu1 %v8352_v40  ;;  %v5045_v55 = vcombine.low %v5022_v54, %v5037_v57  ;;  %v5046_v39 = vcombine.high %v5022_v54, %v5037_v57  ;;  %v5813_v13 = vcombine.low %v4987_v60, %v4994_v56  ;;  %v15858_v34 = vcombine.high %v4987_v60, %v4994_v56 }
 0x3d5   : > { %16779 = vmatprep.subr.msk.bf16.mxu0 %vm8320_vm0, %v6042_v1  ;;  %v8497_v43 = vsel %vm8320_vm0, %v6042_v1, 0  ;;  %v5061_v26 = vcombine.low %v5029_v32, %v5044_v15  ;;  %v5062_v49 = vcombine.high %v5029_v32, %v5044_v15  ;;  %v5545_v61 = vcombine.low %v19115_v31, %v19124_v17 }
 0x3d6   : > { %16422 = vmatpush3.bf16.xpose.msra.mxu0 %v8497_v43  ;;  %v19401_v0 = vrot.slane %v5045_v55, %v18853_v62  ;;  %v19404_v57 = vrot.slane %v5046_v39, %v18853_v62  ;;  %v19412_v46 = vrot.slane %v5813_v13, %v18847_v45  ;;  %v19415_v32 = vrot.slane %v15858_v34, %v18847_v45  ;;  %v4028_v55 = vpop.permute.xlu1 %4027 }
 0x3d7   : > { %v19409_v54 = vrot.slane %v5061_v26, %v18853_v62  ;;  %v19420_v33 = vrot.slane %v5062_v49, %v18853_v62  ;;  %v5553_v1 = vcombine.low %v5536_v19, %v5544_v9  ;;  %v24622_v40 = vcombine.low %v19108_v14, %v19112_v5 }
 0x3d8   : > { %v19433_v17 = vrot.slane %v5545_v61, %v18853_v62  ;;  %v24624_v13 = vcombine.high %v19108_v14, %v19112_v5  ;;  %v24626_v34 = vcombine.low %v19131_v25, %v19134_v63  ;;  %v24627_v26 = vcombine.high %v19131_v25, %v19134_v63 }
 0x3d9   : > { %v5570_v15 = vrot.slane %v24622_v40, %v18847_v45  ;;  %v19440_v9 = vrot.slane %v5553_v1, %v18853_v62  ;;  %v4143_v61 = vpack.i.b16 %v4004_v11, %v18750_v47  ;;  %v4146_v31 = vshrl.u32 %v4004_v11, 16 }
 0x3da   : > { %24623 = vst [vmem:[#allocation60_spill] sm:$0xff] %v19433_v17  ;;  %v5578_v19 = vrot.slane %v24624_v13, %v18847_v45  ;;  %v5586_v43 = vrot.slane %v24626_v34, %v18847_v45  ;;  %v5594_v49 = vrot.slane %v24627_v26, %v18847_v45  ;;  %v4151_v14 = vpack.i.b16 %v4028_v55, %v18752_v52 }
 0x3db   : > { %24625 = vst [vmem:[#allocation61_spill] sm:$0xff] %v19440_v9  ;;  %v4154_v5 = vshrl.u32 %v4028_v55, 16  ;;  %v5561_v1 = vcombine.low %v19433_v17, %v19440_v9  ;;  %v5081_v39 = vcombine.high %v4143_v61, %v18844_v41  ;;  %v5088_v34 = vrot.slane %v4143_v61, %v18847_v45 }
 0x3dc   : > { %v5595_v40 = vcombine.low %v5570_v15, %v5578_v19  ;;  %v5603_v13 = vcombine.low %v5586_v43, %v5594_v49  ;;  %v24629_v25 = vshrl.u32 %v18750_v47, 16  ;;  %v24630_v15 = vshrl.u32 %v18752_v52, 16 }
 0x3dd   : > { %v5096_v19 = vcombine.high %v4151_v14, %v18844_v41  ;;  %v6052_v26 = vshrl.u32 %v5561_v1, 16  ;;  %v5095_v43 = vrot.slane %v5081_v39, %v18847_v45  ;;  %v5103_v49 = vrot.slane %v4151_v14, %v18847_v45 }
 0x3de   : > { %v19457_v60 = vrot.slane %v5595_v40, %v18853_v62  ;;  %v4147_v63 = vpack.i.b16 %v4146_v31, %v24629_v25  ;;  %v4155_v11 = vpack.i.b16 %v4154_v5, %v24630_v15  ;;  %v19465_v55 = vrot.slane %v5603_v13, %v18853_v62 }
 0x3df   : > { %v5110_v47 = vrot.slane %v5096_v19, %v18847_v45  ;;  %v5111_v5 = vcombine.low %v5088_v34, %v5103_v49  ;;  %v5112_v25 = vcombine.high %v5088_v34, %v5103_v49 }
 0x3e0   : > { %24628 = vst [vmem:[#allocation62_spill] sm:$0xff] %v19457_v60  ;;  %24631 = vst [vmem:[#allocation63_spill] sm:$0xff] %v19465_v55  ;;  %v5147_v61 = vcombine.high %v4147_v63, %v18844_v41  ;;  %v5154_v40 = vrot.slane %v4147_v63, %v18847_v45  ;;  %v5162_v31 = vcombine.high %v4155_v11, %v18844_v41 }
 0x3e1   : > { %v5611_v52 = vcombine.low %v19457_v60, %v19465_v55  ;;  %v5169_v13 = vrot.slane %v4155_v11, %v18847_v45  ;;  %v5127_v39 = vcombine.low %v5095_v43, %v5110_v47  ;;  %v5128_v56 = vcombine.high %v5095_v43, %v5110_v47 }
 0x3e2   : > { %v5161_v15 = vrot.slane %v5147_v61, %v18847_v45  ;;  %v5176_v14 = vrot.slane %v5162_v31, %v18847_v45  ;;  %v5119_v63 = vrot.slane %v5111_v5, %v18853_v62  ;;  %v5126_v19 = vrot.slane %v5112_v25, %v18853_v62 }
 0x3e3   : > { %v6051_v21 = vpack.i.b16 %v5611_v52, %v5561_v1  ;;  %v6053_v8 = vshrl.u32 %v5611_v52, 16  ;;  %v19481_v17 = vrot.slane %v5127_v39, %v18853_v62  ;;  %v19484_v60 = vrot.slane %v5128_v56, %v18853_v62  ;;  %v1856_v39 = vpop.permute.xlu0 %1855 }
 0x3e4   : > { %v5177_v34 = vcombine.low %v5154_v40, %v5169_v13  ;;  %v5178_v11 = vcombine.high %v5154_v40, %v5169_v13  ;;  %v5193_v61 = vcombine.low %v5161_v15, %v5176_v14  ;;  %v5194_v1 = vcombine.high %v5161_v15, %v5176_v14 }
 0x3e5   : > { %16772 = vmatprep.subr.msk.bf16.mxu1 %vm8320_vm0, %v6051_v21  ;;  %v6054_v49 = vpack.i.b16 %v6053_v8, %v6052_v26  ;;  %v8355_v43 = vsel %vm8320_vm0, %v6051_v21, 0  ;;  %v5913_v52 = vcombine.low %v5119_v63, %v5126_v19  ;;  %v15862_v5 = vcombine.high %v5119_v63, %v5126_v19 }
 0x3e6   : > { %16392 = vmatpush3.bf16.xpose.msra.mxu1 %v8355_v43  ;;  %v19489_v47 = vrot.slane %v5177_v34, %v18853_v62  ;;  %v19492_v31 = vrot.slane %v5178_v11, %v18853_v62  ;;  %v19501_v21 = vrot.slane %v5193_v61, %v18853_v62  ;;  %v19504_v26 = vrot.slane %v5194_v1, %v18853_v62 }
 0x3e7   : > { %16780 = vmatprep.subr.msk.bf16.mxu0 %vm8320_vm0, %v6054_v49  ;;  %v8500_v8 = vsel %vm8320_vm0, %v6054_v49, 0  ;;  %v19507_v25 = vrot.slane %v5913_v52, %v18847_v45  ;;  %v19510_v13 = vrot.slane %v15862_v5, %v18847_v45  ;;  %v24632_v34 = vcombine.low %v19184_v3, %v19187_v23  ;;  %v1880_v49 = vpop.permute.xlu1 %1879 }
 0x3e8   : > { %16424 = vmatpush3.bf16.xpose.msra.mxu0 %v8500_v8  ;;  %v24633_v43 = vcombine.high %v19184_v3, %v19187_v23  ;;  %v5645_v1 = vcombine.low %v19210_v7, %v19215_v29  ;;  %v24634_v52 = vcombine.low %v19190_v30, %v19195_v48  ;;  %v24635_v8 = vcombine.high %v19190_v30, %v19195_v48 }
 0x3e9   : > { %v5636_v11 = vrot.slane %v24632_v34, %v18847_v45  ;;  %v24636_v34 = vcombine.low %v19202_v16, %v19207_v59  ;;  %v24637_v3 = vcombine.high %v19202_v16, %v19207_v59  ;;  %v1897_v7 = vpack.i.b16 %v1856_v39, %v18662_v20 }
 0x3ea   : > { %v5644_v61 = vrot.slane %v24633_v43, %v18847_v45  ;;  %v5670_v5 = vrot.slane %v24634_v52, %v18847_v45  ;;  %v5678_v19 = vrot.slane %v24635_v8, %v18847_v45  ;;  %v1900_v29 = vshrl.u32 %v1856_v39, 16 }
 0x3eb   : > { %v5686_v63 = vrot.slane %v24636_v34, %v18847_v45  ;;  %v5694_v23 = vrot.slane %v24637_v3, %v18847_v45  ;;  %v19548_v43 = vrot.slane %v5645_v1, %v18853_v62  ;;  %v1905_v30 = vpack.i.b16 %v1880_v49, %v18664_v24 }
 0x3ec   : > { %v5653_v52 = vcombine.low %v5636_v11, %v5644_v61  ;;  %v5695_v14 = vcombine.low %v5670_v5, %v5678_v19  ;;  %v24639_v8 = vshrl.u32 %v18662_v20, 16  ;;  %v2029_v34 = vcombine.high %v1897_v7, %v18844_v41  ;;  %v1858_v19 = vpop.permute.xlu0 %1857 }
 0x3ed   : > { %24638 = vst [vmem:[#allocation64_spill] sm:$0xff] %v19548_v43  ;;  %v5703_v48 = vcombine.low %v5686_v63, %v5694_v23  ;;  %v2036_v40 = vrot.slane %v1897_v7, %v18847_v45  ;;  %v1908_v39 = vshrl.u32 %v1880_v49, 16  ;;  %v2044_v11 = vcombine.high %v1905_v30, %v18844_v41 }
 0x3ee   : > { %v1901_v15 = vpack.i.b16 %v1900_v29, %v24639_v8  ;;  %v19556_v16 = vrot.slane %v5653_v52, %v18853_v62  ;;  %v19559_v59 = vrot.slane %v5695_v14, %v18853_v62  ;;  %v2043_v20 = vrot.slane %v2029_v34, %v18847_v45 }
 0x3ef   : > { %v19563_v61 = vrot.slane %v5703_v48, %v18853_v62  ;;  %v24643_v14 = vshrl.u32 %v18664_v24, 16  ;;  %v2051_v49 = vrot.slane %v1905_v30, %v18847_v45  ;;  %v2058_v23 = vrot.slane %v2044_v11, %v18847_v45 }
 0x3f0   : > { %24640 = vst [vmem:[#allocation65_spill] sm:$0xff] %v19556_v16  ;;  %24641 = vst [vmem:[#allocation66_spill] sm:$0xff] %v19559_v59  ;;  %v2095_v63 = vcombine.high %v1901_v15, %v18844_v41  ;;  %v19568_v1 = vrot.slane %v1901_v15, %v18847_v45  ;;  %v5661_v5 = vcombine.low %v19548_v43, %v19556_v16  ;;  %v1922_v15 = vshrl.u32 %v1858_v19, 16 }
 0x3f1   : > { %24642 = vst [vmem:[#allocation67_spill] sm:$0xff] %v19563_v61  ;;  %v1909_v3 = vpack.i.b16 %v1908_v39, %v24643_v14  ;;  %v5711_v7 = vcombine.low %v19559_v59, %v19563_v61  ;;  %v1919_v52 = vpack.i.b16 %v1858_v19, %v18666_v36  ;;  %v2059_v8 = vcombine.low %v2036_v40, %v2051_v49 }
 0x3f2   : > { %v19579_v29 = vrot.slane %v2095_v63, %v18847_v45  ;;  %v6064_v48 = vshrl.u32 %v5661_v5, 16  ;;  %v2060_v34 = vcombine.high %v2036_v40, %v2051_v49  ;;  %v2075_v56 = vcombine.low %v2043_v20, %v2058_v23 }
 0x3f3   : > { %v6063_v43 = vpack.i.b16 %v5711_v7, %v5661_v5  ;;  %v6065_v24 = vshrl.u32 %v5711_v7, 16  ;;  %v2076_v39 = vcombine.high %v2043_v20, %v2058_v23  ;;  %v2110_v30 = vcombine.high %v1909_v3, %v18844_v41 }
 0x3f4   : > { %v19588_v63 = vrot.slane %v2059_v8, %v18853_v62  ;;  %v19591_v19 = vrot.slane %v1909_v3, %v18847_v45  ;;  %v19595_v5 = vrot.slane %v2060_v34, %v18853_v62  ;;  %v19602_v23 = vrot.slane %v2075_v56, %v18853_v62 }
 0x3f5   : > { %16773 = vmatprep.subr.msk.bf16.mxu1 %vm8320_vm0, %v6063_v43  ;;  %v6066_v40 = vpack.i.b16 %v6065_v24, %v6064_v48  ;;  %v19598_v20 = vrot.slane %v2110_v30, %v18847_v45  ;;  %v8358_v49 = vsel %vm8320_vm0, %v6063_v43, 0  ;;  %v19605_v7 = vrot.slane %v2076_v39, %v18853_v62  ;;  %v1882_v24 = vpop.permute.xlu1 %1881 }
 0x3f6   : > { %16394 = vmatpush3.bf16.xpose.msra.mxu1 %v8358_v49  ;;  %v24644_v3 = vshrl.u32 %v18666_v36, 16  ;;  %v2161_v48 = vcombine.high %v1919_v52, %v18844_v41  ;;  %v2125_v34 = vcombine.low %v19568_v1, %v19591_v19  ;;  %v2126_v43 = vcombine.high %v19568_v1, %v19591_v19 }
 0x3f7   : > { %16781 = vmatprep.subr.msk.bf16.mxu0 %vm8320_vm0, %v6066_v40  ;;  %v8503_v39 = vsel %vm8320_vm0, %v6066_v40, 0  ;;  %v1927_v14 = vpack.i.b16 %v1882_v24, %v18668_v37  ;;  %v1930_v1 = vshrl.u32 %v1882_v24, 16  ;;  %v24645_v19 = vcombine.low %v19277_v12, %v19280_v44 }
 0x3f8   : > { %v1923_v8 = vpack.i.b16 %v1922_v15, %v24644_v3  ;;  %16426 = vmatpush3.bf16.xpose.msra.mxu0 %v8503_v39  ;;  %v2168_v15 = vrot.slane %v1919_v52, %v18847_v45  ;;  %v2175_v30 = vrot.slane %v2161_v48, %v18847_v45  ;;  %v24646_v52 = vcombine.high %v19277_v12, %v19280_v44 }
 0x3f9   : > { %v5736_v40 = vrot.slane %v24645_v19, %v18847_v45  ;;  %v5745_v48 = vcombine.low %v19303_v6, %v19306_v10  ;;  %v24648_v36 = vshrl.u32 %v18668_v37, 16  ;;  %v2176_v19 = vcombine.high %v1927_v14, %v18844_v41 }
 0x3fa   : > { %v2227_v49 = vcombine.high %v1923_v8, %v18844_v41  ;;  %v2234_v3 = vrot.slane %v1923_v8, %v18847_v45  ;;  %v5744_v39 = vrot.slane %v24646_v52, %v18847_v45  ;;  %v24647_v8 = vcombine.low %v19285_v35, %v19288_v4 }
 0x3fb   : > { %v1931_v11 = vpack.i.b16 %v1930_v1, %v24648_v36  ;;  %v24649_v12 = vcombine.high %v19285_v35, %v19288_v4  ;;  %v19649_v52 = vrot.slane %v5745_v48, %v18853_v62  ;;  %v24651_v10 = vcombine.low %v19297_v53, %v19300_v42 }
 0x3fc   : > { %v2241_v56 = vrot.slane %v2227_v49, %v18847_v45  ;;  %v5770_v24 = vrot.slane %v24647_v8, %v18847_v45  ;;  %v2183_v49 = vrot.slane %v1927_v14, %v18847_v45  ;;  %v5753_v6 = vcombine.low %v5736_v40, %v5744_v39 }
 0x3fd   : > { %v5778_v44 = vrot.slane %v24649_v12, %v18847_v45  ;;  %24650 = vst [vmem:[#allocation68_spill] sm:$0xff] %v19649_v52  ;;  %v5786_v8 = vrot.slane %v24651_v10, %v18847_v45  ;;  %v24652_v37 = vcombine.high %v19297_v53, %v19300_v42  ;;  %v2190_v14 = vrot.slane %v2176_v19, %v18847_v45  ;;  %v1860_v42 = vpop.permute.xlu0 %1859 }
 0x3fe   : > { %v2191_v1 = vcombine.low %v2168_v15, %v2183_v49  ;;  %v2192_v59 = vcombine.high %v2168_v15, %v2183_v49  ;;  %v2242_v35 = vcombine.high %v1931_v11, %v18844_v41  ;;  %v2249_v4 = vrot.slane %v1931_v11, %v18847_v45 }
 0x3ff   : > { %v5794_v36 = vrot.slane %v24652_v37, %v18847_v45  ;;  %v19663_v40 = vrot.slane %v5753_v6, %v18853_v62  ;;  %v5795_v39 = vcombine.low %v5770_v24, %v5778_v44  ;;  %v2207_v61 = vcombine.low %v2175_v30, %v2190_v14 }
 0x400   : > { %v2199_v12 = vrot.slane %v2191_v1, %v18853_v62  ;;  %v2206_v10 = vrot.slane %v2192_v59, %v18853_v62  ;;  %v2208_v53 = vcombine.high %v2175_v30, %v2190_v14  ;;  %v2256_v19 = vrot.slane %v2242_v35, %v18847_v45  ;;  %v1884_v35 = vpop.permute.xlu1 %1883 }
 0x401   : > { %24653 = vst [vmem:[#allocation69_spill] sm:$0xff] %v19663_v40  ;;  %v5803_v48 = vcombine.low %v5786_v8, %v5794_v36  ;;  %v2257_v37 = vcombine.low %v2234_v3, %v2249_v4  ;;  %v2258_v15 = vcombine.high %v2234_v3, %v2249_v4  ;;  %v5761_v49 = vcombine.low %v19649_v52, %v19663_v40 }
 0x402   : > { %v19671_v11 = vrot.slane %v2207_v61, %v18853_v62  ;;  %v19674_v24 = vrot.slane %v2208_v53, %v18853_v62  ;;  %v3185_v44 = vcombine.low %v2199_v12, %v2206_v10  ;;  %v15806_v6 = vcombine.high %v2199_v12, %v2206_v10 }
 0x403   : > { %v19677_v59 = vrot.slane %v2257_v37, %v18853_v62  ;;  %v19680_v30 = vrot.slane %v2258_v15, %v18853_v62  ;;  %v2273_v8 = vcombine.low %v2241_v56, %v2256_v19  ;;  %v2274_v36 = vcombine.high %v2241_v56, %v2256_v19  ;;  %v19713_v37 = vpop.permute.xlu0 %1861  ;;  %v24658_v15 = vld [vmem:[#allocation22_spill] sm:$0xff] }
 0x404   : > { %v19683_v3 = vrot.slane %v2125_v34, %v18853_v62  ;;  %v19686_v14 = vrot.slane %v2126_v43, %v18853_v62  ;;  %v19689_v61 = vrot.slane %v3185_v44, %v18847_v45  ;;  %v19692_v1 = vrot.slane %v15806_v6, %v18847_v45 }
 0x405   : > { %v19695_v4 = vrot.slane %v2273_v8, %v18853_v62  ;;  %v19698_v12 = vrot.slane %v2274_v36, %v18853_v62  ;;  %v19707_v10 = vrot.slane %v5795_v39, %v18853_v62  ;;  %v19710_v53 = vrot.slane %v5803_v48, %v18853_v62  ;;  %v24656_v8 = vld [vmem:[#allocation21_spill] sm:$0xff] }
 0x406   : > { %v1935_v19 = vpack.i.b16 %v1860_v42, %v18670_v58  ;;  %v6076_v44 = vshrl.u32 %v5761_v49, 16  ;;  %v1938_v6 = vshrl.u32 %v1860_v42, 16  ;;  %v1943_v36 = vpack.i.b16 %v1884_v35, %v24656_v8 }
 0x407   : > { %24654 = vst [vmem:[#allocation70_spill] sm:$0xff] %v19707_v10  ;;  %24655 = vst [vmem:[#allocation71_spill] sm:$0xff] %v19710_v53  ;;  %v5811_v56 = vcombine.low %v19707_v10, %v19710_v53  ;;  %v1946_v48 = vshrl.u32 %v1884_v35, 16  ;;  %v24657_v34 = vshrl.u32 %v18670_v58, 16  ;;  %v1951_v42 = vpack.i.b16 %v19713_v37, %v24658_v15 }
 0x408   : > { %v2293_v39 = vcombine.high %v1935_v19, %v18844_v41  ;;  %v2300_v43 = vrot.slane %v1935_v19, %v18847_v45  ;;  %v2308_v40 = vcombine.high %v1943_v36, %v18844_v41  ;;  %v2315_v16 = vrot.slane %v1943_v36, %v18847_v45 }
 0x409   : > { %v1939_v52 = vpack.i.b16 %v1938_v6, %v24657_v34  ;;  %v6075_v55 = vpack.i.b16 %v5811_v56, %v5761_v49  ;;  %v6077_v9 = vshrl.u32 %v5811_v56, 16  ;;  %v24659_v10 = vshrl.u32 %v24656_v8, 16 }
 0x40a   : > { %v2307_v22 = vrot.slane %v2293_v39, %v18847_v45  ;;  %v2322_v58 = vrot.slane %v2308_v40, %v18847_v45  ;;  %v2323_v34 = vcombine.low %v2300_v43, %v2315_v16  ;;  %v2324_v36 = vcombine.high %v2300_v43, %v2315_v16 }
 0x40b   : > { %v1947_v53 = vpack.i.b16 %v1946_v48, %v24659_v10  ;;  %v2359_v19 = vcombine.high %v1939_v52, %v18844_v41  ;;  %v2366_v35 = vrot.slane %v1939_v52, %v18847_v45  ;;  %16774 = vmatprep.subr.msk.bf16.mxu1 %vm8320_vm0, %v6075_v55  ;;  %v6078_v6 = vpack.i.b16 %v6077_v9, %v6076_v44 }
 0x40c   : > { %v2331_v8 = vrot.slane %v2323_v34, %v18853_v62  ;;  %v2339_v10 = vcombine.low %v2307_v22, %v2322_v58  ;;  %v2340_v39 = vcombine.high %v2307_v22, %v2322_v58  ;;  %v2338_v52 = vrot.slane %v2324_v36, %v18853_v62 }
 0x40d   : > { %v2374_v27 = vcombine.high %v1947_v53, %v18844_v41  ;;  %v2381_v49 = vrot.slane %v1947_v53, %v18847_v45  ;;  %v2373_v56 = vrot.slane %v2359_v19, %v18847_v45  ;;  %16782 = vmatprep.subr.msk.bf16.mxu0 %vm8320_vm0, %v6078_v6  ;;  %v8361_v43 = vsel %vm8320_vm0, %v6075_v55, 0  ;;  %v1886_v55 = vpop.permute.xlu1 %1885 }
 0x40e   : > { %v19743_v9 = vrot.slane %v2339_v10, %v18853_v62  ;;  %v19746_v16 = vrot.slane %v2340_v39, %v18853_v62  ;;  %v8506_v53 = vsel %vm8320_vm0, %v6078_v6, 0  ;;  %16396 = vmatpush3.bf16.xpose.msra.mxu1 %v8361_v43  ;;  %v3285_v34 = vcombine.low %v2331_v8, %v2338_v52 }
 0x40f   : > { %v2388_v40 = vrot.slane %v2374_v27, %v18847_v45  ;;  %v2389_v48 = vcombine.low %v2366_v35, %v2381_v49  ;;  %v2390_v28 = vcombine.high %v2366_v35, %v2381_v49  ;;  %v15810_v36 = vcombine.high %v2331_v8, %v2338_v52  ;;  %16428 = vmatpush3.bf16.xpose.msra.mxu0 %v8506_v53  ;;  %v24660_v53 = vld [vmem:[#allocation23_spill] sm:$0xff] }
 0x410   : > { %v1954_v39 = vshrl.u32 %v19713_v37, 16  ;;  %v2425_v52 = vcombine.high %v1951_v42, %v18844_v41  ;;  %v2432_v43 = vrot.slane %v1951_v42, %v18847_v45  ;;  %v24661_v10 = vshrl.u32 %v24658_v15, 16 }
 0x411   : > { %v19751_v22 = vrot.slane %v2389_v48, %v18853_v62  ;;  %v19754_v44 = vrot.slane %v2390_v28, %v18853_v62  ;;  %v2405_v19 = vcombine.low %v2373_v56, %v2388_v40  ;;  %v2406_v27 = vcombine.high %v2373_v56, %v2388_v40 }
 0x412   : > { %v19777_v40 = vrot.slane %v3285_v34, %v18847_v45  ;;  %v19780_v48 = vrot.slane %v15810_v36, %v18847_v45  ;;  %v1955_v8 = vpack.i.b16 %v1954_v39, %v24661_v10  ;;  %v1962_v56 = vshrl.u32 %v1886_v55, 16 }
 0x413   : > { %v19761_v6 = vrot.slane %v2405_v19, %v18853_v62  ;;  %v19764_v49 = vrot.slane %v2406_v27, %v18853_v62  ;;  %v1959_v19 = vpack.i.b16 %v1886_v55, %v24660_v53  ;;  %v24662_v37 = vcombine.low %v19385_v50, %v19391_v38 }
 0x414   : > { %v2439_v28 = vrot.slane %v2425_v52, %v18847_v45  ;;  %v24663_v58 = vcombine.high %v19385_v50, %v19391_v38  ;;  %v2491_v55 = vcombine.high %v1955_v8, %v18844_v41  ;;  %v2498_v10 = vrot.slane %v1955_v8, %v18847_v45 }
 0x415   : > { %v5836_v34 = vrot.slane %v24662_v37, %v18847_v45  ;;  %v2440_v36 = vcombine.high %v1959_v19, %v18844_v41  ;;  %v2447_v42 = vrot.slane %v1959_v19, %v18847_v45  ;;  %v24664_v39 = vshrl.u32 %v24660_v53, 16 }
 0x416   : > { %v5844_v27 = vrot.slane %v24663_v58, %v18847_v45  ;;  %v5845_v19 = vcombine.low %v19412_v46, %v19415_v32  ;;  %v2505_v50 = vrot.slane %v2491_v55, %v18847_v45 }
 0x417   : > { %v1963_v37 = vpack.i.b16 %v1962_v56, %v24664_v39  ;;  %v2454_v52 = vrot.slane %v2440_v36, %v18847_v45  ;;  %v2455_v35 = vcombine.low %v2432_v43, %v2447_v42  ;;  %v2456_v18 = vcombine.high %v2432_v43, %v2447_v42 }
 0x418   : > { %v5853_v15 = vcombine.low %v5836_v34, %v5844_v27 }
 0x419   : > { %v2506_v38 = vcombine.high %v1963_v37, %v18844_v41  ;;  %v2513_v58 = vrot.slane %v1963_v37, %v18847_v45  ;;  %v2463_v51 = vrot.slane %v2455_v35, %v18853_v62  ;;  %v2470_v8 = vrot.slane %v2456_v18, %v18853_v62 }
 0x41a   : > { %v2471_v53 = vcombine.low %v2439_v28, %v2454_v52  ;;  %v2472_v56 = vcombine.high %v2439_v28, %v2454_v52  ;;  %v19815_v42 = vrot.slane %v5853_v15, %v18853_v62  ;;  %v19836_v37 = vrot.slane %v5845_v19, %v18853_v62  ;;  %v1888_v19 = vpop.permute.xlu1 %1887 }
 0x41b   : > { %v2520_v36 = vrot.slane %v2506_v38, %v18847_v45  ;;  %v2521_v39 = vcombine.low %v2498_v10, %v2513_v58  ;;  %v2522_v43 = vcombine.high %v2498_v10, %v2513_v58  ;;  %v3385_v27 = vcombine.low %v2463_v51, %v2470_v8  ;;  %v1864_v38 = vpop.permute.xlu0 %1863 }
 0x41c   : > { %24665 = vst [vmem:[#allocation21_spill] sm:$0xff] %v19815_v42  ;;  %v19818_v46 = vrot.slane %v2471_v53, %v18853_v62  ;;  %v19821_v32 = vrot.slane %v2472_v56, %v18853_v62  ;;  %v15814_v34 = vcombine.high %v2463_v51, %v2470_v8  ;;  %24671 = vst [vmem:[#allocation75_spill] sm:$0xff] %v19836_v37  ;;  %v24676_v56 = vld [vmem:[#allocation24_spill] sm:$0xff] }
 0x41d   : > { %v19824_v35 = vrot.slane %v2521_v39, %v18853_v62  ;;  %v19827_v18 = vrot.slane %v2522_v43, %v18853_v62  ;;  %v2537_v28 = vcombine.low %v2505_v50, %v2520_v36  ;;  %v2538_v55 = vcombine.high %v2505_v50, %v2520_v36 }
 0x41e   : > { %24666 = vst [vmem:[#allocation22_spill] sm:$0xff] %v19821_v32  ;;  %v19830_v10 = vrot.slane %v3385_v27, %v18847_v45  ;;  %v19833_v15 = vrot.slane %v15814_v34, %v18847_v45  ;;  %v24672_v51 = vcombine.low %v19401_v0, %v19404_v57  ;;  %v24673_v36 = vcombine.high %v19401_v0, %v19404_v57 }
 0x41f   : > { %24667 = vst [vmem:[#allocation23_spill] sm:$0xff] %v19824_v35  ;;  %24668 = vst [vmem:[#allocation72_spill] sm:$0xff] %v19827_v18  ;;  %v19843_v58 = vrot.slane %v2537_v28, %v18853_v62  ;;  %v19846_v50 = vrot.slane %v2538_v55, %v18853_v62  ;;  %v24674_v43 = vcombine.low %v19409_v54, %v19420_v33  ;;  %v1970_v0 = vshrl.u32 %v1864_v38, 16 }
 0x420   : > { %24669 = vst [vmem:[#allocation73_spill] sm:$0xff] %v19830_v10  ;;  %24670 = vst [vmem:[#allocation74_spill] sm:$0xff] %v19833_v15  ;;  %v5870_v52 = vrot.slane %v24672_v51, %v18847_v45  ;;  %v5878_v39 = vrot.slane %v24673_v36, %v18847_v45  ;;  %v24675_v34 = vcombine.high %v19409_v54, %v19420_v33  ;;  %v24678_v15 = vshrl.u32 %v24676_v56, 16 }
 0x421   : > { %v5886_v27 = vrot.slane %v24674_v43, %v18847_v45  ;;  %v5861_v51 = vcombine.low %v19836_v37, %v19815_v42  ;;  %v1967_v53 = vpack.i.b16 %v1864_v38, %v24676_v56  ;;  %v24677_v43 = vld [vmem:[#allocation25_spill] sm:$0xff]  ;;  %v1978_v55 = vshrl.u32 %v1888_v19, 16 }
 0x422   : > { %v5894_v28 = vrot.slane %v24675_v34, %v18847_v45  ;;  %v5895_v36 = vcombine.low %v5870_v52, %v5878_v39  ;;  %v1975_v10 = vpack.i.b16 %v1888_v19, %v24677_v43  ;;  %v1971_v54 = vpack.i.b16 %v1970_v0, %v24678_v15 }
 0x423   : > { %v2557_v33 = vcombine.high %v1967_v53, %v18844_v41  ;;  %v2564_v34 = vrot.slane %v1967_v53, %v18847_v45 }
 0x424   : > { %v5903_v8 = vcombine.low %v5886_v27, %v5894_v28  ;;  %v19879_v37 = vrot.slane %v5895_v36, %v18853_v62  ;;  %v2572_v57 = vcombine.high %v1975_v10, %v18844_v41  ;;  %v2579_v52 = vrot.slane %v1975_v10, %v18847_v45 }
 0x425   : > { %v2571_v39 = vrot.slane %v2557_v33, %v18847_v45  ;;  %v2623_v56 = vcombine.high %v1971_v54, %v18844_v41  ;;  %v2630_v15 = vrot.slane %v1971_v54, %v18847_v45  ;;  %v24681_v27 = vshrl.u32 %v24677_v43, 16  ;;  %v1866_v43 = vpop.permute.xlu0 %1865 }
 0x426   : > { %24679 = vst [vmem:[#allocation24_spill] sm:$0xff] %v19879_v37  ;;  %v19882_v38 = vrot.slane %v5903_v8, %v18853_v62  ;;  %v2586_v28 = vrot.slane %v2572_v57, %v18847_v45  ;;  %v2587_v8 = vcombine.low %v2564_v34, %v2579_v52  ;;  %v2588_v0 = vcombine.high %v2564_v34, %v2579_v52 }
 0x427   : > { %v1979_v53 = vpack.i.b16 %v1978_v55, %v24681_v27  ;;  %v6088_v36 = vshrl.u32 %v5861_v51, 16  ;;  %v2637_v42 = vrot.slane %v2623_v56, %v18847_v45 }
 0x428   : > { %24680 = vst [vmem:[#allocation25_spill] sm:$0xff] %v19882_v38  ;;  %v5911_v19 = vcombine.low %v19879_v37, %v19882_v38  ;;  %v2595_v54 = vrot.slane %v2587_v8, %v18853_v62  ;;  %v2602_v55 = vrot.slane %v2588_v0, %v18853_v62  ;;  %v2603_v27 = vcombine.low %v2571_v39, %v2586_v28  ;;  %v24682_v8 = vld [vmem:[#allocation26_spill] sm:$0xff] }
 0x429   : > { %v2638_v10 = vcombine.high %v1979_v53, %v18844_v41  ;;  %v2645_v33 = vrot.slane %v1979_v53, %v18847_v45  ;;  %v2604_v37 = vcombine.high %v2571_v39, %v2586_v28  ;;  %v1983_v0 = vpack.i.b16 %v1866_v43, %v24682_v8 }
 0x42a   : > { %v6087_v18 = vpack.i.b16 %v5911_v19, %v5861_v51  ;;  %v6089_v35 = vshrl.u32 %v5911_v19, 16  ;;  %v3485_v56 = vcombine.low %v2595_v54, %v2602_v55  ;;  %v15818_v32 = vcombine.high %v2595_v54, %v2602_v55 }
 0x42b   : > { %v2652_v57 = vrot.slane %v2638_v10, %v18847_v45  ;;  %v2653_v38 = vcombine.low %v2630_v15, %v2645_v33  ;;  %v2654_v52 = vcombine.high %v2630_v15, %v2645_v33  ;;  %v19902_v53 = vrot.slane %v2603_v27, %v18853_v62 }
 0x42c   : > { %16775 = vmatprep.subr.msk.bf16.mxu1 %vm8320_vm0, %v6087_v18  ;;  %v6090_v34 = vpack.i.b16 %v6089_v35, %v6088_v36  ;;  %v19905_v51 = vrot.slane %v2604_v37, %v18853_v62  ;;  %v1890_v36 = vpop.permute.xlu1 %1889  ;;  %v19921_v37 = vrot.slane %v3485_v56, %v18847_v45  ;;  %v19924_v33 = vrot.slane %v15818_v32, %v18847_v45  ;;  %v24686_v56 = vld [vmem:[#allocation27_spill] sm:$0xff] }
 0x42d   : > { %v2669_v19 = vcombine.low %v2637_v42, %v2652_v57  ;;  %v19912_v28 = vrot.slane %v2653_v38, %v18853_v62  ;;  %v19915_v35 = vrot.slane %v2654_v52, %v18853_v62  ;;  %v2670_v15 = vcombine.high %v2637_v42, %v2652_v57 }
 0x42e   : > { %16783 = vmatprep.subr.msk.bf16.mxu0 %vm8320_vm0, %v6090_v34  ;;  %24685 = vst [vmem:[#allocation77_spill] sm:$0xff] %v19921_v37  ;;  %v8364_v54 = vsel %vm8320_vm0, %v6087_v18, 0  ;;  %v8509_v27 = vsel %vm8320_vm0, %v6090_v34, 0  ;;  %v1986_v57 = vshrl.u32 %v1866_v43, 16  ;;  %v2689_v52 = vcombine.high %v1983_v0, %v18844_v41 }
 0x42f   : > { %24683 = vst [vmem:[#allocation26_spill] sm:$0xff] %v19912_v28  ;;  %24684 = vst [vmem:[#allocation76_spill] sm:$0xff] %v19915_v35  ;;  %v19918_v10 = vrot.slane %v2669_v19, %v18853_v62  ;;  %v19928_v55 = vrot.slane %v2670_v15, %v18853_v62  ;;  %16398 = vmatpush3.bf16.xpose.msra.mxu1 %v8364_v54  ;;  %16430 = vmatpush3.bf16.xpose.msra.mxu0 %v8509_v27  ;;  %v1994_v54 = vshrl.u32 %v1890_v36, 16 }
 0x430   : > { %v2696_v32 = vrot.slane %v1983_v0, %v18847_v45  ;;  %v1991_v18 = vpack.i.b16 %v1890_v36, %v24686_v56  ;;  %v24687_v34 = vshrl.u32 %v24682_v8, 16  ;;  %v2703_v43 = vrot.slane %v2689_v52, %v18847_v45 }
 0x431   : > { %v24688_v39 = vshrl.u32 %v24686_v56, 16  ;;  %v24689_v15 = vcombine.low %v19481_v17, %v19484_v60  ;;  %v24690_v36 = vcombine.high %v19481_v17, %v19484_v60  ;;  %v24691_v60 = vcombine.low %v19489_v47, %v19492_v31 }
 0x432   : > { %v1987_v27 = vpack.i.b16 %v1986_v57, %v24687_v34  ;;  %v2704_v38 = vcombine.high %v1991_v18, %v18844_v41  ;;  %v2711_v0 = vrot.slane %v1991_v18, %v18847_v45  ;;  %v5945_v57 = vcombine.low %v19507_v25, %v19510_v13 }
 0x433   : > { %v1995_v37 = vpack.i.b16 %v1994_v54, %v24688_v39  ;;  %v5936_v19 = vrot.slane %v24689_v15, %v18847_v45  ;;  %v5944_v8 = vrot.slane %v24690_v36, %v18847_v45  ;;  %v5970_v17 = vrot.slane %v24691_v60, %v18847_v45 }
 0x434   : > { %v2755_v52 = vcombine.high %v1987_v27, %v18844_v41  ;;  %v2762_v18 = vrot.slane %v1987_v27, %v18847_v45  ;;  %v2718_v56 = vrot.slane %v2704_v38, %v18847_v45  ;;  %v2719_v39 = vcombine.low %v2696_v32, %v2711_v0 }
 0x435   : > { %v2720_v54 = vcombine.high %v2696_v32, %v2711_v0  ;;  %v2770_v34 = vcombine.high %v1995_v37, %v18844_v41  ;;  %v2777_v15 = vrot.slane %v1995_v37, %v18847_v45  ;;  %v5953_v28 = vcombine.low %v5936_v19, %v5944_v8 }
 0x436   : > { %v2769_v36 = vrot.slane %v2755_v52, %v18847_v45  ;;  %v2727_v25 = vrot.slane %v2719_v39, %v18853_v62  ;;  %v2735_v13 = vcombine.low %v2703_v43, %v2718_v56  ;;  %v2736_v42 = vcombine.high %v2703_v43, %v2718_v56 }
 0x437   : > { %v2734_v27 = vrot.slane %v2720_v54, %v18853_v62  ;;  %v2784_v38 = vrot.slane %v2770_v34, %v18847_v45  ;;  %v2785_v32 = vcombine.low %v2762_v18, %v2777_v15  ;;  %v2786_v0 = vcombine.high %v2762_v18, %v2777_v15  ;;  %v24703_v34 = vld [vmem:[#allocation29_spill] sm:$0xff] }
 0x438   : > { %v19975_v35 = vrot.slane %v2735_v13, %v18853_v62  ;;  %v19978_v37 = vrot.slane %v2736_v42, %v18853_v62  ;;  %v24692_v52 = vcombine.high %v19489_v47, %v19492_v31  ;;  %v19993_v19 = vrot.slane %v5945_v57, %v18853_v62  ;;  %v1892_v13 = vpop.permute.xlu1 %1891 }
 0x439   : > { %v19985_v43 = vrot.slane %v2785_v32, %v18853_v62  ;;  %v19988_v56 = vrot.slane %v2786_v0, %v18853_v62  ;;  %v2801_v54 = vcombine.low %v2769_v36, %v2784_v38  ;;  %v2802_v18 = vcombine.high %v2769_v36, %v2784_v38  ;;  %v1868_v36 = vpop.permute.xlu0 %1867 }
 0x43a   : > { %v5978_v39 = vrot.slane %v24692_v52, %v18847_v45  ;;  %v3585_v15 = vcombine.low %v2727_v25, %v2734_v27  ;;  %v15822_v42 = vcombine.high %v2727_v25, %v2734_v27  ;;  %24695 = vst [vmem:[#allocation79_spill] sm:$0xff] %v19993_v19  ;;  %v20010_v27 = vrot.slane %v5953_v28, %v18853_v62  ;;  %v24702_v25 = vld [vmem:[#allocation28_spill] sm:$0xff] }
 0x43b   : > { %24693 = vst [vmem:[#allocation27_spill] sm:$0xff] %v19985_v43  ;;  %24694 = vst [vmem:[#allocation78_spill] sm:$0xff] %v19988_v56  ;;  %v19996_v8 = vrot.slane %v2801_v54, %v18853_v62  ;;  %v19999_v47 = vrot.slane %v2802_v18, %v18853_v62  ;;  %v24699_v38 = vcombine.low %v19501_v21, %v19504_v26  ;;  %v2002_v31 = vshrl.u32 %v1868_v36, 16 }
 0x43c   : > { %24698 = vst [vmem:[#allocation82_spill] sm:$0xff] %v20010_v27  ;;  %v20017_v0 = vrot.slane %v3585_v15, %v18847_v45  ;;  %v20020_v52 = vrot.slane %v15822_v42, %v18847_v45  ;;  %v24701_v54 = vcombine.high %v19501_v21, %v19504_v26  ;;  %v5995_v57 = vcombine.low %v5970_v17, %v5978_v39 }
 0x43d   : > { %24696 = vst [vmem:[#allocation80_spill] sm:$0xff] %v19996_v8  ;;  %24697 = vst [vmem:[#allocation81_spill] sm:$0xff] %v19999_v47  ;;  %v5986_v32 = vrot.slane %v24699_v38, %v18847_v45  ;;  %v5961_v28 = vcombine.low %v19993_v19, %v20010_v27  ;;  %v1999_v60 = vpack.i.b16 %v1868_v36, %v24702_v25  ;;  %v2010_v43 = vshrl.u32 %v1892_v13, 16 }
 0x43e   : > { %24700 = vst [vmem:[#allocation83_spill] sm:$0xff] %v20017_v0  ;;  %v5994_v18 = vrot.slane %v24701_v54, %v18847_v45  ;;  %v2007_v38 = vpack.i.b16 %v1892_v13, %v24703_v34  ;;  %v20035_v21 = vrot.slane %v5995_v57, %v18853_v62  ;;  %v24705_v26 = vshrl.u32 %v24702_v25, 16 }
 0x43f   : > { %v2821_v39 = vcombine.high %v1999_v60, %v18844_v41  ;;  %v2828_v36 = vrot.slane %v1999_v60, %v18847_v45  ;;  %v24707_v15 = vshrl.u32 %v24703_v34, 16  ;;  %v6100_v25 = vshrl.u32 %v5961_v28, 16 }
 0x440   : > { %v6003_v56 = vcombine.low %v5986_v32, %v5994_v18  ;;  %24704 = vst [vmem:[#allocation28_spill] sm:$0xff] %v20035_v21  ;;  %v2003_v17 = vpack.i.b16 %v2002_v31, %v24705_v26  ;;  %v2836_v42 = vcombine.high %v2007_v38, %v18844_v41  ;;  %v2843_v13 = vrot.slane %v2007_v38, %v18847_v45 }
 0x441   : > { %v2011_v19 = vpack.i.b16 %v2010_v43, %v24707_v15  ;;  %v2835_v57 = vrot.slane %v2821_v39, %v18847_v45  ;;  %v3085_v15 = vcombine.low %v19588_v63, %v19595_v5 }
 0x442   : > { %v20042_v54 = vrot.slane %v6003_v56, %v18853_v62  ;;  %v2887_v32 = vcombine.high %v2003_v17, %v18844_v41  ;;  %v2894_v31 = vrot.slane %v2003_v17, %v18847_v45  ;;  %v2850_v56 = vrot.slane %v2836_v42, %v18847_v45 }
 0x443   : > { %v2851_v18 = vcombine.low %v2828_v36, %v2843_v13  ;;  %v2852_v26 = vcombine.high %v2828_v36, %v2843_v13  ;;  %v2902_v34 = vcombine.high %v2011_v19, %v18844_v41  ;;  %v2909_v38 = vrot.slane %v2011_v19, %v18847_v45 }
 0x444   : > { %24706 = vst [vmem:[#allocation29_spill] sm:$0xff] %v20042_v54  ;;  %v6011_v60 = vcombine.low %v20035_v21, %v20042_v54  ;;  %v2901_v43 = vrot.slane %v2887_v32, %v18847_v45  ;;  %v2867_v21 = vcombine.low %v2835_v57, %v2850_v56  ;;  %v2868_v54 = vcombine.high %v2835_v57, %v2850_v56 }
 0x445   : > { %v2859_v17 = vrot.slane %v2851_v18, %v18853_v62  ;;  %v2866_v47 = vrot.slane %v2852_v26, %v18853_v62  ;;  %v2916_v42 = vrot.slane %v2902_v34, %v18847_v45  ;;  %v2917_v36 = vcombine.low %v2894_v31, %v2909_v38 }
 0x446   : > { %v6099_v39 = vpack.i.b16 %v6011_v60, %v5961_v28  ;;  %v6101_v27 = vshrl.u32 %v6011_v60, 16  ;;  %v2918_v32 = vcombine.high %v2894_v31, %v2909_v38  ;;  %v20064_v0 = vrot.slane %v2867_v21, %v18853_v62 }
 0x447   : > { %v3685_v8 = vcombine.low %v2859_v17, %v2866_v47  ;;  %v15826_v19 = vcombine.high %v2859_v17, %v2866_v47  ;;  %v20067_v28 = vrot.slane %v2868_v54, %v18853_v62  ;;  %v2933_v60 = vcombine.low %v2901_v43, %v2916_v42 }
 0x448   : > { %16776 = vmatprep.subr.msk.bf16.mxu1 %vm8320_vm0, %v6099_v39  ;;  %v6102_v13 = vpack.i.b16 %v6101_v27, %v6100_v25  ;;  %v24708_v57 = vcombine.low %v19579_v29, %v19598_v20  ;;  %v20075_v18 = vrot.slane %v2917_v36, %v18853_v62  ;;  %v20078_v27 = vrot.slane %v2918_v32, %v18853_v62  ;;  %v24712_v32 = vld [vmem:[#allocation51_spill] sm:$0xff] }
 0x449   : > { %v2934_v47 = vcombine.high %v2901_v43, %v2916_v42  ;;  %v24711_v21 = vcombine.high %v19579_v29, %v19598_v20  ;;  %v20085_v31 = vrot.slane %v2933_v60, %v18853_v62  ;;  %v20088_v25 = vrot.slane %v3685_v8, %v18847_v45  ;;  %v24713_v29 = vld [vmem:[#allocation30_spill] sm:$0xff] }
 0x44a   : > { %v2149_v56 = vrot.slane %v24708_v57, %v18853_v62  ;;  %16784 = vmatprep.subr.msk.bf16.mxu0 %vm8320_vm0, %v6102_v13  ;;  %24709 = vst [vmem:[#allocation84_spill] sm:$0xff] %v20075_v18  ;;  %24710 = vst [vmem:[#allocation85_spill] sm:$0xff] %v20078_v27  ;;  %v20091_v26 = vrot.slane %v15826_v19, %v18847_v45  ;;  %v8367_v34 = vsel %vm8320_vm0, %v6099_v39, 0  ;;  %v1894_v57 = vpop.permute.xlu1 %1893 }
 0x44b   : > { %v2156_v54 = vrot.slane %v24711_v21, %v18853_v62  ;;  %v20095_v38 = vrot.slane %v2934_v47, %v18853_v62  ;;  %16400 = vmatpush3.bf16.xpose.msra.mxu1 %v8367_v34  ;;  %v3092_v20 = vrot.slane %v3085_v15, %v18847_v45  ;;  %v15802_v8 = vcombine.high %v19588_v63, %v19595_v5  ;;  %v1870_v63 = vpop.permute.xlu0 %1869 }
 0x44c   : > { %v3101_v17 = vcombine.low %v19602_v23, %v19605_v7  ;;  %v15803_v39 = vcombine.high %v19602_v23, %v19605_v7  ;;  %v3135_v42 = vcombine.low %v19683_v3, %v19686_v14  ;;  %v15804_v15 = vcombine.high %v19683_v3, %v19686_v14 }
 0x44d   : > { %v3151_v19 = vcombine.low %v2149_v56, %v2156_v54  ;;  %v3100_v5 = vrot.slane %v15802_v8, %v18847_v45  ;;  %v15805_v34 = vcombine.high %v2149_v56, %v2156_v54  ;;  %v20124_v36 = vpack.i.b16 %v19178_v2, %v24712_v32 }
 0x44e   : > { %v3108_v60 = vrot.slane %v3101_v17, %v18847_v45  ;;  %v3116_v23 = vrot.slane %v15803_v39, %v18847_v45  ;;  %v3142_v7 = vrot.slane %v3135_v42, %v18847_v45  ;;  %v3150_v47 = vrot.slane %v15804_v15, %v18847_v45  ;;  %v24714_v15 = vld [vmem:[#allocation31_spill] sm:$0xff] }
 0x44f   : > { %v3158_v21 = vrot.slane %v3151_v19, %v18847_v45  ;;  %v3117_v3 = vcombine.low %v3092_v20, %v3100_v5  ;;  %v2015_v8 = vpack.i.b16 %v1870_v63, %v24713_v29  ;;  %v2018_v43 = vshrl.u32 %v1870_v63, 16  ;;  %16785 = vmatprep.subr.msk.bf16.mxu1 %vm8320_vm0, %v20124_v36 }
 0x450   : > { %v3125_v14 = vcombine.low %v3108_v60, %v3116_v23  ;;  %v3166_v17 = vrot.slane %v15805_v34, %v18847_v45  ;;  %v3167_v39 = vcombine.low %v3142_v7, %v3150_v47  ;;  %v8512_v42 = vsel %vm8320_vm0, %v6102_v13, 0 }
 0x451   : > { %v2023_v19 = vpack.i.b16 %v1894_v57, %v24714_v15  ;;  %v3124_v56 = vrot.slane %v3117_v3, %v18853_v62  ;;  %v24715_v20 = vshrl.u32 %v24713_v29, 16  ;;  %v2953_v60 = vcombine.high %v2015_v8, %v18844_v41  ;;  %16432 = vmatpush3.bf16.xpose.msra.mxu0 %v8512_v42 }
 0x452   : > { %v3132_v54 = vrot.slane %v3125_v14, %v18853_v62  ;;  %v3174_v63 = vrot.slane %v3167_v39, %v18853_v62  ;;  %v3175_v23 = vcombine.low %v3158_v21, %v3166_v17  ;;  %v2960_v7 = vrot.slane %v2015_v8, %v18847_v45 }
 0x453   : > { %v2019_v5 = vpack.i.b16 %v2018_v43, %v24715_v20  ;;  %v2026_v47 = vshrl.u32 %v1894_v57, 16  ;;  %v2967_v27 = vrot.slane %v2953_v60, %v18847_v45  ;;  %v24717_v29 = vshrl.u32 %v24714_v15, 16 }
 0x454   : > { %v3133_v34 = vcombine.low %v3124_v56, %v3132_v54  ;;  %v20139_v13 = vcombine.high %v3124_v56, %v3132_v54  ;;  %v3182_v14 = vrot.slane %v3175_v23, %v18853_v62  ;;  %v2968_v39 = vcombine.high %v2023_v19, %v18844_v41 }
 0x455   : > { %v3019_v3 = vcombine.high %v2019_v5, %v18844_v41  ;;  %v3026_v43 = vrot.slane %v2019_v5, %v18847_v45  ;;  %v2027_v42 = vpack.i.b16 %v2026_v47, %v24717_v29  ;;  %v2975_v57 = vrot.slane %v2023_v19, %v18847_v45 }
 0x456   : > { %24716 = vst [vmem:[#allocation51_spill] sm:$0xff] %v20139_v13  ;;  %v3888_v21 = vshrl.u32 %v3133_v34, 16  ;;  %v6022_v17 = vshrl.u32 %v24712_v32, 16  ;;  %v3183_v56 = vcombine.low %v3174_v63, %v3182_v14  ;;  %v20151_v54 = vcombine.high %v3174_v63, %v3182_v14 }
 0x457   : > { %v3033_v8 = vrot.slane %v3019_v3, %v18847_v45  ;;  %v2982_v20 = vrot.slane %v2968_v39, %v18847_v45  ;;  %v3034_v60 = vcombine.high %v2027_v42, %v18844_v41  ;;  %v2983_v5 = vcombine.low %v2960_v7, %v2975_v57 }
 0x458   : > { %24718 = vst [vmem:[#allocation30_spill] sm:$0xff] %v20151_v54  ;;  %v2984_v23 = vcombine.high %v2960_v7, %v2975_v57  ;;  %v3041_v15 = vrot.slane %v2027_v42, %v18847_v45  ;;  %v6023_v47 = vshrl.u32 %v19178_v2, 16  ;;  %v3887_v29 = vpack.i.b16 %v3183_v56, %v3133_v34 }
 0x459   : > { %v3889_v13 = vshrl.u32 %v3183_v56, 16  ;;  %v2999_v3 = vcombine.low %v2967_v27, %v2982_v20  ;;  %v3000_v18 = vcombine.high %v2967_v27, %v2982_v20  ;;  %v2991_v19 = vrot.slane %v2983_v5, %v18853_v62  ;;  %v6118_v20 = vpop.permute.xlu0 %6117 }
 0x45a   : > { %v2998_v32 = vrot.slane %v2984_v23, %v18853_v62  ;;  %v3048_v63 = vrot.slane %v3034_v60, %v18847_v45  ;;  %v3049_v14 = vcombine.low %v3026_v43, %v3041_v15  ;;  %16401 = vmatprep.mubr.msk.bf16.mxu1 %vm8320_vm0, %v3887_v29  ;;  %v3050_v2 = vcombine.high %v3026_v43, %v3041_v15 }
 0x45b   : > { %v3890_v39 = vpack.i.b16 %v3889_v13, %v3888_v21  ;;  %v20162_v7 = vrot.slane %v2999_v3, %v18853_v62  ;;  %v20165_v42 = vrot.slane %v3000_v18, %v18853_v62  ;;  %v20186_v23 = vpack.i.b16 %v6023_v47, %v6022_v17 }
 0x45c   : > { %v20168_v34 = vrot.slane %v3049_v14, %v18853_v62  ;;  %v3065_v27 = vcombine.low %v3033_v8, %v3048_v63  ;;  %v3066_v57 = vcombine.high %v3033_v8, %v3048_v63  ;;  %v3785_v56 = vcombine.low %v2991_v19, %v2998_v32  ;;  %v6142_v14 = vpop.permute.xlu1 %6141 }
 0x45d   : > { %16433 = vmatprep.mubr.msk.bf16.mxu0 %vm8320_vm0, %v3890_v39  ;;  %v20176_v21 = vrot.slane %v3050_v2, %v18853_v62  ;;  %v15830_v18 = vcombine.high %v2991_v19, %v2998_v32  ;;  %v24719_v19 = vld [vmem:[#allocation32_spill] sm:$0xff]  ;;  %16793 = vmatprep.subr.msk.bf16.mxu0 %vm8320_vm0, %v20186_v23  ;;  %v6162_v17 = vshrl.u32 %v6118_v20, 16  ;;  %v24720_v47 = vcombine.low %v19671_v11, %v19674_v24 }
 0x45e   : > { %v20179_v43 = vrot.slane %v3065_v27, %v18853_v62  ;;  %v20182_v5 = vrot.slane %v3066_v57, %v18853_v62  ;;  %v20189_v15 = vrot.slane %v3785_v56, %v18847_v45  ;;  %v6159_v32 = vpack.i.b16 %v6118_v20, %v24719_v19 }
 0x45f   : > { %v20192_v29 = vrot.slane %v15830_v18, %v18847_v45  ;;  %v3208_v39 = vrot.slane %v24720_v47, %v18847_v45  ;;  %v24721_v57 = vcombine.high %v19671_v11, %v19674_v24  ;;  %v3217_v18 = vcombine.low %v19689_v61, %v19692_v1 }
 0x460   : > { %v6285_v27 = vcombine.high %v6159_v32, %v18844_v41  ;;  %v24722_v20 = vshrl.u32 %v24719_v19, 16  ;;  %v24723_v47 = vcombine.low %v19677_v59, %v19680_v30  ;;  %v24724_v2 = vcombine.high %v19677_v59, %v19680_v30 }
 0x461   : > { %v3216_v56 = vrot.slane %v24721_v57, %v18847_v45  ;;  %v24725_v11 = vcombine.low %v19695_v4, %v19698_v12  ;;  %v6292_v1 = vrot.slane %v6159_v32, %v18847_v45  ;;  %v3224_v59 = vrot.slane %v3217_v18, %v18853_v62 }
 0x462   : > { %v6163_v63 = vpack.i.b16 %v6162_v17, %v24722_v20  ;;  %v3242_v3 = vrot.slane %v24723_v47, %v18847_v45  ;;  %v3250_v8 = vrot.slane %v24724_v2, %v18847_v45  ;;  %v24726_v17 = vcombine.high %v19695_v4, %v19698_v12  ;;  %v24727_v2 = vld [vmem:[#allocation33_spill] sm:$0xff] }
 0x463   : > { %v3258_v24 = vrot.slane %v24725_v11, %v18847_v45  ;;  %v3225_v19 = vcombine.low %v3208_v39, %v3216_v56  ;;  %v6299_v20 = vrot.slane %v6285_v27, %v18847_v45  ;;  %v6167_v47 = vpack.i.b16 %v6142_v14, %v24727_v2 }
 0x464   : > { %v3266_v57 = vrot.slane %v24726_v17, %v18847_v45  ;;  %v3267_v30 = vcombine.low %v3242_v3, %v3250_v8  ;;  %v6351_v11 = vcombine.high %v6163_v63, %v18844_v41  ;;  %v6170_v60 = vshrl.u32 %v6142_v14, 16 }
 0x465   : > { %v3232_v13 = vrot.slane %v3225_v19, %v18853_v62  ;;  %v6358_v32 = vrot.slane %v6163_v63, %v18847_v45  ;;  %v6300_v39 = vcombine.high %v6167_v47, %v18844_v41  ;;  %v6307_v4 = vrot.slane %v6167_v47, %v18847_v45 }
 0x466   : > { %v3275_v61 = vcombine.low %v3258_v24, %v3266_v57  ;;  %v24728_v12 = vcombine.low %v19743_v9, %v19746_v16  ;;  %v3274_v56 = vrot.slane %v3267_v30, %v18853_v62  ;;  %v24730_v14 = vshrl.u32 %v24727_v2, 16 }
 0x467   : > { %v3233_v8 = vcombine.low %v3224_v59, %v3232_v13  ;;  %v20249_v3 = vcombine.high %v3224_v59, %v3232_v13  ;;  %v6314_v63 = vrot.slane %v6300_v39, %v18847_v45  ;;  %v6315_v19 = vcombine.low %v6292_v1, %v6307_v4 }
 0x468   : > { %v3308_v27 = vrot.slane %v24728_v12, %v18847_v45  ;;  %v3282_v18 = vrot.slane %v3275_v61, %v18853_v62  ;;  %v6171_v24 = vpack.i.b16 %v6170_v60, %v24730_v14  ;;  %v6316_v17 = vcombine.high %v6292_v1, %v6307_v4 }
 0x469   : > { %24729 = vst [vmem:[#allocation31_spill] sm:$0xff] %v20249_v3  ;;  %v6365_v57 = vrot.slane %v6351_v11, %v18847_v45  ;;  %v24732_v13 = vcombine.high %v19743_v9, %v19746_v16  ;;  %v6323_v30 = vrot.slane %v6315_v19, %v18853_v62  ;;  %v6331_v2 = vcombine.low %v6299_v20, %v6314_v63 }
 0x46a   : > { %v3283_v47 = vcombine.low %v3274_v56, %v3282_v18  ;;  %v20257_v54 = vcombine.high %v3274_v56, %v3282_v18  ;;  %v6330_v61 = vrot.slane %v6316_v17, %v18853_v62  ;;  %v6332_v60 = vcombine.high %v6299_v20, %v6314_v63  ;;  %v6120_v18 = vpop.permute.xlu1 %6119 }
 0x46b   : > { %v3316_v59 = vrot.slane %v24732_v13, %v18847_v45  ;;  %v3900_v39 = vshrl.u32 %v3233_v8, 16  ;;  %v20268_v11 = vrot.slane %v6331_v2, %v18853_v62  ;;  %v6366_v9 = vcombine.high %v6171_v24, %v18844_v41 }
 0x46c   : > { %24731 = vst [vmem:[#allocation32_spill] sm:$0xff] %v20257_v54  ;;  %v3899_v12 = vpack.i.b16 %v3283_v47, %v3233_v8  ;;  %v3901_v14 = vshrl.u32 %v3283_v47, 16  ;;  %v20271_v4 = vrot.slane %v6332_v60, %v18853_v62  ;;  %v6373_v16 = vrot.slane %v6171_v24, %v18847_v45 }
 0x46d   : > { %v7341_v20 = vcombine.low %v6323_v30, %v6330_v61  ;;  %v15866_v8 = vcombine.high %v6323_v30, %v6330_v61  ;;  %v6380_v63 = vrot.slane %v6366_v9, %v18847_v45  ;;  %v3317_v47 = vcombine.low %v19777_v40, %v19780_v48 }
 0x46e   : > { %v3902_v56 = vpack.i.b16 %v3901_v14, %v3900_v39  ;;  %16402 = vmatmul.mubr.msk.bf16.vlgmr.msra.gmra.mrb[0].mxu1 %vm8320_vm0, %v3899_v12  ;;  %v6381_v19 = vcombine.low %v6358_v32, %v6373_v16  ;;  %v6382_v17 = vcombine.high %v6358_v32, %v6373_v16  ;;  %v3325_v61 = vcombine.low %v3308_v27, %v3316_v59 }
 0x46f   : > { %v20281_v13 = vrot.slane %v7341_v20, %v18847_v45  ;;  %v20284_v2 = vrot.slane %v15866_v8, %v18847_v45  ;;  %v6397_v40 = vcombine.low %v6365_v57, %v6380_v63  ;;  %v6398_v48 = vcombine.high %v6365_v57, %v6380_v63  ;;  %v6122_v8 = vpop.permute.xlu0 %6121 }
 0x470   : > { %16434 = vmatmul.mubr.msk.bf16.vlgmr.msra.gmra.mrb[96].mxu0 %vm8320_vm0, %v3902_v56  ;;  %v20292_v30 = vrot.slane %v6381_v19, %v18853_v62  ;;  %v20295_v32 = vrot.slane %v6382_v17, %v18853_v62  ;;  %v24734_v12 = vcombine.low %v19751_v22, %v19754_v44  ;;  %v24735_v14 = vcombine.high %v19751_v22, %v19754_v44 }
 0x471   : > { %v24736_v16 = vcombine.low %v19761_v6, %v19764_v49  ;;  %v20310_v20 = vrot.slane %v6397_v40, %v18853_v62  ;;  %v20313_v27 = vrot.slane %v6398_v48, %v18853_v62  ;;  %v20318_v59 = vrot.slane %v3317_v47, %v18853_v62  ;;  %v24742_v48 = vld [vmem:[#allocation53_spill] sm:$0xff]  ;;  %v24749_v47 = vld [vmem:[#allocation34_spill] sm:$0xff] }
 0x472   : > { %24733 = vst [vmem:[#allocation33_spill] sm:$0xff] %v20295_v32  ;;  %v3342_v39 = vrot.slane %v24734_v12, %v18847_v45  ;;  %v3350_v9 = vrot.slane %v24735_v14, %v18847_v45  ;;  %v20321_v22 = vrot.slane %v3325_v61, %v18853_v62  ;;  %v24741_v44 = vcombine.high %v19761_v6, %v19764_v49  ;;  %v24743_v12 = vld [vmem:[#allocation52_spill] sm:$0xff]  ;;  %v24744_v14 = vld [vmem:[#allocation55_spill] sm:$0xff] }
 0x473   : > { %v3358_v56 = vrot.slane %v24736_v16, %v18847_v45  ;;  %24737 = vst [vmem:[#allocation86_spill] sm:$0xff] %v20310_v20  ;;  %24738 = vst [vmem:[#allocation87_spill] sm:$0xff] %v20313_v27  ;;  %v8636_v17 = vsel %vm8320_vm0, %v20124_v36, 0  ;;  %v5362_v61 = vcombine.high %v24743_v12, %v24742_v48  ;;  %v24745_v16 = vld [vmem:[#allocation54_spill] sm:$0xff]  ;;  %v6194_v12 = vshrl.u32 %v6122_v8, 16  ;;  %v6126_v57 = vpop.permute.xlu0 %6125 }
 0x474   : > { %24739 = vst [vmem:[#allocation88_spill] sm:$0xff] %v20318_v59  ;;  %24740 = vst [vmem:[#allocation89_spill] sm:$0xff] %v20321_v22  ;;  %v3366_v63 = vrot.slane %v24741_v44, %v18847_v45  ;;  %v3367_v19 = vcombine.low %v3342_v39, %v3350_v9  ;;  %16450 = vmatpush3.bf16.xpose.msra.mxu1 %v8636_v17  ;;  %v5412_v1 = vcombine.high %v24745_v16, %v24744_v14  ;;  %v24747_v17 = vld [vmem:[#allocation36_spill] sm:$0xff] }
 0x475   : > { %v3333_v49 = vcombine.low %v20318_v59, %v20321_v22  ;;  %v8781_v39 = vsel %vm8320_vm0, %v20186_v23, 0  ;;  %v6191_v48 = vpack.i.b16 %v6122_v8, %v24747_v17  ;;  %v6034_v16 = vshrl.u32 %v5362_v61, 16 }
 0x476   : > { %v3375_v36 = vcombine.low %v3358_v56, %v3366_v63  ;;  %v20344_v9 = vrot.slane %v3367_v19, %v18853_v62  ;;  %v20346_v44 = vpack.i.b16 %v5412_v1, %v5362_v61  ;;  %16482 = vmatpush3.bf16.xpose.msra.mxu0 %v8781_v39  ;;  %v6035_v6 = vshrl.u32 %v5412_v1, 16 }
 0x477   : > { %v6175_v40 = vpack.i.b16 %v6120_v18, %v24749_v47  ;;  %v3912_v23 = vshrl.u32 %v3333_v49, 16  ;;  %v24750_v56 = vshrl.u32 %v24747_v17, 16  ;;  %v6549_v19 = vcombine.high %v6191_v48, %v18844_v41 }
 0x478   : > { %24746 = vst [vmem:[#allocation53_spill] sm:$0xff] %v20344_v9  ;;  %v20350_v14 = vrot.slane %v3375_v36, %v18853_v62  ;;  %16786 = vmatprep.subr.msk.bf16.mxu1 %vm8320_vm0, %v20346_v44  ;;  %v6178_v39 = vshrl.u32 %v6120_v18, 16  ;;  %v20361_v36 = vrot.slane %v6191_v48, %v18847_v45  ;;  %v20363_v1 = vpack.i.b16 %v6035_v6, %v6034_v16  ;;  %v24752_v6 = vld [vmem:[#allocation40_spill] sm:$0xff] }
 0x479   : > { %v6195_v63 = vpack.i.b16 %v6194_v12, %v24750_v56  ;;  %v6417_v61 = vcombine.high %v6175_v40, %v18844_v41  ;;  %v20367_v60 = vrot.slane %v6549_v19, %v18847_v45  ;;  %v24751_v12 = vshrl.u32 %v24749_v47, 16 }
 0x47a   : > { %24748 = vst [vmem:[#allocation52_spill] sm:$0xff] %v20350_v14  ;;  %v3383_v8 = vcombine.low %v20344_v9, %v20350_v14  ;;  %v6424_v18 = vrot.slane %v6175_v40, %v18847_v45  ;;  %16794 = vmatprep.subr.msk.bf16.mxu0 %vm8320_vm0, %v20363_v1  ;;  %v6223_v48 = vpack.i.b16 %v6126_v57, %v24752_v6  ;;  %v6144_v14 = vpop.permute.xlu1 %6143 }
 0x47b   : > { %v6615_v17 = vcombine.high %v6195_v63, %v18844_v41  ;;  %v6179_v56 = vpack.i.b16 %v6178_v39, %v24751_v12  ;;  %v20374_v59 = vrot.slane %v6195_v63, %v18847_v45  ;;  %v6431_v19 = vrot.slane %v6417_v61, %v18847_v45 }
 0x47c   : > { %v3911_v24 = vpack.i.b16 %v3383_v8, %v3333_v49  ;;  %v3913_v54 = vshrl.u32 %v3383_v8, 16  ;;  %v6226_v39 = vshrl.u32 %v6126_v57, 16  ;;  %v6813_v63 = vcombine.high %v6223_v48, %v18844_v41  ;;  %v24753_v8 = vld [vmem:[#allocation22_spill] sm:$0xff] }
 0x47d   : > { %v20380_v16 = vrot.slane %v6615_v17, %v18847_v45  ;;  %v6483_v47 = vcombine.high %v6179_v56, %v18844_v41  ;;  %v6490_v49 = vrot.slane %v6179_v56, %v18847_v45  ;;  %v24754_v12 = vcombine.low %v19818_v46, %v24753_v8  ;;  %v24757_v57 = vld [vmem:[#allocation74_spill] sm:$0xff] }
 0x47e   : > { %16405 = vmatprep.mubr.msk.bf16.mxu1 %vm8320_vm0, %v3911_v24  ;;  %v3914_v40 = vpack.i.b16 %v3913_v54, %v3912_v23  ;;  %v24755_v17 = vshrl.u32 %v24752_v6, 16  ;;  %v20394_v61 = vrot.slane %v6223_v48, %v18847_v45  ;;  %v24756_v24 = vcombine.high %v19818_v46, %v24753_v8  ;;  %v24758_v23 = vld [vmem:[#allocation73_spill] sm:$0xff]  ;;  %v24760_v6 = vld [vmem:[#allocation72_spill] sm:$0xff] }
 0x47f   : > { %v3408_v22 = vrot.slane %v24754_v12, %v18847_v45  ;;  %v3417_v56 = vcombine.low %v24758_v23, %v24757_v57  ;;  %v6497_v27 = vrot.slane %v6483_v47, %v18847_v45  ;;  %v24759_v12 = vld [vmem:[#allocation23_spill] sm:$0xff]  ;;  %v24763_v46 = vcombine.low %v19843_v58, %v19846_v50 }
 0x480   : > { %v6227_v9 = vpack.i.b16 %v6226_v39, %v24755_v17  ;;  %v3416_v54 = vrot.slane %v24756_v24, %v18847_v45  ;;  %16437 = vmatprep.mubr.msk.bf16.mxu0 %vm8320_vm0, %v3914_v40  ;;  %v24761_v39 = vcombine.low %v24759_v12, %v24760_v6  ;;  %v24762_v48 = vcombine.high %v24759_v12, %v24760_v6 }
 0x481   : > { %v3458_v8 = vrot.slane %v24763_v46, %v18847_v45  ;;  %v20417_v24 = vrot.slane %v6813_v63, %v18847_v45  ;;  %v24764_v23 = vcombine.high %v19843_v58, %v19846_v50  ;;  %v6186_v3 = vshrl.u32 %v6144_v14, 16 }
 0x482   : > { %v3442_v17 = vrot.slane %v24761_v39, %v18847_v45  ;;  %v3450_v20 = vrot.slane %v24762_v48, %v18847_v45  ;;  %v6879_v47 = vcombine.high %v6227_v9, %v18844_v41  ;;  %v20421_v40 = vrot.slane %v6227_v9, %v18847_v45  ;;  %v24765_v39 = vld [vmem:[#allocation35_spill] sm:$0xff] }
 0x483   : > { %v3425_v57 = vcombine.low %v3408_v22, %v3416_v54  ;;  %v3466_v12 = vrot.slane %v24764_v23, %v18847_v45  ;;  %v6183_v48 = vpack.i.b16 %v6144_v14, %v24765_v39  ;;  %v20429_v46 = vrot.slane %v3417_v56, %v18853_v62 }
 0x484   : > { %v3467_v6 = vcombine.low %v3442_v17, %v3450_v20  ;;  %v24768_v9 = vcombine.low %v19902_v53, %v19905_v51  ;;  %v24769_v58 = vcombine.high %v19902_v53, %v19905_v51  ;;  %v20443_v20 = vrot.slane %v6879_v47, %v18847_v45 }
 0x485   : > { %24766 = vst [vmem:[#allocation55_spill] sm:$0xff] %v20429_v46  ;;  %v20432_v63 = vrot.slane %v3425_v57, %v18853_v62  ;;  %v3475_v14 = vcombine.low %v3458_v8, %v3466_v12  ;;  %v24770_v54 = vshrl.u32 %v24765_v39, 16  ;;  %v6432_v17 = vcombine.high %v6183_v48, %v18844_v41  ;;  %v24773_v39 = vld [vmem:[#allocation77_spill] sm:$0xff] }
 0x486   : > { %v3508_v22 = vrot.slane %v24768_v9, %v18847_v45  ;;  %v3516_v50 = vrot.slane %v24769_v58, %v18847_v45  ;;  %v20451_v23 = vrot.slane %v3467_v6, %v18853_v62  ;;  %v6439_v9 = vrot.slane %v6183_v48, %v18847_v45 }
 0x487   : > { %24767 = vst [vmem:[#allocation54_spill] sm:$0xff] %v20432_v63  ;;  %v6187_v56 = vpack.i.b16 %v6186_v3, %v24770_v54  ;;  %v3433_v57 = vcombine.low %v20429_v46, %v20432_v63  ;;  %v20455_v53 = vrot.slane %v3475_v14, %v18853_v62  ;;  %v6446_v51 = vrot.slane %v6432_v17, %v18847_v45  ;;  %v24786_v63 = vld [vmem:[#allocation59_spill] sm:$0xff] }
 0x488   : > { %24771 = vst [vmem:[#allocation36_spill] sm:$0xff] %v20451_v23  ;;  %v3525_v32 = vcombine.low %v3508_v22, %v3516_v50  ;;  %v6447_v47 = vcombine.low %v6424_v18, %v6439_v9  ;;  %v6448_v12 = vcombine.high %v6424_v18, %v6439_v9  ;;  %v3517_v58 = vcombine.low %v24773_v39, %v19924_v33 }
 0x489   : > { %24772 = vst [vmem:[#allocation34_spill] sm:$0xff] %v20455_v53  ;;  %v6498_v8 = vcombine.high %v6187_v56, %v18844_v41  ;;  %v6505_v3 = vrot.slane %v6187_v56, %v18847_v45  ;;  %v3483_v48 = vcombine.low %v20451_v23, %v20455_v53  ;;  %v6463_v22 = vcombine.low %v6431_v19, %v6446_v51  ;;  %v24784_v23 = vld [vmem:[#allocation57_spill] sm:$0xff]  ;;  %v24785_v53 = vld [vmem:[#allocation56_spill] sm:$0xff] }
 0x48a   : > { %v20463_v6 = vrot.slane %v3525_v32, %v18853_v62  ;;  %v6464_v50 = vcombine.high %v6431_v19, %v6446_v51  ;;  %v6455_v54 = vrot.slane %v6447_v47, %v18853_v62  ;;  %v6462_v17 = vrot.slane %v6448_v12, %v18853_v62 }
 0x48b   : > { %v6512_v14 = vrot.slane %v6498_v8, %v18847_v45  ;;  %v6513_v56 = vcombine.low %v6490_v49, %v6505_v3  ;;  %v6514_v46 = vcombine.high %v6490_v49, %v6505_v3  ;;  %v3923_v18 = vpack.i.b16 %v3483_v48, %v3433_v57 }
 0x48c   : > { %24774 = vst [vmem:[#allocation40_spill] sm:$0xff] %v20463_v6  ;;  %v20471_v9 = vrot.slane %v6463_v22, %v18853_v62  ;;  %v20474_v33 = vrot.slane %v6464_v50, %v18853_v62  ;;  %v7441_v8 = vcombine.low %v6455_v54, %v6462_v17  ;;  %v15870_v3 = vcombine.high %v6455_v54, %v6462_v17  ;;  %v24779_v17 = vld [vmem:[#allocation76_spill] sm:$0xff] }
 0x48d   : > { %v6529_v32 = vcombine.low %v6497_v27, %v6512_v14  ;;  %v20477_v39 = vrot.slane %v6513_v56, %v18853_v62  ;;  %v20480_v19 = vrot.slane %v6514_v46, %v18853_v62  ;;  %v6530_v51 = vcombine.high %v6497_v27, %v6512_v14  ;;  %16406 = vmatmul.mubr.msk.bf16.gmra.mrb[4].mxu1 %vm8320_vm0, %v3923_v18 }
 0x48e   : > { %v20489_v12 = vrot.slane %v3517_v58, %v18853_v62  ;;  %v20495_v46 = vrot.slane %v7441_v8, %v18847_v45  ;;  %v24778_v58 = vld [vmem:[#allocation26_spill] sm:$0xff]  ;;  %v20514_v8 = vrot.slane %v15870_v3, %v18847_v45  ;;  %v24782_v14 = vcombine.low %v19918_v10, %v19928_v55 }
 0x48f   : > { %24775 = vst [vmem:[#allocation22_spill] sm:$0xff] %v20477_v39  ;;  %24776 = vst [vmem:[#allocation74_spill] sm:$0xff] %v20480_v19  ;;  %v20484_v49 = vrot.slane %v6529_v32, %v18853_v62  ;;  %v20492_v22 = vrot.slane %v6530_v51, %v18853_v62  ;;  %v24780_v56 = vcombine.low %v24778_v58, %v24779_v17  ;;  %v3924_v3 = vshrl.u32 %v3433_v57, 16  ;;  %v24787_v19 = vld [vmem:[#allocation58_spill] sm:$0xff] }
 0x490   : > { %24777 = vst [vmem:[#allocation73_spill] sm:$0xff] %v20489_v12  ;;  %v3533_v54 = vcombine.low %v20489_v12, %v20463_v6  ;;  %v24781_v32 = vcombine.high %v24778_v58, %v24779_v17  ;;  %v3558_v27 = vrot.slane %v24782_v14, %v18847_v45  ;;  %v6128_v12 = vpop.permute.xlu0 %6127  ;;  %v8639_v58 = vsel %vm8320_vm0, %v20346_v44, 0  ;;  %v24788_v44 = vld [vmem:[#allocation42_spill] sm:$0xff] }
 0x491   : > { %v3542_v18 = vrot.slane %v24780_v56, %v18847_v45  ;;  %v24783_v56 = vcombine.high %v19918_v10, %v19928_v55  ;;  %v3925_v17 = vshrl.u32 %v3483_v48, 16  ;;  %16452 = vmatpush3.bf16.xpose.msra.mxu1 %v8639_v58  ;;  %v5462_v14 = vcombine.high %v24785_v53, %v24784_v23  ;;  %v6146_v10 = vpop.permute.xlu1 %6145 }
 0x492   : > { %v3550_v51 = vrot.slane %v24781_v32, %v18847_v45  ;;  %v5512_v39 = vcombine.high %v24787_v19, %v24786_v63  ;;  %v6239_v57 = vpack.i.b16 %v6128_v12, %v24788_v44  ;;  %v6242_v23 = vshrl.u32 %v6128_v12, 16 }
 0x493   : > { %v3566_v47 = vrot.slane %v24783_v56, %v18847_v45  ;;  %v3926_v55 = vpack.i.b16 %v3925_v17, %v3924_v3  ;;  %v3936_v56 = vshrl.u32 %v3533_v54, 16  ;;  %v6046_v53 = vshrl.u32 %v5462_v14, 16 }
 0x494   : > { %v3567_v6 = vcombine.low %v3542_v18, %v3550_v51  ;;  %v8784_v18 = vsel %vm8320_vm0, %v20363_v1, 0  ;;  %v6945_v63 = vcombine.high %v6239_v57, %v18844_v41  ;;  %v6047_v19 = vshrl.u32 %v5512_v39, 16  ;;  %v24791_v51 = vld [vmem:[#allocation37_spill] sm:$0xff] }
 0x495   : > { %v3575_v50 = vcombine.low %v3558_v27, %v3566_v47  ;;  %v20543_v27 = vpack.i.b16 %v5512_v39, %v5462_v14  ;;  %16484 = vmatpush3.bf16.xpose.msra.mxu0 %v8784_v18  ;;  %v6199_v1 = vpack.i.b16 %v6146_v10, %v24791_v51  ;;  %v20555_v3 = vrot.slane %v6239_v57, %v18847_v45 }
 0x496   : > { %v20538_v48 = vrot.slane %v3567_v6, %v18853_v62  ;;  %16438 = vmatmul.mubr.msk.bf16.gmra.mrb[100].mxu0 %vm8320_vm0, %v3926_v55  ;;  %v24792_v6 = vshrl.u32 %v24788_v44, 16  ;;  %v6202_v12 = vshrl.u32 %v6146_v10, 16  ;;  %v20557_v17 = vpack.i.b16 %v6047_v19, %v6046_v53 }
 0x497   : > { %v20541_v47 = vrot.slane %v3575_v50, %v18853_v62  ;;  %16787 = vmatprep.subr.msk.bf16.mxu1 %vm8320_vm0, %v20543_v27  ;;  %v6564_v14 = vcombine.high %v6199_v1, %v18844_v41  ;;  %v6571_v39 = vrot.slane %v6199_v1, %v18847_v45  ;;  %v24793_v55 = vcombine.low %v19975_v35, %v19978_v37 }
 0x498   : > { %24789 = vst [vmem:[#allocation23_spill] sm:$0xff] %v20538_v48  ;;  %v6243_v50 = vpack.i.b16 %v6242_v23, %v24792_v6  ;;  %v20566_v44 = vrot.slane %v6945_v63, %v18847_v45  ;;  %16795 = vmatprep.subr.msk.bf16.mxu0 %vm8320_vm0, %v20557_v17  ;;  %v24794_v10 = vshrl.u32 %v24791_v51, 16  ;;  %v24796_v51 = vld [vmem:[#allocation83_spill] sm:$0xff] }
 0x499   : > { %24790 = vst [vmem:[#allocation72_spill] sm:$0xff] %v20541_v47  ;;  %v3583_v58 = vcombine.low %v20538_v48, %v20541_v47  ;;  %v3608_v18 = vrot.slane %v24793_v55, %v18847_v45  ;;  %v6578_v53 = vrot.slane %v6564_v14, %v18847_v45  ;;  %v6579_v19 = vcombine.low %v20361_v36, %v6571_v39 }
 0x49a   : > { %v7011_v57 = vcombine.high %v6243_v50, %v18844_v41  ;;  %v6203_v23 = vpack.i.b16 %v6202_v12, %v24794_v10  ;;  %v6580_v1 = vcombine.high %v20361_v36, %v6571_v39  ;;  %v20578_v63 = vrot.slane %v6243_v50, %v18847_v45 }
 0x49b   : > { %v3935_v32 = vpack.i.b16 %v3583_v58, %v3533_v54  ;;  %v3937_v48 = vshrl.u32 %v3583_v58, 16  ;;  %v24795_v58 = vcombine.high %v19975_v35, %v19978_v37  ;;  %v3617_v12 = vcombine.low %v24796_v51, %v20020_v52 }
 0x49c   : > { %v6587_v14 = vrot.slane %v6579_v19, %v18853_v62  ;;  %v6594_v55 = vrot.slane %v6580_v1, %v18853_v62  ;;  %v6595_v36 = vcombine.low %v20367_v60, %v6578_v53  ;;  %v6637_v35 = vrot.slane %v6203_v23, %v18847_v45  ;;  %v24811_v1 = vld [vmem:[#allocation38_spill] sm:$0xff] }
 0x49d   : > { %16409 = vmatprep.mubr.msk.bf16.mxu1 %vm8320_vm0, %v3935_v32  ;;  %v3938_v54 = vpack.i.b16 %v3937_v48, %v3936_v56  ;;  %v3616_v6 = vrot.slane %v24795_v58, %v18847_v45  ;;  %v6596_v32 = vcombine.high %v20367_v60, %v6578_v53  ;;  %v20592_v56 = vrot.slane %v7011_v57, %v18847_v45 }
 0x49e   : > { %v6630_v48 = vcombine.high %v6203_v23, %v18844_v41  ;;  %v20597_v52 = vrot.slane %v6595_v36, %v18853_v62  ;;  %v7541_v39 = vcombine.low %v6587_v14, %v6594_v55  ;;  %v15874_v10 = vcombine.high %v6587_v14, %v6594_v55  ;;  %v6124_v14 = vpop.permute.xlu1 %6123  ;;  %v24801_v36 = vld [vmem:[#allocation27_spill] sm:$0xff] }
 0x49f   : > { %16441 = vmatprep.mubr.msk.bf16.mxu0 %vm8320_vm0, %v3938_v54  ;;  %v3625_v37 = vcombine.low %v3608_v18, %v3616_v6  ;;  %v20600_v50 = vrot.slane %v6596_v32, %v18853_v62  ;;  %v6645_v53 = vcombine.low %v20374_v59, %v6637_v35  ;;  %v6646_v57 = vcombine.high %v20374_v59, %v6637_v35  ;;  %v24802_v32 = vld [vmem:[#allocation78_spill] sm:$0xff] }
 0x4a0   : > { %v6644_v60 = vrot.slane %v6630_v48, %v18847_v45  ;;  %v20609_v23 = vrot.slane %v7541_v39, %v18847_v45  ;;  %v20612_v18 = vrot.slane %v15874_v10, %v18847_v45  ;;  %v20617_v54 = vrot.slane %v3617_v12, %v18853_v62  ;;  %v24805_v39 = vld [vmem:[#allocation80_spill] sm:$0xff]  ;;  %v24806_v10 = vld [vmem:[#allocation81_spill] sm:$0xff] }
 0x4a1   : > { %v20606_v19 = vrot.slane %v3625_v37, %v18853_v62  ;;  %v20620_v58 = vrot.slane %v6645_v53, %v18853_v62  ;;  %v20623_v59 = vrot.slane %v6646_v57, %v18853_v62  ;;  %v24803_v48 = vcombine.low %v24801_v36, %v24802_v32 }
 0x4a2   : > { %24798 = vst [vmem:[#allocation77_spill] sm:$0xff] %v20617_v54  ;;  %v6661_v6 = vcombine.low %v20380_v16, %v6644_v60  ;;  %v6662_v51 = vcombine.high %v20380_v16, %v6644_v60  ;;  %v24804_v35 = vcombine.high %v24801_v36, %v24802_v32  ;;  %v24807_v53 = vcombine.low %v24805_v39, %v24806_v10 }
 0x4a3   : > { %24797 = vst [vmem:[#allocation35_spill] sm:$0xff] %v20606_v19  ;;  %24799 = vst [vmem:[#allocation26_spill] sm:$0xff] %v20620_v58  ;;  %v3642_v12 = vrot.slane %v24803_v48, %v18847_v45  ;;  %v3633_v48 = vcombine.low %v20617_v54, %v20606_v19  ;;  %v24810_v36 = vcombine.high %v24805_v39, %v24806_v10  ;;  %v6210_v47 = vshrl.u32 %v6124_v14, 16  ;;  %v24826_v58 = vld [vmem:[#allocation62_spill] sm:$0xff] }
 0x4a4   : > { %24800 = vst [vmem:[#allocation76_spill] sm:$0xff] %v20623_v59  ;;  %v3650_v37 = vrot.slane %v24804_v35, %v18847_v45  ;;  %v3658_v57 = vrot.slane %v24807_v53, %v18847_v45  ;;  %v20642_v16 = vrot.slane %v6661_v6, %v18853_v62  ;;  %v20645_v60 = vrot.slane %v6662_v51, %v18853_v62  ;;  %v24816_v59 = vld [vmem:[#allocation84_spill] sm:$0xff] }
 0x4a5   : > { %v3666_v32 = vrot.slane %v24810_v36, %v18847_v45  ;;  %v6207_v53 = vpack.i.b16 %v6124_v14, %v24811_v1  ;;  %v24812_v55 = vcombine.low %v20064_v0, %v20067_v28  ;;  %v24813_v39 = vcombine.high %v20064_v0, %v20067_v28  ;;  %v24817_v0 = vld [vmem:[#allocation85_spill] sm:$0xff] }
 0x4a6   : > { %24808 = vst [vmem:[#allocation57_spill] sm:$0xff] %v20642_v16  ;;  %24809 = vst [vmem:[#allocation56_spill] sm:$0xff] %v20645_v60  ;;  %v3667_v35 = vcombine.low %v3642_v12, %v3650_v37  ;;  %v24814_v37 = vshrl.u32 %v24811_v1, 16  ;;  %v24818_v28 = vcombine.low %v24816_v59, %v24817_v0  ;;  %v24825_v16 = vld [vmem:[#allocation63_spill] sm:$0xff] }
 0x4a7   : > { %v3708_v54 = vrot.slane %v24812_v55, %v18847_v45  ;;  %v3716_v10 = vrot.slane %v24813_v39, %v18847_v45  ;;  %v3675_v14 = vcombine.low %v3658_v57, %v3666_v32  ;;  %v6681_v6 = vcombine.high %v6207_v53, %v18844_v41 }
 0x4a8   : > { %v6211_v36 = vpack.i.b16 %v6210_v47, %v24814_v37  ;;  %v20674_v51 = vrot.slane %v3667_v35, %v18853_v62  ;;  %v3717_v55 = vcombine.low %v20088_v25, %v20091_v26  ;;  %v3742_v39 = vrot.slane %v24818_v28, %v18847_v45  ;;  %v6130_v37 = vpop.permute.xlu0 %6129 }
 0x4a9   : > { %v3725_v19 = vcombine.low %v3708_v54, %v3716_v10  ;;  %v20683_v12 = vrot.slane %v3675_v14, %v18853_v62  ;;  %v20686_v1 = vrot.slane %v6207_v53, %v18847_v45  ;;  %v20689_v47 = vrot.slane %v6681_v6, %v18847_v45 }
 0x4aa   : > { %24815 = vst [vmem:[#allocation59_spill] sm:$0xff] %v20674_v51  ;;  %v6747_v57 = vcombine.high %v6211_v36, %v18844_v41  ;;  %v20693_v32 = vrot.slane %v3717_v55, %v18853_v62  ;;  %v24820_v26 = vcombine.high %v24816_v59, %v24817_v0  ;;  %v24821_v35 = vcombine.low %v20085_v31, %v20095_v38 }
 0x4ab   : > { %24819 = vst [vmem:[#allocation58_spill] sm:$0xff] %v20683_v12  ;;  %v20696_v25 = vrot.slane %v3725_v19, %v18853_v62  ;;  %v3683_v6 = vcombine.low %v20674_v51, %v20683_v12  ;;  %v20709_v10 = vrot.slane %v6211_v36, %v18847_v45  ;;  %v24822_v19 = vcombine.high %v20085_v31, %v20095_v38 }
 0x4ac   : > { %v3750_v54 = vrot.slane %v24820_v26, %v18847_v45  ;;  %v3758_v53 = vrot.slane %v24821_v35, %v18847_v45  ;;  %v8642_v59 = vsel %vm8320_vm0, %v20543_v27, 0  ;;  %v3948_v28 = vshrl.u32 %v3633_v48, 16  ;;  %v24823_v26 = vld [vmem:[#allocation61_spill] sm:$0xff]  ;;  %v24824_v35 = vld [vmem:[#allocation60_spill] sm:$0xff] }
 0x4ad   : > { %v3766_v14 = vrot.slane %v24822_v19, %v18847_v45  ;;  %v3733_v55 = vcombine.low %v20693_v32, %v20696_v25  ;;  %16454 = vmatpush3.bf16.xpose.msra.mxu1 %v8642_v59  ;;  %v5562_v51 = vcombine.high %v24824_v35, %v24823_v26  ;;  %v3947_v36 = vpack.i.b16 %v3683_v6, %v3633_v48  ;;  %v6148_v59 = vpop.permute.xlu1 %6147 }
 0x4ae   : > { %v3767_v0 = vcombine.low %v3742_v39, %v3750_v54  ;;  %v3949_v60 = vshrl.u32 %v3683_v6, 16  ;;  %v5612_v31 = vcombine.high %v24826_v58, %v24825_v16  ;;  %v20724_v38 = vrot.slane %v6747_v57, %v18847_v45  ;;  %v24828_v54 = vld [vmem:[#allocation47_spill] sm:$0xff] }
 0x4af   : > { %v3775_v12 = vcombine.low %v3758_v53, %v3766_v14  ;;  %v8787_v39 = vsel %vm8320_vm0, %v20557_v17, 0  ;;  %v6255_v19 = vpack.i.b16 %v6130_v37, %v24828_v54  ;;  %16410 = vmatmul.mubr.msk.bf16.gmra.mrb[8].mxu1 %vm8320_vm0, %v3947_v36  ;;  %v6258_v58 = vshrl.u32 %v6130_v37, 16 }
 0x4b0   : > { %v20727_v27 = vrot.slane %v3767_v0, %v18853_v62  ;;  %v3950_v53 = vpack.i.b16 %v3949_v60, %v3948_v28  ;;  %v20736_v6 = vpack.i.b16 %v5612_v31, %v5562_v51  ;;  %16486 = vmatpush3.bf16.xpose.msra.mxu0 %v8787_v39  ;;  %v3960_v16 = vshrl.u32 %v3733_v55, 16  ;;  %v24831_v28 = vld [vmem:[#allocation39_spill] sm:$0xff] }
 0x4b1   : > { %v20734_v48 = vrot.slane %v3775_v12, %v18853_v62  ;;  %v7077_v57 = vcombine.high %v6255_v19, %v18844_v41  ;;  %v6058_v14 = vshrl.u32 %v5562_v51, 16  ;;  %v6059_v0 = vshrl.u32 %v5612_v31, 16 }
 0x4b2   : > { %24827 = vst [vmem:[#allocation42_spill] sm:$0xff] %v20727_v27  ;;  %16442 = vmatmul.mubr.msk.bf16.gmra.mrb[104].mxu0 %vm8320_vm0, %v3950_v53  ;;  %16788 = vmatprep.subr.msk.bf16.mxu1 %vm8320_vm0, %v20736_v6  ;;  %v24830_v12 = vshrl.u32 %v24828_v54, 16  ;;  %v6215_v26 = vpack.i.b16 %v6148_v59, %v24831_v28  ;;  %v6218_v35 = vshrl.u32 %v6148_v59, 16  ;;  %v20748_v37 = vrot.slane %v6255_v19, %v18847_v45 }
 0x4b3   : > { %24829 = vst [vmem:[#allocation37_spill] sm:$0xff] %v20734_v48  ;;  %v3783_v17 = vcombine.low %v20727_v27, %v20734_v48  ;;  %v20750_v36 = vpack.i.b16 %v6059_v0, %v6058_v14  ;;  %v24832_v51 = vcombine.low %v20162_v7, %v20165_v42  ;;  %v24833_v39 = vcombine.high %v20162_v7, %v20165_v42 }
 0x4b4   : > { %v6259_v60 = vpack.i.b16 %v6258_v58, %v24830_v12  ;;  %v20761_v12 = vrot.slane %v7077_v57, %v18847_v45  ;;  %v24834_v59 = vshrl.u32 %v24831_v28, 16  ;;  %v6696_v0 = vcombine.high %v6215_v26, %v18844_v41 }
 0x4b5   : > { %v3808_v31 = vrot.slane %v24832_v51, %v18847_v45  ;;  %v3816_v53 = vrot.slane %v24833_v39, %v18847_v45  ;;  %v3959_v54 = vpack.i.b16 %v3783_v17, %v3733_v55  ;;  %v3961_v58 = vshrl.u32 %v3783_v17, 16  ;;  %16796 = vmatprep.subr.msk.bf16.mxu0 %vm8320_vm0, %v20750_v36 }
 0x4b6   : > { %v7143_v19 = vcombine.high %v6259_v60, %v18844_v41  ;;  %v6219_v14 = vpack.i.b16 %v6218_v35, %v24834_v59  ;;  %v6703_v51 = vrot.slane %v6215_v26, %v18847_v45  ;;  %v3817_v7 = vcombine.low %v20189_v15, %v20192_v29 }
 0x4b7   : > { %16413 = vmatprep.mubr.msk.bf16.mxu1 %vm8320_vm0, %v3959_v54  ;;  %v3962_v42 = vpack.i.b16 %v3961_v58, %v3960_v16  ;;  %v20774_v55 = vrot.slane %v6259_v60, %v18847_v45  ;;  %v3825_v17 = vcombine.low %v3808_v31, %v3816_v53  ;;  %v6710_v28 = vrot.slane %v6696_v0, %v18847_v45 }
 0x4b8   : > { %v20777_v57 = vrot.slane %v7143_v19, %v18847_v45  ;;  %v6711_v35 = vcombine.low %v20686_v1, %v6703_v51  ;;  %v6712_v39 = vcombine.high %v20686_v1, %v6703_v51  ;;  %v6762_v26 = vcombine.high %v6219_v14, %v18844_v41 }
 0x4b9   : > { %16445 = vmatprep.mubr.msk.bf16.mxu0 %vm8320_vm0, %v3962_v42  ;;  %v6769_v15 = vrot.slane %v6219_v14, %v18847_v45  ;;  %v20786_v29 = vrot.slane %v3817_v7, %v18853_v62  ;;  %v20789_v16 = vrot.slane %v3825_v17, %v18853_v62  ;;  %v24837_v60 = vcombine.low %v20168_v34, %v20176_v21 }
 0x4ba   : > { %v6719_v53 = vrot.slane %v6711_v35, %v18853_v62  ;;  %v6726_v1 = vrot.slane %v6712_v39, %v18853_v62  ;;  %v6727_v54 = vcombine.low %v20689_v47, %v6710_v28  ;;  %v6728_v58 = vcombine.high %v20689_v47, %v6710_v28 }
 0x4bb   : > { %24835 = vst [vmem:[#allocation83_spill] sm:$0xff] %v20786_v29  ;;  %24836 = vst [vmem:[#allocation27_spill] sm:$0xff] %v20789_v16  ;;  %v3842_v31 = vrot.slane %v24837_v60, %v18847_v45  ;;  %v6776_v19 = vrot.slane %v6762_v26, %v18847_v45  ;;  %v6777_v59 = vcombine.low %v20709_v10, %v6769_v15  ;;  %v8790_v27 = vsel %vm8320_vm0, %v20750_v36, 0 }
 0x4bc   : > { %v6778_v14 = vcombine.high %v20709_v10, %v6769_v15  ;;  %v24838_v0 = vcombine.high %v20168_v34, %v20176_v21  ;;  %v20807_v7 = vrot.slane %v6727_v54, %v18853_v62  ;;  %v20810_v42 = vrot.slane %v6728_v58, %v18853_v62  ;;  %v6150_v34 = vpop.permute.xlu1 %6149  ;;  %16488 = vmatpush3.bf16.xpose.msra.mxu0 %v8790_v27 }
 0x4bd   : > { %v7641_v17 = vcombine.low %v6719_v53, %v6726_v1  ;;  %v15878_v35 = vcombine.high %v6719_v53, %v6726_v1  ;;  %v20813_v47 = vrot.slane %v6777_v59, %v18853_v62  ;;  %v6793_v10 = vcombine.low %v20724_v38, %v6776_v19 }
 0x4be   : > { %v3850_v51 = vrot.slane %v24838_v0, %v18847_v45  ;;  %v20816_v28 = vrot.slane %v6778_v14, %v18853_v62  ;;  %v6794_v39 = vcombine.high %v20724_v38, %v6776_v19  ;;  %v3833_v60 = vcombine.low %v20786_v29, %v20789_v16  ;;  %v24846_v29 = vld [vmem:[#allocation65_spill] sm:$0xff] }
 0x4bf   : > { %v20821_v21 = vrot.slane %v7641_v17, %v18847_v45  ;;  %v20824_v26 = vrot.slane %v15878_v35, %v18847_v45  ;;  %v20831_v53 = vrot.slane %v6793_v10, %v18853_v62  ;;  %v24839_v58 = vcombine.low %v20179_v43, %v20182_v5  ;;  %v24841_v17 = vld [vmem:[#allocation41_spill] sm:$0xff] }
 0x4c0   : > { %v20834_v1 = vrot.slane %v6794_v39, %v18853_v62  ;;  %v24840_v59 = vcombine.high %v20179_v43, %v20182_v5  ;;  %v3867_v0 = vcombine.low %v3842_v31, %v3850_v51  ;;  %v6231_v35 = vpack.i.b16 %v6150_v34, %v24841_v17  ;;  %v24844_v39 = vld [vmem:[#allocation51_spill] sm:$0xff] }
 0x4c1   : > { %v3858_v19 = vrot.slane %v24839_v58, %v18847_v45  ;;  %v6234_v54 = vshrl.u32 %v6150_v34, 16  ;;  %v8645_v38 = vsel %vm8320_vm0, %v20736_v6, 0  ;;  %v24843_v51 = vshrl.u32 %v24841_v17, 16  ;;  %v24845_v34 = vld [vmem:[#allocation30_spill] sm:$0xff]  ;;  %v24847_v6 = vld [vmem:[#allocation64_spill] sm:$0xff] }
 0x4c2   : > { %v3866_v14 = vrot.slane %v24840_v59, %v18847_v45  ;;  %v6828_v43 = vcombine.high %v6231_v35, %v18844_v41  ;;  %v6835_v5 = vrot.slane %v6231_v35, %v18847_v45  ;;  %16456 = vmatpush3.bf16.xpose.msra.mxu1 %v8645_v38  ;;  %v20860_v31 = vrot.slane %v3867_v0, %v18853_v62  ;;  %v24850_v35 = vld [vmem:[#allocation66_spill] sm:$0xff] }
 0x4c3   : > { %v6235_v59 = vpack.i.b16 %v6234_v54, %v24843_v51  ;;  %v3893_v10 = vpack.i.b16 %v24845_v34, %v24844_v39  ;;  %v5662_v16 = vcombine.high %v24847_v6, %v24846_v29  ;;  %v24849_v54 = vld [vmem:[#allocation67_spill] sm:$0xff] }
 0x4c4   : > { %v3875_v15 = vcombine.low %v3858_v19, %v3866_v14  ;;  %24842 = vst [vmem:[#allocation78_spill] sm:$0xff] %v20860_v31  ;;  %v6842_v19 = vrot.slane %v6828_v43, %v18847_v45  ;;  %v6843_v14 = vcombine.low %v20394_v61, %v6835_v5  ;;  %v6844_v38 = vcombine.high %v20394_v61, %v6835_v5  ;;  %v6152_v61 = vpop.permute.xlu1 %6151 }
 0x4c5   : > { %v6894_v0 = vcombine.high %v6235_v59, %v18844_v41  ;;  %v6901_v17 = vrot.slane %v6235_v59, %v18847_v45  ;;  %v5712_v51 = vcombine.high %v24850_v35, %v24849_v54 }
 0x4c6   : > { %v20869_v58 = vrot.slane %v3875_v15, %v18853_v62  ;;  %v6851_v15 = vrot.slane %v6843_v14, %v18853_v62  ;;  %v6858_v43 = vrot.slane %v6844_v38, %v18853_v62  ;;  %v6859_v6 = vcombine.low %v20417_v24, %v6842_v19 }
 0x4c7   : > { %v6860_v5 = vcombine.high %v20417_v24, %v6842_v19  ;;  %v6908_v59 = vrot.slane %v6894_v0, %v18847_v45  ;;  %v6909_v54 = vcombine.low %v20421_v40, %v6901_v17  ;;  %v6910_v35 = vcombine.high %v20421_v40, %v6901_v17 }
 0x4c8   : > { %24848 = vst [vmem:[#allocation80_spill] sm:$0xff] %v20869_v58  ;;  %v3883_v29 = vcombine.low %v20860_v31, %v20869_v58  ;;  %v20890_v48 = vrot.slane %v6859_v6, %v18853_v62  ;;  %v7741_v31 = vcombine.low %v6851_v15, %v6858_v43  ;;  %v15882_v14 = vcombine.high %v6851_v15, %v6858_v43 }
 0x4c9   : > { %v20893_v38 = vrot.slane %v6860_v5, %v18853_v62  ;;  %v20896_v27 = vrot.slane %v6909_v54, %v18853_v62  ;;  %v20899_v24 = vrot.slane %v6910_v35, %v18853_v62  ;;  %v6925_v19 = vcombine.low %v20443_v20, %v6908_v59 }
 0x4ca   : > { %v3971_v36 = vpack.i.b16 %v3883_v29, %v3833_v60  ;;  %v6926_v40 = vcombine.high %v20443_v20, %v6908_v59  ;;  %v20905_v0 = vrot.slane %v7741_v31, %v18847_v45  ;;  %v3972_v17 = vshrl.u32 %v3833_v60, 16  ;;  %v6154_v59 = vpop.permute.xlu1 %6153 }
 0x4cb   : > { %v3973_v15 = vshrl.u32 %v3883_v29, 16  ;;  %v20908_v43 = vrot.slane %v6925_v19, %v18853_v62  ;;  %v20911_v6 = vrot.slane %v15882_v14, %v18847_v45  ;;  %v6069_v29 = vpack.i.b16 %v5712_v51, %v5662_v16 }
 0x4cc   : > { %16414 = vmatmul.mubr.msk.bf16.gmra.mrb[12].mxu1 %vm8320_vm0, %v3971_v36  ;;  %v20919_v20 = vrot.slane %v6926_v40, %v18853_v62  ;;  %v3894_v35 = vshrl.u32 %v24844_v39, 16  ;;  %v3895_v36 = vshrl.u32 %v24845_v34, 16  ;;  %v6070_v14 = vshrl.u32 %v5662_v16, 16  ;;  %v24851_v40 = vld [vmem:[#allocation43_spill] sm:$0xff]  ;;  %v24852_v39 = vld [vmem:[#allocation48_spill] sm:$0xff] }
 0x4cd   : > { %16465 = vmatprep.mubr.msk.bf16.mxu1 %vm8320_vm0, %v3893_v10  ;;  %v3974_v31 = vpack.i.b16 %v3973_v15, %v3972_v17  ;;  %v6071_v19 = vshrl.u32 %v5712_v51, 16  ;;  %16789 = vmatprep.subr.msk.bf16.mxu1 %vm8320_vm0, %v6069_v29  ;;  %v6247_v17 = vpack.i.b16 %v6152_v61, %v24851_v40  ;;  %v6250_v15 = vshrl.u32 %v6152_v61, 16 }
 0x4ce   : > { %v3896_v60 = vpack.i.b16 %v3895_v36, %v3894_v35  ;;  %v6263_v58 = vpack.i.b16 %v6154_v59, %v24852_v39  ;;  %v6266_v34 = vshrl.u32 %v6154_v59, 16  ;;  %v24853_v51 = vshrl.u32 %v24851_v40, 16 }
 0x4cf   : > { %16446 = vmatmul.mubr.msk.bf16.gmra.mrb[108].mxu0 %vm8320_vm0, %v3974_v31  ;;  %v6072_v5 = vpack.i.b16 %v6071_v19, %v6070_v14  ;;  %v6960_v10 = vcombine.high %v6247_v17, %v18844_v41  ;;  %v6967_v31 = vrot.slane %v6247_v17, %v18847_v45  ;;  %v8648_v59 = vsel %vm8320_vm0, %v6069_v29, 0 }
 0x4d0   : > { %v6251_v54 = vpack.i.b16 %v6250_v15, %v24853_v51  ;;  %16497 = vmatprep.mubr.msk.bf16.mxu0 %vm8320_vm0, %v3896_v60  ;;  %v7092_v61 = vcombine.high %v6263_v58, %v18844_v41  ;;  %v7099_v35 = vrot.slane %v6263_v58, %v18847_v45  ;;  %16458 = vmatpush3.bf16.xpose.msra.mxu1 %v8648_v59  ;;  %v24854_v15 = vshrl.u32 %v24852_v39, 16 }
 0x4d1   : > { %16797 = vmatprep.subr.msk.bf16.mxu0 %vm8320_vm0, %v6072_v5  ;;  %v8793_v36 = vsel %vm8320_vm0, %v6072_v5, 0  ;;  %v6974_v14 = vrot.slane %v6960_v10, %v18847_v45  ;;  %v6975_v19 = vcombine.low %v20555_v3, %v6967_v31  ;;  %v6976_v40 = vcombine.high %v20555_v3, %v6967_v31 }
 0x4d2   : > { %v7026_v17 = vcombine.high %v6251_v54, %v18844_v41  ;;  %v7033_v60 = vrot.slane %v6251_v54, %v18847_v45  ;;  %v6267_v51 = vpack.i.b16 %v6266_v34, %v24854_v15  ;;  %v7106_v58 = vrot.slane %v7092_v61, %v18847_v45  ;;  %16490 = vmatpush3.bf16.xpose.msra.mxu0 %v8793_v36 }
 0x4d3   : > { %v7107_v29 = vcombine.low %v20748_v37, %v7099_v35  ;;  %v6983_v5 = vrot.slane %v6975_v19, %v18853_v62  ;;  %v6990_v10 = vrot.slane %v6976_v40, %v18853_v62  ;;  %v6991_v16 = vcombine.low %v20566_v44, %v6974_v14 }
 0x4d4   : > { %v6992_v3 = vcombine.high %v20566_v44, %v6974_v14  ;;  %v7040_v31 = vrot.slane %v7026_v17, %v18847_v45  ;;  %v7041_v54 = vcombine.low %v20578_v63, %v7033_v60  ;;  %v7042_v39 = vcombine.high %v20578_v63, %v7033_v60 }
 0x4d5   : > { %v7108_v34 = vcombine.high %v20748_v37, %v7099_v35  ;;  %v20963_v61 = vrot.slane %v6991_v16, %v18853_v62  ;;  %v7841_v36 = vcombine.low %v6983_v5, %v6990_v10  ;;  %v15886_v19 = vcombine.high %v6983_v5, %v6990_v10  ;;  %v6132_v10 = vpop.permute.xlu1 %6131 }
 0x4d6   : > { %v20966_v59 = vrot.slane %v6992_v3, %v18853_v62  ;;  %v20969_v40 = vrot.slane %v7041_v54, %v18853_v62  ;;  %v20972_v44 = vrot.slane %v7042_v39, %v18853_v62  ;;  %v7057_v14 = vcombine.low %v20592_v56, %v7040_v31 }
 0x4d7   : > { %v7058_v63 = vcombine.high %v20592_v56, %v7040_v31  ;;  %v20977_v37 = vrot.slane %v7841_v36, %v18847_v45  ;;  %v20980_v16 = vrot.slane %v15886_v19, %v18847_v45  ;;  %v7115_v17 = vrot.slane %v7107_v29, %v18853_v62  ;;  %v24864_v36 = vld [vmem:[#allocation71_spill] sm:$0xff] }
 0x4d8   : > { %24855 = vst [vmem:[#allocation81_spill] sm:$0xff] %v20969_v40  ;;  %24856 = vst [vmem:[#allocation38_spill] sm:$0xff] %v20972_v44  ;;  %v20986_v60 = vrot.slane %v7057_v14, %v18853_v62  ;;  %v7122_v3 = vrot.slane %v7108_v34, %v18853_v62  ;;  %v7123_v31 = vcombine.low %v20761_v12, %v7106_v58  ;;  %v24860_v14 = vld [vmem:[#allocation69_spill] sm:$0xff]  ;;  %v24865_v40 = vld [vmem:[#allocation70_spill] sm:$0xff] }
 0x4d9   : > { %24857 = vst [vmem:[#allocation84_spill] sm:$0xff] %v20977_v37  ;;  %v20989_v15 = vrot.slane %v7058_v63, %v18853_v62  ;;  %v7124_v54 = vcombine.high %v20761_v12, %v7106_v58  ;;  %v7158_v29 = vcombine.high %v6267_v51, %v18844_v41  ;;  %v7165_v19 = vrot.slane %v6267_v51, %v18847_v45  ;;  %v24861_v63 = vld [vmem:[#allocation68_spill] sm:$0xff] }
 0x4da   : > { %24858 = vst [vmem:[#allocation85_spill] sm:$0xff] %v20986_v60  ;;  %v5762_v5 = vcombine.high %v24861_v63, %v24860_v14  ;;  %v21007_v56 = vrot.slane %v7123_v31, %v18853_v62  ;;  %v7941_v58 = vcombine.low %v7115_v17, %v7122_v3  ;;  %v15890_v44 = vcombine.high %v7115_v17, %v7122_v3  ;;  %v6156_v17 = vpop.permute.xlu1 %6155  ;;  %v24871_v14 = vld [vmem:[#allocation50_spill] sm:$0xff] }
 0x4db   : > { %24859 = vst [vmem:[#allocation61_spill] sm:$0xff] %v20989_v15  ;;  %v21010_v34 = vrot.slane %v7124_v54, %v18853_v62  ;;  %v7172_v12 = vrot.slane %v7158_v29, %v18847_v45  ;;  %v7173_v35 = vcombine.low %v20774_v55, %v7165_v19  ;;  %v7174_v39 = vcombine.high %v20774_v55, %v7165_v19 }
 0x4dc   : > { %24862 = vst [vmem:[#allocation60_spill] sm:$0xff] %v21007_v56  ;;  %v5812_v51 = vcombine.high %v24865_v40, %v24864_v36  ;;  %v21022_v54 = vrot.slane %v7941_v58, %v18847_v45  ;;  %v21031_v55 = vrot.slane %v15890_v44, %v18847_v45  ;;  %v6082_v19 = vshrl.u32 %v5762_v5, 16 }
 0x4dd   : > { %24863 = vst [vmem:[#allocation63_spill] sm:$0xff] %v21010_v34  ;;  %v7189_v31 = vcombine.low %v20777_v57, %v7172_v12  ;;  %v7190_v63 = vcombine.high %v20777_v57, %v7172_v12  ;;  %v21025_v29 = vrot.slane %v7173_v35, %v18853_v62  ;;  %v21028_v37 = vrot.slane %v7174_v39, %v18853_v62  ;;  %v24870_v12 = vld [vmem:[#allocation49_spill] sm:$0xff] }
 0x4de   : > { %24866 = vst [vmem:[#allocation62_spill] sm:$0xff] %v21022_v54  ;;  %24869 = vst [vmem:[#allocation41_spill] sm:$0xff] %v21031_v55  ;;  %v6081_v36 = vpack.i.b16 %v5812_v51, %v5762_v5  ;;  %v6083_v44 = vshrl.u32 %v5812_v51, 16  ;;  %v6271_v58 = vpack.i.b16 %v6132_v10, %v24870_v12  ;;  %v6279_v54 = vpack.i.b16 %v6156_v17, %v24871_v14 }
 0x4df   : > { %24867 = vst [vmem:[#allocation47_spill] sm:$0xff] %v21025_v29  ;;  %24868 = vst [vmem:[#allocation39_spill] sm:$0xff] %v21028_v37  ;;  %v21036_v3 = vrot.slane %v7189_v31, %v18853_v62  ;;  %v21039_v57 = vrot.slane %v7190_v63, %v18853_v62  ;;  %v6274_v63 = vshrl.u32 %v6132_v10, 16  ;;  %v6282_v5 = vshrl.u32 %v6156_v17, 16  ;;  %v24874_v37 = vld [vmem:[#allocation21_spill] sm:$0xff] }
 0x4e0   : > { %16790 = vmatprep.subr.msk.bf16.mxu1 %vm8320_vm0, %v6081_v36  ;;  %v6084_v35 = vpack.i.b16 %v6083_v44, %v6082_v19  ;;  %v7209_v55 = vcombine.high %v6271_v58, %v18844_v41  ;;  %v7216_v39 = vrot.slane %v6271_v58, %v18847_v45  ;;  %v24872_v51 = vshrl.u32 %v24870_v12, 16  ;;  %v24875_v58 = vld [vmem:[#allocation75_spill] sm:$0xff] }
 0x4e1   : > { %v7224_v56 = vcombine.high %v6279_v54, %v18844_v41  ;;  %v7231_v40 = vrot.slane %v6279_v54, %v18847_v45  ;;  %v8651_v31 = vsel %vm8320_vm0, %v6081_v36, 0  ;;  %v24873_v19 = vshrl.u32 %v24871_v14, 16 }
 0x4e2   : > { %v6275_v34 = vpack.i.b16 %v6274_v63, %v24872_v51  ;;  %16798 = vmatprep.subr.msk.bf16.mxu0 %vm8320_vm0, %v6084_v35  ;;  %v7223_v10 = vrot.slane %v7209_v55, %v18847_v45  ;;  %16460 = vmatpush3.bf16.xpose.msra.mxu1 %v8651_v31  ;;  %v5862_v17 = vcombine.high %v24875_v58, %v24874_v37  ;;  %v8796_v12 = vsel %vm8320_vm0, %v6084_v35, 0  ;;  %v24877_v31 = vld [vmem:[#allocation24_spill] sm:$0xff] }
 0x4e3   : > { %v6283_v44 = vpack.i.b16 %v6282_v5, %v24873_v19  ;;  %v7238_v54 = vrot.slane %v7224_v56, %v18847_v45  ;;  %v7239_v36 = vcombine.low %v7216_v39, %v7231_v40  ;;  %16492 = vmatpush3.bf16.xpose.msra.mxu0 %v8796_v12  ;;  %v7240_v29 = vcombine.high %v7216_v39, %v7231_v40  ;;  %v24876_v5 = vld [vmem:[#allocation25_spill] sm:$0xff] }
 0x4e4   : > { %v7275_v63 = vcombine.high %v6275_v34, %v18844_v41  ;;  %v7282_v51 = vrot.slane %v6275_v34, %v18847_v45  ;;  %v5912_v19 = vcombine.high %v24877_v31, %v24876_v5  ;;  %v6094_v5 = vshrl.u32 %v5862_v17, 16 }
 0x4e5   : > { %v7290_v55 = vcombine.high %v6283_v44, %v18844_v41  ;;  %v7297_v14 = vrot.slane %v6283_v44, %v18847_v45  ;;  %v7247_v35 = vrot.slane %v7239_v36, %v18853_v62  ;;  %v7255_v58 = vcombine.low %v7223_v10, %v7238_v54 }
 0x4e6   : > { %v7289_v37 = vrot.slane %v7275_v63, %v18847_v45  ;;  %v7256_v15 = vcombine.high %v7223_v10, %v7238_v54  ;;  %v7254_v34 = vrot.slane %v7240_v29, %v18853_v62  ;;  %v6093_v63 = vpack.i.b16 %v5912_v19, %v5862_v17 }
 0x4e7   : > { %v7304_v56 = vrot.slane %v7290_v55, %v18847_v45  ;;  %v7305_v60 = vcombine.low %v7282_v51, %v7297_v14  ;;  %v7306_v12 = vcombine.high %v7282_v51, %v7297_v14  ;;  %v21080_v39 = vrot.slane %v7255_v58, %v18853_v62  ;;  %v24886_v14 = vld [vmem:[#allocation28_spill] sm:$0xff] }
 0x4e8   : > { %v21083_v44 = vrot.slane %v7256_v15, %v18853_v62  ;;  %v8041_v55 = vcombine.low %v7247_v35, %v7254_v34  ;;  %v15894_v51 = vcombine.high %v7247_v35, %v7254_v34  ;;  %16791 = vmatprep.subr.msk.bf16.mxu1 %vm8320_vm0, %v6093_v63  ;;  %v6095_v34 = vshrl.u32 %v5912_v19, 16 }
 0x4e9   : > { %v21086_v36 = vrot.slane %v7305_v60, %v18853_v62  ;;  %v21089_v10 = vrot.slane %v7306_v12, %v18853_v62  ;;  %v7321_v29 = vcombine.low %v7289_v37, %v7304_v56  ;;  %v7322_v54 = vcombine.high %v7289_v37, %v7304_v56  ;;  %v24885_v37 = vld [vmem:[#allocation29_spill] sm:$0xff] }
 0x4ea   : > { %24878 = vst [vmem:[#allocation51_spill] sm:$0xff] %v21083_v44  ;;  %v21105_v35 = vrot.slane %v8041_v55, %v18847_v45  ;;  %v8654_v17 = vsel %vm8320_vm0, %v6093_v63, 0  ;;  %v21111_v56 = vrot.slane %v15894_v51, %v18847_v45  ;;  %v6012_v55 = vcombine.high %v24886_v14, %v24885_v37  ;;  %v24889_v14 = vld [vmem:[#allocation33_spill] sm:$0xff] }
 0x4eb   : > { %24879 = vst [vmem:[#allocation30_spill] sm:$0xff] %v21086_v36  ;;  %24880 = vst [vmem:[#allocation65_spill] sm:$0xff] %v21089_v10  ;;  %v21095_v15 = vrot.slane %v7321_v29, %v18853_v62  ;;  %v21098_v31 = vrot.slane %v7322_v54, %v18853_v62  ;;  %16462 = vmatpush3.bf16.xpose.msra.mxu1 %v8654_v17  ;;  %v24883_v29 = vld [vmem:[#allocation82_spill] sm:$0xff]  ;;  %v24884_v54 = vld [vmem:[#allocation79_spill] sm:$0xff]  ;;  %v6096_v40 = vpack.i.b16 %v6095_v34, %v6094_v5 }
 0x4ec   : > { %24881 = vst [vmem:[#allocation64_spill] sm:$0xff] %v21105_v35  ;;  %24882 = vst [vmem:[#allocation67_spill] sm:$0xff] %v21111_v56  ;;  %v5962_v60 = vcombine.high %v24884_v54, %v24883_v29  ;;  %v24887_v19 = vcombine.low %v20268_v11, %v20271_v4  ;;  %v24888_v63 = vcombine.high %v20268_v11, %v20271_v4  ;;  %v6107_v29 = vshrl.u32 %v6012_v55, 16  ;;  %v24898_v10 = vld [vmem:[#allocation53_spill] sm:$0xff]  ;;  %v24900_v36 = vld [vmem:[#allocation88_spill] sm:$0xff] }
 0x4ed   : > { %v7373_v17 = vcombine.low %v20281_v13, %v20284_v2  ;;  %v24890_v5 = vcombine.low %v20292_v30, %v24889_v14  ;;  %16799 = vmatprep.subr.msk.bf16.mxu0 %vm8320_vm0, %v6096_v40  ;;  %v8799_v34 = vsel %vm8320_vm0, %v6096_v40, 0  ;;  %v24891_v4 = vcombine.high %v20292_v30, %v24889_v14  ;;  %v24892_v2 = vld [vmem:[#allocation31_spill] sm:$0xff]  ;;  %v24901_v35 = vld [vmem:[#allocation32_spill] sm:$0xff] }
 0x4ee   : > { %v7364_v58 = vrot.slane %v24887_v19, %v18847_v45  ;;  %v7372_v51 = vrot.slane %v24888_v63, %v18847_v45  ;;  %v6105_v12 = vpack.i.b16 %v6012_v55, %v5962_v60  ;;  %v6106_v41 = vshrl.u32 %v5962_v60, 16  ;;  %16494 = vmatpush3.bf16.xpose.msra.mxu0 %v8799_v34  ;;  %v24893_v19 = vld [vmem:[#allocation86_spill] sm:$0xff]  ;;  %v24894_v63 = vld [vmem:[#allocation87_spill] sm:$0xff] }
 0x4ef   : > { %v7398_v37 = vrot.slane %v24890_v5, %v18847_v45  ;;  %v21136_v54 = vrot.slane %v7373_v17, %v18853_v62  ;;  %v7406_v13 = vrot.slane %v24891_v4, %v18847_v45  ;;  %v3906_v60 = vshrl.u32 %v24892_v2, 16  ;;  %v24897_v4 = vld [vmem:[#allocation52_spill] sm:$0xff] }
 0x4f0   : > { %v7381_v11 = vcombine.low %v7364_v58, %v7372_v51  ;;  %16792 = vmatprep.subr.msk.bf16.mxu1 %vm8320_vm0, %v6105_v12  ;;  %v6108_v55 = vpack.i.b16 %v6107_v29, %v6106_v41  ;;  %v24895_v5 = vcombine.low %v24893_v19, %v24894_v63  ;;  %v24896_v58 = vcombine.high %v24893_v19, %v24894_v63  ;;  %v24899_v29 = vld [vmem:[#allocation89_spill] sm:$0xff]  ;;  %v24905_v63 = vld [vmem:[#allocation22_spill] sm:$0xff] }
 0x4f1   : > { %v8657_v17 = vsel %vm8320_vm0, %v6105_v12, 0  ;;  %v7423_v14 = vcombine.low %v7398_v37, %v7406_v13  ;;  %v3384_v34 = vcombine.high %v24898_v10, %v24897_v4  ;;  %v24902_v56 = vshrl.u32 %v24901_v35, 16 }
 0x4f2   : > { %v7414_v40 = vrot.slane %v24895_v5, %v18847_v45  ;;  %v7422_v51 = vrot.slane %v24896_v58, %v18847_v45  ;;  %v21154_v30 = vrot.slane %v7381_v11, %v18853_v62  ;;  %16800 = vmatprep.subr.msk.bf16.mxu0 %vm8320_vm0, %v6108_v55  ;;  %v3334_v5 = vcombine.high %v24900_v36, %v24899_v29 }
 0x4f3   : > { %v3908_v44 = vpack.i.b16 %v24902_v56, %v3906_v60  ;;  %v24903_v12 = vcombine.low %v20471_v9, %v20474_v33  ;;  %v21170_v11 = vrot.slane %v7423_v14, %v18853_v62  ;;  %v8802_v10 = vsel %vm8320_vm0, %v6108_v55, 0  ;;  %16464 = vmatpush3.bf16.xpose.msra.mxu1 %v8657_v17 }
 0x4f4   : > { %v7431_v41 = vcombine.low %v7414_v40, %v7422_v51  ;;  %v7389_v37 = vcombine.low %v21136_v54, %v21154_v30  ;;  %v24904_v36 = vcombine.high %v20471_v9, %v20474_v33  ;;  %v7473_v60 = vcombine.low %v20495_v46, %v20514_v8  ;;  %v24906_v40 = vld [vmem:[#allocation74_spill] sm:$0xff] }
 0x4f5   : > { %v7464_v19 = vrot.slane %v24903_v12, %v18847_v45  ;;  %v24907_v58 = vcombine.low %v24905_v63, %v24906_v40  ;;  %v24908_v55 = vcombine.high %v24905_v63, %v24906_v40  ;;  %v3917_v4 = vpack.i.b16 %v3384_v34, %v3334_v5 }
 0x4f6   : > { %v7472_v13 = vrot.slane %v24904_v36, %v18847_v45  ;;  %v21178_v56 = vrot.slane %v7431_v41, %v18853_v62  ;;  %v24909_v33 = vcombine.low %v20484_v49, %v20492_v22  ;;  %v24910_v46 = vcombine.high %v20484_v49, %v20492_v22  ;;  %16496 = vmatpush3.bf16.xpose.msra.mxu0 %v8802_v10 }
 0x4f7   : > { %v7498_v51 = vrot.slane %v24907_v58, %v18847_v45  ;;  %v7506_v14 = vrot.slane %v24908_v55, %v18847_v45  ;;  %v8145_v29 = vshrl.u32 %v7389_v37, 16  ;;  %v21201_v12 = vrot.slane %v7473_v60, %v18853_v62 }
 0x4f8   : > { %v7481_v9 = vcombine.low %v7464_v19, %v7472_v13  ;;  %v7514_v17 = vrot.slane %v24909_v33, %v18847_v45  ;;  %v7522_v8 = vrot.slane %v24910_v46, %v18847_v45  ;;  %v7439_v41 = vcombine.low %v21170_v11, %v21178_v56 }
 0x4f9   : > { %v7523_v36 = vcombine.low %v7498_v51, %v7506_v14  ;;  %v3919_v63 = vshrl.u32 %v3384_v34, 16  ;;  %v24911_v40 = vcombine.low %v20597_v52, %v20600_v50  ;;  %v3918_v55 = vshrl.u32 %v3334_v5, 16 }
 0x4fa   : > { %v21204_v19 = vrot.slane %v7481_v9, %v18853_v62  ;;  %v7531_v13 = vcombine.low %v7514_v17, %v7522_v8  ;;  %v8146_v49 = vshrl.u32 %v7439_v41, 16  ;;  %v8143_v22 = vpack.i.b16 %v7439_v41, %v7389_v37  ;;  %v24914_v37 = vld [vmem:[#allocation26_spill] sm:$0xff]  ;;  %v24915_v17 = vld [vmem:[#allocation76_spill] sm:$0xff] }
 0x4fb   : > { %v7564_v58 = vrot.slane %v24911_v40, %v18847_v45  ;;  %v24912_v60 = vcombine.high %v20597_v52, %v20600_v50  ;;  %v21217_v14 = vrot.slane %v7523_v36, %v18853_v62  ;;  %v7573_v9 = vcombine.low %v20609_v23, %v20612_v18  ;;  %v24919_v36 = vld [vmem:[#allocation57_spill] sm:$0xff] }
 0x4fc   : > { %v7489_v51 = vcombine.low %v21201_v12, %v21204_v19  ;;  %v21220_v34 = vrot.slane %v7531_v13, %v18853_v62  ;;  %v8147_v10 = vpack.i.b16 %v8146_v49, %v8145_v29  ;;  %16513 = vmatprep.subr.bf16.mxu0 %v8143_v22  ;;  %v24916_v52 = vcombine.low %v24914_v37, %v24915_v17  ;;  %v24920_v13 = vld [vmem:[#allocation56_spill] sm:$0xff] }
 0x4fd   : > { %v7572_v33 = vrot.slane %v24912_v60, %v18847_v45  ;;  %24913 = vst [vmem:[#allocation66_spill] sm:$0xff] %v21217_v14  ;;  %v24917_v46 = vcombine.high %v24914_v37, %v24915_v17  ;;  %v24918_v41 = vpack.i.b16 %v24901_v35, %v24892_v2  ;;  %v3920_v18 = vpack.i.b16 %v3919_v63, %v3918_v55  ;;  %v24924_v37 = vld [vmem:[#allocation55_spill] sm:$0xff] }
 0x4fe   : > { %v7598_v50 = vrot.slane %v24916_v52, %v18847_v45  ;;  %v7539_v23 = vcombine.low %v21217_v14, %v21220_v34  ;;  %v21239_v29 = vrot.slane %v7573_v9, %v18853_v62  ;;  %v24921_v40 = vcombine.low %v24919_v36, %v24920_v13  ;;  %16545 = vmatprep.subr.bf16.mxu1 %v8147_v10  ;;  %v24923_v9 = vld [vmem:[#allocation54_spill] sm:$0xff]  ;;  %v24927_v14 = vld [vmem:[#allocation40_spill] sm:$0xff] }
 0x4ff   : > { %v7581_v5 = vcombine.low %v7564_v58, %v7572_v33  ;;  %v7606_v8 = vrot.slane %v24917_v46, %v18847_v45  ;;  %16466 = vmatmul.mubr.msk.bf16.vlgmr.msra.gmra.mrb[16].mxu1 %vm8320_vm0, %v24918_v41  ;;  %v8161_v49 = vshrl.u32 %v7489_v51, 16  ;;  %v24922_v2 = vcombine.high %v24919_v36, %v24920_v13  ;;  %v24925_v52 = vld [vmem:[#allocation34_spill] sm:$0xff]  ;;  %v24926_v46 = vld [vmem:[#allocation36_spill] sm:$0xff]  ;;  %v24928_v36 = vld [vmem:[#allocation73_spill] sm:$0xff]  ;;  %16498 = vmatmul.mubr.msk.bf16.vlgmr.msra.gmra.mrb[112].mxu0 %vm8320_vm0, %v3908_v44 }
 0x500   : > { %v7614_v58 = vrot.slane %v24921_v40, %v18847_v45  ;;  %16469 = vmatprep.mubr.msk.bf16.mxu1 %vm8320_vm0, %v3917_v4  ;;  %16546 = vmatpush3.bf16.msra.mxu1 %v8147_v10  ;;  %v8162_v60 = vshrl.u32 %v7539_v23, 16  ;;  %v8159_v33 = vpack.i.b16 %v7539_v23, %v7489_v51  ;;  %v3434_v17 = vcombine.high %v24924_v37, %v24923_v9 }
 0x501   : > { %v21247_v35 = vrot.slane %v7581_v5, %v18853_v62  ;;  %v7622_v63 = vrot.slane %v24922_v2, %v18847_v45  ;;  %v7623_v55 = vcombine.low %v7598_v50, %v7606_v8  ;;  %v3484_v41 = vcombine.high %v24926_v46, %v24925_v52  ;;  %v24929_v50 = vld [vmem:[#allocation72_spill] sm:$0xff]  ;;  %v24930_v8 = vld [vmem:[#allocation23_spill] sm:$0xff]  ;;  %16501 = vmatprep.mubr.msk.bf16.mxu0 %vm8320_vm0, %v3920_v18 }
 0x502   : > { %v3534_v13 = vcombine.high %v24928_v36, %v24927_v14  ;;  %v8163_v10 = vpack.i.b16 %v8162_v60, %v8161_v49  ;;  %v3584_v23 = vcombine.high %v24930_v8, %v24929_v50  ;;  %v3930_v2 = vshrl.u32 %v3434_v17, 16  ;;  %16514 = vmatpush3.bf16.msra.mxu0 %v8143_v22 }
 0x503   : > { %v7589_v4 = vcombine.low %v21239_v29, %v21247_v35  ;;  %v21260_v5 = vrot.slane %v7623_v55, %v18853_v62  ;;  %v7631_v40 = vcombine.low %v7614_v58, %v7622_v63  ;;  %v3929_v51 = vpack.i.b16 %v3484_v41, %v3434_v17  ;;  %16515 = vmatprep.subr.bf16.mxu0 %v8159_v33 }
 0x504   : > { %v3931_v37 = vshrl.u32 %v3484_v41, 16  ;;  %v24931_v14 = vcombine.low %v20807_v7, %v20810_v42  ;;  %16547 = vmatprep.subr.bf16.mxu1 %v8163_v10  ;;  %v3941_v44 = vpack.i.b16 %v3584_v23, %v3534_v13  ;;  %v24932_v49 = vcombine.high %v20807_v7, %v20810_v42 }
 0x505   : > { %v21269_v9 = vrot.slane %v7631_v40, %v18853_v62  ;;  %v8177_v55 = vshrl.u32 %v7589_v4, 16  ;;  %v7673_v22 = vcombine.low %v20821_v21, %v20824_v26  ;;  %v3942_v18 = vshrl.u32 %v3534_v13, 16  ;;  %16548 = vmatpush3.bf16.msra.mxu1 %v8163_v10 }
 0x506   : > { %v7664_v58 = vrot.slane %v24931_v14, %v18847_v45  ;;  %v7672_v63 = vrot.slane %v24932_v49, %v18847_v45  ;;  %v3932_v17 = vpack.i.b16 %v3931_v37, %v3930_v2  ;;  %v24933_v52 = vcombine.low %v20813_v47, %v20816_v28  ;;  %16516 = vmatpush3.bf16.msra.mxu0 %v8159_v33 }
 0x507   : > { %v7639_v60 = vcombine.low %v21260_v5, %v21269_v9  ;;  %v24934_v41 = vcombine.high %v20813_v47, %v20816_v28  ;;  %16470 = vmatmul.mubr.msk.bf16.gmra.mrb[20].mxu1 %vm8320_vm0, %v3929_v51  ;;  %v21293_v42 = vrot.slane %v7673_v22, %v18853_v62  ;;  %v24935_v26 = vcombine.low %v20831_v53, %v20834_v1 }
 0x508   : > { %v7698_v46 = vrot.slane %v24933_v52, %v18847_v45  ;;  %v7681_v21 = vcombine.low %v7664_v58, %v7672_v63  ;;  %v24936_v36 = vcombine.high %v20831_v53, %v20834_v1  ;;  %16473 = vmatprep.mubr.msk.bf16.mxu1 %vm8320_vm0, %v3941_v44  ;;  %v3943_v51 = vshrl.u32 %v3584_v23, 16  ;;  %16502 = vmatmul.mubr.msk.bf16.gmra.mrb[116].mxu0 %vm8320_vm0, %v3932_v17 }
 0x509   : > { %v7706_v7 = vrot.slane %v24934_v41, %v18847_v45  ;;  %v7714_v40 = vrot.slane %v24935_v26, %v18847_v45  ;;  %v8178_v10 = vshrl.u32 %v7639_v60, 16  ;;  %v8175_v47 = vpack.i.b16 %v7639_v60, %v7589_v4  ;;  %v24944_v41 = vld [vmem:[#allocation77_spill] sm:$0xff]  ;;  %v24946_v26 = vld [vmem:[#allocation59_spill] sm:$0xff] }
 0x50a   : > { %v7722_v13 = vrot.slane %v24936_v36, %v18847_v45  ;;  %v21305_v50 = vrot.slane %v7681_v21, %v18853_v62  ;;  %v24937_v2 = vcombine.low %v20890_v48, %v20893_v38  ;;  %v24938_v53 = vcombine.high %v20890_v48, %v20893_v38  ;;  %v24945_v21 = vld [vmem:[#allocation58_spill] sm:$0xff] }
 0x50b   : > { %v7723_v28 = vcombine.low %v7698_v46, %v7706_v7  ;;  %v8179_v33 = vpack.i.b16 %v8178_v10, %v8177_v55  ;;  %16517 = vmatprep.subr.bf16.mxu0 %v8175_v47  ;;  %v3944_v23 = vpack.i.b16 %v3943_v51, %v3942_v18  ;;  %v7773_v14 = vcombine.low %v20905_v0, %v20911_v6  ;;  %v24943_v46 = vld [vmem:[#allocation35_spill] sm:$0xff] }
 0x50c   : > { %v7731_v8 = vcombine.low %v7714_v40, %v7722_v13  ;;  %v7764_v37 = vrot.slane %v24937_v2, %v18847_v45  ;;  %v7772_v1 = vrot.slane %v24938_v53, %v18847_v45  ;;  %v7689_v58 = vcombine.low %v21293_v42, %v21305_v50  ;;  %16518 = vmatpush3.bf16.msra.mxu0 %v8175_v47 }
 0x50d   : > { %v21316_v4 = vrot.slane %v7723_v28, %v18853_v62  ;;  %v24939_v48 = vcombine.low %v20896_v27, %v20899_v24  ;;  %16549 = vmatprep.subr.bf16.mxu1 %v8179_v33  ;;  %16505 = vmatprep.mubr.msk.bf16.mxu0 %vm8320_vm0, %v3944_v23  ;;  %v21332_v55 = vrot.slane %v7773_v14, %v18853_v62 }
 0x50e   : > { %v21324_v44 = vrot.slane %v7731_v8, %v18853_v62  ;;  %v7781_v49 = vcombine.low %v7764_v37, %v7772_v1  ;;  %v24940_v0 = vcombine.high %v20896_v27, %v20899_v24  ;;  %v24941_v63 = vcombine.low %v20908_v43, %v20919_v20  ;;  %16550 = vmatpush3.bf16.msra.mxu1 %v8179_v33  ;;  %v24948_v8 = vld [vmem:[#allocation42_spill] sm:$0xff] }
 0x50f   : > { %v7798_v38 = vrot.slane %v24939_v48, %v18847_v45  ;;  %v8193_v60 = vshrl.u32 %v7689_v58, 16  ;;  %v24942_v52 = vcombine.high %v20908_v43, %v20919_v20  ;;  %v3634_v7 = vcombine.high %v24944_v41, %v24943_v46  ;;  %v24947_v20 = vld [vmem:[#allocation37_spill] sm:$0xff] }
 0x510   : > { %v7806_v6 = vrot.slane %v24940_v0, %v18847_v45  ;;  %v7814_v22 = vrot.slane %v24941_v63, %v18847_v45  ;;  %v7739_v18 = vcombine.low %v21316_v4, %v21324_v44  ;;  %v21345_v17 = vrot.slane %v7781_v49, %v18853_v62  ;;  %v24957_v46 = vld [vmem:[#allocation61_spill] sm:$0xff] }
 0x511   : > { %v7822_v27 = vrot.slane %v24942_v52, %v18847_v45  ;;  %v3684_v40 = vcombine.high %v24946_v26, %v24945_v21  ;;  %v3734_v36 = vcombine.high %v20693_v32, %v20696_v25  ;;  %v3784_v2 = vcombine.high %v24948_v8, %v24947_v20  ;;  %v24960_v20 = vld [vmem:[#allocation60_spill] sm:$0xff]  ;;  %v24961_v8 = vld [vmem:[#allocation63_spill] sm:$0xff] }
 0x512   : > { %v7823_v24 = vcombine.low %v7798_v38, %v7806_v6  ;;  %v8194_v13 = vshrl.u32 %v7739_v18, 16  ;;  %v8191_v10 = vpack.i.b16 %v7739_v18, %v7689_v58  ;;  %v7789_v47 = vcombine.low %v21332_v55, %v21345_v17  ;;  %v24951_v6 = vld [vmem:[#allocation84_spill] sm:$0xff]  ;;  %v24953_v18 = vld [vmem:[#allocation38_spill] sm:$0xff] }
 0x513   : > { %v7831_v28 = vcombine.low %v7814_v22, %v7822_v27  ;;  %v3953_v43 = vpack.i.b16 %v3684_v40, %v3634_v7  ;;  %v3954_v37 = vshrl.u32 %v3634_v7, 16  ;;  %v3955_v25 = vshrl.u32 %v3684_v40, 16  ;;  %v24952_v22 = vld [vmem:[#allocation81_spill] sm:$0xff] }
 0x514   : > { %v21360_v51 = vrot.slane %v7823_v24, %v18853_v62  ;;  %v8195_v53 = vpack.i.b16 %v8194_v13, %v8193_v60  ;;  %16519 = vmatprep.subr.bf16.mxu0 %v8191_v10  ;;  %v8209_v32 = vshrl.u32 %v7789_v47, 16  ;;  %v3965_v33 = vpack.i.b16 %v3784_v2, %v3734_v36  ;;  %v24956_v24 = vld [vmem:[#allocation85_spill] sm:$0xff] }
 0x515   : > { %v21365_v1 = vrot.slane %v7831_v28, %v18853_v62  ;;  %16520 = vmatpush3.bf16.msra.mxu0 %v8191_v10  ;;  %16474 = vmatmul.mubr.msk.bf16.gmra.mrb[24].mxu1 %vm8320_vm0, %v3953_v43  ;;  %v24949_v23 = vcombine.low %v20963_v61, %v20966_v59  ;;  %v24950_v58 = vcombine.high %v20963_v61, %v20966_v59  ;;  %v3966_v48 = vshrl.u32 %v3734_v36, 16 }
 0x516   : > { %16551 = vmatprep.subr.bf16.mxu1 %v8195_v53  ;;  %v3956_v0 = vpack.i.b16 %v3955_v25, %v3954_v37  ;;  %v7873_v63 = vcombine.low %v24951_v6, %v20980_v16  ;;  %v24954_v60 = vcombine.low %v24952_v22, %v24953_v18  ;;  %16477 = vmatprep.mubr.msk.bf16.mxu1 %vm8320_vm0, %v3965_v33  ;;  %v3967_v16 = vshrl.u32 %v3784_v2, 16 }
 0x517   : > { %v7864_v14 = vrot.slane %v24949_v23, %v18847_v45  ;;  %v7872_v49 = vrot.slane %v24950_v58, %v18847_v45  ;;  %v7839_v38 = vcombine.low %v21360_v51, %v21365_v1  ;;  %16552 = vmatpush3.bf16.msra.mxu1 %v8195_v53  ;;  %v24955_v61 = vcombine.high %v24952_v22, %v24953_v18  ;;  %v24964_v23 = vld [vmem:[#allocation41_spill] sm:$0xff] }
 0x518   : > { %v7898_v52 = vrot.slane %v24954_v60, %v18847_v45  ;;  %v24958_v41 = vcombine.low %v24956_v24, %v24957_v46  ;;  %16506 = vmatmul.mubr.msk.bf16.gmra.mrb[120].mxu0 %vm8320_vm0, %v3956_v0  ;;  %v21395_v40 = vrot.slane %v7873_v63, %v18853_v62  ;;  %v24959_v36 = vcombine.high %v24956_v24, %v24957_v46 }
 0x519   : > { %v7881_v27 = vcombine.low %v7864_v14, %v7872_v49  ;;  %v7906_v59 = vrot.slane %v24955_v61, %v18847_v45  ;;  %v8210_v21 = vshrl.u32 %v7839_v38, 16  ;;  %v8207_v26 = vpack.i.b16 %v7839_v38, %v7789_v47  ;;  %v24965_v14 = vld [vmem:[#allocation62_spill] sm:$0xff]  ;;  %v24967_v38 = vld [vmem:[#allocation39_spill] sm:$0xff] }
 0x51a   : > { %v7914_v7 = vrot.slane %v24958_v41, %v18847_v45  ;;  %v7922_v13 = vrot.slane %v24959_v36, %v18847_v45  ;;  %v3968_v43 = vpack.i.b16 %v3967_v16, %v3966_v48  ;;  %v24962_v2 = vcombine.low %v24960_v20, %v24961_v8  ;;  %v24972_v41 = vld [vmem:[#allocation27_spill] sm:$0xff] }
 0x51b   : > { %v21402_v10 = vrot.slane %v7881_v27, %v18853_v62  ;;  %v7923_v28 = vcombine.low %v7898_v52, %v7906_v59  ;;  %v8211_v37 = vpack.i.b16 %v8210_v21, %v8209_v32  ;;  %16521 = vmatprep.subr.bf16.mxu0 %v8207_v26  ;;  %v24963_v25 = vcombine.high %v24960_v20, %v24961_v8  ;;  %v24966_v32 = vld [vmem:[#allocation47_spill] sm:$0xff] }
 0x51c   : > { %v7964_v47 = vrot.slane %v24962_v2, %v18847_v45  ;;  %v7931_v53 = vcombine.low %v7914_v7, %v7922_v13  ;;  %v7973_v58 = vcombine.low %v24965_v14, %v24964_v23  ;;  %v15897_v49 = vcombine.high %v21095_v15, %v21098_v31  ;;  %16509 = vmatprep.mubr.msk.bf16.mxu0 %vm8320_vm0, %v3968_v43  ;;  %v24973_v7 = vld [vmem:[#allocation83_spill] sm:$0xff]  ;;  %v24974_v13 = vld [vmem:[#allocation80_spill] sm:$0xff] }
 0x51d   : > { %v7972_v33 = vrot.slane %v24963_v25, %v18847_v45  ;;  %v7889_v48 = vcombine.low %v21395_v40, %v21402_v10  ;;  %16522 = vmatpush3.bf16.msra.mxu0 %v8207_v26  ;;  %v24968_v0 = vcombine.low %v24966_v32, %v24967_v38  ;;  %16553 = vmatprep.subr.bf16.mxu1 %v8211_v37  ;;  %v24976_v2 = vld [vmem:[#allocation51_spill] sm:$0xff] }
 0x51e   : > { %v21424_v63 = vrot.slane %v7923_v28, %v18853_v62  ;;  %v21427_v22 = vrot.slane %v7931_v53, %v18853_v62  ;;  %v24969_v60 = vcombine.high %v24966_v32, %v24967_v38  ;;  %16554 = vmatpush3.bf16.msra.mxu1 %v8211_v37  ;;  %v21434_v27 = vrot.slane %v7973_v58, %v18853_v62  ;;  %v24975_v28 = vld [vmem:[#allocation78_spill] sm:$0xff] }
 0x51f   : > { %v7998_v6 = vrot.slane %v24968_v0, %v18847_v45  ;;  %v7981_v18 = vcombine.low %v7964_v47, %v7972_v33  ;;  %v24970_v61 = vcombine.low %v21036_v3, %v21039_v57  ;;  %v24971_v24 = vcombine.high %v21036_v3, %v21039_v57 }
 0x520   : > { %v8006_v52 = vrot.slane %v24969_v60, %v18847_v45  ;;  %v3834_v16 = vcombine.high %v24973_v7, %v24972_v41  ;;  %v7939_v21 = vcombine.low %v21424_v63, %v21427_v22  ;;  %v3884_v43 = vcombine.high %v24975_v28, %v24974_v13 }
 0x521   : > { %v8014_v59 = vrot.slane %v24970_v61, %v18847_v45  ;;  %v8022_v46 = vrot.slane %v24971_v24, %v18847_v45  ;;  %v21449_v26 = vrot.slane %v7981_v18, %v18853_v62  ;;  %v8225_v20 = vshrl.u32 %v7889_v48, 16  ;;  %v24980_v18 = vld [vmem:[#allocation64_spill] sm:$0xff] }
 0x522   : > { %v8023_v36 = vcombine.low %v7998_v6, %v8006_v52  ;;  %v24977_v3 = vcombine.low %v21080_v39, %v24976_v2  ;;  %v24978_v47 = vcombine.high %v21080_v39, %v24976_v2  ;;  %v8226_v53 = vshrl.u32 %v7939_v21, 16  ;;  %v24979_v6 = vld [vmem:[#allocation67_spill] sm:$0xff]  ;;  %v24982_v52 = vld [vmem:[#allocation65_spill] sm:$0xff] }
 0x523   : > { %v8031_v8 = vcombine.low %v8014_v59, %v8022_v46  ;;  %v8223_v25 = vpack.i.b16 %v7939_v21, %v7889_v48  ;;  %v7989_v33 = vcombine.low %v21434_v27, %v21449_v26  ;;  %v3978_v23 = vshrl.u32 %v3834_v16, 16  ;;  %v24981_v48 = vld [vmem:[#allocation30_spill] sm:$0xff] }
 0x524   : > { %v8064_v57 = vrot.slane %v24977_v3, %v18847_v45  ;;  %v8072_v37 = vrot.slane %v24978_v47, %v18847_v45  ;;  %v21464_v14 = vrot.slane %v8023_v36, %v18853_v62  ;;  %v3977_v32 = vpack.i.b16 %v3884_v43, %v3834_v16 }
 0x525   : > { %v21467_v58 = vrot.slane %v8031_v8, %v18853_v62  ;;  %v3979_v38 = vshrl.u32 %v3884_v43, 16  ;;  %v8227_v0 = vpack.i.b16 %v8226_v53, %v8225_v20  ;;  %16523 = vmatprep.subr.bf16.mxu0 %v8223_v25  ;;  %v8073_v39 = vcombine.low %v24980_v18, %v24979_v6 }
 0x526   : > { %v8081_v60 = vcombine.low %v8064_v57, %v8072_v37  ;;  %v24983_v61 = vcombine.low %v24981_v48, %v24982_v52  ;;  %16524 = vmatpush3.bf16.msra.mxu0 %v8223_v25  ;;  %16478 = vmatmul.mubr.msk.bf16.gmra.mrb[28].mxu1 %vm8320_vm0, %v3977_v32  ;;  %v24984_v7 = vcombine.high %v24981_v48, %v24982_v52  ;;  %v8241_v28 = vshrl.u32 %v7989_v33, 16 }
 0x527   : > { %v8039_v24 = vcombine.low %v21464_v14, %v21467_v58  ;;  %v3980_v46 = vpack.i.b16 %v3979_v38, %v3978_v23  ;;  %16555 = vmatprep.subr.bf16.mxu1 %v8227_v0  ;;  %v24985_v21 = vcombine.low %v21095_v15, %v21098_v31  ;;  %v8122_v13 = vrot.slane %v15897_v49, %v18847_v45 }
 0x528   : > { %v8098_v59 = vrot.slane %v24983_v61, %v18847_v45  ;;  %v21479_v41 = vrot.slane %v8081_v60, %v18853_v62  ;;  %v8106_v16 = vrot.slane %v24984_v7, %v18847_v45  ;;  %16556 = vmatpush3.bf16.msra.mxu1 %v8227_v0  ;;  %v21492_v8 = vrot.slane %v8073_v39, %v18853_v62 }
 0x529   : > { %v8114_v36 = vrot.slane %v24985_v21, %v18847_v45  ;;  %v8242_v43 = vshrl.u32 %v8039_v24, 16  ;;  %v8239_v20 = vpack.i.b16 %v8039_v24, %v7989_v33  ;;  %16510 = vmatmul.mubr.msk.bf16.gmra.mrb[124].mxu0 %vm8320_vm0, %v3980_v46  ;;  %v7440_v47 = vcombine.high %v21170_v11, %v21178_v56 }
 0x52a   : > { %v8123_v2 = vcombine.low %v8098_v59, %v8106_v16  ;;  %v8089_v15 = vcombine.low %v21492_v8, %v21479_v41  ;;  %v7390_v37 = vcombine.high %v21136_v54, %v21154_v30  ;;  %v24987_v0 = vlaneseq  ;;  %v24989_v54 = vld [vmem:[#allocation18_spill] sm:$0xff] }
 0x52b   : > { %v8131_v3 = vcombine.low %v8114_v36, %v8122_v13  ;;  %v8243_v57 = vpack.i.b16 %v8242_v43, %v8241_v28  ;;  %16525 = vmatprep.subr.bf16.mxu0 %v8239_v20  ;;  %v8154_v25 = vshrl.u32 %v7440_v47, 16  ;;  %v8278_v30 = vadd.s32 64, %v24989_v54 }
 0x52c   : > { %v21499_v31 = vrot.slane %v8123_v2, %v18853_v62  ;;  %16526 = vmatpush3.bf16.msra.mxu0 %v8239_v20  ;;  %v8257_v11 = vshrl.u32 %v8089_v15, 16  ;;  %v8153_v23 = vshrl.u32 %v7390_v37, 16  ;;  %v21508_v38 = vpack.i.b16 %v7440_v47, %v7390_v37  ;;  %v24990_v20 = vld [vmem:[#allocation66_spill] sm:$0xff] }
 0x52d   : > { %v21502_v49 = vrot.slane %v8131_v3, %v18853_v62  ;;  %16557 = vmatprep.subr.bf16.mxu1 %v8243_v57  ;;  %v21511_v6 = vand.u32 127, %v24987_v0  ;;  %v8281_v39 = vadd.s32 88, %v24989_v54  ;;  %v8279_v60 = vadd.s32 72, %v24989_v54 }
 0x52e   : > { %16558 = vmatpush3.bf16.msra.mxu1 %v8243_v57  ;;  %24986 = vst [vmem:[#allocation43_spill] sm:$0xff] %v21508_v38  ;;  %v21513_v18 = vpack.i.b16 %v8154_v25, %v8153_v23  ;;  %v8284_v48 = vadd.s32 112, %v24989_v54  ;;  %v8282_v52 = vadd.s32 96, %v24989_v54  ;;  %v8285_v61 = vadd.s32 120, %v24989_v54 }
 0x52f   : > { %v8139_v53 = vcombine.low %v21499_v31, %v21502_v49  ;;  %v8283_v59 = vadd.s32 104, %v24989_v54  ;;  %vm8296_vm1 = vcmp.ge.s32.totalorder %v8278_v30, %v21511_v6  ;;  %vm8299_vm2 = vcmp.ge.s32.totalorder %v8281_v39, %v21511_v6 }
 0x530   : > { %24988 = vst [vmem:[#allocation48_spill] sm:$0xff] %v21513_v18  ;;  %vm8297_vm3 = vcmp.ge.s32.totalorder %v8279_v60, %v21511_v6  ;;  %v17874_v24 = vmov -1e+30   ;;  %vm8302_vm4 = vcmp.ge.s32.totalorder %v8284_v48, %v21511_v6  ;;  %vm8300_vm5 = vcmp.ge.s32.totalorder %v8282_v52, %v21511_v6 }
 0x531   : > { %v8258_v56 = vshrl.u32 %v8139_v53, 16  ;;  %v8255_v33 = vpack.i.b16 %v8139_v53, %v8089_v15  ;;  %v21528_v46 = vsel %vm8296_vm1, 0.0, %v17874_v24  ;;  %v21531_v7 = vsel %vm8299_vm2, 0.0, %v17874_v24 }
 0x532   : > { %v21534_v16 = vsel %vm8297_vm3, 0.0, %v17874_v24  ;;  %vm8303_vm6 = vcmp.ge.s32.totalorder %v8285_v61, %v21511_v6  ;;  %vm8301_vm7 = vcmp.ge.s32.totalorder %v8283_v59, %v21511_v6  ;;  %v21541_v21 = vsel %vm8302_vm4, 0.0, %v17874_v24 }
 0x533   : > { %v8259_v32 = vpack.i.b16 %v8258_v56, %v8257_v11  ;;  %16527 = vmatprep.subr.bf16.mxu0 %v8255_v33  ;;  %v21544_v36 = vsel %vm8300_vm5, 0.0, %v17874_v24  ;;  %v21547_v13 = vsel %vm8303_vm6, 0.0, %v17874_v24  ;;  %v21550_v28 = vsel %vm8301_vm7, 0.0, %v17874_v24 }
 0x534   : > { %16528 = vmatpush3.bf16.msra.mxu0 %v8255_v33  ;;  %v7490_v43 = vcombine.high %v21201_v12, %v21204_v19  ;;  %v7540_v2 = vcombine.high %v24990_v20, %v21220_v34  ;;  %v7590_v3 = vcombine.high %v21239_v29, %v21247_v35  ;;  %v7640_v57 = vcombine.high %v21260_v5, %v21269_v9 }
 0x535   : > { %16559 = vmatprep.subr.bf16.mxu1 %v8259_v32  ;;  %16577 = vmatprep.subr.bf16.mxu0 %v21508_v38  ;;  %v7690_v47 = vcombine.high %v21293_v42, %v21305_v50  ;;  %v7740_v15 = vcombine.high %v21316_v4, %v21324_v44  ;;  %v7790_v37 = vcombine.high %v21332_v55, %v21345_v17  ;;  %v8272_v60 = vadd.s32 16, %v24989_v54 }
 0x536   : > { %16560 = vmatpush3.bf16.msra.mxu1 %v8259_v32  ;;  %v7840_v12 = vcombine.high %v21360_v51, %v21365_v1  ;;  %v21568_v19 = vpack.i.b16 %v7540_v2, %v7490_v43  ;;  %v21570_v34 = vpack.i.b16 %v7640_v57, %v7590_v3  ;;  %v8169_v29 = vshrl.u32 %v7490_v43, 16 }
 0x537   : > { %16609 = vmatprep.subr.bf16.mxu1 %v21513_v18  ;;  %v8170_v35 = vshrl.u32 %v7540_v2, 16  ;;  %v21572_v53 = vpack.i.b16 %v7740_v15, %v7690_v47  ;;  %v8185_v9 = vshrl.u32 %v7590_v3, 16  ;;  %v8186_v42 = vshrl.u32 %v7640_v57, 16 }
 0x538   : > { %24991 = vst [vmem:[#allocation69_spill] sm:$0xff] %v21568_v19  ;;  %24992 = vst [vmem:[#allocation68_spill] sm:$0xff] %v21570_v34  ;;  %v21574_v5 = vpack.i.b16 %v7840_v12, %v7790_v37  ;;  %v7890_v4 = vcombine.high %v21395_v40, %v21402_v10  ;;  %v7940_v44 = vcombine.high %v21424_v63, %v21427_v22  ;;  %v8201_v55 = vshrl.u32 %v7690_v47, 16 }
 0x539   : > { %24993 = vst [vmem:[#allocation71_spill] sm:$0xff] %v21572_v53  ;;  %v21576_v50 = vpack.i.b16 %v8170_v35, %v8169_v29  ;;  %v21582_v17 = vpack.i.b16 %v8186_v42, %v8185_v9  ;;  %v8202_v51 = vshrl.u32 %v7740_v15, 16  ;;  %v7990_v1 = vcombine.high %v21434_v27, %v21449_v26 }
 0x53a   : > { %24994 = vst [vmem:[#allocation70_spill] sm:$0xff] %v21574_v5  ;;  %v8040_v25 = vcombine.high %v21464_v14, %v21467_v58  ;;  %v21588_v11 = vpack.i.b16 %v7940_v44, %v7890_v4  ;;  %v8217_v56 = vshrl.u32 %v7790_v37, 16  ;;  %v8218_v33 = vshrl.u32 %v7840_v12, 16 }
 0x53b   : > { %24995 = vst [vmem:[#allocation49_spill] sm:$0xff] %v21576_v50  ;;  %24996 = vst [vmem:[#allocation50_spill] sm:$0xff] %v21582_v17  ;;  %v8090_v40 = vcombine.high %v21492_v8, %v21479_v41  ;;  %v21592_v10 = vpack.i.b16 %v8202_v51, %v8201_v55  ;;  %v8140_v22 = vcombine.high %v21499_v31, %v21502_v49  ;;  %v8233_v23 = vshrl.u32 %v7890_v4, 16 }
 0x53c   : > { %24997 = vst [vmem:[#allocation21_spill] sm:$0xff] %v21588_v11  ;;  %v21594_v63 = vpack.i.b16 %v8040_v25, %v7990_v1  ;;  %v21598_v32 = vpack.i.b16 %v8218_v33, %v8217_v56  ;;  %v8234_v27 = vshrl.u32 %v7940_v44, 16  ;;  %v8249_v26 = vshrl.u32 %v7990_v1, 16 }
 0x53d   : > { %24998 = vst [vmem:[#allocation75_spill] sm:$0xff] %v21592_v10  ;;  %v8250_v14 = vshrl.u32 %v8040_v25, 16  ;;  %v21600_v58 = vpack.i.b16 %v8140_v22, %v8090_v40  ;;  %v8265_v0 = vshrl.u32 %v8090_v40, 16  ;;  %v8266_v30 = vshrl.u32 %v8140_v22, 16 }
 0x53e   : > { %24999 = vst [vmem:[#allocation25_spill] sm:$0xff] %v21594_v63  ;;  %25000 = vst [vmem:[#allocation24_spill] sm:$0xff] %v21598_v32  ;;  %v21602_v39 = vpack.i.b16 %v8234_v27, %v8233_v23  ;;  %v8273_v31 = vadd.s32 24, %v24989_v54  ;;  %vm8290_vm8 = vcmp.ge.s32.totalorder %v8272_v60, %v21511_v6  ;;  %v8271_v49 = vadd.s32 8, %v24989_v54 }
 0x53f   : > { %25001 = vst [vmem:[#allocation82_spill] sm:$0xff] %v21600_v58  ;;  %v21604_v41 = vpack.i.b16 %v8250_v14, %v8249_v26  ;;  %v21606_v8 = vpack.i.b16 %v8266_v30, %v8265_v0  ;;  %v21614_v48 = vsel %vm8290_vm8, 0.0, %v17874_v24  ;;  %vm8288_vm10 = vcmp.ge.s32.totalorder %v24989_v54, %v21511_v6 }
 0x540   : > { %25002 = vst [vmem:[#allocation79_spill] sm:$0xff] %v21602_v39  ;;  %vm8291_vm9 = vcmp.ge.s32.totalorder %v8273_v31, %v21511_v6  ;;  %vm8289_vm11 = vcmp.ge.s32.totalorder %v8271_v49, %v21511_v6  ;;  %v21626_v20 = vsel %vm8288_vm10, 0.0, %v17874_v24  ;;  %v8276_v51 = vadd.s32 48, %v24989_v54 }
 0x541   : > { %25003 = vst [vmem:[#allocation29_spill] sm:$0xff] %v21604_v41  ;;  %25004 = vst [vmem:[#allocation28_spill] sm:$0xff] %v21606_v8  ;;  %v16403_v52 = vpop.f32.mrb[0].mxu1  ;;  %v21619_v61 = vsel %vm8291_vm9, 0.0, %v17874_v24  ;;  %v21633_v37 = vsel %vm8289_vm11, 0.0, %v17874_v24  ;;  %v8277_v1 = vadd.s32 56, %v24989_v54 }
 0x542   : > { %v21622_v59 = vadd.f32 %v16403_v52, %v21614_v48  ;;  %v8403_v43 = vpop.f32.mrb[1].mxu1  ;;  %vm8294_vm12 = vcmp.ge.s32.totalorder %v8276_v51, %v21511_v6  ;;  %v8274_v25 = vadd.s32 32, %v24989_v54  ;;  %v8275_v56 = vadd.s32 40, %v24989_v54 }
 0x543   : > { %v16404_v2 = vpop.f32.mrb[2].mxu1  ;;  %v16435_v3 = vpop.f32.mrb[96].mxu0  ;;  %v21636_v29 = vadd.f32 %v8403_v43, %v21626_v20  ;;  %vm8295_vm13 = vcmp.ge.s32.totalorder %v8277_v1, %v21511_v6  ;;  %v21667_v33 = vsel %vm8294_vm12, 0.0, %v17874_v24  ;;  %v8280_v51 = vadd.s32 80, %v24989_v54 }
 0x544   : > { %v21629_v57 = vadd.f32 %v16404_v2, %v21619_v61  ;;  %v8406_v47 = vpop.f32.mrb[3].mxu1  ;;  %8905 = vmax.xlane.f32.xlu0 %v21622_v59  ;;  %v8548_v15 = vpop.f32.mrb[97].mxu0  ;;  %v21644_v42 = vadd.f32 %v16435_v3, %v21614_v48  ;;  %vm8292_vm14 = vcmp.ge.s32.totalorder %v8274_v25, %v21511_v6  ;;  %v21671_v22 = vsel %vm8295_vm13, 0.0, %v17874_v24 }
 0x545   : > { %v16436_v12 = vpop.f32.mrb[98].mxu0  ;;  %v21640_v9 = vadd.f32 %v8406_v47, %v21633_v37  ;;  %v21652_v44 = vadd.f32 %v8548_v15, %v21626_v20  ;;  %vm8293_vm15 = vcmp.ge.s32.totalorder %v8275_v56, %v21511_v6  ;;  %v21678_v26 = vsel %vm8292_vm14, 0.0, %v17874_v24 }
 0x546   : > { %v8551_v35 = vpop.f32.mrb[99].mxu0  ;;  %8907 = vmax.xlane.f32.xlu1 %v21629_v57  ;;  %v21648_v4 = vadd.f32 %v16436_v12, %v21619_v61  ;;  %v21685_v60 = vsel %vm8293_vm15, 0.0, %v17874_v24  ;;  %vm8298_vm1 = vcmp.ge.s32.totalorder %v8280_v51, %v21511_v6 }
 0x547   : > { %v21657_v55 = vadd.f32 %v8551_v35, %v21633_v37  ;;  %v21715_v1 = vsel %vm8298_vm1, 0.0, %v17874_v24 }
 0x548   : > { %8901 = vmax.xlane.f32.xlu0 %v21636_v29 }
 0x54a   : > { %8903 = vmax.xlane.f32.xlu1 %v21640_v9 }
 0x54c   : > { %8937 = vmax.xlane.f32.xlu0 %v21644_v42 }
 0x54e   : > { %8939 = vmax.xlane.f32.xlu1 %v21648_v4 }
 0x550   : > { %8933 = vmax.xlane.f32.xlu0 %v21652_v44 }
 0x554   : > { %8935 = vmax.xlane.f32.xlu0 %v21657_v55 }
 0x560   : > { %v16407_v40 = vpop.f32.mrb[4].mxu1 }
 0x561   : > { %v21674_v23 = vadd.f32 %v16407_v40, %v21667_v33  ;;  %v8419_v27 = vpop.f32.mrb[5].mxu1 }
 0x562   : > { %v16408_v14 = vpop.f32.mrb[6].mxu1  ;;  %v21688_v31 = vadd.f32 %v8419_v27, %v21678_v26 }
 0x563   : > { %v21681_v0 = vadd.f32 %v16408_v14, %v21671_v22  ;;  %v8422_v30 = vpop.f32.mrb[7].mxu1  ;;  %8913 = vmax.xlane.f32.xlu0 %v21674_v23 }
 0x564   : > { %v21692_v49 = vadd.f32 %v8422_v30, %v21685_v60 }
 0x565   : > { %8915 = vmax.xlane.f32.xlu1 %v21681_v0 }
 0x567   : > { %8909 = vmax.xlane.f32.xlu0 %v21688_v31 }
 0x569   : > { %v16439_v52 = vpop.f32.mrb[100].mxu0  ;;  %8911 = vmax.xlane.f32.xlu1 %v21692_v49 }
 0x56a   : > { %v21696_v43 = vadd.f32 %v16439_v52, %v21667_v33  ;;  %v8564_v2 = vpop.f32.mrb[101].mxu0 }
 0x56b   : > { %v16440_v3 = vpop.f32.mrb[102].mxu0  ;;  %v21704_v12 = vadd.f32 %v8564_v2, %v21678_v26 }
 0x56c   : > { %v21700_v47 = vadd.f32 %v16440_v3, %v21671_v22  ;;  %v8567_v15 = vpop.f32.mrb[103].mxu0  ;;  %8945 = vmax.xlane.f32.xlu0 %v21696_v43 }
 0x56d   : > { %v21708_v35 = vadd.f32 %v8567_v15, %v21685_v60 }
 0x56e   : > { %8947 = vmax.xlane.f32.xlu1 %v21700_v47 }
 0x570   : > { %8941 = vmax.xlane.f32.xlu0 %v21704_v12 }
 0x572   : > { %8943 = vmax.xlane.f32.xlu1 %v21708_v35 }
 0x582   : > { %v16411_v25 = vpop.f32.mrb[8].mxu1 }
 0x583   : > { %v21718_v56 = vadd.f32 %v16411_v25, %v21715_v1  ;;  %v8435_v40 = vpop.f32.mrb[9].mxu1 }
 0x584   : > { %v16412_v27 = vpop.f32.mrb[10].mxu1  ;;  %v21725_v6 = vadd.f32 %v8435_v40, %v21528_v46 }
 0x585   : > { %v16443_v14 = vpop.f32.mrb[104].mxu0  ;;  %v21721_v30 = vadd.f32 %v16412_v27, %v21531_v7  ;;  %v8438_v52 = vpop.f32.mrb[11].mxu1  ;;  %8921 = vmax.xlane.f32.xlu0 %v21718_v56 }
 0x586   : > { %v8580_v2 = vpop.f32.mrb[105].mxu0  ;;  %v21729_v15 = vadd.f32 %v8438_v52, %v21534_v16  ;;  %v21733_v51 = vadd.f32 %v16443_v14, %v21715_v1 }
 0x587   : > { %v16444_v3 = vpop.f32.mrb[106].mxu0  ;;  %8923 = vmax.xlane.f32.xlu1 %v21721_v30  ;;  %v21741_v40 = vadd.f32 %v8580_v2, %v21528_v46 }
 0x588   : > { %v8583_v24 = vpop.f32.mrb[107].mxu0  ;;  %v21737_v25 = vadd.f32 %v16444_v3, %v21531_v7 }
 0x589   : > { %8917 = vmax.xlane.f32.xlu0 %v21725_v6  ;;  %v21745_v27 = vadd.f32 %v8583_v24, %v21534_v16 }
 0x58b   : > { %8919 = vmax.xlane.f32.xlu1 %v21729_v15 }
 0x58d   : > { %8953 = vmax.xlane.f32.xlu0 %v21733_v51 }
 0x58f   : > { %8955 = vmax.xlane.f32.xlu1 %v21737_v25 }
 0x591   : > { %8949 = vmax.xlane.f32.xlu0 %v21741_v40 }
 0x593   : > { %8951 = vmax.xlane.f32.xlu1 %v21745_v27 }
 0x59f   : > { %v16415_v14 = vpop.f32.mrb[12].mxu1 }
 0x5a0   : > { %v21750_v52 = vadd.f32 %v16415_v14, %v21541_v21  ;;  %v8451_v3 = vpop.f32.mrb[13].mxu1 }
 0x5a1   : > { %v16416_v54 = vpop.f32.mrb[14].mxu1  ;;  %v21757_v24 = vadd.f32 %v8451_v3, %v21544_v36 }
 0x5a2   : > { %v21753_v62 = vadd.f32 %v16416_v54, %v21547_v13  ;;  %v8454_v2 = vpop.f32.mrb[15].mxu1  ;;  %8929 = vmax.xlane.f32.xlu0 %v21750_v52  ;;  %v16447_v45 = vpop.f32.mrb[108].mxu0 }
 0x5a3   : > { %25005 = vst [vmem:[#allocation33_spill] sm:$0xff] %v21757_v24  ;;  %v8596_v8 = vpop.f32.mrb[109].mxu0  ;;  %v21761_v39 = vadd.f32 %v8454_v2, %v21550_v28  ;;  %v21765_v54 = vadd.f32 %v16447_v45, %v21541_v21 }
 0x5a4   : > { %8931 = vmax.xlane.f32.xlu1 %v21753_v62  ;;  %v16448_v41 = vpop.f32.mrb[110].mxu0  ;;  %v21773_v3 = vadd.f32 %v8596_v8, %v21544_v36 }
 0x5a5   : > { %v8599_v14 = vpop.f32.mrb[111].mxu0  ;;  %25006 = vst [vmem:[#allocation31_spill] sm:$0xff] %v21765_v54  ;;  %v21769_v58 = vadd.f32 %v16448_v41, %v21547_v13 }
 0x5a6   : > { %8925 = vmax.xlane.f32.xlu0 %v21757_v24  ;;  %25007 = vst [vmem:[#allocation86_spill] sm:$0xff] %v21773_v3  ;;  %v21777_v2 = vadd.f32 %v8599_v14, %v21550_v28 }
 0x5a8   : > { %8927 = vmax.xlane.f32.xlu1 %v21761_v39  ;;  %25008 = vst [vmem:[#allocation87_spill] sm:$0xff] %v21777_v2 }
 0x5aa   : > { %8961 = vmax.xlane.f32.xlu0 %v21765_v54 }
 0x5ac   : > { %8963 = vmax.xlane.f32.xlu1 %v21769_v58 }
 0x5ae   : > { %8957 = vmax.xlane.f32.xlu0 %v21773_v3 }
 0x5b0   : > { %8959 = vmax.xlane.f32.xlu1 %v21777_v2 }
 0x5d2   : > { %v16467_v45 = vpop.f32.mrb[16].mxu1  ;;  %v16499_v11 = vpop.f32.mrb[112].mxu0 }
 0x5d3   : > { %v21782_v32 = vadd.f32 %v16467_v45, %v21614_v48  ;;  %v8693_v41 = vpop.f32.mrb[17].mxu1  ;;  %v8838_v17 = vpop.f32.mrb[113].mxu0 }
 0x5d4   : > { %v16468_v63 = vpop.f32.mrb[18].mxu1  ;;  %v21789_v14 = vadd.f32 %v8693_v41, %v21626_v20  ;;  %v16500_v5 = vpop.f32.mrb[114].mxu0 }
 0x5d5   : > { %25009 = vst [vmem:[#allocation52_spill] sm:$0xff] %v21782_v32  ;;  %v21785_v10 = vadd.f32 %v16468_v63, %v21619_v61  ;;  %v8696_v8 = vpop.f32.mrb[19].mxu1  ;;  %8969 = vmax.xlane.f32.xlu0 %v21782_v32  ;;  %v8841_v45 = vpop.f32.mrb[115].mxu0  ;;  %v21797_v63 = vadd.f32 %v16499_v11, %v21614_v48  ;;  %v21801_v41 = vadd.f32 %v16500_v5, %v21619_v61 }
 0x5d6   : > { %25011 = vst [vmem:[#allocation89_spill] sm:$0xff] %v21789_v14  ;;  %v21793_v50 = vadd.f32 %v8696_v8, %v21633_v37  ;;  %v21805_v8 = vadd.f32 %v8838_v17, %v21626_v20  ;;  %v21809_v11 = vadd.f32 %v8841_v45, %v21633_v37  ;;  %v21820_v20 = vpop.xlane.xlu0 %8905 }
 0x5d7   : > { %25010 = vst [vmem:[#allocation53_spill] sm:$0xff] %v21785_v10  ;;  %8971 = vmax.xlane.f32.xlu1 %v21785_v10  ;;  %25013 = vst [vmem:[#allocation32_spill] sm:$0xff] %v21797_v63 }
 0x5d8   : > { %25012 = vst [vmem:[#allocation88_spill] sm:$0xff] %v21793_v50  ;;  %25014 = vst [vmem:[#allocation22_spill] sm:$0xff] %v21801_v41 }
 0x5d9   : > { %8965 = vmax.xlane.f32.xlu0 %v21789_v14  ;;  %25015 = vst [vmem:[#allocation74_spill] sm:$0xff] %v21805_v8  ;;  %25016 = vst [vmem:[#allocation26_spill] sm:$0xff] %v21809_v11 }
 0x5da   : > { %v16471_v18 = vpop.f32.mrb[20].mxu1 }
 0x5db   : > { %v8709_v53 = vpop.f32.mrb[21].mxu1  ;;  %8967 = vmax.xlane.f32.xlu1 %v21793_v50  ;;  %v16503_v38 = vpop.f32.mrb[116].mxu0  ;;  %v21813_v5 = vadd.f32 %v16471_v18, %v21667_v33 }
 0x5dc   : > { %v16472_v34 = vpop.f32.mrb[22].mxu1  ;;  %v8854_v10 = vpop.f32.mrb[117].mxu0  ;;  %v21823_v37 = vadd.f32 %v8709_v53, %v21678_v26 }
 0x5dd   : > { %v8712_v19 = vpop.f32.mrb[23].mxu1  ;;  %9001 = vmax.xlane.f32.xlu0 %v21797_v63  ;;  %v16504_v14 = vpop.f32.mrb[118].mxu0  ;;  %25017 = vst [vmem:[#allocation76_spill] sm:$0xff] %v21813_v5  ;;  %v21817_v61 = vadd.f32 %v16472_v34, %v21671_v22 }
 0x5de   : > { %v8857_v48 = vpop.f32.mrb[119].mxu0  ;;  %25019 = vst [vmem:[#allocation56_spill] sm:$0xff] %v21823_v37  ;;  %v21834_v53 = vpop.xlane.xlu0 %8901 }
 0x5df   : > { %9003 = vmax.xlane.f32.xlu1 %v21801_v41  ;;  %25018 = vst [vmem:[#allocation57_spill] sm:$0xff] %v21817_v61 }
 0x5e1   : > { %8997 = vmax.xlane.f32.xlu0 %v21805_v8  ;;  %v8908_v8 = vpop.xlane.xlu1 %8907 }
 0x5e3   : > { %8999 = vmax.xlane.f32.xlu1 %v21809_v11  ;;  %v21827_v11 = vadd.f32 %v8712_v19, %v21685_v60  ;;  %v21841_v19 = vadd.f32 %v8854_v10, %v21678_v26 }
 0x5e5   : > { %8977 = vmax.xlane.f32.xlu0 %v21813_v5  ;;  %25020 = vst [vmem:[#allocation54_spill] sm:$0xff] %v21827_v11  ;;  %v21831_v5 = vadd.f32 %v16503_v38, %v21667_v33  ;;  %v8904_v3 = vpop.xlane.xlu1 %8903  ;;  %25023 = vst [vmem:[#allocation36_spill] sm:$0xff] %v21841_v19  ;;  %v21848_v38 = vpop.xlane.xlu0 %8937 }
 0x5e7   : > { %8979 = vmax.xlane.f32.xlu1 %v21817_v61  ;;  %25021 = vst [vmem:[#allocation55_spill] sm:$0xff] %v21831_v5  ;;  %v21837_v61 = vadd.f32 %v16504_v14, %v21671_v22 }
 0x5e8   : > { %v16475_v17 = vpop.f32.mrb[24].mxu1 }
 0x5e9   : > { %v8725_v41 = vpop.f32.mrb[25].mxu1  ;;  %8973 = vmax.xlane.f32.xlu0 %v21823_v37  ;;  %25022 = vst [vmem:[#allocation34_spill] sm:$0xff] %v21837_v61  ;;  %v21845_v37 = vadd.f32 %v8857_v48, %v21685_v60  ;;  %v21851_v33 = vadd.f32 %v16475_v17, %v21715_v1 }
 0x5ea   : > { %v16476_v45 = vpop.f32.mrb[26].mxu1 }
 0x5eb   : > { %v16507_v18 = vpop.f32.mrb[120].mxu0  ;;  %v8728_v63 = vpop.f32.mrb[27].mxu1  ;;  %8975 = vmax.xlane.f32.xlu1 %v21827_v11  ;;  %25024 = vst [vmem:[#allocation40_spill] sm:$0xff] %v21845_v37  ;;  %25025 = vst [vmem:[#allocation73_spill] sm:$0xff] %v21851_v33  ;;  %v21855_v10 = vadd.f32 %v16476_v45, %v21531_v7 }
 0x5ec   : > { %v8870_v34 = vpop.f32.mrb[121].mxu0  ;;  %v21864_v11 = vpop.xlane.xlu0 %8933  ;;  %v21869_v45 = vadd.f32 %v8728_v63, %v21534_v16  ;;  %v21874_v54 = vadd.f32 %v16507_v18, %v21715_v1  ;;  %v9030_v63 = vsub.f32 %v21640_v9, %v8904_v3 }
 0x5ed   : > { %v16508_v50 = vpop.f32.mrb[122].mxu0  ;;  %9009 = vmax.xlane.f32.xlu0 %v21831_v5  ;;  %v8940_v5 = vpop.xlane.xlu1 %8939  ;;  %25026 = vst [vmem:[#allocation72_spill] sm:$0xff] %v21855_v10 }
 0x5ee   : > { %v8873_v32 = vpop.f32.mrb[123].mxu0 }
 0x5ef   : > { %9011 = vmax.xlane.f32.xlu1 %v21837_v61  ;;  %v21894_v1 = vadd.f32 %v8873_v32, %v21534_v16  ;;  %v9031_v16 = vsub.f32 %v21622_v59, %v21820_v20 }
 0x5f0   : > { %v21881_v24 = vpop.xlane.xlu0 %8935 }
 0x5f1   : > { %9005 = vmax.xlane.f32.xlu0 %v21841_v19  ;;  %v21861_v19 = vadd.f32 %v8725_v41, %v21528_v46  ;;  %v21878_v41 = vadd.f32 %v16508_v50, %v21531_v7  ;;  %v9095_v7 = vmul.f32 1.442695, %v9030_v63  ;;  %v9048_v50 = vsub.f32 %v21648_v4, %v8940_v5 }
 0x5f2   : > { %v9097_v59 = vmul.f32 1.442695, %v9031_v16 }
 0x5f3   : > { %9007 = vmax.xlane.f32.xlu1 %v21845_v37  ;;  %25027 = vst [vmem:[#allocation23_spill] sm:$0xff] %v21861_v19 }
 0x5f4   : > { %v21897_v3 = vpop.xlane.xlu0 %8913 }
 0x5f5   : > { %8985 = vmax.xlane.f32.xlu0 %v21851_v33  ;;  %v9032_v33 = vsub.f32 %v21629_v57, %v8908_v8  ;;  %v9131_v8 = vmul.f32 1.442695, %v9048_v50 }
 0x5f7   : > { %8987 = vmax.xlane.f32.xlu1 %v21855_v10  ;;  %v8916_v10 = vpop.xlane.xlu1 %8915  ;;  %v9099_v2 = vmul.f32 1.442695, %v9032_v33 }
 0x5f8   : > { %v21914_v5 = vpop.xlane.xlu0 %8909 }
 0x5f9   : > { %v16479_v22 = vpop.f32.mrb[28].mxu1  ;;  %8981 = vmax.xlane.f32.xlu0 %v21861_v19  ;;  %v21885_v19 = vadd.f32 %v8870_v34, %v21528_v46  ;;  %17319 = vpow2.f32 %v9099_v2  ;;  %v9036_v2 = vsub.f32 %v21681_v0, %v8916_v10 }
 0x5fa   : > { %v8741_v14 = vpop.f32.mrb[29].mxu1  ;;  %17321 = vpow2.f32 %v9095_v7  ;;  %v21905_v18 = vadd.f32 %v16479_v22, %v21541_v21  ;;  %v9045_v7 = vsub.f32 %v21652_v44, %v21864_v11 }
 0x5fb   : > { %v16480_v26 = vpop.f32.mrb[30].mxu1  ;;  %8983 = vmax.xlane.f32.xlu1 %v21869_v45  ;;  %v8912_v9 = vpop.xlane.xlu1 %8911  ;;  %17323 = vpow2.f32 %v9131_v8  ;;  %v9107_v34 = vmul.f32 1.442695, %v9036_v2  ;;  %v21918_v33 = vadd.f32 %v8741_v14, %v21544_v36 }
 0x5fc   : > { %v16511_v61 = vpop.f32.mrb[124].mxu0  ;;  %v8744_v60 = vpop.f32.mrb[31].mxu1  ;;  %v21889_v57 = vadd.f32 %v16480_v26, %v21547_v13  ;;  %v9034_v0 = vsub.f32 %v21692_v49, %v8912_v9  ;;  %v9125_v50 = vmul.f32 1.442695, %v9045_v7  ;;  %v9046_v9 = vsub.f32 %v21657_v55, %v21881_v24 }
 0x5fd   : > { %v21858_v48 = vpop.f32.mrb[125].mxu0  ;;  %9017 = vmax.xlane.f32.xlu0 %v21874_v54  ;;  %v21900_v46 = vadd.f32 %v8744_v60, %v21550_v28  ;;  %17325 = vpow2.f32 %v9107_v34  ;;  %v21928_v26 = vadd.f32 %v16511_v61, %v21541_v21  ;;  %v21931_v14 = vpop.xlane.xlu0 %8945 }
 0x5fe   : > { %v16512_v17 = vpop.f32.mrb[126].mxu0  ;;  %v9103_v20 = vmul.f32 1.442695, %v9034_v0  ;;  %17327 = vpow2.f32 %v9097_v59  ;;  %v21941_v21 = vadd.f32 %v21858_v48, %v21544_v36  ;;  %v9127_v16 = vmul.f32 1.442695, %v9046_v9 }
 0x5ff   : > { %v21866_v37 = vpop.f32.mrb[127].mxu0  ;;  %9019 = vmax.xlane.f32.xlu1 %v21878_v41  ;;  %v21911_v32 = vadd.f32 %v16512_v17, %v21547_v13  ;;  %v8948_v4 = vpop.xlane.xlu1 %8947  ;;  %v9029_v13 = vsub.f32 %v21636_v29, %v21834_v53  ;;  %v9047_v29 = vsub.f32 %v21644_v42, %v21848_v38 }
 0x600   : > { %v9052_v10 = vsub.f32 %v21700_v47, %v8948_v4  ;;  %17329 = vpow2.f32 %v9103_v20  ;;  %v9035_v4 = vsub.f32 %v21674_v23, %v21897_v3 }
 0x601   : > { %9013 = vmax.xlane.f32.xlu0 %v21885_v19  ;;  %v9093_v17 = vmul.f32 1.442695, %v9029_v13  ;;  %v9129_v63 = vmul.f32 1.442695, %v9047_v29  ;;  %v8942_v42 = vpop.xlane.xlu0 %8941  ;;  %v9033_v13 = vsub.f32 %v21688_v31, %v21914_v5  ;;  %v9051_v29 = vsub.f32 %v21696_v43, %v21931_v14 }
 0x602   : > { %v9139_v53 = vmul.f32 1.442695, %v9052_v10  ;;  %v9105_v59 = vmul.f32 1.442695, %v9035_v4  ;;  %v9049_v7 = vsub.f32 %v21704_v12, %v8942_v42 }
 0x603   : > { %8995 = vmax.xlane.f32.xlu1 %v21889_v57  ;;  %v21921_v22 = vpop.eup %17319  ;;  %v8944_v49 = vpop.xlane.xlu1 %8943  ;;  %17331 = vpow2.f32 %v9093_v17  ;;  %v9101_v17 = vmul.f32 1.442695, %v9033_v13 }
 0x604   : > { %v21933_v60 = vpop.eup %17321  ;;  %v9050_v47 = vsub.f32 %v21708_v35, %v8944_v49  ;;  %17333 = vpow2.f32 %v9139_v53  ;;  %v21951_v35 = vadd.f32 %v21866_v37, %v21550_v28  ;;  %v9133_v14 = vmul.f32 1.442695, %v9049_v7 }
 0x605   : > { %9015 = vmax.xlane.f32.xlu0 %v21894_v1  ;;  %v21944_v61 = vpop.eup %17323  ;;  %17335 = vpow2.f32 %v9129_v63  ;;  %v9137_v63 = vmul.f32 1.442695, %v9051_v29 }
 0x606   : > { %v9135_v38 = vmul.f32 1.442695, %v9050_v47 }
 0x607   : > { %8991 = vmax.xlane.f32.xlu1 %v21900_v46  ;;  %v21954_v48 = vpop.eup %17325 }
 0x608   : > { %v21960_v11 = vpop.eup %17327  ;;  %17337 = vpow2.f32 %v9135_v38 }
 0x609   : > { %8993 = vmax.xlane.f32.xlu0 %v21905_v18  ;;  %17339 = vpow2.f32 %v9125_v50 }
 0x60a   : > { %v21963_v2 = vpop.eup %17329 }
 0x60b   : > { %9027 = vmax.xlane.f32.xlu1 %v21911_v32 }
 0x60d   : > { %8989 = vmax.xlane.f32.xlu0 %v21918_v33 }
 0x60f   : > { %9227 = vadd.xlane.f32.xlu1 %v21921_v22 }
 0x611   : > { %9025 = vmax.xlane.f32.xlu0 %v21928_v26 }
 0x612   : > { %v8922_v37 = vpop.xlane.xlu0 %8921 }
 0x613   : > { %9223 = vadd.xlane.f32.xlu1 %v21933_v60  ;;  %v9039_v38 = vsub.f32 %v21718_v56, %v8922_v37 }
 0x614   : > { %v8924_v36 = vpop.xlane.xlu1 %8923 }
 0x615   : > { %9021 = vmax.xlane.f32.xlu0 %v21941_v21  ;;  %v9040_v44 = vsub.f32 %v21721_v30, %v8924_v36  ;;  %v21969_v30 = vpop.eup %17331  ;;  %v9113_v42 = vmul.f32 1.442695, %v9039_v38 }
 0x616   : > { %v21972_v0 = vpop.eup %17333 }
 0x617   : > { %9259 = vadd.xlane.f32.xlu1 %v21944_v61  ;;  %v9115_v8 = vmul.f32 1.442695, %v9040_v44  ;;  %v21978_v3 = vpop.eup %17335 }
 0x618   : > { %v8920_v28 = vpop.xlane.xlu1 %8919  ;;  %v21981_v49 = vpop.eup %17337 }
 0x619   : > { %9023 = vmax.xlane.f32.xlu0 %v21951_v35  ;;  %v9038_v55 = vsub.f32 %v21729_v15, %v8920_v28  ;;  %17341 = vpow2.f32 %v9115_v8  ;;  %v8918_v15 = vpop.xlane.xlu0 %8917 }
 0x61a   : > { %17343 = vpow2.f32 %v9127_v16  ;;  %v9037_v9 = vsub.f32 %v21725_v6, %v8918_v15 }
 0x61b   : > { %9235 = vadd.xlane.f32.xlu1 %v21954_v48  ;;  %v9111_v24 = vmul.f32 1.442695, %v9038_v55 }
 0x61c   : > { %v8956_v34 = vpop.xlane.xlu1 %8955  ;;  %v9109_v4 = vmul.f32 1.442695, %v9037_v9  ;;  %v25030_v9 = vld [vmem:[#allocation31_spill] sm:$0xff] }
 0x61d   : > { %9225 = vadd.xlane.f32.xlu0 %v21960_v11  ;;  %v9056_v23 = vsub.f32 %v21737_v25, %v8956_v34  ;;  %17345 = vpow2.f32 %v9111_v24  ;;  %v21987_v25 = vpop.eup %17339  ;;  %v8954_v53 = vpop.xlane.xlu0 %8953 }
 0x61e   : > { %17347 = vpow2.f32 %v9105_v59  ;;  %v9055_v55 = vsub.f32 %v21733_v51, %v8954_v53 }
 0x61f   : > { %9231 = vadd.xlane.f32.xlu1 %v21963_v2  ;;  %v9147_v20 = vmul.f32 1.442695, %v9056_v23 }
 0x620   : > { %v8952_v10 = vpop.xlane.xlu1 %8951  ;;  %v9145_v59 = vmul.f32 1.442695, %v9055_v55  ;;  %v25032_v55 = vld [vmem:[#allocation86_spill] sm:$0xff] }
 0x621   : > { %9221 = vadd.xlane.f32.xlu0 %v21969_v30  ;;  %v9054_v31 = vsub.f32 %v21745_v27, %v8952_v10  ;;  %17349 = vpow2.f32 %v9147_v20  ;;  %v8950_v36 = vpop.xlane.xlu0 %8949 }
 0x622   : > { %17351 = vpow2.f32 %v9101_v17  ;;  %v9053_v13 = vsub.f32 %v21741_v40, %v8950_v36 }
 0x623   : > { %9267 = vadd.xlane.f32.xlu1 %v21972_v0  ;;  %v9143_v5 = vmul.f32 1.442695, %v9054_v31  ;;  %v21990_v47 = vpop.eup %17341  ;;  %v25028_v31 = vld [vmem:[#allocation87_spill] sm:$0xff] }
 0x624   : > { %v21994_v43 = vpop.eup %17343 }
 0x625   : > { %9257 = vadd.xlane.f32.xlu0 %v21978_v3  ;;  %17353 = vpow2.f32 %v9143_v5 }
 0x626   : > { %17355 = vpow2.f32 %v9137_v63 }
 0x627   : > { %9263 = vadd.xlane.f32.xlu1 %v21981_v49  ;;  %v21997_v27 = vpop.eup %17345  ;;  %17357 = vpow2.f32 %v9133_v14  ;;  %v25029_v14 = vld [vmem:[#allocation33_spill] sm:$0xff] }
 0x628   : > { %v22001_v50 = vpop.eup %17347  ;;  %17359 = vpow2.f32 %v9113_v42 }
 0x629   : > { %9253 = vadd.xlane.f32.xlu0 %v21987_v25 }
 0x62b   : > { %9243 = vadd.xlane.f32.xlu1 %v21990_v47  ;;  %v22004_v12 = vpop.eup %17349 }
 0x62c   : > { %v22009_v28 = vpop.eup %17351 }
 0x62d   : > { %9255 = vadd.xlane.f32.xlu0 %v21994_v43 }
 0x62f   : > { %9239 = vadd.xlane.f32.xlu1 %v21997_v27  ;;  %v8930_v37 = vpop.xlane.xlu0 %8929  ;;  %v22012_v16 = vpop.eup %17353 }
 0x630   : > { %v22017_v34 = vpop.eup %17355  ;;  %v9043_v17 = vsub.f32 %v21750_v52, %v8930_v37 }
 0x631   : > { %v8932_v44 = vpop.xlane.xlu1 %8931  ;;  %9233 = vadd.xlane.f32.xlu0 %v22001_v50  ;;  %v22023_v20 = vpop.eup %17357 }
 0x632   : > { %v9044_v8 = vsub.f32 %v21753_v62, %v8932_v44  ;;  %v22028_v5 = vpop.eup %17359  ;;  %v9121_v7 = vmul.f32 1.442695, %v9043_v17 }
 0x633   : > { %9275 = vadd.xlane.f32.xlu1 %v22004_v12  ;;  %v8926_v15 = vpop.xlane.xlu0 %8925 }
 0x634   : > { %v9123_v56 = vmul.f32 1.442695, %v9044_v8  ;;  %v9041_v38 = vsub.f32 %v25029_v14, %v8926_v15  ;;  %v25035_v14 = vld [vmem:[#allocation89_spill] sm:$0xff] }
 0x635   : > { %v8928_v24 = vpop.xlane.xlu1 %8927  ;;  %9229 = vadd.xlane.f32.xlu0 %v22009_v28 }
 0x636   : > { %17361 = vpow2.f32 %v9123_v56  ;;  %v9042_v6 = vsub.f32 %v21761_v39, %v8928_v24  ;;  %v9141_v39 = vmul.f32 1.442695, %v9053_v13  ;;  %v9117_v42 = vmul.f32 1.442695, %v9041_v38 }
 0x637   : > { %9271 = vadd.xlane.f32.xlu1 %v22012_v16  ;;  %17363 = vpow2.f32 %v9109_v4 }
 0x638   : > { %v9119_v62 = vmul.f32 1.442695, %v9042_v6 }
 0x639   : > { %v8964_v23 = vpop.xlane.xlu1 %8963  ;;  %9265 = vadd.xlane.f32.xlu0 %v22017_v34 }
 0x63a   : > { %17365 = vpow2.f32 %v9119_v62  ;;  %v9060_v51 = vsub.f32 %v21769_v58, %v8964_v23  ;;  %v8962_v58 = vpop.xlane.xlu0 %8961 }
 0x63b   : > { %17367 = vpow2.f32 %v9145_v59  ;;  %v9059_v44 = vsub.f32 %v25030_v9, %v8962_v58  ;;  %v25036_v9 = vld [vmem:[#allocation88_spill] sm:$0xff] }
 0x63c   : > { %v9155_v10 = vmul.f32 1.442695, %v9060_v51 }
 0x63d   : > { %v8960_v29 = vpop.xlane.xlu1 %8959  ;;  %9261 = vadd.xlane.f32.xlu0 %v22023_v20  ;;  %v9153_v4 = vmul.f32 1.442695, %v9059_v44 }
 0x63e   : > { %17369 = vpow2.f32 %v9155_v10  ;;  %v9058_v40 = vsub.f32 %v25028_v31, %v8960_v29  ;;  %v8958_v8 = vpop.xlane.xlu0 %8957  ;;  %v25034_v31 = vld [vmem:[#allocation53_spill] sm:$0xff] }
 0x63f   : > { %17371 = vpow2.f32 %v9141_v39  ;;  %v9057_v24 = vsub.f32 %v25032_v55, %v8958_v8  ;;  %v25033_v39 = vld [vmem:[#allocation52_spill] sm:$0xff] }
 0x640   : > { %v22030_v53 = vpop.eup %17361  ;;  %v9151_v63 = vmul.f32 1.442695, %v9058_v40 }
 0x641   : > { %9251 = vadd.xlane.f32.xlu1 %v22030_v53  ;;  %9241 = vadd.xlane.f32.xlu0 %v22028_v5  ;;  %v22035_v52 = vpop.eup %17363  ;;  %v9149_v59 = vmul.f32 1.442695, %v9057_v24 }
 0x642   : > { %17373 = vpow2.f32 %v9151_v63 }
 0x643   : > { %17375 = vpow2.f32 %v9121_v7 }
 0x644   : > { %v22037_v36 = vpop.eup %17365  ;;  %17377 = vpow2.f32 %v9117_v42 }
 0x645   : > { %9247 = vadd.xlane.f32.xlu1 %v22037_v36  ;;  %9237 = vadd.xlane.f32.xlu0 %v22035_v52  ;;  %v22042_v56 = vpop.eup %17367  ;;  %17379 = vpow2.f32 %v9153_v4 }
 0x646   : > { %17381 = vpow2.f32 %v9149_v59 }
 0x648   : > { %v22044_v37 = vpop.eup %17369 }
 0x649   : > { %25031 = vst [vmem:[#allocation35_spill] sm:$0xff] %v22044_v37  ;;  %9283 = vadd.xlane.f32.xlu1 %v22044_v37  ;;  %9273 = vadd.xlane.f32.xlu0 %v22042_v56  ;;  %v22049_v6 = vpop.eup %17371 }
 0x64c   : > { %v22051_v62 = vpop.eup %17373 }
 0x64d   : > { %9279 = vadd.xlane.f32.xlu1 %v22051_v62  ;;  %9269 = vadd.xlane.f32.xlu0 %v22049_v6  ;;  %v22055_v13 = vpop.eup %17375 }
 0x64e   : > { %v22058_v23 = vpop.eup %17377 }
 0x64f   : > { %v22061_v51 = vpop.eup %17379 }
 0x650   : > { %v22064_v15 = vpop.eup %17381 }
 0x651   : > { %9249 = vadd.xlane.f32.xlu0 %v22055_v13 }
 0x655   : > { %9245 = vadd.xlane.f32.xlu0 %v22058_v23 }
 0x659   : > { %9281 = vadd.xlane.f32.xlu0 %v22061_v51 }
 0x65d   : > { %9277 = vadd.xlane.f32.xlu0 %v22064_v15 }
 0x662   : > { %v8970_v10 = vpop.xlane.xlu0 %8969 }
 0x663   : > { %v9063_v17 = vsub.f32 %v25033_v39, %v8970_v10  ;;  %v25037_v10 = vld [vmem:[#allocation32_spill] sm:$0xff] }
 0x664   : > { %v8972_v29 = vpop.xlane.xlu1 %8971 }
 0x665   : > { %v9064_v40 = vsub.f32 %v25034_v31, %v8972_v29  ;;  %v9161_v63 = vmul.f32 1.442695, %v9063_v17  ;;  %v25038_v29 = vld [vmem:[#allocation74_spill] sm:$0xff] }
 0x666   : > { %v8966_v58 = vpop.xlane.xlu0 %8965 }
 0x667   : > { %v9163_v7 = vmul.f32 1.442695, %v9064_v40  ;;  %17383 = vpow2.f32 %v9161_v63  ;;  %v9061_v38 = vsub.f32 %v25035_v14, %v8966_v58  ;;  %v25040_v63 = vld [vmem:[#allocation22_spill] sm:$0xff] }
 0x668   : > { %v8968_v42 = vpop.xlane.xlu1 %8967  ;;  %v25041_v14 = vld [vmem:[#allocation26_spill] sm:$0xff] }
 0x669   : > { %17385 = vpow2.f32 %v9163_v7  ;;  %v9062_v44 = vsub.f32 %v25036_v9, %v8968_v42  ;;  %v9157_v8 = vmul.f32 1.442695, %v9061_v38 }
 0x66a   : > { %v9002_v4 = vpop.xlane.xlu0 %9001 }
 0x66b   : > { %v9159_v55 = vmul.f32 1.442695, %v9062_v44  ;;  %17387 = vpow2.f32 %v9157_v8  ;;  %v9079_v39 = vsub.f32 %v25037_v10, %v9002_v4  ;;  %v25043_v8 = vld [vmem:[#allocation76_spill] sm:$0xff] }
 0x66c   : > { %v9004_v24 = vpop.xlane.xlu1 %9003 }
 0x66d   : > { %17389 = vpow2.f32 %v9159_v55  ;;  %v9080_v58 = vsub.f32 %v25040_v63, %v9004_v24  ;;  %v9193_v9 = vmul.f32 1.442695, %v9079_v39  ;;  %v25044_v24 = vld [vmem:[#allocation57_spill] sm:$0xff]  ;;  %v25046_v63 = vld [vmem:[#allocation56_spill] sm:$0xff] }
 0x66e   : > { %v8998_v59 = vpop.xlane.xlu0 %8997 }
 0x66f   : > { %v9077_v17 = vsub.f32 %v25038_v29, %v8998_v59  ;;  %v9195_v10 = vmul.f32 1.442695, %v9080_v58 }
 0x670   : > { %v9000_v31 = vpop.xlane.xlu1 %8999 }
 0x671   : > { %v22073_v40 = vpop.eup %17383  ;;  %v9078_v7 = vsub.f32 %v25041_v14, %v9000_v31  ;;  %v9189_v37 = vmul.f32 1.442695, %v9077_v17 }
 0x672   : > { %25039 = vst [vmem:[#allocation77_spill] sm:$0xff] %v22073_v40  ;;  %9289 = vadd.xlane.f32.xlu0 %v22073_v40  ;;  %v8978_v38 = vpop.xlane.xlu0 %8977 }
 0x673   : > { %v22078_v42 = vpop.eup %17385  ;;  %v9191_v44 = vmul.f32 1.442695, %v9078_v7  ;;  %17391 = vpow2.f32 %v9189_v37  ;;  %v9067_v4 = vsub.f32 %v25043_v8, %v8978_v38  ;;  %v25047_v38 = vld [vmem:[#allocation54_spill] sm:$0xff] }
 0x674   : > { %25042 = vst [vmem:[#allocation58_spill] sm:$0xff] %v22078_v42  ;;  %9291 = vadd.xlane.f32.xlu1 %v22078_v42  ;;  %v8980_v55 = vpop.xlane.xlu1 %8979 }
 0x675   : > { %v22082_v59 = vpop.eup %17387  ;;  %17393 = vpow2.f32 %v9191_v44  ;;  %v9068_v29 = vsub.f32 %v25044_v24, %v8980_v55  ;;  %v9169_v39 = vmul.f32 1.442695, %v9067_v4 }
 0x676   : > { %9285 = vadd.xlane.f32.xlu0 %v22082_v59  ;;  %v8974_v17 = vpop.xlane.xlu0 %8973  ;;  %17395 = vpow2.f32 %v9193_v9 }
 0x677   : > { %v22086_v31 = vpop.eup %17389  ;;  %v9065_v37 = vsub.f32 %v25046_v63, %v8974_v17  ;;  %17397 = vpow2.f32 %v9195_v10  ;;  %v9171_v7 = vmul.f32 1.442695, %v9068_v29  ;;  %v25050_v17 = vld [vmem:[#allocation55_spill] sm:$0xff]  ;;  %v25051_v10 = vld [vmem:[#allocation36_spill] sm:$0xff] }
 0x678   : > { %25045 = vst [vmem:[#allocation59_spill] sm:$0xff] %v22086_v31  ;;  %9287 = vadd.xlane.f32.xlu1 %v22086_v31  ;;  %v8976_v14 = vpop.xlane.xlu1 %8975  ;;  %17399 = vpow2.f32 %v9169_v39 }
 0x679   : > { %v9066_v8 = vsub.f32 %v25047_v38, %v8976_v14  ;;  %v9165_v44 = vmul.f32 1.442695, %v9065_v37  ;;  %17401 = vpow2.f32 %v9171_v7  ;;  %v25052_v37 = vld [vmem:[#allocation34_spill] sm:$0xff]  ;;  %v25053_v7 = vld [vmem:[#allocation40_spill] sm:$0xff] }
 0x67a   : > { %v9010_v58 = vpop.xlane.xlu0 %9009 }
 0x67b   : > { %v9167_v42 = vmul.f32 1.442695, %v9066_v8  ;;  %17403 = vpow2.f32 %v9165_v44  ;;  %v9083_v63 = vsub.f32 %v25050_v17, %v9010_v58 }
 0x67c   : > { %v9012_v55 = vpop.xlane.xlu1 %9011 }
 0x67d   : > { %v22091_v24 = vpop.eup %17391  ;;  %17405 = vpow2.f32 %v9167_v42  ;;  %v9084_v38 = vsub.f32 %v25052_v37, %v9012_v55  ;;  %v9201_v44 = vmul.f32 1.442695, %v9083_v63  ;;  %v25055_v55 = vld [vmem:[#allocation72_spill] sm:$0xff] }
 0x67e   : > { %25048 = vst [vmem:[#allocation37_spill] sm:$0xff] %v22091_v24  ;;  %9317 = vadd.xlane.f32.xlu0 %v22091_v24  ;;  %v9006_v9 = vpop.xlane.xlu0 %9005 }
 0x67f   : > { %v22094_v4 = vpop.eup %17393  ;;  %v9081_v29 = vsub.f32 %v25051_v10, %v9006_v9  ;;  %v25054_v9 = vld [vmem:[#allocation73_spill] sm:$0xff]  ;;  %v9203_v42 = vmul.f32 1.442695, %v9084_v38 }
 0x680   : > { %25049 = vst [vmem:[#allocation42_spill] sm:$0xff] %v22094_v4  ;;  %9319 = vadd.xlane.f32.xlu1 %v22094_v4  ;;  %v9008_v14 = vpop.xlane.xlu1 %9007  ;;  %v22099_v39 = vpop.eup %17395 }
 0x681   : > { %v9082_v8 = vsub.f32 %v25053_v7, %v9008_v14  ;;  %v9197_v31 = vmul.f32 1.442695, %v9081_v29  ;;  %v22104_v40 = vpop.eup %17397  ;;  %v25056_v7 = vld [vmem:[#allocation23_spill] sm:$0xff] }
 0x682   : > { %9321 = vadd.xlane.f32.xlu0 %v22099_v39  ;;  %v8986_v24 = vpop.xlane.xlu0 %8985  ;;  %v22108_v4 = vpop.eup %17399 }
 0x683   : > { %v9199_v58 = vmul.f32 1.442695, %v9082_v8  ;;  %17407 = vpow2.f32 %v9197_v31  ;;  %v9071_v17 = vsub.f32 %v25054_v9, %v8986_v24  ;;  %v22112_v37 = vpop.eup %17401 }
 0x684   : > { %9323 = vadd.xlane.f32.xlu1 %v22104_v40  ;;  %v8988_v10 = vpop.xlane.xlu1 %8987 }
 0x685   : > { %17409 = vpow2.f32 %v9199_v58  ;;  %v9072_v14 = vsub.f32 %v25055_v55, %v8988_v10  ;;  %v9177_v63 = vmul.f32 1.442695, %v9071_v17  ;;  %v22116_v8 = vpop.eup %17403 }
 0x686   : > { %9297 = vadd.xlane.f32.xlu0 %v22108_v4  ;;  %v8982_v29 = vpop.xlane.xlu0 %8981  ;;  %17411 = vpow2.f32 %v9201_v44 }
 0x687   : > { %v9069_v31 = vsub.f32 %v25056_v7, %v8982_v29  ;;  %17413 = vpow2.f32 %v9203_v42  ;;  %v9179_v9 = vmul.f32 1.442695, %v9072_v14  ;;  %v22120_v10 = vpop.eup %17405 }
 0x688   : > { %9299 = vadd.xlane.f32.xlu1 %v22112_v37  ;;  %v8984_v24 = vpop.xlane.xlu1 %8983  ;;  %17415 = vpow2.f32 %v9177_v63 }
 0x689   : > { %v9070_v38 = vsub.f32 %v21869_v45, %v8984_v24  ;;  %v9173_v55 = vmul.f32 1.442695, %v9069_v31  ;;  %17417 = vpow2.f32 %v9179_v9 }
 0x68a   : > { %9293 = vadd.xlane.f32.xlu0 %v22116_v8  ;;  %v9018_v58 = vpop.xlane.xlu0 %9017 }
 0x68b   : > { %v9175_v29 = vmul.f32 1.442695, %v9070_v38  ;;  %v9087_v7 = vsub.f32 %v21874_v54, %v9018_v58  ;;  %17419 = vpow2.f32 %v9173_v55 }
 0x68c   : > { %9295 = vadd.xlane.f32.xlu1 %v22120_v10  ;;  %v9020_v44 = vpop.xlane.xlu1 %9019 }
 0x68d   : > { %v22123_v17 = vpop.eup %17407  ;;  %17421 = vpow2.f32 %v9175_v29  ;;  %v9088_v9 = vsub.f32 %v21878_v41, %v9020_v44  ;;  %v9209_v38 = vmul.f32 1.442695, %v9087_v7 }
 0x68e   : > { %25057 = vst [vmem:[#allocation84_spill] sm:$0xff] %v22123_v17  ;;  %9325 = vadd.xlane.f32.xlu0 %v22123_v17  ;;  %v9014_v42 = vpop.xlane.xlu0 %9013 }
 0x68f   : > { %v22127_v45 = vpop.eup %17409  ;;  %v9085_v14 = vsub.f32 %v21885_v19, %v9014_v42  ;;  %v9211_v17 = vmul.f32 1.442695, %v9088_v9 }
 0x690   : > { %25058 = vst [vmem:[#allocation81_spill] sm:$0xff] %v22127_v45  ;;  %9327 = vadd.xlane.f32.xlu1 %v22127_v45  ;;  %v8996_v63 = vpop.xlane.xlu1 %8995  ;;  %v22131_v31 = vpop.eup %17411 }
 0x691   : > { %v9205_v24 = vmul.f32 1.442695, %v9085_v14  ;;  %v22135_v58 = vpop.eup %17413  ;;  %v9076_v29 = vsub.f32 %v21889_v57, %v8996_v63 }
 0x692   : > { %9329 = vadd.xlane.f32.xlu0 %v22131_v31  ;;  %v9016_v54 = vpop.xlane.xlu0 %9015  ;;  %v22139_v42 = vpop.eup %17415 }
 0x693   : > { %17423 = vpow2.f32 %v9205_v24  ;;  %v9086_v55 = vsub.f32 %v21894_v1, %v9016_v54  ;;  %v22143_v44 = vpop.eup %17417  ;;  %v9187_v54 = vmul.f32 1.442695, %v9076_v29 }
 0x694   : > { %9331 = vadd.xlane.f32.xlu1 %v22135_v58  ;;  %v8992_v19 = vpop.xlane.xlu1 %8991  ;;  %17425 = vpow2.f32 %v9209_v38  ;;  %25059 = vst [vmem:[#allocation38_spill] sm:$0xff] %v22143_v44 }
 0x695   : > { %v9207_v45 = vmul.f32 1.442695, %v9086_v55  ;;  %v22147_v14 = vpop.eup %17419  ;;  %v9074_v63 = vsub.f32 %v21900_v46, %v8992_v19 }
 0x696   : > { %9305 = vadd.xlane.f32.xlu0 %v22139_v42  ;;  %v8994_v41 = vpop.xlane.xlu0 %8993 }
 0x697   : > { %17427 = vpow2.f32 %v9207_v45  ;;  %v9075_v7 = vsub.f32 %v21905_v18, %v8994_v41  ;;  %v22150_v57 = vpop.eup %17421  ;;  %v9183_v29 = vmul.f32 1.442695, %v9074_v63 }
 0x698   : > { %9307 = vadd.xlane.f32.xlu1 %v22143_v44  ;;  %v9028_v1 = vpop.xlane.xlu1 %9027  ;;  %17429 = vpow2.f32 %v9211_v17 }
 0x699   : > { %v9185_v24 = vmul.f32 1.442695, %v9075_v7  ;;  %v9092_v63 = vsub.f32 %v21911_v32, %v9028_v1 }
 0x69a   : > { %9301 = vadd.xlane.f32.xlu0 %v22147_v14  ;;  %v8990_v9 = vpop.xlane.xlu0 %8989 }
 0x69b   : > { %17431 = vpow2.f32 %v9185_v24  ;;  %v9073_v45 = vsub.f32 %v21918_v33, %v8990_v9 }
 0x69c   : > { %9303 = vadd.xlane.f32.xlu1 %v22150_v57  ;;  %v9228_v18 = vpop.xlane.xlu1 %9227  ;;  %17433 = vpow2.f32 %v9187_v54 }
 0x69d   : > { %v22155_v38 = vpop.eup %17423  ;;  %v9181_v55 = vmul.f32 1.442695, %v9073_v45 }
 0x69e   : > { %25060 = vst [vmem:[#allocation85_spill] sm:$0xff] %v22155_v38  ;;  %9333 = vadd.xlane.f32.xlu0 %v22155_v38  ;;  %v9026_v17 = vpop.xlane.xlu0 %9025  ;;  %v22158_v41 = vpop.eup %17425 }
 0x69f   : > { %17435 = vpow2.f32 %v9181_v55  ;;  %25061 = vst [vmem:[#allocation61_spill] sm:$0xff] %v22158_v41  ;;  %v9091_v46 = vsub.f32 %v21928_v26, %v9026_v17 }
 0x6a0   : > { %v9224_v7 = vpop.xlane.xlu1 %9223  ;;  %17437 = vpow2.f32 %v9183_v29 }
 0x6a1   : > { %v22160_v44 = vpop.eup %17427  ;;  %v9217_v55 = vmul.f32 1.442695, %v9091_v46 }
 0x6a2   : > { %25062 = vst [vmem:[#allocation60_spill] sm:$0xff] %v22160_v44  ;;  %9337 = vadd.xlane.f32.xlu0 %v22158_v41  ;;  %v9022_v33 = vpop.xlane.xlu0 %9021  ;;  %9335 = vadd.xlane.f32.xlu1 %v22160_v44  ;;  %v22166_v24 = vpop.eup %17429  ;;  %v9219_v41 = vmul.f32 1.442695, %v9092_v63 }
 0x6a3   : > { %v9089_v19 = vsub.f32 %v21941_v21, %v9022_v33  ;;  %25063 = vst [vmem:[#allocation63_spill] sm:$0xff] %v22166_v24 }
 0x6a4   : > { %v9260_v54 = vpop.xlane.xlu1 %9259 }
 0x6a5   : > { %v22168_v9 = vpop.eup %17431  ;;  %v9213_v45 = vmul.f32 1.442695, %v9089_v19 }
 0x6a6   : > { %25064 = vst [vmem:[#allocation41_spill] sm:$0xff] %v22168_v9  ;;  %9313 = vadd.xlane.f32.xlu0 %v22168_v9  ;;  %v9024_v26 = vpop.xlane.xlu0 %9023  ;;  %9339 = vadd.xlane.f32.xlu1 %v22166_v24  ;;  %v22174_v29 = vpop.eup %17433 }
 0x6a7   : > { %17439 = vpow2.f32 %v9213_v45  ;;  %v9090_v17 = vsub.f32 %v21951_v35, %v9024_v26  ;;  %25065 = vst [vmem:[#allocation62_spill] sm:$0xff] %v22174_v29 }
 0x6a8   : > { %v9236_v21 = vpop.xlane.xlu1 %9235  ;;  %17441 = vrcp.f32 %v9224_v7 }
 0x6a9   : > { %v22176_v33 = vpop.eup %17435  ;;  %v9215_v44 = vmul.f32 1.442695, %v9090_v17  ;;  %17443 = vpow2.f32 %v9217_v55 }
 0x6aa   : > { %25066 = vst [vmem:[#allocation47_spill] sm:$0xff] %v22176_v33  ;;  %9309 = vadd.xlane.f32.xlu0 %v22176_v33  ;;  %9315 = vadd.xlane.f32.xlu1 %v22174_v29  ;;  %v9226_v32 = vpop.xlane.xlu0 %9225  ;;  %v22180_v46 = vpop.eup %17437 }
 0x6ab   : > { %17445 = vpow2.f32 %v9215_v44  ;;  %25067 = vst [vmem:[#allocation39_spill] sm:$0xff] %v22180_v46 }
 0x6ac   : > { %17447 = vrcp.f32 %v9228_v18  ;;  %v9232_v1 = vpop.xlane.xlu1 %9231 }
 0x6ad   : > { %17449 = vpow2.f32 %v9219_v41 }
 0x6ae   : > { %9311 = vadd.xlane.f32.xlu1 %v22180_v46  ;;  %17451 = vrcp.f32 %v9226_v32  ;;  %v9222_v35 = vpop.xlane.xlu0 %9221 }
 0x6af   : > { %17453 = vrcp.f32 %v9222_v35 }
 0x6b0   : > { %v9268_v19 = vpop.xlane.xlu1 %9267  ;;  %17455 = vrcp.f32 %v9260_v54 }
 0x6b1   : > { %v22183_v63 = vpop.eup %17439 }
 0x6b2   : > { %25068 = vst [vmem:[#allocation27_spill] sm:$0xff] %v22183_v63  ;;  %9341 = vadd.xlane.f32.xlu0 %v22183_v63  ;;  %v9258_v7 = vpop.xlane.xlu0 %9257  ;;  %v17442_v45 = vpop.eup %17441 }
 0x6b3   : > { %v22186_v55 = vpop.eup %17443  ;;  %v9414_v35 = vmul.f32 %v17442_v45, %v21933_v60  ;;  %v25071_v60 = vld [vmem:[#allocation43_spill] sm:$0xff] }
 0x6b4   : > { %25069 = vst [vmem:[#allocation83_spill] sm:$0xff] %v22186_v55  ;;  %v9264_v26 = vpop.xlane.xlu1 %9263 }
 0x6b5   : > { %v22188_v44 = vpop.eup %17445 }
 0x6b6   : > { %25070 = vst [vmem:[#allocation80_spill] sm:$0xff] %v22188_v44  ;;  %v17448_v18 = vpop.eup %17447  ;;  %9345 = vadd.xlane.f32.xlu0 %v22186_v55  ;;  %9343 = vadd.xlane.f32.xlu1 %v22188_v44  ;;  %v9254_v41 = vpop.xlane.xlu0 %9253 }
 0x6b7   : > { %v22192_v17 = vpop.eup %17449  ;;  %v9416_v9 = vmul.f32 %v17448_v18, %v21921_v22  ;;  %17457 = vrcp.f32 %v9254_v41  ;;  %v25072_v22 = vld [vmem:[#allocation69_spill] sm:$0xff] }
 0x6b8   : > { %v17452_v32 = vpop.eup %17451  ;;  %17459 = vrcp.f32 %v9258_v7  ;;  %v9244_v29 = vpop.xlane.xlu1 %9243 }
 0x6b9   : > { %v17454_v63 = vpop.eup %17453  ;;  %v9415_v44 = vmul.f32 %v17452_v32, %v21960_v11 }
 0x6ba   : > { %9347 = vadd.xlane.f32.xlu1 %v22192_v17  ;;  %v9256_v46 = vpop.xlane.xlu0 %9255  ;;  %v9413_v55 = vmul.f32 %v17454_v63, %v21969_v30  ;;  %v17456_v54 = vpop.eup %17455 }
 0x6bb   : > { %17461 = vrcp.f32 %v9256_v46  ;;  %v9478_v24 = vpack.c.bf16 %v9416_v9, %v9415_v44  ;;  %v9432_v9 = vmul.f32 %v17456_v54, %v21944_v61  ;;  %v25074_v44 = vld [vmem:[#allocation71_spill] sm:$0xff] }
 0x6bc   : > { %v9477_v33 = vpack.c.bf16 %v9414_v35, %v9413_v55  ;;  %v9240_v45 = vpop.xlane.xlu1 %9239  ;;  %v25076_v35 = vld [vmem:[#allocation49_spill] sm:$0xff] }
 0x6be   : > { %v9234_v38 = vpop.xlane.xlu0 %9233  ;;  %16529 = vmatprep.mubr.bf16.mxu0 %v9477_v33  ;;  %v25073_v33 = vld [vmem:[#allocation68_spill] sm:$0xff] }
 0x6bf   : > { %16530 = vmatmul.mubr.bf16.vlgmr.msra.gmra.mrb[128].mxu0 %v9478_v24  ;;  %17463 = vrcp.f32 %v9234_v38 }
 0x6c0   : > { %16578 = vmatpush3.bf16.msra.mxu0 %v25071_v60  ;;  %17465 = vrcp.f32 %v9232_v1  ;;  %v9276_v55 = vpop.xlane.xlu1 %9275  ;;  %v25077_v60 = vld [vmem:[#allocation70_spill] sm:$0xff] }
 0x6c1   : > { %16579 = vmatprep.subr.bf16.mxu0 %v25072_v22  ;;  %17467 = vrcp.f32 %v9236_v21  ;;  %v17458_v30 = vpop.eup %17457 }
 0x6c2   : > { %v9230_v7 = vpop.xlane.xlu0 %9229  ;;  %v17460_v11 = vpop.eup %17459  ;;  %v9429_v24 = vmul.f32 %v17458_v30, %v21987_v25 }
 0x6c3   : > { %17469 = vrcp.f32 %v9230_v7  ;;  %v9431_v63 = vmul.f32 %v17460_v11, %v21978_v3 }
 0x6c4   : > { %16580 = vmatpush3.bf16.msra.mxu0 %v25072_v22  ;;  %v9272_v7 = vpop.xlane.xlu1 %9271 }
 0x6c5   : > { %v17462_v46 = vpop.eup %17461  ;;  %16581 = vmatprep.subr.bf16.mxu0 %v25073_v33  ;;  %v9486_v18 = vpack.c.bf16 %v9432_v9, %v9431_v63  ;;  %v25079_v9 = vld [vmem:[#allocation21_spill] sm:$0xff] }
 0x6c6   : > { %v9266_v38 = vpop.xlane.xlu0 %9265  ;;  %v9430_v1 = vmul.f32 %v17462_v46, %v21994_v43  ;;  %v25075_v43 = vld [vmem:[#allocation48_spill] sm:$0xff]  ;;  %v25078_v46 = vld [vmem:[#allocation50_spill] sm:$0xff] }
 0x6c7   : > { %17471 = vrcp.f32 %v9266_v38 }
 0x6c8   : > { %16582 = vmatpush3.bf16.msra.mxu0 %v25073_v33  ;;  %v9485_v21 = vpack.c.bf16 %v9430_v1, %v9429_v24  ;;  %17473 = vrcp.f32 %v9264_v26  ;;  %v25081_v1 = vld [vmem:[#allocation25_spill] sm:$0xff] }
 0x6c9   : > { %16583 = vmatprep.subr.bf16.mxu0 %v25074_v44  ;;  %v17464_v41 = vpop.eup %17463  ;;  %17475 = vrcp.f32 %v9268_v19 }
 0x6ca   : > { %16561 = vmatprep.mubr.bf16.mxu1 %v9485_v21  ;;  %v9262_v61 = vpop.xlane.xlu0 %9261  ;;  %v17466_v32 = vpop.eup %17465  ;;  %v9419_v26 = vmul.f32 %v17464_v41, %v22001_v50 }
 0x6cb   : > { %17477 = vrcp.f32 %v9262_v61  ;;  %16562 = vmatmul.mubr.bf16.vlgmr.msra.gmra.mrb[32].mxu1 %v9486_v18  ;;  %v17468_v25 = vpop.eup %17467  ;;  %v9418_v54 = vmul.f32 %v17466_v32, %v21963_v2  ;;  %v25082_v61 = vld [vmem:[#allocation24_spill] sm:$0xff]  ;;  %v25083_v32 = vld [vmem:[#allocation82_spill] sm:$0xff] }
 0x6cc   : > { %16610 = vmatpush3.bf16.msra.mxu1 %v25075_v43  ;;  %16584 = vmatpush3.bf16.msra.mxu0 %v25074_v44  ;;  %v9420_v30 = vmul.f32 %v17468_v25, %v21954_v48 }
 0x6cd   : > { %v17470_v3 = vpop.eup %17469  ;;  %16611 = vmatprep.subr.bf16.mxu1 %v25076_v35  ;;  %16585 = vmatprep.subr.bf16.mxu0 %v25077_v60 }
 0x6ce   : > { %v9242_v22 = vpop.xlane.xlu0 %9241  ;;  %v9417_v19 = vmul.f32 %v17470_v3, %v22009_v28  ;;  %v9480_v50 = vpack.c.bf16 %v9420_v30, %v9419_v26  ;;  %v9252_v38 = vpop.xlane.xlu1 %9251  ;;  %v25085_v30 = vld [vmem:[#allocation29_spill] sm:$0xff] }
 0x6cf   : > { %17479 = vrcp.f32 %v9242_v22 }
 0x6d0   : > { %16612 = vmatpush3.bf16.msra.mxu1 %v25076_v35  ;;  %16586 = vmatpush3.bf16.msra.mxu0 %v25077_v60  ;;  %v9479_v11 = vpack.c.bf16 %v9418_v54, %v9417_v19  ;;  %17481 = vrcp.f32 %v9240_v45  ;;  %v25080_v45 = vld [vmem:[#allocation75_spill] sm:$0xff] }
 0x6d1   : > { %16613 = vmatprep.subr.bf16.mxu1 %v25078_v46  ;;  %16587 = vmatprep.subr.bf16.mxu0 %v25079_v9  ;;  %v17472_v33 = vpop.eup %17471  ;;  %17483 = vrcp.f32 %v9244_v29  ;;  %v25084_v35 = vld [vmem:[#allocation79_spill] sm:$0xff] }
 0x6d2   : > { %v9238_v28 = vpop.xlane.xlu0 %9237  ;;  %16533 = vmatprep.mubr.bf16.mxu0 %v9479_v11  ;;  %v17474_v2 = vpop.eup %17473  ;;  %v9435_v63 = vmul.f32 %v17472_v33, %v22017_v34 }
 0x6d3   : > { %17485 = vrcp.f32 %v9238_v28  ;;  %16534 = vmatmul.mubr.bf16.gmra.mrb[132].mxu0 %v9480_v50  ;;  %v17476_v48 = vpop.eup %17475  ;;  %v9434_v44 = vmul.f32 %v17474_v2, %v21981_v49 }
 0x6d4   : > { %16614 = vmatpush3.bf16.msra.mxu1 %v25078_v46  ;;  %16588 = vmatpush3.bf16.msra.mxu0 %v25079_v9  ;;  %v9436_v18 = vmul.f32 %v17476_v48, %v21972_v0 }
 0x6d5   : > { %v17478_v24 = vpop.eup %17477  ;;  %16615 = vmatprep.subr.bf16.mxu1 %v25080_v45  ;;  %16589 = vmatprep.subr.bf16.mxu0 %v25081_v1 }
 0x6d6   : > { %v9274_v21 = vpop.xlane.xlu0 %9273  ;;  %v9433_v29 = vmul.f32 %v17478_v24, %v22023_v20  ;;  %v9488_v25 = vpack.c.bf16 %v9436_v18, %v9435_v63  ;;  %v9248_v20 = vpop.xlane.xlu1 %9247 }
 0x6d7   : > { %17487 = vrcp.f32 %v9274_v21 }
 0x6d8   : > { %16616 = vmatpush3.bf16.msra.mxu1 %v25080_v45  ;;  %16590 = vmatpush3.bf16.msra.mxu0 %v25081_v1  ;;  %v9487_v41 = vpack.c.bf16 %v9434_v44, %v9433_v29  ;;  %17489 = vrcp.f32 %v9272_v7 }
 0x6d9   : > { %16617 = vmatprep.subr.bf16.mxu1 %v25082_v61  ;;  %16591 = vmatprep.subr.bf16.mxu0 %v25083_v32  ;;  %v17480_v34 = vpop.eup %17479  ;;  %17491 = vrcp.f32 %v9276_v55 }
 0x6da   : > { %v9270_v43 = vpop.xlane.xlu0 %9269  ;;  %16565 = vmatprep.mubr.bf16.mxu1 %v9487_v41  ;;  %v17482_v49 = vpop.eup %17481  ;;  %v9423_v60 = vmul.f32 %v17480_v34, %v22028_v5 }
 0x6db   : > { %17493 = vrcp.f32 %v9270_v43  ;;  %16566 = vmatmul.mubr.bf16.gmra.mrb[36].mxu1 %v9488_v25  ;;  %v17484_v0 = vpop.eup %17483  ;;  %v9422_v55 = vmul.f32 %v17482_v49, %v21997_v27  ;;  %v9284_v54 = vpop.xlane.xlu1 %9283  ;;  %v25086_v27 = vld [vmem:[#allocation28_spill] sm:$0xff]  ;;  %v25087_v49 = vld [vmem:[#allocation35_spill] sm:$0xff] }
 0x6dc   : > { %16618 = vmatpush3.bf16.msra.mxu1 %v25082_v61  ;;  %16592 = vmatpush3.bf16.msra.mxu0 %v25083_v32  ;;  %v9424_v19 = vmul.f32 %v17484_v0, %v21990_v47 }
 0x6dd   : > { %v17486_v3 = vpop.eup %17485  ;;  %16619 = vmatprep.subr.bf16.mxu1 %v25084_v35 }
 0x6de   : > { %v9250_v26 = vpop.xlane.xlu0 %9249  ;;  %v9421_v22 = vmul.f32 %v17486_v3, %v22035_v52  ;;  %v9482_v11 = vpack.c.bf16 %v9424_v19, %v9423_v60 }
 0x6df   : > { %17495 = vrcp.f32 %v9250_v26  ;;  %v9280_v33 = vpop.xlane.xlu1 %9279 }
 0x6e0   : > { %16620 = vmatpush3.bf16.msra.mxu1 %v25084_v35  ;;  %v9481_v7 = vpack.c.bf16 %v9422_v55, %v9421_v22  ;;  %17497 = vrcp.f32 %v9248_v20 }
 0x6e1   : > { %16621 = vmatprep.subr.bf16.mxu1 %v25085_v30  ;;  %v17488_v46 = vpop.eup %17487  ;;  %17499 = vrcp.f32 %v9252_v38 }
 0x6e2   : > { %v9246_v9 = vpop.xlane.xlu0 %9245  ;;  %16537 = vmatprep.mubr.bf16.mxu0 %v9481_v7  ;;  %v17490_v5 = vpop.eup %17489  ;;  %v9439_v50 = vmul.f32 %v17488_v46, %v22042_v56  ;;  %v25088_v7 = vld [vmem:[#allocation77_spill] sm:$0xff]  ;;  %v25089_v46 = vld [vmem:[#allocation59_spill] sm:$0xff] }
 0x6e3   : > { %17501 = vrcp.f32 %v9246_v9  ;;  %16538 = vmatmul.mubr.bf16.gmra.mrb[136].mxu0 %v9482_v11  ;;  %v17492_v52 = vpop.eup %17491  ;;  %v9438_v48 = vmul.f32 %v17490_v5, %v22012_v16  ;;  %v25090_v5 = vld [vmem:[#allocation58_spill] sm:$0xff] }
 0x6e4   : > { %16622 = vmatpush3.bf16.msra.mxu1 %v25085_v30  ;;  %v9440_v38 = vmul.f32 %v17492_v52, %v22004_v12 }
 0x6e5   : > { %v17494_v47 = vpop.eup %17493  ;;  %16623 = vmatprep.subr.bf16.mxu1 %v25086_v27 }
 0x6e6   : > { %v9282_v28 = vpop.xlane.xlu0 %9281  ;;  %v9437_v2 = vmul.f32 %v17494_v47, %v22049_v6  ;;  %v9490_v45 = vpack.c.bf16 %v9440_v38, %v9439_v50 }
 0x6e7   : > { %17503 = vrcp.f32 %v9282_v28 }
 0x6e8   : > { %16624 = vmatpush3.bf16.msra.mxu1 %v25086_v27  ;;  %v9489_v24 = vpack.c.bf16 %v9438_v48, %v9437_v2  ;;  %17505 = vrcp.f32 %v9280_v33 }
 0x6e9   : > { %v17496_v1 = vpop.eup %17495  ;;  %17507 = vrcp.f32 %v9284_v54 }
 0x6ea   : > { %v9278_v63 = vpop.xlane.xlu0 %9277  ;;  %16569 = vmatprep.mubr.bf16.mxu1 %v9489_v24  ;;  %v17498_v21 = vpop.eup %17497  ;;  %v9427_v6 = vmul.f32 %v17496_v1, %v22055_v13 }
 0x6eb   : > { %17509 = vrcp.f32 %v9278_v63  ;;  %16570 = vmatmul.mubr.bf16.gmra.mrb[40].mxu1 %v9490_v45  ;;  %v17500_v56 = vpop.eup %17499  ;;  %v9426_v12 = vmul.f32 %v17498_v21, %v22037_v36  ;;  %v25092_v45 = vld [vmem:[#allocation42_spill] sm:$0xff] }
 0x6ec   : > { %v9428_v44 = vmul.f32 %v17500_v56, %v22030_v53 }
 0x6ed   : > { %v17502_v29 = vpop.eup %17501 }
 0x6ee   : > { %v9425_v16 = vmul.f32 %v17502_v29, %v22058_v23  ;;  %v9484_v41 = vpack.c.bf16 %v9428_v44, %v9427_v6 }
 0x6f0   : > { %v9483_v18 = vpack.c.bf16 %v9426_v12, %v9425_v16 }
 0x6f1   : > { %v17504_v61 = vpop.eup %17503 }
 0x6f2   : > { %16541 = vmatprep.mubr.bf16.mxu0 %v9483_v18  ;;  %v17506_v32 = vpop.eup %17505  ;;  %v9443_v43 = vmul.f32 %v17504_v61, %v22061_v51 }
 0x6f3   : > { %16542 = vmatmul.mubr.bf16.gmra.mrb[140].mxu0 %v9484_v41  ;;  %v17508_v25 = vpop.eup %17507  ;;  %v9442_v13 = vmul.f32 %v17506_v32, %v22051_v62 }
 0x6f4   : > { %v9444_v23 = vmul.f32 %v17508_v25, %v25087_v49 }
 0x6f5   : > { %v17510_v34 = vpop.eup %17509 }
 0x6f6   : > { %v9441_v20 = vmul.f32 %v17510_v34, %v22064_v15  ;;  %v9492_v36 = vpack.c.bf16 %v9444_v23, %v9443_v43 }
 0x6f8   : > { %v9491_v0 = vpack.c.bf16 %v9442_v13, %v9441_v20 }
 0x6fa   : > { %16573 = vmatprep.mubr.bf16.mxu1 %v9491_v0 }
 0x6fb   : > { %16574 = vmatmul.mubr.bf16.gmra.mrb[44].mxu1 %v9492_v36 }
 0x6ff   : > { %v9290_v53 = vpop.xlane.xlu0 %9289 }
 0x700   : > { %17511 = vrcp.f32 %v9290_v53  ;;  %v25093_v53 = vld [vmem:[#allocation84_spill] sm:$0xff] }
 0x701   : > { %v9292_v3 = vpop.xlane.xlu1 %9291 }
 0x703   : > { %v9286_v35 = vpop.xlane.xlu0 %9285 }
 0x704   : > { %17513 = vrcp.f32 %v9286_v35 }
 0x705   : > { %17515 = vrcp.f32 %v9292_v3  ;;  %v9288_v60 = vpop.xlane.xlu1 %9287 }
 0x706   : > { %17517 = vrcp.f32 %v9288_v60 }
 0x70a   : > { %v17512_v51 = vpop.eup %17511 }
 0x70b   : > { %v9318_v26 = vpop.xlane.xlu0 %9317  ;;  %v9447_v30 = vmul.f32 %v17512_v51, %v25088_v7 }
 0x70c   : > { %17519 = vrcp.f32 %v9318_v26 }
 0x70d   : > { %v9320_v15 = vpop.xlane.xlu1 %9319 }
 0x70e   : > { %v17514_v22 = vpop.eup %17513  ;;  %17521 = vrcp.f32 %v9320_v15 }
 0x70f   : > { %v17516_v62 = vpop.eup %17515  ;;  %v9322_v55 = vpop.xlane.xlu0 %9321  ;;  %v9445_v19 = vmul.f32 %v17514_v22, %v22082_v59  ;;  %v25091_v59 = vld [vmem:[#allocation37_spill] sm:$0xff] }
 0x710   : > { %v17518_v54 = vpop.eup %17517  ;;  %17523 = vrcp.f32 %v9322_v55  ;;  %v9448_v52 = vmul.f32 %v17516_v62, %v25090_v5 }
 0x711   : > { %v9324_v11 = vpop.xlane.xlu1 %9323  ;;  %v9446_v9 = vmul.f32 %v17518_v54, %v25089_v46 }
 0x712   : > { %17525 = vrcp.f32 %v9324_v11  ;;  %v9494_v50 = vpack.c.bf16 %v9448_v52, %v9447_v30 }
 0x713   : > { %v9298_v47 = vpop.xlane.xlu0 %9297  ;;  %v9493_v27 = vpack.c.bf16 %v9446_v9, %v9445_v19 }
 0x714   : > { %17527 = vrcp.f32 %v9298_v47  ;;  %v25095_v47 = vld [vmem:[#allocation38_spill] sm:$0xff] }
 0x715   : > { %v9300_v33 = vpop.xlane.xlu1 %9299  ;;  %16593 = vmatprep.mubr.bf16.mxu0 %v9493_v27 }
 0x716   : > { %v17520_v28 = vpop.eup %17519  ;;  %16594 = vmatmul.mubr.bf16.vlgmr.msra.gmra.mrb[144].mxu0 %v9494_v50 }
 0x717   : > { %v9294_v2 = vpop.xlane.xlu0 %9293  ;;  %v9461_v48 = vmul.f32 %v17520_v28, %v25091_v59 }
 0x718   : > { %v17522_v38 = vpop.eup %17521  ;;  %17529 = vrcp.f32 %v9294_v2 }
 0x719   : > { %17531 = vrcp.f32 %v9300_v33  ;;  %v9296_v24 = vpop.xlane.xlu1 %9295  ;;  %v9462_v1 = vmul.f32 %v17522_v38, %v25092_v45  ;;  %v25096_v38 = vld [vmem:[#allocation85_spill] sm:$0xff] }
 0x71a   : > { %v17524_v63 = vpop.eup %17523  ;;  %17533 = vrcp.f32 %v9296_v24  ;;  %v25097_v24 = vld [vmem:[#allocation60_spill] sm:$0xff] }
 0x71b   : > { %v9463_v21 = vmul.f32 %v17524_v63, %v22099_v39  ;;  %v9326_v56 = vpop.xlane.xlu0 %9325  ;;  %v9501_v29 = vpack.c.bf16 %v9462_v1, %v9461_v48 }
 0x71c   : > { %v17526_v6 = vpop.eup %17525  ;;  %17535 = vrcp.f32 %v9326_v56  ;;  %v25098_v56 = vld [vmem:[#allocation61_spill] sm:$0xff] }
 0x71d   : > { %v9464_v16 = vmul.f32 %v17526_v6, %v22104_v40  ;;  %v9328_v12 = vpop.xlane.xlu1 %9327  ;;  %16625 = vmatprep.mubr.bf16.mxu1 %v9501_v29  ;;  %v25099_v6 = vld [vmem:[#allocation63_spill] sm:$0xff] }
 0x71e   : > { %17537 = vrcp.f32 %v9328_v12  ;;  %v17528_v41 = vpop.eup %17527 }
 0x71f   : > { %v9330_v44 = vpop.xlane.xlu0 %9329  ;;  %v9502_v18 = vpack.c.bf16 %v9464_v16, %v9463_v21  ;;  %v9451_v20 = vmul.f32 %v17528_v41, %v22108_v4 }
 0x720   : > { %17539 = vrcp.f32 %v9330_v44 }
 0x721   : > { %v9332_v61 = vpop.xlane.xlu1 %9331  ;;  %16626 = vmatmul.mubr.bf16.vlgmr.msra.gmra.mrb[48].mxu1 %v9502_v18 }
 0x722   : > { %v17530_v32 = vpop.eup %17529  ;;  %17541 = vrcp.f32 %v9332_v61 }
 0x723   : > { %v17532_v25 = vpop.eup %17531  ;;  %v9306_v34 = vpop.xlane.xlu0 %9305  ;;  %v9449_v39 = vmul.f32 %v17530_v32, %v22116_v8  ;;  %v25094_v8 = vld [vmem:[#allocation81_spill] sm:$0xff] }
 0x724   : > { %v17534_v43 = vpop.eup %17533  ;;  %v9452_v23 = vmul.f32 %v17532_v25, %v22112_v37  ;;  %17543 = vrcp.f32 %v9306_v34  ;;  %v25100_v34 = vld [vmem:[#allocation62_spill] sm:$0xff] }
 0x725   : > { %v9308_v13 = vpop.xlane.xlu1 %9307  ;;  %v9450_v40 = vmul.f32 %v17534_v43, %v22120_v10 }
 0x726   : > { %v17536_v49 = vpop.eup %17535  ;;  %v9496_v60 = vpack.c.bf16 %v9452_v23, %v9451_v20  ;;  %v25101_v20 = vld [vmem:[#allocation47_spill] sm:$0xff]  ;;  %v25103_v23 = vld [vmem:[#allocation41_spill] sm:$0xff] }
 0x727   : > { %v9302_v0 = vpop.xlane.xlu0 %9301  ;;  %v9495_v36 = vpack.c.bf16 %v9450_v40, %v9449_v39  ;;  %v9465_v3 = vmul.f32 %v17536_v49, %v25093_v53  ;;  %v25102_v40 = vld [vmem:[#allocation39_spill] sm:$0xff] }
 0x728   : > { %v17538_v35 = vpop.eup %17537  ;;  %17545 = vrcp.f32 %v9302_v0 }
 0x729   : > { %17547 = vrcp.f32 %v9308_v13  ;;  %v9304_v26 = vpop.xlane.xlu1 %9303  ;;  %16597 = vmatprep.mubr.bf16.mxu0 %v9495_v36  ;;  %v9466_v51 = vmul.f32 %v17538_v35, %v25094_v8 }
 0x72a   : > { %v17540_v4 = vpop.eup %17539  ;;  %17549 = vrcp.f32 %v9304_v26  ;;  %16598 = vmatmul.mubr.bf16.gmra.mrb[148].mxu0 %v9496_v60  ;;  %v25104_v26 = vld [vmem:[#allocation27_spill] sm:$0xff] }
 0x72b   : > { %v9334_v10 = vpop.xlane.xlu0 %9333  ;;  %v9503_v15 = vpack.c.bf16 %v9466_v51, %v9465_v3  ;;  %v9467_v37 = vmul.f32 %v17540_v4, %v22131_v31  ;;  %v25105_v51 = vld [vmem:[#allocation80_spill] sm:$0xff] }
 0x72c   : > { %v17542_v22 = vpop.eup %17541  ;;  %17551 = vrcp.f32 %v9334_v10 }
 0x72d   : > { %16629 = vmatprep.mubr.bf16.mxu1 %v9503_v15  ;;  %v9468_v62 = vmul.f32 %v17542_v22, %v22135_v58 }
 0x72e   : > { %v17544_v7 = vpop.eup %17543 }
 0x72f   : > { %v9338_v55 = vpop.xlane.xlu0 %9337  ;;  %v9336_v19 = vpop.xlane.xlu1 %9335  ;;  %v9504_v54 = vpack.c.bf16 %v9468_v62, %v9467_v37  ;;  %v9455_v31 = vmul.f32 %v17544_v7, %v22139_v42  ;;  %v25106_v37 = vld [vmem:[#allocation83_spill] sm:$0xff] }
 0x730   : > { %17553 = vrcp.f32 %v9336_v19 }
 0x731   : > { %16630 = vmatmul.mubr.bf16.gmra.mrb[52].mxu1 %v9504_v54  ;;  %17555 = vrcp.f32 %v9338_v55 }
 0x732   : > { %v17546_v30 = vpop.eup %17545 }
 0x733   : > { %v17548_v11 = vpop.eup %17547  ;;  %v9314_v46 = vpop.xlane.xlu0 %9313  ;;  %v9453_v5 = vmul.f32 %v17546_v30, %v22147_v14 }
 0x734   : > { %v9340_v9 = vpop.xlane.xlu1 %9339  ;;  %v17550_v52 = vpop.eup %17549  ;;  %v9456_v27 = vmul.f32 %v17548_v11, %v25095_v47 }
 0x735   : > { %17557 = vrcp.f32 %v9340_v9  ;;  %v9454_v58 = vmul.f32 %v17550_v52, %v22150_v57 }
 0x736   : > { %v9498_v2 = vpack.c.bf16 %v9456_v27, %v9455_v31  ;;  %v17552_v59 = vpop.eup %17551 }
 0x737   : > { %v9310_v50 = vpop.xlane.xlu0 %9309  ;;  %v9497_v28 = vpack.c.bf16 %v9454_v58, %v9453_v5  ;;  %v9469_v42 = vmul.f32 %v17552_v59, %v25096_v38 }
 0x738   : > { %v9316_v33 = vpop.xlane.xlu1 %9315 }
 0x739   : > { %17559 = vrcp.f32 %v9316_v33  ;;  %16601 = vmatprep.mubr.bf16.mxu0 %v9497_v28 }
 0x73a   : > { %17561 = vrcp.f32 %v9310_v50  ;;  %16602 = vmatmul.mubr.bf16.gmra.mrb[152].mxu0 %v9498_v2  ;;  %v17554_v48 = vpop.eup %17553 }
 0x73b   : > { %17563 = vrcp.f32 %v9314_v46  ;;  %v9470_v45 = vmul.f32 %v17554_v48, %v25097_v24  ;;  %v17556_v57 = vpop.eup %17555 }
 0x73c   : > { %v9312_v14 = vpop.xlane.xlu1 %9311  ;;  %v9471_v29 = vmul.f32 %v17556_v57, %v25098_v56 }
 0x73d   : > { %17565 = vrcp.f32 %v9312_v14  ;;  %v9505_v1 = vpack.c.bf16 %v9470_v45, %v9469_v42 }
 0x73f   : > { %v17558_v63 = vpop.eup %17557  ;;  %v9342_v21 = vpop.xlane.xlu0 %9341  ;;  %16633 = vmatprep.mubr.bf16.mxu1 %v9505_v1 }
 0x740   : > { %v9472_v16 = vmul.f32 %v17558_v63, %v25099_v6  ;;  %17567 = vrcp.f32 %v9342_v21 }
 0x742   : > { %v9506_v12 = vpack.c.bf16 %v9472_v16, %v9471_v29 }
 0x743   : > { %v17560_v44 = vpop.eup %17559  ;;  %v9346_v18 = vpop.xlane.xlu0 %9345 }
 0x744   : > { %v9344_v41 = vpop.xlane.xlu1 %9343  ;;  %v17562_v61 = vpop.eup %17561  ;;  %16634 = vmatmul.mubr.bf16.gmra.mrb[56].mxu1 %v9506_v12  ;;  %v9460_v39 = vmul.f32 %v17560_v44, %v25100_v34 }
 0x745   : > { %v17564_v32 = vpop.eup %17563  ;;  %17569 = vrcp.f32 %v9344_v41  ;;  %v9457_v13 = vmul.f32 %v17562_v61, %v25101_v20 }
 0x746   : > { %17571 = vrcp.f32 %v9346_v18  ;;  %v9459_v0 = vmul.f32 %v17564_v32, %v25103_v23 }
 0x747   : > { %v17566_v25 = vpop.eup %17565 }
 0x748   : > { %v9348_v43 = vpop.xlane.xlu1 %9347  ;;  %v9458_v49 = vmul.f32 %v17566_v25, %v25102_v40  ;;  %v9500_v53 = vpack.c.bf16 %v9460_v39, %v9459_v0 }
 0x749   : > { %17573 = vrcp.f32 %v9348_v43 }
 0x74a   : > { %v9499_v36 = vpack.c.bf16 %v9458_v49, %v9457_v13  ;;  %v17568_v3 = vpop.eup %17567 }
 0x74b   : > { %v9473_v8 = vmul.f32 %v17568_v3, %v25104_v26 }
 0x74c   : > { %16605 = vmatprep.mubr.bf16.mxu0 %v9499_v36 }
 0x74d   : > { %16606 = vmatmul.mubr.bf16.gmra.mrb[156].mxu0 %v9500_v53 }
 0x74f   : > { %v17570_v35 = vpop.eup %17569 }
 0x750   : > { %v17572_v60 = vpop.eup %17571  ;;  %v9474_v4 = vmul.f32 %v17570_v35, %v25105_v51 }
 0x751   : > { %v9475_v22 = vmul.f32 %v17572_v60, %v25106_v37 }
 0x752   : > { %v9507_v15 = vpack.c.bf16 %v9474_v4, %v9473_v8 }
 0x753   : > { %v17574_v10 = vpop.eup %17573 }
 0x754   : > { %v9476_v62 = vmul.f32 %v17574_v10, %v22192_v17  ;;  %16637 = vmatprep.mubr.bf16.mxu1 %v9507_v15 }
 0x756   : > { %v9508_v55 = vpack.c.bf16 %v9476_v62, %v9475_v22 }
 0x758   : > { %16638 = vmatmul.mubr.bf16.gmra.mrb[60].mxu1 %v9508_v55 }
 0x792   : > { %v16531_v19 = vpop.f32.mrb[128].mxu0 }
 0x793   : > { %v9543_v54 = vpop.f32.mrb[129].mxu0 }
 0x794   : > { %v16532_v7 = vpop.f32.mrb[130].mxu0 }
 0x795   : > { %v9898_v30 = vpack.c.bf16 %v16532_v7, %v16531_v19  ;;  %v9546_v11 = vpop.f32.mrb[131].mxu0 }
 0x796   : > { %v9897_v46 = vpack.c.bf16 %v9546_v11, %v9543_v54 }
 0x797   : > { %v9949_v27 = vshrl.u32 %v9898_v30, 16 }
 0x798   : > { %v9933_v17 = vshrl.u32 %v9897_v46, 16 }
 0x79e   : > { %v16563_v9 = vpop.f32.mrb[32].mxu1 }
 0x79f   : > { %v9640_v5 = vpop.f32.mrb[33].mxu1 }
 0x7a0   : > { %v16564_v52 = vpop.f32.mrb[34].mxu1 }
 0x7a1   : > { %v9906_v31 = vpack.c.bf16 %v16564_v52, %v16563_v9  ;;  %v9643_v58 = vpop.f32.mrb[35].mxu1 }
 0x7a2   : > { %v9905_v47 = vpack.c.bf16 %v9643_v58, %v9640_v5 }
 0x7a3   : > { %v22289_v50 = vpack.i.b16 %v9906_v31, %v9898_v30  ;;  %v9950_v33 = vshrl.u32 %v9906_v31, 16 }
 0x7a4   : > { %v22291_v28 = vpack.i.b16 %v9905_v47, %v9897_v46  ;;  %v9934_v2 = vshrl.u32 %v9905_v47, 16 }
 0x7a5   : > { %v22293_v59 = vpack.i.b16 %v9950_v33, %v9949_v27 }
 0x7a6   : > { %v22295_v48 = vpack.i.b16 %v9934_v2, %v9933_v17  ;;  %v16535_v14 = vpop.f32.mrb[132].mxu0 }
 0x7a7   : > { %v9559_v38 = vpop.f32.mrb[133].mxu0 }
 0x7a8   : > { %v16536_v42 = vpop.f32.mrb[134].mxu0 }
 0x7a9   : > { %v9900_v24 = vpack.c.bf16 %v16536_v42, %v16535_v14  ;;  %v9562_v45 = vpop.f32.mrb[135].mxu0  ;;  %v25107_v42 = vld [vmem:[#allocation44_spill] sm:$0xff] }
 0x7aa   : > { %v9899_v57 = vpack.c.bf16 %v9562_v45, %v9559_v38 }
 0x7ab   : > { %v9981_v16 = vshrl.u32 %v9900_v24, 16 }
 0x7ac   : > { %v9965_v18 = vshrl.u32 %v9899_v57, 16 }
 0x7ae   : > { %v16567_v1 = vpop.f32.mrb[36].mxu1 }
 0x7af   : > { %v9656_v63 = vpop.f32.mrb[37].mxu1 }
 0x7b0   : > { %v16568_v21 = vpop.f32.mrb[38].mxu1 }
 0x7b1   : > { %v9908_v56 = vpack.c.bf16 %v16568_v21, %v16567_v1  ;;  %v9659_v29 = vpop.f32.mrb[39].mxu1  ;;  %v10255_v21 = vcombine.high %v22293_v59, %v25107_v42 }
 0x7b2   : > { %v9907_v6 = vpack.c.bf16 %v9659_v29, %v9656_v63 }
 0x7b3   : > { %v22297_v12 = vpack.i.b16 %v9908_v56, %v9900_v24  ;;  %v9982_v44 = vshrl.u32 %v9908_v56, 16  ;;  %v10189_v24 = vcombine.high %v22289_v50, %v25107_v42  ;;  %v10123_v56 = vcombine.high %v22295_v48, %v25107_v42 }
 0x7b4   : > { %v22299_v41 = vpack.i.b16 %v9907_v6, %v9899_v57  ;;  %v9966_v61 = vshrl.u32 %v9907_v6, 16  ;;  %v10057_v57 = vcombine.high %v22291_v28, %v25107_v42  ;;  %v25108_v6 = vld [vmem:[#allocation45_spill] sm:$0xff] }
 0x7b5   : > { %v22301_v32 = vpack.i.b16 %v9982_v44, %v9981_v16  ;;  %v22335_v16 = vrot.slane %v22289_v50, %v25108_v6  ;;  %v22338_v44 = vrot.slane %v10189_v24, %v25108_v6 }
 0x7b6   : > { %v22303_v25 = vpack.i.b16 %v9966_v61, %v9965_v18  ;;  %v16539_v34 = vpop.f32.mrb[136].mxu0  ;;  %v22342_v18 = vrot.slane %v22291_v28, %v25108_v6  ;;  %v10453_v61 = vcombine.high %v22297_v12, %v25107_v42  ;;  %v22353_v50 = vrot.slane %v10057_v57, %v25108_v6 }
 0x7b7   : > { %v9575_v39 = vpop.f32.mrb[137].mxu0 }
 0x7b8   : > { %v16540_v43 = vpop.f32.mrb[138].mxu0  ;;  %v10387_v28 = vcombine.high %v22303_v25, %v25107_v42 }
 0x7b9   : > { %v9902_v20 = vpack.c.bf16 %v16540_v43, %v16539_v34  ;;  %v9578_v13 = vpop.f32.mrb[139].mxu0  ;;  %v10321_v34 = vcombine.high %v22299_v41, %v25107_v42  ;;  %v10519_v43 = vcombine.high %v22301_v32, %v25107_v42 }
 0x7ba   : > { %v9901_v40 = vpack.c.bf16 %v9578_v13, %v9575_v39  ;;  %v22350_v39 = vrot.slane %v22293_v59, %v25108_v6  ;;  %v22364_v13 = vrot.slane %v22295_v48, %v25108_v6 }
 0x7bb   : > { %v10013_v35 = vshrl.u32 %v9902_v20, 16 }
 0x7bc   : > { %v9997_v8 = vshrl.u32 %v9901_v40, 16 }
 0x7be   : > { %v16571_v49 = vpop.f32.mrb[40].mxu1 }
 0x7bf   : > { %v9672_v23 = vpop.f32.mrb[41].mxu1 }
 0x7c0   : > { %v16572_v0 = vpop.f32.mrb[42].mxu1 }
 0x7c1   : > { %v9910_v36 = vpack.c.bf16 %v16572_v0, %v16571_v49  ;;  %v9675_v53 = vpop.f32.mrb[43].mxu1  ;;  %v22373_v49 = vrot.slane %v22297_v12, %v25108_v6  ;;  %v22391_v12 = vrot.slane %v10321_v34, %v25108_v6  ;;  %v17053_v34 = vld [vmem:[#allocation7 + $0x20] ss:$8 sps:$4 sm:$0xff]  }
 0x7c2   : > { %v9909_v3 = vpack.c.bf16 %v9675_v53, %v9672_v23  ;;  %v22377_v23 = vrot.slane %v22299_v41, %v25108_v6  ;;  %v22388_v53 = vrot.slane %v22301_v32, %v25108_v6 }
 0x7c3   : > { %v22305_v60 = vpack.i.b16 %v9910_v36, %v9902_v20  ;;  %v10014_v26 = vshrl.u32 %v9910_v36, 16  ;;  %v22360_v20 = vrot.slane %v10255_v21, %v25108_v6  ;;  %v22384_v36 = vrot.slane %v10453_v61, %v25108_v6 }
 0x7c4   : > { %v22307_v51 = vpack.i.b16 %v9909_v3, %v9901_v40  ;;  %v9998_v4 = vshrl.u32 %v9909_v3, 16  ;;  %v22367_v40 = vrot.slane %v10123_v56, %v25108_v6  ;;  %v17047_v3 = vld [vmem:[#allocation7] ss:$8 sps:$4 sm:$0xff]  }
 0x7c5   : > { %v22309_v10 = vpack.i.b16 %v10014_v26, %v10013_v35  ;;  %v10717_v59 = vcombine.high %v22305_v60, %v25107_v42  ;;  %v17049_v35 = vld [vmem:[#allocation7 + $0x4] ss:$8 sps:$4 sm:$0xff]   ;;  %v22396_v26 = vrot.slane %v10519_v43, %v25108_v6 }
 0x7c6   : > { %v22311_v15 = vpack.i.b16 %v9998_v4, %v9997_v8  ;;  %v16543_v37 = vpop.f32.mrb[140].mxu0  ;;  %v10585_v48 = vcombine.high %v22307_v51, %v25107_v42  ;;  %v22400_v8 = vrot.slane %v22303_v25, %v25108_v6  ;;  %v22403_v4 = vrot.slane %v10387_v28, %v25108_v6  ;;  %12309 = vmatprep.subr.bf16.mxu0 %v17049_v35  ;;  %v17055_v43 = vld [vmem:[#allocation7 + $0x24] ss:$8 sps:$4 sm:$0xff]  }
 0x7c7   : > { %v9591_v22 = vpop.f32.mrb[141].mxu0  ;;  %v10783_v0 = vcombine.high %v22309_v10, %v25107_v42  ;;  %12310 = vmatpush1.bf16.msra.mxu0 %v17047_v3 }
 0x7c8   : > { %v16544_v62 = vpop.f32.mrb[142].mxu0  ;;  %v10651_v41 = vcombine.high %v22311_v15, %v25107_v42 }
 0x7c9   : > { %v9904_v55 = vpack.c.bf16 %v16544_v62, %v16543_v37  ;;  %v9594_v19 = vpop.f32.mrb[143].mxu0  ;;  %v22412_v62 = vrot.slane %v10717_v59, %v25108_v6 }
 0x7ca   : > { %v9903_v54 = vpack.c.bf16 %v9594_v19, %v9591_v22  ;;  %v22409_v22 = vrot.slane %v22305_v60, %v25108_v6  ;;  %v22428_v60 = vrot.slane %v10585_v48, %v25108_v6  ;;  %v17058_v48 = vld [vmem:[#allocation7 + $0x34] ss:$8 sps:$4 sm:$0xff]  }
 0x7cb   : > { %v10045_v52 = vshrl.u32 %v9904_v55, 16 }
 0x7cc   : > { %v10029_v47 = vshrl.u32 %v9903_v54, 16 }
 0x7ce   : > { %v16575_v7 = vpop.f32.mrb[44].mxu1 }
 0x7cf   : > { %v9688_v30 = vpop.f32.mrb[45].mxu1 }
 0x7d0   : > { %v16576_v11 = vpop.f32.mrb[46].mxu1 }
 0x7d1   : > { %v9912_v46 = vpack.c.bf16 %v16576_v11, %v16575_v7  ;;  %v9691_v9 = vpop.f32.mrb[47].mxu1  ;;  %v22425_v7 = vrot.slane %v10783_v0, %v25108_v6  ;;  %v22435_v11 = vrot.slane %v10651_v41, %v25108_v6 }
 0x7d2   : > { %v9911_v5 = vpack.c.bf16 %v9691_v9, %v9688_v30  ;;  %v22432_v30 = vrot.slane %v22311_v15, %v25108_v6 }
 0x7d3   : > { %v22313_v31 = vpack.i.b16 %v9912_v46, %v9904_v55  ;;  %v10046_v58 = vshrl.u32 %v9912_v46, 16  ;;  %v22416_v55 = vrot.slane %v22307_v51, %v25108_v6 }
 0x7d4   : > { %v22315_v27 = vpack.i.b16 %v9911_v5, %v9903_v54  ;;  %v10030_v33 = vshrl.u32 %v9911_v5, 16  ;;  %v22422_v54 = vrot.slane %v22309_v10, %v25108_v6 }
 0x7d5   : > { %v22317_v17 = vpack.i.b16 %v10046_v58, %v10045_v52  ;;  %v10981_v32 = vcombine.high %v22313_v31, %v25107_v42  ;;  %v22439_v46 = vrot.slane %v22313_v31, %v25108_v6  ;;  %v17050_v52 = vld [vmem:[#allocation7 + $0x10] ss:$8 sps:$4 sm:$0xff]   ;;  %v17052_v58 = vld [vmem:[#allocation7 + $0x14] ss:$8 sps:$4 sm:$0xff]  }
 0x7d6   : > { %v22319_v2 = vpack.i.b16 %v10030_v33, %v10029_v47  ;;  %v10849_v25 = vcombine.high %v22315_v27, %v25107_v42  ;;  %v22443_v10 = vrot.slane %v22315_v27, %v25108_v6  ;;  %12311 = vmatprep.subr.bf16.mxu0 %v17052_v58 }
 0x7d7   : > { %25109 = vst [vmem:[#allocation78_spill] sm:$0xff] %v22439_v46  ;;  %v22446_v15 = vrot.slane %v10981_v32, %v25108_v6  ;;  %v11047_v47 = vcombine.high %v22317_v17, %v25107_v42  ;;  %v22452_v33 = vrot.slane %v22317_v17, %v25108_v6  ;;  %12312 = vmatpush1.bf16.msra.mxu0 %v17050_v52  ;;  %v25116_v52 = vld [vmem:[#allocation46_spill] sm:$0xff] }
 0x7d8   : > { %25110 = vst [vmem:[#allocation51_spill] sm:$0xff] %v22443_v10  ;;  %v22465_v17 = vrot.slane %v22319_v2, %v25108_v6  ;;  %12313 = vmatprep.subr.bf16.mxu0 %v17055_v43 }
 0x7d9   : > { %25111 = vst [vmem:[#allocation67_spill] sm:$0xff] %v22446_v15  ;;  %25112 = vst [vmem:[#allocation64_spill] sm:$0xff] %v22452_v33  ;;  %v22470_v28 = vrot.slane %v11047_v47, %v25108_v6 }
 0x7da   : > { %25114 = vst [vmem:[#allocation65_spill] sm:$0xff] %v22465_v17 }
 0x7db   : > { %25115 = vst [vmem:[#allocation66_spill] sm:$0xff] %v22470_v28  ;;  %12314 = vmatpush1.bf16.msra.mxu0 %v17053_v34 }
 0x7dc   : > { %12315 = vmatprep.subr.bf16.mxu0 %v17058_v48 }
 0x7e9   : > { %v16595_v14 = vpop.f32.mrb[144].mxu0 }
 0x7ea   : > { %v9737_v38 = vpop.f32.mrb[145].mxu0 }
 0x7eb   : > { %v16596_v45 = vpop.f32.mrb[146].mxu0 }
 0x7ec   : > { %v22325_v1 = vpack.c.bf16 %v16596_v45, %v16595_v14  ;;  %v9740_v63 = vpop.f32.mrb[147].mxu0  ;;  %v22455_v14 = vrot.slane %v10849_v25, %v25108_v6  ;;  %v10915_v45 = vcombine.high %v22319_v2, %v25107_v42 }
 0x7ed   : > { %v22331_v29 = vpack.c.bf16 %v9740_v63, %v9737_v38 }
 0x7ee   : > { %25113 = vst [vmem:[#allocation30_spill] sm:$0xff] %v22455_v14  ;;  %v9957_v27 = vshrl.u32 %v22325_v1, 16 }
 0x7ef   : > { %v9941_v57 = vshrl.u32 %v22331_v29, 16 }
 0x7f4   : > { %v16627_v37 = vpop.f32.mrb[48].mxu1 }
 0x7f5   : > { %v9834_v19 = vpop.f32.mrb[49].mxu1 }
 0x7f6   : > { %v16628_v51 = vpop.f32.mrb[50].mxu1 }
 0x7f7   : > { %v9922_v9 = vpack.c.bf16 %v16628_v51, %v16627_v37  ;;  %v9837_v5 = vpop.f32.mrb[51].mxu1 }
 0x7f8   : > { %v9921_v31 = vpack.c.bf16 %v9837_v5, %v9834_v19  ;;  %v17056_v5 = vld [vmem:[#allocation7 + $0x30] ss:$8 sps:$4 sm:$0xff]  }
 0x7f9   : > { %v9955_v38 = vpack.i.b16 %v9922_v9, %v22325_v1  ;;  %v9958_v24 = vshrl.u32 %v9922_v9, 16  ;;  %12316 = vmatpush1.bf16.msra.mxu0 %v17056_v5 }
 0x7fa   : > { %v9939_v63 = vpack.i.b16 %v9921_v31, %v22331_v29  ;;  %v9942_v21 = vshrl.u32 %v9921_v31, 16 }
 0x7fb   : > { %v9959_v56 = vpack.i.b16 %v9958_v24, %v9957_v27  ;;  %v10204_v61 = vcombine.high %v9955_v38, %v25107_v42  ;;  %v10211_v1 = vrot.slane %v9955_v38, %v25108_v6  ;;  %v17061_v38 = vld [vmem:[#allocation7 + $0x44] ss:$8 sps:$4 sm:$0xff]  }
 0x7fc   : > { %v22472_v59 = vpack.i.b16 %v9942_v21, %v9941_v57  ;;  %v10072_v29 = vcombine.high %v9939_v63, %v25107_v42  ;;  %v10079_v0 = vrot.slane %v9939_v63, %v25108_v6  ;;  %12317 = vmatprep.subr.bf16.mxu0 %v17061_v38 }
 0x7fd   : > { %v10218_v2 = vrot.slane %v10204_v61, %v25108_v6  ;;  %v10219_v41 = vcombine.low %v22335_v16, %v10211_v1  ;;  %v10220_v3 = vcombine.high %v22335_v16, %v10211_v1  ;;  %v10270_v35 = vcombine.high %v9959_v56, %v25107_v42  ;;  %v22480_v32 = vpop.f32.mrb[148].mxu0 }
 0x7fe   : > { %v10277_v37 = vrot.slane %v9959_v56, %v25108_v6  ;;  %v22484_v25 = vrot.slane %v10072_v29, %v25108_v6  ;;  %v10087_v19 = vcombine.low %v22342_v18, %v10079_v0  ;;  %v10088_v51 = vcombine.high %v22342_v18, %v10079_v0  ;;  %v22488_v9 = vpop.f32.mrb[149].mxu0 }
 0x7ff   : > { %v10227_v16 = vrot.slane %v10219_v41, %v25116_v52  ;;  %v10234_v58 = vrot.slane %v10220_v3, %v25116_v52  ;;  %v10235_v47 = vcombine.low %v22338_v44, %v10218_v2  ;;  %v10236_v31 = vcombine.high %v22338_v44, %v10218_v2  ;;  %v16600_v27 = vpop.f32.mrb[150].mxu0 }
 0x800   : > { %v10284_v24 = vrot.slane %v10270_v35, %v25108_v6  ;;  %v10285_v57 = vcombine.low %v22350_v39, %v10277_v37  ;;  %v10286_v18 = vcombine.high %v22350_v39, %v10277_v37  ;;  %v10095_v63 = vrot.slane %v10087_v19, %v25116_v52  ;;  %v22498_v21 = vpop.f32.mrb[151].mxu0  ;;  %v17059_v39 = vld [vmem:[#allocation7 + $0x40] ss:$8 sps:$4 sm:$0xff]   ;;  %v17064_v35 = vld [vmem:[#allocation7 + $0x54] ss:$8 sps:$4 sm:$0xff]  }
 0x801   : > { %v10243_v56 = vrot.slane %v10235_v47, %v25116_v52  ;;  %v10250_v61 = vrot.slane %v10236_v31, %v25116_v52  ;;  %v11213_v1 = vcombine.low %v10227_v16, %v10234_v58  ;;  %v15934_v34 = vcombine.high %v10227_v16, %v10234_v58  ;;  %12318 = vmatpush1.bf16.msra.mxu0 %v17059_v39  ;;  %v17070_v31 = vld [vmem:[#allocation7 + $0x74] ss:$8 sps:$4 sm:$0xff]  }
 0x802   : > { %v10293_v44 = vrot.slane %v10285_v57, %v25116_v52  ;;  %v10300_v43 = vrot.slane %v10286_v18, %v25116_v52  ;;  %v10301_v29 = vcombine.low %v22360_v20, %v10284_v24  ;;  %v10302_v0 = vcombine.high %v22360_v20, %v10284_v24  ;;  %12319 = vmatprep.subr.bf16.mxu0 %v17064_v35 }
 0x803   : > { %v22507_v48 = vrot.slane %v11213_v1, %v25108_v6  ;;  %v22510_v2 = vrot.slane %v15934_v34, %v25108_v6  ;;  %v11229_v41 = vcombine.low %v10243_v56, %v10250_v61  ;;  %v15935_v3 = vcombine.high %v10243_v56, %v10250_v61 }
 0x804   : > { %v10309_v37 = vrot.slane %v10301_v29, %v25116_v52  ;;  %v10316_v19 = vrot.slane %v10302_v0, %v25116_v52  ;;  %v11263_v16 = vcombine.low %v10293_v44, %v10300_v43  ;;  %v15936_v58 = vcombine.high %v10293_v44, %v10300_v43  ;;  %v16631_v47 = vpop.f32.mrb[52].mxu1  ;;  %v17067_v0 = vld [vmem:[#allocation7 + $0x64] ss:$8 sps:$4 sm:$0xff]  }
 0x805   : > { %v22515_v20 = vrot.slane %v10915_v45, %v25108_v6  ;;  %v22518_v5 = vrot.slane %v11229_v41, %v25108_v6  ;;  %v10102_v24 = vrot.slane %v10088_v51, %v25116_v52  ;;  %v9850_v38 = vpop.f32.mrb[53].mxu1  ;;  %v22524_v57 = vrot.slane %v15935_v3, %v25108_v6  ;;  %v17062_v45 = vld [vmem:[#allocation7 + $0x50] ss:$8 sps:$4 sm:$0xff]  }
 0x806   : > { %v22527_v18 = vrot.slane %v11263_v16, %v25108_v6  ;;  %v11279_v56 = vcombine.low %v10309_v37, %v10316_v19  ;;  %v15937_v61 = vcombine.high %v10309_v37, %v10316_v19  ;;  %v16632_v1 = vpop.f32.mrb[54].mxu1  ;;  %v10103_v34 = vcombine.low %v22353_v50, %v22484_v25  ;;  %12320 = vmatpush1.bf16.msra.mxu0 %v17062_v45 }
 0x807   : > { %25117 = vst [vmem:[#allocation87_spill] sm:$0xff] %v22515_v20  ;;  %v10104_v44 = vcombine.high %v22353_v50, %v22484_v25  ;;  %v10138_v51 = vcombine.high %v22472_v59, %v25107_v42  ;;  %v10145_v43 = vrot.slane %v22472_v59, %v25108_v6  ;;  %v9853_v29 = vpop.f32.mrb[55].mxu1  ;;  %v22538_v41 = vrot.slane %v15936_v58, %v25108_v6 }
 0x808   : > { %v22541_v39 = vrot.slane %v11279_v56, %v25108_v6  ;;  %v11113_v3 = vcombine.low %v10095_v63, %v10102_v24  ;;  %v15930_v37 = vcombine.high %v10095_v63, %v10102_v24  ;;  %v10111_v19 = vrot.slane %v10103_v34, %v25116_v52  ;;  %v17065_v63 = vld [vmem:[#allocation7 + $0x60] ss:$8 sps:$4 sm:$0xff]   ;;  %12321 = vmatprep.subr.bf16.mxu0 %v17067_v0 }
 0x809   : > { %v10118_v50 = vrot.slane %v10104_v44, %v25116_v52  ;;  %v10152_v25 = vrot.slane %v10138_v51, %v25108_v6  ;;  %v10153_v16 = vcombine.low %v22364_v13, %v10145_v43  ;;  %v10154_v59 = vcombine.high %v22364_v13, %v10145_v43 }
 0x80a   : > { %v22549_v35 = vrot.slane %v11113_v3, %v25108_v6  ;;  %v22552_v58 = vrot.slane %v15930_v37, %v25108_v6  ;;  %v9916_v56 = vpack.c.bf16 %v16600_v27, %v22480_v32  ;;  %v22559_v13 = vrot.slane %v15937_v61, %v25108_v6  ;;  %12322 = vmatpush1.bf16.msra.mxu0 %v17065_v63 }
 0x80b   : > { %v10161_v24 = vrot.slane %v10153_v16, %v25116_v52  ;;  %v10169_v34 = vcombine.low %v22367_v40, %v10152_v25  ;;  %v10170_v44 = vcombine.high %v22367_v40, %v10152_v25  ;;  %v11129_v51 = vcombine.low %v10111_v19, %v10118_v50  ;;  %12323 = vmatprep.subr.bf16.mxu0 %v17070_v31 }
 0x80c   : > { %v10168_v43 = vrot.slane %v10154_v59, %v25116_v52  ;;  %v15931_v3 = vcombine.high %v10111_v19, %v10118_v50  ;;  %v9989_v37 = vshrl.u32 %v9916_v56, 16  ;;  %v9915_v40 = vpack.c.bf16 %v22498_v21, %v22488_v9  ;;  %v17068_v59 = vld [vmem:[#allocation7 + $0x70] ss:$8 sps:$4 sm:$0xff]  }
 0x80d   : > { %v22565_v27 = vrot.slane %v10169_v34, %v25116_v52  ;;  %v22568_v45 = vrot.slane %v10170_v44, %v25116_v52  ;;  %v16603_v0 = vpop.f32.mrb[152].mxu0  ;;  %v22573_v61 = vrot.slane %v11129_v51, %v25108_v6  ;;  %v9924_v19 = vpack.c.bf16 %v16632_v1, %v16631_v47  ;;  %v17073_v51 = vld [vmem:[#allocation7 + $0x84] ss:$8 sps:$4 sm:$0xff]  }
 0x80e   : > { %v11163_v25 = vcombine.low %v10161_v24, %v10168_v43  ;;  %v15932_v16 = vcombine.high %v10161_v24, %v10168_v43  ;;  %v9769_v50 = vpop.f32.mrb[153].mxu0  ;;  %v22576_v34 = vrot.slane %v15931_v3, %v25108_v6  ;;  %v9923_v9 = vpack.c.bf16 %v9853_v29, %v9850_v38  ;;  %12324 = vmatpush1.bf16.msra.mxu0 %v17068_v59 }
 0x80f   : > { %v11179_v44 = vcombine.low %v22565_v27, %v22568_v45  ;;  %v16604_v21 = vpop.f32.mrb[154].mxu0  ;;  %v9973_v47 = vshrl.u32 %v9915_v40, 16  ;;  %v9987_v1 = vpack.i.b16 %v9924_v19, %v9916_v56  ;;  %v9990_v63 = vshrl.u32 %v9924_v19, 16  ;;  %12325 = vmatprep.subr.bf16.mxu0 %v17073_v51 }
 0x810   : > { %v22583_v20 = vrot.slane %v11163_v25, %v25108_v6  ;;  %v9772_v24 = vpop.f32.mrb[155].mxu0  ;;  %v22586_v43 = vrot.slane %v15932_v16, %v25108_v6  ;;  %v9971_v17 = vpack.i.b16 %v9923_v9, %v9915_v40  ;;  %v9974_v14 = vshrl.u32 %v9923_v9, 16  ;;  %v17071_v25 = vld [vmem:[#allocation7 + $0x80] ss:$8 sps:$4 sm:$0xff]   ;;  %v17076_v40 = vld [vmem:[#allocation7 + $0x94] ss:$8 sps:$4 sm:$0xff]  }
 0x811   : > { %v22589_v3 = vrot.slane %v11179_v44, %v25108_v6  ;;  %v9991_v32 = vpack.i.b16 %v9990_v63, %v9989_v37  ;;  %v10468_v38 = vcombine.high %v9987_v1, %v25107_v42  ;;  %v10475_v31 = vrot.slane %v9987_v1, %v25108_v6 }
 0x812   : > { %v22593_v29 = vpack.c.bf16 %v16604_v21, %v16603_v0  ;;  %v22595_v56 = vpack.i.b16 %v9974_v14, %v9973_v47  ;;  %v10336_v19 = vcombine.high %v9971_v17, %v25107_v42  ;;  %v10343_v16 = vrot.slane %v9971_v17, %v25108_v6  ;;  %12326 = vmatpush1.bf16.msra.mxu0 %v17071_v25 }
 0x813   : > { %v22599_v10 = vpack.c.bf16 %v9772_v24, %v9769_v50  ;;  %v10482_v37 = vrot.slane %v10468_v38, %v25108_v6  ;;  %v10483_v44 = vcombine.low %v22373_v49, %v10475_v31  ;;  %v10484_v9 = vcombine.high %v22373_v49, %v10475_v31  ;;  %v17074_v49 = vld [vmem:[#allocation7 + $0x90] ss:$8 sps:$4 sm:$0xff]   ;;  %12327 = vmatprep.subr.bf16.mxu0 %v17076_v40 }
 0x814   : > { %v10534_v0 = vcombine.high %v9991_v32, %v25107_v42  ;;  %v10541_v59 = vrot.slane %v9991_v32, %v25108_v6  ;;  %v10350_v14 = vrot.slane %v10336_v19, %v25108_v6  ;;  %v10351_v21 = vcombine.low %v22377_v23, %v10343_v16 }
 0x815   : > { %v10352_v17 = vcombine.high %v22377_v23, %v10343_v16  ;;  %v10491_v50 = vrot.slane %v10483_v44, %v25116_v52  ;;  %v10498_v51 = vrot.slane %v10484_v9, %v25116_v52  ;;  %v10499_v47 = vcombine.low %v22384_v36, %v10482_v37  ;;  %v17079_v23 = vld [vmem:[#allocation7 + $0xa4] ss:$8 sps:$4 sm:$0xff]  }
 0x816   : > { %v10500_v1 = vcombine.high %v22384_v36, %v10482_v37  ;;  %v10548_v63 = vrot.slane %v10534_v0, %v25108_v6  ;;  %v10549_v32 = vcombine.low %v22388_v53, %v10541_v59  ;;  %v10550_v24 = vcombine.high %v22388_v53, %v10541_v59  ;;  %12328 = vmatpush1.bf16.msra.mxu0 %v17074_v49 }
 0x817   : > { %v10359_v38 = vrot.slane %v10351_v21, %v25116_v52  ;;  %v22617_v31 = vpop.f32.mrb[56].mxu1  ;;  %v10507_v19 = vrot.slane %v10499_v47, %v25116_v52  ;;  %v11413_v44 = vcombine.low %v10491_v50, %v10498_v51  ;;  %v15942_v36 = vcombine.high %v10491_v50, %v10498_v51  ;;  %12329 = vmatprep.subr.bf16.mxu0 %v17079_v23 }
 0x818   : > { %v10514_v16 = vrot.slane %v10500_v1, %v25116_v52  ;;  %v22621_v25 = vpop.f32.mrb[57].mxu1  ;;  %v10557_v37 = vrot.slane %v10549_v32, %v25116_v52  ;;  %v10564_v9 = vrot.slane %v10550_v24, %v25116_v52  ;;  %v10565_v53 = vcombine.low %v22396_v26, %v10548_v63  ;;  %v17077_v1 = vld [vmem:[#allocation7 + $0xa0] ss:$8 sps:$4 sm:$0xff]  }
 0x819   : > { %v10566_v0 = vcombine.high %v22396_v26, %v10548_v63  ;;  %v22627_v59 = vpop.f32.mrb[58].mxu1  ;;  %v22630_v40 = vrot.slane %v11413_v44, %v25108_v6  ;;  %v22633_v21 = vrot.slane %v15942_v36, %v25108_v6  ;;  %v17082_v63 = vld [vmem:[#allocation7 + $0xb4] ss:$8 sps:$4 sm:$0xff]   ;;  %v25118_v44 = vcombine.high %v22565_v27, %v22568_v45 }
 0x81a   : > { %v11429_v47 = vcombine.low %v10507_v19, %v10514_v16  ;;  %v15943_v50 = vcombine.high %v10507_v19, %v10514_v16  ;;  %v22635_v51 = vpop.f32.mrb[59].mxu1  ;;  %v10573_v32 = vrot.slane %v10565_v53, %v25116_v52  ;;  %v11463_v28 = vcombine.low %v10557_v37, %v10564_v9  ;;  %12330 = vmatpush1.bf16.msra.mxu0 %v17077_v1 }
 0x81b   : > { %v10580_v24 = vrot.slane %v10566_v0, %v25116_v52  ;;  %v15944_v26 = vcombine.high %v10557_v37, %v10564_v9  ;;  %v22643_v36 = vrot.slane %v25118_v44, %v25108_v6  ;;  %v10366_v16 = vrot.slane %v10352_v17, %v25116_v52  ;;  %v17080_v17 = vld [vmem:[#allocation7 + $0xb0] ss:$8 sps:$4 sm:$0xff]   ;;  %12331 = vmatprep.subr.bf16.mxu0 %v17082_v63 }
 0x81c   : > { %v22646_v19 = vrot.slane %v11429_v47, %v25108_v6  ;;  %v22652_v53 = vrot.slane %v15943_v50, %v25108_v6  ;;  %v22655_v23 = vrot.slane %v11463_v28, %v25108_v6  ;;  %v10367_v27 = vcombine.low %v22391_v12, %v10350_v14 }
 0x81d   : > { %v11479_v37 = vcombine.low %v10573_v32, %v10580_v24  ;;  %v15945_v9 = vcombine.high %v10573_v32, %v10580_v24  ;;  %v10368_v45 = vcombine.high %v22391_v12, %v10350_v14  ;;  %v10402_v0 = vcombine.high %v22595_v56, %v25107_v42  ;;  %v17085_v12 = vld [vmem:[#allocation7 + $0xc4] ss:$8 sps:$4 sm:$0xff]  }
 0x81e   : > { %v10409_v47 = vrot.slane %v22595_v56, %v25108_v6  ;;  %v22664_v50 = vrot.slane %v15944_v26, %v25108_v6  ;;  %v11313_v44 = vcombine.low %v10359_v38, %v10366_v16  ;;  %v15938_v32 = vcombine.high %v10359_v38, %v10366_v16  ;;  %12332 = vmatpush1.bf16.msra.mxu0 %v17080_v17 }
 0x81f   : > { %v22667_v28 = vrot.slane %v11479_v37, %v25108_v6  ;;  %v10375_v14 = vrot.slane %v10367_v27, %v25116_v52  ;;  %v10382_v49 = vrot.slane %v10368_v45, %v25116_v52  ;;  %v10416_v56 = vrot.slane %v10402_v0, %v25108_v6  ;;  %12333 = vmatprep.subr.bf16.mxu0 %v17085_v12 }
 0x820   : > { %v22669_v24 = vpop.f32.mrb[156].mxu0  ;;  %v10417_v1 = vcombine.low %v22400_v8, %v10409_v47  ;;  %v22678_v26 = vrot.slane %v15945_v9, %v25108_v6  ;;  %v10418_v37 = vcombine.high %v22400_v8, %v10409_v47  ;;  %v22682_v38 = vrot.slane %v11313_v44, %v25108_v6  ;;  %v17083_v9 = vld [vmem:[#allocation7 + $0xc0] ss:$8 sps:$4 sm:$0xff]  }
 0x821   : > { %25119 = vst [vmem:[#allocation33_spill] sm:$0xff] %v22667_v28  ;;  %v22675_v33 = vpop.f32.mrb[157].mxu0  ;;  %v22685_v63 = vrot.slane %v15938_v32, %v25108_v6  ;;  %v10433_v45 = vcombine.low %v22403_v4, %v10416_v56  ;;  %v10434_v0 = vcombine.high %v22403_v4, %v10416_v56  ;;  %v11329_v15 = vcombine.low %v10375_v14, %v10382_v49  ;;  %v17088_v28 = vld [vmem:[#allocation7 + $0xd4] ss:$8 sps:$4 sm:$0xff]  }
 0x822   : > { %v22687_v16 = vpop.f32.mrb[158].mxu0  ;;  %v10425_v27 = vrot.slane %v10417_v1, %v25116_v52  ;;  %v10432_v8 = vrot.slane %v10418_v37, %v25116_v52  ;;  %v15939_v47 = vcombine.high %v10375_v14, %v10382_v49  ;;  %v10021_v32 = vshrl.u32 %v22593_v29, 16  ;;  %12334 = vmatpush1.bf16.msra.mxu0 %v17083_v9 }
 0x823   : > { %v22692_v46 = vpop.f32.mrb[159].mxu0  ;;  %v22699_v1 = vrot.slane %v10433_v45, %v25116_v52  ;;  %v22702_v4 = vrot.slane %v10434_v0, %v25116_v52  ;;  %v22705_v56 = vrot.slane %v11329_v15, %v25108_v6  ;;  %v25120_v14 = vcombine.low %v22549_v35, %v22552_v58  ;;  %12335 = vmatprep.subr.bf16.mxu0 %v17088_v28 }
 0x824   : > { %v11363_v37 = vcombine.low %v10425_v27, %v10432_v8  ;;  %v15940_v49 = vcombine.high %v10425_v27, %v10432_v8  ;;  %v11153_v12 = vcombine.low %v22573_v61, %v22576_v34  ;;  %v11195_v15 = vcombine.low %v22583_v20, %v22586_v43  ;;  %v17086_v8 = vld [vmem:[#allocation7 + $0xd0] ss:$8 sps:$4 sm:$0xff]  }
 0x825   : > { %v11152_v44 = vrot.slane %v25120_v14, %v25116_v52  ;;  %v11379_v45 = vcombine.low %v22699_v1, %v22702_v4  ;;  %v11203_v27 = vcombine.low %v22589_v3, %v22643_v36  ;;  %v22723_v35 = vrot.slane %v15939_v47, %v25108_v6  ;;  %v17091_v14 = vld [vmem:[#allocation7 + $0xe4] ss:$8 sps:$4 sm:$0xff]  }
 0x826   : > { %v22726_v58 = vrot.slane %v11363_v37, %v25108_v6  ;;  %v22729_v61 = vrot.slane %v15940_v49, %v25108_v6  ;;  %v11160_v34 = vrot.slane %v11153_v12, %v25116_v52  ;;  %v11202_v43 = vrot.slane %v11195_v15, %v25116_v52  ;;  %12336 = vmatpush1.bf16.msra.mxu0 %v17086_v8 }
 0x827   : > { %v22733_v20 = vrot.slane %v11379_v45, %v25108_v6  ;;  %v11210_v3 = vrot.slane %v11203_v27, %v25116_v52  ;;  %v25121_v36 = vcombine.low %v22507_v48, %v22510_v2  ;;  %v11253_v28 = vcombine.low %v22518_v5, %v22524_v57  ;;  %12337 = vmatprep.subr.bf16.mxu0 %v17091_v14 }
 0x828   : > { %v22741_v47 = vcombine.high %v11152_v44, %v11160_v34  ;;  %v22743_v37 = vcombine.low %v11152_v44, %v11160_v34  ;;  %v11295_v49 = vcombine.low %v22527_v18, %v22538_v41  ;;  %v11303_v15 = vcombine.low %v22541_v39, %v22559_v13  ;;  %v17089_v44 = vld [vmem:[#allocation7 + $0xe0] ss:$8 sps:$4 sm:$0xff]   ;;  %v17094_v34 = vld [vmem:[#allocation7 + $0xf4] ss:$8 sps:$4 sm:$0xff]  }
 0x829   : > { %v11252_v9 = vrot.slane %v25121_v36, %v25116_v52  ;;  %v22749_v12 = vcombine.high %v11202_v43, %v11210_v3  ;;  %v22751_v45 = vcombine.low %v11202_v43, %v11210_v3  ;;  %v9926_v48 = vpack.c.bf16 %v22627_v59, %v22617_v31 }
 0x82a   : > { %25122 = vst [vmem:[#allocation31_spill] sm:$0xff] %v22741_v47  ;;  %v11922_v27 = vshrl.u32 %v22741_v47, 16  ;;  %v11916_v5 = vshrl.u32 %v22743_v37, 16  ;;  %v11260_v57 = vrot.slane %v11253_v28, %v25116_v52  ;;  %v11302_v18 = vrot.slane %v11295_v49, %v25116_v52  ;;  %12338 = vmatpush1.bf16.msra.mxu0 %v17089_v44 }
 0x82b   : > { %25123 = vst [vmem:[#allocation86_spill] sm:$0xff] %v22749_v12  ;;  %25124 = vst [vmem:[#allocation52_spill] sm:$0xff] %v22751_v45  ;;  %v22757_v2 = vpop.f32.mrb[60].mxu1  ;;  %v11923_v39 = vshrl.u32 %v22749_v12, 16  ;;  %v11917_v13 = vshrl.u32 %v22751_v45, 16  ;;  %v11310_v31 = vrot.slane %v11303_v15, %v25116_v52  ;;  %v10019_v59 = vpack.i.b16 %v9926_v48, %v22593_v29  ;;  %12339 = vmatprep.subr.bf16.mxu0 %v17094_v34 }
 0x82c   : > { %v22763_v41 = vpop.f32.mrb[61].mxu1  ;;  %v22771_v43 = vcombine.high %v11252_v9, %v11260_v57  ;;  %v10022_v3 = vshrl.u32 %v9926_v48, 16  ;;  %v9925_v36 = vpack.c.bf16 %v22635_v51, %v22621_v25  ;;  %v22775_v28 = vcombine.low %v11252_v9, %v11260_v57  ;;  %v17092_v29 = vld [vmem:[#allocation7 + $0xf0] ss:$8 sps:$4 sm:$0xff]  }
 0x82d   : > { %v22769_v8 = vpop.f32.mrb[62].mxu1  ;;  %v11924_v49 = vpack.i.b16 %v11923_v39, %v11922_v27  ;;  %v11918_v0 = vpack.i.b16 %v11917_v13, %v11916_v5  ;;  %v22779_v17 = vcombine.high %v11302_v18, %v11310_v31  ;;  %v10732_v15 = vcombine.high %v10019_v59, %v25107_v42 }
 0x82e   : > { %v22777_v14 = vpop.f32.mrb[63].mxu1  ;;  %v11934_v12 = vshrl.u32 %v22771_v43, 16  ;;  %v10023_v47 = vpack.i.b16 %v10022_v3, %v10021_v32  ;;  %v10739_v48 = vrot.slane %v10019_v59, %v25108_v6  ;;  %v10003_v45 = vpack.i.b16 %v9925_v36, %v22599_v10  ;;  %12340 = vmatpush1.bf16.msra.mxu0 %v17092_v29 }
 0x82f   : > { %12025 = vrot.lane.b32.xlu0 %v11924_v49, %s17870_s28  ;;  %12009 = vrot.lane.b32.xlu1 %v11918_v0, %s17870_s28  ;;  %v11935_v25 = vshrl.u32 %v22779_v17, 16  ;;  %v10746_v51 = vrot.slane %v10732_v15, %v25108_v6  ;;  %v10006_v9 = vshrl.u32 %v9925_v36, 16  ;;  %v22789_v27 = vcombine.low %v11302_v18, %v11310_v31 }
 0x830   : > { %v10747_v44 = vcombine.low %v22409_v22, %v10739_v48  ;;  %v10748_v32 = vcombine.high %v22409_v22, %v10739_v48  ;;  %v10798_v5 = vcombine.high %v10023_v47, %v25107_v42  ;;  %v10805_v57 = vrot.slane %v10023_v47, %v25108_v6 }
 0x831   : > { %v11936_v34 = vpack.i.b16 %v11935_v25, %v11934_v12  ;;  %v10763_v39 = vcombine.low %v22412_v62, %v10746_v51  ;;  %v10764_v0 = vcombine.high %v22412_v62, %v10746_v51  ;;  %v25125_v13 = vshrl.u32 %v22599_v10, 16 }
 0x832   : > { %v10755_v18 = vrot.slane %v10747_v44, %v25116_v52  ;;  %v10762_v31 = vrot.slane %v10748_v32, %v25116_v52  ;;  %v10812_v3 = vrot.slane %v10798_v5, %v25108_v6  ;;  %v10813_v22 = vcombine.low %v22422_v54, %v10805_v57 }
 0x833   : > { %v10007_v59 = vpack.i.b16 %v10006_v9, %v25125_v13  ;;  %12027 = vrot.lane.b32.xlu1 %v11936_v34, %s17870_s28  ;;  %v10771_v47 = vrot.slane %v10763_v39, %v25116_v52  ;;  %v10778_v12 = vrot.slane %v10764_v0, %v25116_v52  ;;  %v10814_v62 = vcombine.high %v22422_v54, %v10805_v57 }
 0x834   : > { %v10600_v10 = vcombine.high %v10003_v45, %v25107_v42  ;;  %v10821_v36 = vrot.slane %v10813_v22, %v25116_v52  ;;  %v10829_v49 = vcombine.low %v22425_v7, %v10812_v3  ;;  %v10830_v15 = vcombine.high %v22425_v7, %v10812_v3 }
 0x835   : > { %v11613_v29 = vcombine.low %v10755_v18, %v10762_v31  ;;  %v10828_v48 = vrot.slane %v10814_v62, %v25116_v52  ;;  %v15950_v25 = vcombine.high %v10755_v18, %v10762_v31  ;;  %v11629_v51 = vcombine.low %v10771_v47, %v10778_v12 }
 0x836   : > { %v15951_v9 = vcombine.high %v10771_v47, %v10778_v12  ;;  %v10837_v44 = vrot.slane %v10829_v49, %v25116_v52  ;;  %v10844_v32 = vrot.slane %v10830_v15, %v25116_v52  ;;  %v10607_v5 = vrot.slane %v10003_v45, %v25108_v6 }
 0x837   : > { %v22815_v54 = vrot.slane %v11613_v29, %v25108_v6  ;;  %v25126_v57 = vcombine.high %v22699_v1, %v22702_v4  ;;  %v22825_v34 = vrot.slane %v15950_v25, %v25108_v6  ;;  %v22828_v39 = vrot.slane %v11629_v51, %v25108_v6 }
 0x838   : > { %v11663_v0 = vcombine.low %v10821_v36, %v10828_v48  ;;  %v15952_v13 = vcombine.high %v10821_v36, %v10828_v48  ;;  %v11679_v18 = vcombine.low %v10837_v44, %v10844_v32  ;;  %v15953_v31 = vcombine.high %v10837_v44, %v10844_v32 }
 0x839   : > { %v22822_v7 = vrot.slane %v25126_v57, %v25108_v6  ;;  %v10614_v3 = vrot.slane %v10600_v10, %v25108_v6  ;;  %v22832_v45 = vrot.slane %v15951_v9, %v25108_v6  ;;  %v11645_v1 = vcombine.low %v22815_v54, %v22825_v34 }
 0x83a   : > { %v10615_v4 = vcombine.low %v22416_v55, %v10607_v5  ;;  %v10616_v22 = vcombine.high %v22416_v55, %v10607_v5  ;;  %v22839_v47 = vrot.slane %v11663_v0, %v25108_v6  ;;  %v22842_v12 = vrot.slane %v15952_v13, %v25108_v6 }
 0x83b   : > { %v22845_v62 = vrot.slane %v11679_v18, %v25108_v6  ;;  %v10631_v10 = vcombine.low %v22428_v60, %v10614_v3  ;;  %v10632_v15 = vcombine.high %v22428_v60, %v10614_v3  ;;  %v10666_v29 = vcombine.high %v10007_v59, %v25107_v42 }
 0x83c   : > { %v10623_v36 = vrot.slane %v10615_v4, %v25116_v52  ;;  %v10630_v49 = vrot.slane %v10616_v22, %v25116_v52  ;;  %v10673_v48 = vrot.slane %v10007_v59, %v25108_v6  ;;  %v11928_v25 = vshrl.u32 %v22775_v28, 16 }
 0x83d   : > { %v10639_v55 = vrot.slane %v10631_v10, %v25116_v52  ;;  %v11929_v51 = vshrl.u32 %v22789_v27, 16  ;;  %v10646_v9 = vrot.slane %v10632_v15, %v25116_v52  ;;  %v10680_v44 = vrot.slane %v10666_v29, %v25108_v6 }
 0x83e   : > { %v11513_v32 = vcombine.low %v10623_v36, %v10630_v49  ;;  %v15946_v5 = vcombine.high %v10623_v36, %v10630_v49  ;;  %v10681_v57 = vcombine.low %v22432_v30, %v10673_v48  ;;  %v10682_v60 = vcombine.high %v22432_v30, %v10673_v48 }
 0x83f   : > { %v11930_v0 = vpack.i.b16 %v11929_v51, %v11928_v25  ;;  %v9920_v13 = vpack.c.bf16 %v22687_v16, %v22669_v24  ;;  %v10697_v59 = vcombine.low %v22435_v11, %v10680_v44  ;;  %v10698_v18 = vcombine.high %v22435_v11, %v10680_v44 }
 0x840   : > { %v22865_v3 = vrot.slane %v11513_v32, %v25108_v6  ;;  %v22868_v4 = vrot.slane %v15946_v5, %v25108_v6  ;;  %v10689_v22 = vrot.slane %v10681_v57, %v25116_v52  ;;  %v10696_v10 = vrot.slane %v10682_v60, %v25116_v52 }
 0x841   : > { %v11529_v36 = vcombine.low %v10639_v55, %v10646_v9  ;;  %v15947_v30 = vcombine.high %v10639_v55, %v10646_v9  ;;  %12011 = vrot.lane.b32.xlu1 %v11930_v0, %s17870_s28  ;;  %v22874_v24 = vrot.slane %v15953_v31, %v25108_v6  ;;  %v22877_v16 = vrot.slane %v10697_v59, %v25116_v52 }
 0x842   : > { %v22880_v11 = vrot.slane %v10698_v18, %v25116_v52  ;;  %v11545_v49 = vcombine.low %v22865_v3, %v22868_v4  ;;  %v11563_v29 = vcombine.low %v10689_v22, %v10696_v10  ;;  %v15948_v48 = vcombine.high %v10689_v22, %v10696_v10 }
 0x843   : > { %v22885_v15 = vrot.slane %v11529_v36, %v25108_v6  ;;  %v10053_v55 = vshrl.u32 %v9920_v13, 16  ;;  %v22888_v25 = vrot.slane %v15947_v30, %v25108_v6  ;;  %v11353_v9 = vcombine.low %v22705_v56, %v22723_v35 }
 0x844   : > { %v11579_v31 = vcombine.low %v22877_v16, %v22880_v11  ;;  %v15949_v51 = vcombine.high %v22877_v16, %v22880_v11  ;;  %v22897_v44 = vrot.slane %v11563_v29, %v25108_v6  ;;  %v25127_v32 = vcombine.low %v22682_v38, %v22685_v63 }
 0x845   : > { %v11395_v57 = vcombine.low %v22726_v58, %v22729_v61  ;;  %v11403_v60 = vcombine.low %v22733_v20, %v22822_v7  ;;  %v22908_v0 = vrot.slane %v15948_v48, %v25108_v6  ;;  %v11360_v56 = vrot.slane %v11353_v9, %v25116_v52 }
 0x846   : > { %v11352_v5 = vrot.slane %v25127_v32, %v25116_v52  ;;  %v22911_v59 = vrot.slane %v11579_v31, %v25108_v6  ;;  %v9919_v35 = vpack.c.bf16 %v22692_v46, %v22675_v33  ;;  %v25128_v58 = vcombine.low %v22630_v40, %v22633_v21  ;;  %v25129_v40 = vld [vmem:[#allocation33_spill] sm:$0xff] }
 0x847   : > { %v11402_v38 = vrot.slane %v11395_v57, %v25116_v52  ;;  %v11410_v63 = vrot.slane %v11403_v60, %v25116_v52  ;;  %v11453_v20 = vcombine.low %v22646_v19, %v22652_v53  ;;  %v11495_v46 = vcombine.low %v22655_v23, %v22664_v50 }
 0x848   : > { %v11452_v61 = vrot.slane %v25128_v58, %v25116_v52  ;;  %v22924_v7 = vcombine.high %v11352_v5, %v11360_v56  ;;  %v22926_v18 = vcombine.low %v11352_v5, %v11360_v56  ;;  %v10037_v22 = vshrl.u32 %v9919_v35, 16 }
 0x849   : > { %v22930_v33 = vcombine.high %v11402_v38, %v11410_v63  ;;  %v22932_v10 = vcombine.low %v11402_v38, %v11410_v63  ;;  %v11460_v36 = vrot.slane %v11453_v20, %v25116_v52  ;;  %v11503_v21 = vcombine.low %v25129_v40, %v22678_v26 }
 0x84a   : > { %v11946_v30 = vshrl.u32 %v22924_v7, 16  ;;  %v11940_v19 = vshrl.u32 %v22926_v18, 16  ;;  %v11502_v53 = vrot.slane %v11495_v46, %v25116_v52  ;;  %v9928_v29 = vpack.c.bf16 %v22769_v8, %v22757_v2 }
 0x84b   : > { %v11947_v23 = vshrl.u32 %v22930_v33, 16  ;;  %v11941_v50 = vshrl.u32 %v22932_v10, 16  ;;  %v22944_v48 = vcombine.high %v11452_v61, %v11460_v36  ;;  %v11510_v31 = vrot.slane %v11503_v21, %v25116_v52  ;;  %v25130_v21 = vld [vmem:[#allocation78_spill] sm:$0xff] }
 0x84c   : > { %v22947_v9 = vcombine.low %v11452_v61, %v11460_v36  ;;  %v10051_v26 = vpack.i.b16 %v9928_v29, %v9920_v13  ;;  %v10054_v32 = vshrl.u32 %v9928_v29, 16  ;;  %v9927_v5 = vpack.c.bf16 %v22777_v14, %v22763_v41 }
 0x84d   : > { %v11948_v57 = vpack.i.b16 %v11947_v23, %v11946_v30  ;;  %v11942_v60 = vpack.i.b16 %v11941_v50, %v11940_v19  ;;  %v22951_v56 = vcombine.high %v11502_v53, %v11510_v31  ;;  %v11958_v2 = vshrl.u32 %v22944_v48, 16  ;;  %v25131_v23 = vld [vmem:[#allocation67_spill] sm:$0xff] }
 0x84e   : > { %v22954_v8 = vcombine.low %v11502_v53, %v11510_v31  ;;  %v11952_v38 = vshrl.u32 %v22947_v9, 16  ;;  %v10055_v63 = vpack.i.b16 %v10054_v32, %v10053_v55  ;;  %v10996_v58 = vcombine.high %v10051_v26, %v25107_v42 }
 0x84f   : > { %12029 = vrot.lane.b32.xlu0 %v11948_v57, %s17870_s28  ;;  %12013 = vrot.lane.b32.xlu1 %v11942_v60, %s17870_s28  ;;  %v11959_v13 = vshrl.u32 %v22951_v56, 16  ;;  %v11003_v41 = vrot.slane %v10051_v26, %v25108_v6  ;;  %v10035_v14 = vpack.i.b16 %v9927_v5, %v9919_v35  ;;  %v10038_v61 = vshrl.u32 %v9927_v5, 16  ;;  %v25132_v5 = vld [vmem:[#allocation64_spill] sm:$0xff] }
 0x850   : > { %v11953_v20 = vshrl.u32 %v22954_v8, 16  ;;  %v11010_v46 = vrot.slane %v10996_v58, %v25108_v6  ;;  %v11062_v36 = vcombine.high %v10055_v63, %v25107_v42  ;;  %v11069_v55 = vrot.slane %v10055_v63, %v25108_v6 }
 0x851   : > { %v11960_v40 = vpack.i.b16 %v11959_v13, %v11958_v2  ;;  %v11011_v30 = vcombine.low %v25130_v21, %v11003_v41  ;;  %v11012_v19 = vcombine.high %v25130_v21, %v11003_v41  ;;  %v10039_v53 = vpack.i.b16 %v10038_v61, %v10037_v22 }
 0x852   : > { %v11954_v29 = vpack.i.b16 %v11953_v20, %v11952_v38  ;;  %v11027_v50 = vcombine.low %v25131_v23, %v11010_v46  ;;  %v11028_v35 = vcombine.high %v25131_v23, %v11010_v46  ;;  %v11076_v31 = vrot.slane %v11062_v36, %v25108_v6  ;;  %v25133_v38 = vld [vmem:[#allocation66_spill] sm:$0xff] }
 0x853   : > { %12031 = vrot.lane.b32.xlu0 %v11960_v40, %s17870_s28  ;;  %v11019_v26 = vrot.slane %v11011_v30, %v25116_v52  ;;  %v11026_v32 = vrot.slane %v11012_v19, %v25116_v52  ;;  %v11077_v57 = vcombine.low %v25132_v5, %v11069_v55  ;;  %v11078_v60 = vcombine.high %v25132_v5, %v11069_v55 }
 0x854   : > { %12015 = vrot.lane.b32.xlu1 %v11954_v29, %s17870_s28  ;;  %v11035_v22 = vrot.slane %v11027_v50, %v25116_v52  ;;  %v11042_v2 = vrot.slane %v11028_v35, %v25116_v52  ;;  %v11093_v63 = vcombine.low %v25133_v38, %v11076_v31  ;;  %v11094_v58 = vcombine.high %v25133_v38, %v11076_v31 }
 0x855   : > { %v11085_v13 = vrot.slane %v11077_v57, %v25116_v52  ;;  %v11092_v41 = vrot.slane %v11078_v60, %v25116_v52  ;;  %v11813_v61 = vcombine.low %v11019_v26, %v11026_v32  ;;  %v15958_v20 = vcombine.high %v11019_v26, %v11026_v32 }
 0x856   : > { %v11101_v46 = vrot.slane %v11093_v63, %v25116_v52  ;;  %v11108_v36 = vrot.slane %v11094_v58, %v25116_v52  ;;  %v11829_v55 = vcombine.low %v11035_v22, %v11042_v2  ;;  %v15959_v40 = vcombine.high %v11035_v22, %v11042_v2  ;;  %v25134_v58 = vld [vmem:[#allocation51_spill] sm:$0xff] }
 0x857   : > { %v22986_v21 = vrot.slane %v11813_v61, %v25108_v6  ;;  %v22989_v30 = vrot.slane %v15958_v20, %v25108_v6  ;;  %v11863_v19 = vcombine.low %v11085_v13, %v11092_v41  ;;  %v15960_v29 = vcombine.high %v11085_v13, %v11092_v41 }
 0x858   : > { %v11594_v23 = vrot.slane %v15949_v51, %v25108_v6  ;;  %v22996_v50 = vrot.slane %v11829_v55, %v25108_v6  ;;  %v11879_v35 = vcombine.low %v11101_v46, %v11108_v36  ;;  %v15961_v31 = vcombine.high %v11101_v46, %v11108_v36  ;;  %v25136_v36 = vld [vmem:[#allocation65_spill] sm:$0xff] }
 0x859   : > { %v22999_v26 = vrot.slane %v15959_v40, %v25108_v6  ;;  %v11845_v32 = vcombine.low %v22986_v21, %v22989_v30  ;;  %v23004_v5 = vrot.slane %v11863_v19, %v25108_v6  ;;  %v10864_v57 = vcombine.high %v10035_v14, %v25107_v42 }
 0x85a   : > { %v23008_v60 = vrot.slane %v15960_v29, %v25108_v6  ;;  %v23011_v16 = vrot.slane %v11879_v35, %v25108_v6  ;;  %v10871_v11 = vrot.slane %v10035_v14, %v25108_v6  ;;  %v10930_v51 = vcombine.high %v10039_v53, %v25107_v42  ;;  %v25135_v42 = vld [vmem:[#allocation30_spill] sm:$0xff] }
 0x85b   : > { %v23016_v22 = vrot.slane %v15961_v31, %v25108_v6  ;;  %v10878_v2 = vrot.slane %v10864_v57, %v25108_v6  ;;  %v10937_v38 = vrot.slane %v10039_v53, %v25108_v6  ;;  %v11553_v63 = vcombine.low %v22885_v15, %v22888_v25  ;;  %v25137_v25 = vld [vmem:[#allocation87_spill] sm:$0xff] }
 0x85c   : > { %v10879_v13 = vcombine.low %v25134_v58, %v10871_v11  ;;  %v10880_v41 = vcombine.high %v25134_v58, %v10871_v11  ;;  %v10944_v61 = vrot.slane %v10930_v51, %v25108_v6  ;;  %v11595_v14 = vcombine.low %v22897_v44, %v22908_v0 }
 0x85d   : > { %v10895_v20 = vcombine.low %v25135_v42, %v10878_v2  ;;  %v10896_v46 = vcombine.high %v25135_v42, %v10878_v2  ;;  %v10945_v55 = vcombine.low %v25136_v36, %v10937_v38  ;;  %v10946_v53 = vcombine.high %v25136_v36, %v10937_v38 }
 0x85e   : > { %v10887_v40 = vrot.slane %v10879_v13, %v25116_v52  ;;  %v10894_v15 = vrot.slane %v10880_v41, %v25116_v52  ;;  %v10961_v19 = vcombine.low %v25137_v25, %v10944_v61  ;;  %v10962_v29 = vcombine.high %v25137_v25, %v10944_v61 }
 0x85f   : > { %v10903_v35 = vrot.slane %v10895_v20, %v25116_v52  ;;  %v10910_v44 = vrot.slane %v10896_v46, %v25116_v52  ;;  %v10953_v0 = vrot.slane %v10945_v55, %v25116_v52  ;;  %v10960_v31 = vrot.slane %v10946_v53, %v25116_v52 }
 0x860   : > { %v10969_v57 = vrot.slane %v10961_v19, %v25116_v52  ;;  %v10976_v11 = vrot.slane %v10962_v29, %v25116_v52  ;;  %v11713_v51 = vcombine.low %v10887_v40, %v10894_v15  ;;  %v15954_v2 = vcombine.high %v10887_v40, %v10894_v15 }
 0x861   : > { %v11729_v38 = vcombine.low %v10903_v35, %v10910_v44  ;;  %v15955_v58 = vcombine.high %v10903_v35, %v10910_v44  ;;  %v11763_v13 = vcombine.low %v10953_v0, %v10960_v31  ;;  %v15956_v41 = vcombine.high %v10953_v0, %v10960_v31 }
 0x862   : > { %v11720_v61 = vrot.slane %v11713_v51, %v25108_v6  ;;  %v11728_v42 = vrot.slane %v15954_v2, %v25108_v6  ;;  %v11779_v20 = vcombine.low %v10969_v57, %v10976_v11  ;;  %v15957_v46 = vcombine.high %v10969_v57, %v10976_v11 }
 0x863   : > { %v11736_v36 = vrot.slane %v11729_v38, %v25108_v6  ;;  %v11744_v55 = vrot.slane %v15955_v58, %v25108_v6  ;;  %v11770_v53 = vrot.slane %v11763_v13, %v25108_v6  ;;  %v11552_v40 = vrot.slane %v11545_v49, %v25116_v52 }
 0x864   : > { %v11745_v15 = vcombine.low %v11720_v61, %v11728_v42  ;;  %v11778_v25 = vrot.slane %v15956_v41, %v25108_v6  ;;  %v11786_v19 = vrot.slane %v11779_v20, %v25108_v6  ;;  %v11560_v29 = vrot.slane %v11553_v63, %v25116_v52 }
 0x865   : > { %v11794_v35 = vrot.slane %v15957_v46, %v25108_v6  ;;  %v11602_v44 = vrot.slane %v11595_v14, %v25116_v52  ;;  %v11603_v0 = vcombine.low %v22911_v59, %v11594_v23  ;;  %v11653_v31 = vcombine.low %v22828_v39, %v22832_v45 }
 0x866   : > { %v23058_v57 = vcombine.high %v11552_v40, %v11560_v29  ;;  %v23060_v3 = vcombine.low %v11552_v40, %v11560_v29  ;;  %v11695_v4 = vcombine.low %v22839_v47, %v22842_v12  ;;  %v11703_v49 = vcombine.low %v22845_v62, %v22874_v24 }
 0x867   : > { %v11610_v63 = vrot.slane %v11603_v0, %v25116_v52  ;;  %v11652_v6 = vrot.slane %v11645_v1, %v25116_v52  ;;  %v11660_v59 = vrot.slane %v11653_v31, %v25116_v52  ;;  %v11753_v39 = vcombine.low %v11736_v36, %v11744_v55 }
 0x868   : > { %v11970_v45 = vshrl.u32 %v23058_v57, 16  ;;  %v11702_v23 = vrot.slane %v11695_v4, %v25116_v52  ;;  %v11710_v14 = vrot.slane %v11703_v49, %v25116_v52  ;;  %v11752_v47 = vrot.slane %v11745_v15, %v25116_v52 }
 0x869   : > { %v23076_v12 = vcombine.high %v11602_v44, %v11610_v63  ;;  %v23078_v62 = vcombine.low %v11602_v44, %v11610_v63  ;;  %v23080_v24 = vcombine.high %v11652_v6, %v11660_v59  ;;  %v23082_v11 = vcombine.low %v11652_v6, %v11660_v59 }
 0x86a   : > { %v23084_v54 = vcombine.high %v11702_v23, %v11710_v14  ;;  %v23086_v34 = vcombine.low %v11702_v23, %v11710_v14  ;;  %v11760_v1 = vrot.slane %v11753_v39, %v25116_v52  ;;  %v11795_v51 = vcombine.low %v11770_v53, %v11778_v25 }
 0x86b   : > { %v11971_v2 = vshrl.u32 %v23076_v12, 16  ;;  %v11964_v38 = vshrl.u32 %v23060_v3, 16  ;;  %v11965_v58 = vshrl.u32 %v23078_v62, 16  ;;  %v11982_v13 = vshrl.u32 %v23080_v24, 16 }
 0x86c   : > { %v11983_v41 = vshrl.u32 %v23084_v54, 16  ;;  %v11976_v61 = vshrl.u32 %v23082_v11, 16  ;;  %v11977_v42 = vshrl.u32 %v23086_v34, 16  ;;  %v23096_v20 = vcombine.high %v11752_v47, %v11760_v1 }
 0x86d   : > { %v11972_v46 = vpack.i.b16 %v11971_v2, %v11970_v45  ;;  %v11966_v36 = vpack.i.b16 %v11965_v58, %v11964_v38  ;;  %v11803_v55 = vcombine.low %v11786_v19, %v11794_v35  ;;  %v23098_v53 = vcombine.low %v11752_v47, %v11760_v1 }
 0x86e   : > { %v11984_v40 = vpack.i.b16 %v11983_v41, %v11982_v13  ;;  %v11978_v15 = vpack.i.b16 %v11977_v42, %v11976_v61  ;;  %v11802_v25 = vrot.slane %v11795_v51, %v25116_v52  ;;  %v11853_v44 = vcombine.low %v22996_v50, %v22999_v26 }
 0x86f   : > { %12033 = vrot.lane.b32.xlu0 %v11972_v46, %s17870_s28  ;;  %12017 = vrot.lane.b32.xlu1 %v11966_v36, %s17870_s28  ;;  %v11810_v29 = vrot.slane %v11803_v55, %v25116_v52  ;;  %v11895_v0 = vcombine.low %v23004_v5, %v23008_v60  ;;  %v11994_v19 = vshrl.u32 %v23096_v20, 16  ;;  %v11988_v35 = vshrl.u32 %v23098_v53, 16 }
 0x870   : > { %v11852_v31 = vrot.slane %v11845_v32, %v25116_v52  ;;  %v11903_v4 = vcombine.low %v23011_v16, %v23016_v22  ;;  %v11860_v50 = vrot.slane %v11853_v44, %v25116_v52  ;;  %v11927_v60 = vpack.i.b16 %v22789_v27, %v22775_v28 }
 0x871   : > { %v23116_v49 = vcombine.high %v11802_v25, %v11810_v29  ;;  %v23118_v63 = vcombine.low %v11802_v25, %v11810_v29  ;;  %v11902_v26 = vrot.slane %v11895_v0, %v25116_v52  ;;  %v11945_v21 = vpack.i.b16 %v22930_v33, %v22924_v7 }
 0x872   : > { %v11910_v5 = vrot.slane %v11903_v4, %v25116_v52  ;;  %v11939_v30 = vpack.i.b16 %v22932_v10, %v22926_v18  ;;  %v23133_v22 = vcombine.high %v11852_v31, %v11860_v50  ;;  %v23135_v52 = vcombine.low %v11852_v31, %v11860_v50 }
 0x873   : > { %12035 = vrot.lane.b32.xlu0 %v11984_v40, %s17870_s28  ;;  %12019 = vrot.lane.b32.xlu1 %v11978_v15, %s17870_s28  ;;  %v11995_v32 = vshrl.u32 %v23116_v49, 16  ;;  %v11989_v16 = vshrl.u32 %v23118_v63, 16  ;;  %v11957_v27 = vpack.i.b16 %v22951_v56, %v22944_v48  ;;  %v11951_v7 = vpack.i.b16 %v22954_v8, %v22947_v9 }
 0x874   : > { %v23137_v6 = vcombine.high %v11902_v26, %v11910_v5  ;;  %v23139_v28 = vcombine.low %v11902_v26, %v11910_v5  ;;  %v12006_v10 = vshrl.u32 %v23133_v22, 16  ;;  %v12000_v59 = vshrl.u32 %v23135_v52, 16 }
 0x875   : > { %v11996_v18 = vpack.i.b16 %v11995_v32, %v11994_v19  ;;  %v11990_v33 = vpack.i.b16 %v11989_v16, %v11988_v35  ;;  %v11969_v23 = vpack.i.b16 %v23076_v12, %v23058_v57  ;;  %v11963_v14 = vpack.i.b16 %v23078_v62, %v23060_v3  ;;  %v25138_v62 = vld [vmem:[#allocation52_spill] sm:$0xff]  ;;  %v25142_v16 = vld [vmem:[#allocation19_spill] sm:$0xff] }
 0x876   : > { %v12007_v39 = vshrl.u32 %v23137_v6, 16  ;;  %v12001_v45 = vshrl.u32 %v23139_v28, 16  ;;  %v11981_v48 = vpack.i.b16 %v23084_v54, %v23080_v24  ;;  %v11975_v9 = vpack.i.b16 %v23086_v34, %v23082_v11  ;;  %v25139_v11 = vld [vmem:[#allocation31_spill] sm:$0xff]  ;;  %v25140_v54 = vld [vmem:[#allocation86_spill] sm:$0xff] }
 0x877   : > { %12037 = vrot.lane.b32.xlu0 %v11996_v18, %s17870_s28  ;;  %12021 = vrot.lane.b32.xlu1 %v11990_v33, %s17870_s28  ;;  %v11993_v56 = vpack.i.b16 %v23116_v49, %v23096_v20  ;;  %v11987_v57 = vpack.i.b16 %v23118_v63, %v23098_v53  ;;  %v12005_v3 = vpack.i.b16 %v23137_v6, %v23133_v22  ;;  %v17607_v18 = vld [vmem:[%s18157_s26] sm:$0xff] }
 0x878   : > { %v12008_v8 = vpack.i.b16 %v12007_v39, %v12006_v10  ;;  %v12002_v47 = vpack.i.b16 %v12001_v45, %v12000_v59  ;;  %v11999_v12 = vpack.i.b16 %v23139_v28, %v23135_v52  ;;  %v11915_v24 = vpack.i.b16 %v25138_v62, %v22743_v37  ;;  %v17608_v39 = vld [vmem:[%s18157_s26 + $0x8] sm:$0xff] }
 0x879   : > { %v11921_v34 = vpack.i.b16 %v25140_v54, %v25139_v11  ;;  %v11933_v58 = vpack.i.b16 %v22779_v17, %v22771_v43  ;;  %v17611_v11 = vld [vmem:[%s18157_s26 + $0x20] sm:$0xff] }
 0x87b   : > { %12039 = vrot.lane.b32.xlu0 %v12008_v8, %s17870_s28  ;;  %12023 = vrot.lane.b32.xlu1 %v12002_v47, %s17870_s28  ;;  %s24078_s28 = scalar_lea.vmem [#allocation11], %s15700_s11  ;;  %s16256_s11 = sshll.u32 %s17964_s25, 12 }
 0x87c   : > { %s15578_s3 = sshll.u32 %s24078_s28, 4  ;;  %s24171_s14 = scalar_lea.hbm %s25211_s21, %s16256_s11  ;;  %s24173_s3 = int_to_ptr.vmem [resolvable:$true] %s15578_s3 }
 0x87d   : > { %s15565_s25 = scalar_lea.sflag [#allocation4], %s18151_s15  ;;  %s17781_s9 = scalar_lea.vmem %s24173_s3, 4096 }
 0x87e   : > { %p17782_p3 = scmp.ne.s32.totalorder %s24173_s3, %s17781_s9 }
 0x880   : > { %p17783_p5 = pnand %p17782_p3, %p18099_p10 }
 0x882   : > { %p17784_p7 = pneg %p17783_p5 }
 0x8a1   : > { %v12026_v1 = vpop.permute.xlu0 %12025  ;;  %v12010_v51 = vpop.permute.xlu1 %12009 }
 0x8a2   : > { %v12043_v2 = vsel %vm8320_vm0, %v11915_v24, %v12010_v51  ;;  %v12075_v38 = vsel %vm8320_vm0, %v11921_v34, %v12026_v1  ;;  %v17612_v51 = vld [vmem:[%s18157_s26 + $0x28] sm:$0xff] }
 0x8a3   : > { %12341 = vmatprep.mubr.bf16.mxu0 %v12075_v38 }
 0x8a4   : > { %12342 = vmatmul.mubr.bf16.vlgmr.msra.gmra.mrb[160].mxu0 %v12043_v2 }
 0x8a5   : > { %v12028_v13 = vpop.permute.xlu1 %12027 }
 0x8a6   : > { %v12079_v41 = vsel %vm8320_vm0, %v11933_v58, %v12028_v13  ;;  %v17613_v58 = vld [vmem:[%s18157_s26 + $0x30] sm:$0xff] }
 0x8a7   : > { %12351 = vmatprep.mubr.bf16.mxu0 %v12079_v41  ;;  %v17614_v41 = vld [vmem:[%s18157_s26 + $0x38] sm:$0xff] }
 0x8b3   : > { %v12012_v61 = vpop.permute.xlu1 %12011 }
 0x8b4   : > { %v12047_v37 = vsel %vm8320_vm0, %v11927_v60, %v12012_v61 }
 0x8b5   : > { %12352 = vmatmul.mubr.bf16.gmra.mrb[164].mxu0 %v12047_v37 }
 0x8c1   : > { %v12030_v42 = vpop.permute.xlu0 %12029  ;;  %v12014_v20 = vpop.permute.xlu1 %12013 }
 0x8c2   : > { %v12083_v46 = vsel %vm8320_vm0, %v11945_v21, %v12030_v42  ;;  %v12051_v36 = vsel %vm8320_vm0, %v11939_v30, %v12014_v20  ;;  %v12137_v21 = vld [vmem:[%s24226_s5] sm:$0x3]  ;;  %v25141_v30 = vld [vmem:[#allocation20_spill] sm:$0xff] }
 0x8c3   : > { %12361 = vmatprep.mubr.bf16.mxu0 %v12083_v46  ;;  %v23195_v32 = vrot.slane %v12137_v21, %v25141_v30  ;;  %v23198_v22 = vrot.slane %v12137_v21, %v25142_v16  ;;  %v17619_v21 = vld [vmem:[%s18157_s26 + $0x60] sm:$0xff] }
 0x8c4   : > { %12362 = vmatmul.mubr.bf16.gmra.mrb[168].mxu0 %v12051_v36 }
 0x8c5   : > { %v12032_v55 = vpop.permute.xlu0 %12031 }
 0x8c6   : > { %v12087_v53 = vsel %vm8320_vm0, %v11957_v27, %v12032_v55  ;;  %v12016_v17 = vpop.permute.xlu1 %12015 }
 0x8c7   : > { %12371 = vmatprep.mubr.bf16.mxu0 %v12087_v53  ;;  %v12055_v43 = vsel %vm8320_vm0, %v11951_v7, %v12016_v17  ;;  %v17615_v17 = vld [vmem:[%s18157_s26 + $0x40] sm:$0xff] }
 0x8cc   : > { %12372 = vmatmul.mubr.bf16.gmra.mrb[172].mxu0 %v12055_v43 }
 0x8e1   : > { %v12034_v40 = vpop.permute.xlu0 %12033  ;;  %v12018_v15 = vpop.permute.xlu1 %12017 }
 0x8e2   : > { %v12091_v25 = vsel %vm8320_vm0, %v11969_v23, %v12034_v40  ;;  %v12059_v29 = vsel %vm8320_vm0, %v11963_v14, %v12018_v15  ;;  %v17609_v14 = vld [vmem:[%s18157_s26 + $0x10] sm:$0xff] }
 0x8e3   : > { %12381 = vmatprep.mubr.bf16.mxu0 %v12091_v25  ;;  %v17616_v25 = vld [vmem:[%s18157_s26 + $0x48] sm:$0xff] }
 0x8e4   : > { %12382 = vmatmul.mubr.bf16.gmra.mrb[176].mxu0 %v12059_v29 }
 0x8e5   : > { %v12036_v44 = vpop.permute.xlu0 %12035  ;;  %v12020_v19 = vpop.permute.xlu1 %12019 }
 0x8e6   : > { %v12095_v0 = vsel %vm8320_vm0, %v11981_v48, %v12036_v44  ;;  %v12063_v4 = vsel %vm8320_vm0, %v11975_v9, %v12020_v19  ;;  %v17610_v9 = vld [vmem:[%s18157_s26 + $0x18] sm:$0xff] }
 0x8e7   : > { %12391 = vmatprep.mubr.bf16.mxu0 %v12095_v0  ;;  %v17617_v0 = vld [vmem:[%s18157_s26 + $0x50] sm:$0xff] }
 0x8e9   : > { %v12038_v35 = vpop.permute.xlu0 %12037  ;;  %v12022_v49 = vpop.permute.xlu1 %12021 }
 0x8ea   : > { %v12099_v31 = vsel %vm8320_vm0, %v11993_v56, %v12038_v35  ;;  %v12067_v50 = vsel %vm8320_vm0, %v11987_v57, %v12022_v49  ;;  %v17618_v35 = vld [vmem:[%s18157_s26 + $0x58] sm:$0xff] }
 0x8ec   : > { %12392 = vmatmul.mubr.bf16.gmra.mrb[180].mxu0 %v12063_v4 }
 0x8ed   : > { %12401 = vmatprep.mubr.bf16.mxu0 %v12099_v31  ;;  %v12040_v63 = vpop.permute.xlu0 %12039  ;;  %v12024_v5 = vpop.permute.xlu1 %12023 }
 0x8ee   : > { %v12103_v26 = vsel %vm8320_vm0, %v12005_v3, %v12040_v63  ;;  %v12071_v60 = vsel %vm8320_vm0, %v11999_v12, %v12024_v5 }
 0x8f4   : > { %12402 = vmatmul.mubr.bf16.gmra.mrb[184].mxu0 %v12067_v50 }
 0x8f5   : > { %12411 = vmatprep.mubr.bf16.mxu0 %v12103_v26 }
 0x8fc   : > { %12412 = vmatmul.mubr.bf16.gmra.mrb[188].mxu0 %v12071_v60 }
 0x977   : > { %v12343_v52 = vpop.f32.mrb[160].mxu0 }
 0x978   : > { %v12344_v6 = vadd.f32 %v12343_v52, %v23195_v32  ;;  %v12345_v28 = vpop.f32.mrb[161].mxu0 }
 0x979   : > { %v12346_v27 = vadd.f32 %v12345_v28, %v23198_v22  ;;  %v12347_v7 = vpop.f32.mrb[162].mxu0 }
 0x97a   : > { %v23203_v33 = vadd.f32 %v17607_v18, %v12344_v6  ;;  %v12348_v10 = vadd.f32 %v12347_v7, %v23195_v32  ;;  %v12349_v59 = vpop.f32.mrb[163].mxu0 }
 0x97b   : > { %v23207_v45 = vadd.f32 %v17608_v39, %v12346_v27  ;;  %v12350_v23 = vadd.f32 %v12349_v59, %v23198_v22  ;;  %v17620_v27 = vld [vmem:[%s18157_s26 + $0x68] sm:$0xff]  ;;  %v17622_v39 = vld [vmem:[%s18157_s26 + $0x78] sm:$0xff] }
 0x97c   : > { %25143 = vst [vmem:[#allocation53_spill] sm:$0xff] %v23203_v33  ;;  %v23211_v48 = vadd.f32 %v17609_v14, %v12348_v10  ;;  %v17621_v10 = vld [vmem:[%s18157_s26 + $0x70] sm:$0xff] }
 0x97d   : > { %25144 = vst [vmem:[#allocation89_spill] sm:$0xff] %v23207_v45  ;;  %v23214_v56 = vadd.f32 %v17610_v9, %v12350_v23  ;;  %v12454_v8 = vadd.f32 %v23207_v45, %v23203_v33 }
 0x97e   : > { %25145 = vst [vmem:[#allocation88_spill] sm:$0xff] %v23211_v48 }
 0x97f   : > { %25146 = vst [vmem:[#allocation32_spill] sm:$0xff] %v23214_v56  ;;  %12455 = vadd.xlane.f32.xlu0 %v12454_v8  ;;  %v12457_v47 = vadd.f32 %v23214_v56, %v23211_v48 }
 0x981   : > { %12458 = vadd.xlane.f32.xlu1 %v12457_v47 }
 0x988   : > { %v12353_v57 = vpop.f32.mrb[164].mxu0 }
 0x989   : > { %v12354_v3 = vadd.f32 %v12353_v57, %v23195_v32  ;;  %v12355_v12 = vpop.f32.mrb[165].mxu0 }
 0x98a   : > { %v12356_v62 = vadd.f32 %v12355_v12, %v23198_v22  ;;  %v12357_v24 = vpop.f32.mrb[166].mxu0 }
 0x98b   : > { %v23223_v54 = vadd.f32 %v17611_v11, %v12354_v3  ;;  %v12358_v34 = vadd.f32 %v12357_v24, %v23195_v32  ;;  %v12359_v1 = vpop.f32.mrb[167].mxu0 }
 0x98c   : > { %v23227_v2 = vadd.f32 %v17612_v51, %v12356_v62  ;;  %v12360_v38 = vadd.f32 %v12359_v1, %v23198_v22  ;;  %v17623_v62 = vld [vmem:[%s18157_s26 + $0x80] sm:$0xff]  ;;  %v17624_v1 = vld [vmem:[%s18157_s26 + $0x88] sm:$0xff] }
 0x98d   : > { %25147 = vst [vmem:[#allocation74_spill] sm:$0xff] %v23223_v54  ;;  %v23231_v13 = vadd.f32 %v17613_v58, %v12358_v34  ;;  %v17625_v58 = vld [vmem:[%s18157_s26 + $0x90] sm:$0xff] }
 0x98e   : > { %25148 = vst [vmem:[#allocation22_spill] sm:$0xff] %v23227_v2  ;;  %v23234_v61 = vadd.f32 %v17614_v41, %v12360_v38  ;;  %v12460_v37 = vadd.f32 %v23227_v2, %v23223_v54 }
 0x98f   : > { %25149 = vst [vmem:[#allocation26_spill] sm:$0xff] %v23231_v13 }
 0x990   : > { %25150 = vst [vmem:[#allocation76_spill] sm:$0xff] %v23234_v61  ;;  %12461 = vadd.xlane.f32.xlu0 %v12460_v37  ;;  %v12463_v42 = vadd.f32 %v23234_v61, %v23231_v13  ;;  %v17626_v37 = vld [vmem:[%s18157_s26 + $0x98] sm:$0xff] }
 0x994   : > { %12464 = vadd.xlane.f32.xlu0 %v12463_v42 }
 0x997   : > { %v12363_v20 = vpop.f32.mrb[168].mxu0 }
 0x998   : > { %v12364_v46 = vadd.f32 %v12363_v20, %v23195_v32  ;;  %v12365_v36 = vpop.f32.mrb[169].mxu0 }
 0x999   : > { %v12366_v55 = vadd.f32 %v12365_v36, %v23198_v22  ;;  %v12367_v53 = vpop.f32.mrb[170].mxu0 }
 0x99a   : > { %v23243_v43 = vadd.f32 %v17615_v17, %v12364_v46  ;;  %v12368_v40 = vadd.f32 %v12367_v53, %v23195_v32  ;;  %v12369_v15 = vpop.f32.mrb[171].mxu0 }
 0x99b   : > { %v23247_v29 = vadd.f32 %v17616_v25, %v12366_v55  ;;  %v12370_v44 = vadd.f32 %v12369_v15, %v23198_v22  ;;  %v17627_v15 = vld [vmem:[%s18157_s26 + $0xa0] sm:$0xff] }
 0x99c   : > { %25151 = vst [vmem:[#allocation57_spill] sm:$0xff] %v23243_v43  ;;  %v23251_v19 = vadd.f32 %v17617_v0, %v12368_v40 }
 0x99d   : > { %25152 = vst [vmem:[#allocation56_spill] sm:$0xff] %v23247_v29  ;;  %v23254_v31 = vadd.f32 %v17618_v35, %v12370_v44  ;;  %v12466_v4 = vadd.f32 %v23247_v29, %v23243_v43  ;;  %v17628_v35 = vld [vmem:[%s18157_s26 + $0xa8] sm:$0xff] }
 0x99e   : > { %25153 = vst [vmem:[#allocation54_spill] sm:$0xff] %v23251_v19 }
 0x99f   : > { %25154 = vst [vmem:[#allocation55_spill] sm:$0xff] %v23254_v31  ;;  %v12373_v49 = vpop.f32.mrb[172].mxu0  ;;  %12467 = vadd.xlane.f32.xlu0 %v12466_v4  ;;  %v12469_v63 = vadd.f32 %v23254_v31, %v23251_v19 }
 0x9a0   : > { %v12374_v50 = vadd.f32 %v12373_v49, %v23195_v32  ;;  %v12375_v26 = vpop.f32.mrb[173].mxu0 }
 0x9a1   : > { %v12376_v5 = vadd.f32 %v12375_v26, %v23198_v22  ;;  %v12377_v60 = vpop.f32.mrb[174].mxu0  ;;  %12470 = vadd.xlane.f32.xlu1 %v12469_v63  ;;  %v17629_v63 = vld [vmem:[%s18157_s26 + $0xb0] sm:$0xff]  ;;  %v17630_v26 = vld [vmem:[%s18157_s26 + $0xb8] sm:$0xff] }
 0x9a2   : > { %v23263_v52 = vadd.f32 %v17619_v21, %v12374_v50  ;;  %v12378_v6 = vadd.f32 %v12377_v60, %v23195_v32  ;;  %v12379_v28 = vpop.f32.mrb[175].mxu0 }
 0x9a3   : > { %v23267_v7 = vadd.f32 %v17620_v27, %v12376_v5  ;;  %v12380_v18 = vadd.f32 %v12379_v28, %v23198_v22 }
 0x9a4   : > { %25155 = vst [vmem:[#allocation36_spill] sm:$0xff] %v23263_v52  ;;  %v23271_v59 = vadd.f32 %v17621_v10, %v12378_v6 }
 0x9a5   : > { %25156 = vst [vmem:[#allocation34_spill] sm:$0xff] %v23267_v7  ;;  %v23274_v23 = vadd.f32 %v17622_v39, %v12380_v18  ;;  %v12472_v14 = vadd.f32 %v23267_v7, %v23263_v52  ;;  %v17631_v39 = vld [vmem:[%s18157_s26 + $0xc0] sm:$0xff] }
 0x9a6   : > { %25157 = vst [vmem:[#allocation40_spill] sm:$0xff] %v23271_v59 }
 0x9a7   : > { %25158 = vst [vmem:[#allocation73_spill] sm:$0xff] %v23274_v23  ;;  %12473 = vadd.xlane.f32.xlu0 %v12472_v14  ;;  %v12475_v9 = vadd.f32 %v23274_v23, %v23271_v59 }
 0x9a9   : > { %12476 = vadd.xlane.f32.xlu1 %v12475_v9 }
 0x9b7   : > { %v12383_v8 = vpop.f32.mrb[176].mxu0 }
 0x9b8   : > { %v12384_v47 = vadd.f32 %v12383_v8, %v23195_v32  ;;  %v12385_v57 = vpop.f32.mrb[177].mxu0 }
 0x9b9   : > { %v12386_v3 = vadd.f32 %v12385_v57, %v23198_v22  ;;  %v12387_v12 = vpop.f32.mrb[178].mxu0 }
 0x9ba   : > { %v23283_v24 = vadd.f32 %v17623_v62, %v12384_v47  ;;  %v12388_v11 = vadd.f32 %v12387_v12, %v23195_v32  ;;  %v12389_v34 = vpop.f32.mrb[179].mxu0  ;;  %v17632_v47 = vld [vmem:[%s18157_s26 + $0xc8] sm:$0xff]  ;;  %v17633_v12 = vld [vmem:[%s18157_s26 + $0xd0] sm:$0xff] }
 0x9bb   : > { %v23287_v51 = vadd.f32 %v17624_v1, %v12386_v3  ;;  %v12390_v38 = vadd.f32 %v12389_v34, %v23198_v22 }
 0x9bc   : > { %25159 = vst [vmem:[#allocation72_spill] sm:$0xff] %v23283_v24  ;;  %v23291_v41 = vadd.f32 %v17625_v58, %v12388_v11  ;;  %v17634_v11 = vld [vmem:[%s18157_s26 + $0xd8] sm:$0xff] }
 0x9bd   : > { %25160 = vst [vmem:[#allocation23_spill] sm:$0xff] %v23287_v51  ;;  %v23294_v42 = vadd.f32 %v17626_v37, %v12390_v38  ;;  %v12478_v20 = vadd.f32 %v23287_v51, %v23283_v24 }
 0x9be   : > { %25161 = vst [vmem:[#allocation43_spill] sm:$0xff] %v23291_v41 }
 0x9bf   : > { %25162 = vst [vmem:[#allocation69_spill] sm:$0xff] %v23294_v42  ;;  %v12393_v46 = vpop.f32.mrb[180].mxu0  ;;  %12479 = vadd.xlane.f32.xlu0 %v12478_v20  ;;  %v12481_v36 = vadd.f32 %v23294_v42, %v23291_v41 }
 0x9c0   : > { %v12394_v55 = vadd.f32 %v12393_v46, %v23195_v32  ;;  %v12395_v53 = vpop.f32.mrb[181].mxu0 }
 0x9c1   : > { %v12396_v17 = vadd.f32 %v12395_v53, %v23198_v22  ;;  %v12397_v40 = vpop.f32.mrb[182].mxu0  ;;  %12482 = vadd.xlane.f32.xlu1 %v12481_v36 }
 0x9c2   : > { %v23303_v25 = vadd.f32 %v17627_v15, %v12394_v55  ;;  %v12398_v44 = vadd.f32 %v12397_v40, %v23195_v32  ;;  %v12399_v0 = vpop.f32.mrb[183].mxu0  ;;  %v17635_v55 = vld [vmem:[%s18157_s26 + $0xe0] sm:$0xff]  ;;  %v17636_v15 = vld [vmem:[%s18157_s26 + $0xe8] sm:$0xff] }
 0x9c3   : > { %v23307_v4 = vadd.f32 %v17628_v35, %v12396_v17  ;;  %v12400_v49 = vadd.f32 %v12399_v0, %v23198_v22  ;;  %v17637_v35 = vld [vmem:[%s18157_s26 + $0xf0] sm:$0xff] }
 0x9c4   : > { %25163 = vst [vmem:[#allocation68_spill] sm:$0xff] %v23303_v25  ;;  %v23311_v50 = vadd.f32 %v17629_v63, %v12398_v44  ;;  %v17638_v63 = vld [vmem:[%s18157_s26 + $0xf8] sm:$0xff]  ;;  %s17875_s26 = smov [#allocation11]  }
 0x9c5   : > { %25164 = vst [vmem:[#allocation71_spill] sm:$0xff] %v23307_v4  ;;  %v23314_v5 = vadd.f32 %v17630_v26, %v12400_v49  ;;  %v12484_v60 = vadd.f32 %v23307_v4, %v23303_v25 }
 0x9c6   : > { %25165 = vst [vmem:[#allocation48_spill] sm:$0xff] %v23311_v50 }
 0x9c7   : > { %25166 = vst [vmem:[#allocation49_spill] sm:$0xff] %v23314_v5  ;;  %12485 = vadd.xlane.f32.xlu0 %v12484_v60  ;;  %v12487_v21 = vadd.f32 %v23314_v5, %v23311_v50  ;;  %v12403_v6 = vpop.f32.mrb[184].mxu0 }
 0x9c8   : > { %v12404_v28 = vadd.f32 %v12403_v6, %v23195_v32  ;;  %v12405_v27 = vpop.f32.mrb[185].mxu0  ;;  %v12818_v6 = vld [vmem:[#allocation8 + $0x20] sm:$0xff] }
 0x9c9   : > { %12488 = vadd.xlane.f32.xlu1 %v12487_v21  ;;  %v12406_v18 = vadd.f32 %v12405_v27, %v23198_v22  ;;  %v12407_v10 = vpop.f32.mrb[186].mxu0 }
 0x9ca   : > { %v23323_v14 = vadd.f32 %v17631_v39, %v12404_v28  ;;  %v12408_v9 = vadd.f32 %v12407_v10, %v23195_v32  ;;  %v12409_v8 = vpop.f32.mrb[187].mxu0  ;;  %v12815_v28 = vld [vmem:[#allocation8 + $0x8] sm:$0xff]  ;;  %v12822_v10 = vld [vmem:[#allocation8 + $0x40] sm:$0xff] }
 0x9cb   : > { %v23327_v57 = vadd.f32 %v17632_v47, %v12406_v18  ;;  %v12410_v3 = vadd.f32 %v12409_v8, %v23198_v22  ;;  %v12826_v39 = vld [vmem:[#allocation8 + $0x60] sm:$0xff] }
 0x9cc   : > { %25167 = vst [vmem:[#allocation70_spill] sm:$0xff] %v23323_v14  ;;  %v23331_v62 = vadd.f32 %v17633_v12, %v12408_v9  ;;  %v16003_v47 = vcombine.high %v12822_v10, %v12826_v39  ;;  %v12827_v12 = vld [vmem:[#allocation8 + $0x68] sm:$0xff] }
 0x9cd   : > { %25168 = vst [vmem:[#allocation50_spill] sm:$0xff] %v23327_v57  ;;  %v23334_v34 = vadd.f32 %v17634_v11, %v12410_v3  ;;  %v12490_v1 = vadd.f32 %v23327_v57, %v23323_v14  ;;  %v12823_v3 = vld [vmem:[#allocation8 + $0x48] sm:$0xff]  ;;  %v12830_v11 = vld [vmem:[#allocation8 + $0x80] sm:$0xff] }
 0x9ce   : > { %25169 = vst [vmem:[#allocation21_spill] sm:$0xff] %v23331_v62 }
 0x9cf   : > { %25170 = vst [vmem:[#allocation75_spill] sm:$0xff] %v23334_v34  ;;  %v12413_v38 = vpop.f32.mrb[188].mxu0  ;;  %12491 = vadd.xlane.f32.xlu0 %v12490_v1  ;;  %v12493_v58 = vadd.f32 %v23334_v34, %v23331_v62  ;;  %v16005_v1 = vcombine.high %v12823_v3, %v12827_v12 }
 0x9d0   : > { %v12414_v37 = vadd.f32 %v12413_v38, %v23195_v32  ;;  %v12415_v20 = vpop.f32.mrb[189].mxu0  ;;  %v12834_v38 = vld [vmem:[#allocation8 + $0xa0] sm:$0xff] }
 0x9d1   : > { %v12416_v46 = vadd.f32 %v12415_v20, %v23198_v22  ;;  %v12417_v36 = vpop.f32.mrb[190].mxu0  ;;  %12494 = vadd.xlane.f32.xlu1 %v12493_v58  ;;  %v12831_v58 = vld [vmem:[#allocation8 + $0x88] sm:$0xff]  ;;  %v16002_v20 = vcombine.low %v12822_v10, %v12826_v39 }
 0x9d2   : > { %v23343_v53 = vadd.f32 %v17635_v55, %v12414_v37  ;;  %v12418_v17 = vadd.f32 %v12417_v36, %v23195_v32  ;;  %v12419_v40 = vpop.f32.mrb[191].mxu0  ;;  %v12814_v32 = vld [vmem:[#allocation8] sm:$0xff]  ;;  %v12835_v37 = vld [vmem:[#allocation8 + $0xa8] sm:$0xff]  ;;  %v16011_v36 = vcombine.high %v12830_v11, %v12834_v38 }
 0x9d3   : > { %v23347_v44 = vadd.f32 %v17636_v15, %v12416_v46  ;;  %v12420_v0 = vadd.f32 %v12419_v40, %v23198_v22  ;;  %v15994_v27 = vcombine.low %v12814_v32, %v12818_v6  ;;  %v15995_v18 = vcombine.high %v12814_v32, %v12818_v6  ;;  %v12819_v22 = vld [vmem:[#allocation8 + $0x28] sm:$0xff]  ;;  %v12842_v40 = vld [vmem:[#allocation8 + $0xe0] sm:$0xff] }
 0x9d4   : > { %25171 = vst [vmem:[#allocation25_spill] sm:$0xff] %v23343_v53  ;;  %v23351_v49 = vadd.f32 %v17637_v35, %v12418_v17  ;;  %v15996_v9 = vcombine.low %v12815_v28, %v12819_v22  ;;  %v15997_v8 = vcombine.high %v12815_v28, %v12819_v22  ;;  %v16004_v46 = vcombine.low %v12823_v3, %v12827_v12  ;;  %v12838_v17 = vld [vmem:[#allocation8 + $0xc0] sm:$0xff]  ;;  %v12839_v15 = vld [vmem:[#allocation8 + $0xc8] sm:$0xff] }
 0x9d5   : > { %25172 = vst [vmem:[#allocation24_spill] sm:$0xff] %v23347_v44  ;;  %v23354_v26 = vadd.f32 %v17638_v63, %v12420_v0  ;;  %v12496_v60 = vadd.f32 %v23347_v44, %v23343_v53  ;;  %13624 = vmatprep.subr.bf16.mxu1 %v15995_v18  ;;  %v16013_v55 = vcombine.high %v12831_v58, %v12835_v37  ;;  %v12843_v0 = vld [vmem:[#allocation8 + $0xe8] sm:$0xff]  ;;  %v12846_v32 = vld [vmem:[#allocation8 + $0x100] sm:$0xff] }
 0x9d6   : > { %25173 = vst [vmem:[#allocation82_spill] sm:$0xff] %v23351_v49  ;;  %13737 = vmatprep.subr.bf16.mxu0 %v15997_v8  ;;  %13625 = vmatpush1.bf16.msra.mxu1 %v15994_v27  ;;  %v16010_v35 = vcombine.low %v12830_v11, %v12834_v38  ;;  %v16012_v63 = vcombine.low %v12831_v58, %v12835_v37  ;;  %v12850_v6 = vld [vmem:[#allocation8 + $0x120] sm:$0xff]  ;;  %v12847_v28 = vld [vmem:[#allocation8 + $0x108] sm:$0xff] }
 0x9d7   : > { %25174 = vst [vmem:[#allocation79_spill] sm:$0xff] %v23354_v26  ;;  %12497 = vadd.xlane.f32.xlu0 %v12496_v60  ;;  %v12499_v21 = vadd.f32 %v23354_v26, %v23351_v49  ;;  %13738 = vmatpush1.bf16.msra.mxu0 %v15996_v9  ;;  %v16019_v60 = vcombine.high %v12838_v17, %v12842_v40  ;;  %v12851_v27 = vld [vmem:[#allocation8 + $0x128] sm:$0xff]  ;;  %v12854_v9 = vld [vmem:[#allocation8 + $0x140] sm:$0xff] }
 0x9d8   : > { %13626 = vmatprep.subr.bf16.mxu1 %v16003_v47  ;;  %13739 = vmatprep.subr.bf16.mxu0 %v16005_v1  ;;  %v16018_v18 = vcombine.low %v12838_v17, %v12842_v40  ;;  %v16020_v22 = vcombine.low %v12839_v15, %v12843_v0  ;;  %v16027_v10 = vcombine.high %v12846_v32, %v12850_v6  ;;  %v12858_v8 = vld [vmem:[#allocation8 + $0x160] sm:$0xff]  ;;  %v12855_v47 = vld [vmem:[#allocation8 + $0x148] sm:$0xff] }
 0x9d9   : > { %12500 = vadd.xlane.f32.xlu1 %v12499_v21  ;;  %v16021_v21 = vcombine.high %v12839_v15, %v12843_v0  ;;  %v16029_v39 = vcombine.high %v12847_v28, %v12851_v27  ;;  %v12859_v3 = vld [vmem:[#allocation8 + $0x168] sm:$0xff]  ;;  %v16026_v12 = vcombine.low %v12846_v32, %v12850_v6  ;;  %v16028_v11 = vcombine.low %v12847_v28, %v12851_v27  ;;  %v12862_v58 = vld [vmem:[#allocation8 + $0x180] sm:$0xff] }
 0x9da   : > { %13627 = vmatpush1.bf16.msra.mxu1 %v16002_v20  ;;  %v16035_v1 = vcombine.high %v12854_v9, %v12858_v8  ;;  %v16037_v38 = vcombine.high %v12855_v47, %v12859_v3  ;;  %v12866_v37 = vld [vmem:[#allocation8 + $0x1a0] sm:$0xff]  ;;  %v12863_v20 = vld [vmem:[#allocation8 + $0x188] sm:$0xff] }
 0x9db   : > { %13740 = vmatpush1.bf16.msra.mxu0 %v16004_v46  ;;  %13628 = vmatprep.subr.bf16.mxu1 %v16011_v36  ;;  %v12867_v46 = vld [vmem:[#allocation8 + $0x1a8] sm:$0xff]  ;;  %v16034_v36 = vcombine.low %v12854_v9, %v12858_v8  ;;  %v16043_v17 = vcombine.high %v12862_v58, %v12866_v37  ;;  %v12870_v15 = vld [vmem:[#allocation8 + $0x1c0] sm:$0xff] }
 0x9dc   : > { %13741 = vmatprep.subr.bf16.mxu0 %v16013_v55  ;;  %v16036_v55 = vcombine.low %v12855_v47, %v12859_v3  ;;  %v16045_v40 = vcombine.high %v12863_v20, %v12867_v46  ;;  %v12874_v0 = vld [vmem:[#allocation8 + $0x1e0] sm:$0xff] }
 0x9dd   : > { %v16051_v32 = vcombine.high %v12870_v15, %v12874_v0  ;;  %v12878_v28 = vld [vmem:[#allocation8 + $0x200] sm:$0xff] }
 0x9de   : > { %13629 = vmatpush1.bf16.msra.mxu1 %v16010_v35  ;;  %v12871_v35 = vld [vmem:[#allocation8 + $0x1c8] sm:$0xff]  ;;  %v12882_v27 = vld [vmem:[#allocation8 + $0x220] sm:$0xff] }
 0x9df   : > { %13742 = vmatpush1.bf16.msra.mxu0 %v16012_v63  ;;  %13630 = vmatprep.subr.bf16.mxu1 %v16019_v60  ;;  %v12875_v63 = vld [vmem:[#allocation8 + $0x1e8] sm:$0xff]  ;;  %v16042_v60 = vcombine.low %v12862_v58, %v12866_v37  ;;  %v16059_v9 = vcombine.high %v12878_v28, %v12882_v27  ;;  %v12886_v3 = vld [vmem:[#allocation8 + $0x240] sm:$0xff]  ;;  %v16058_v37 = vcombine.low %v12878_v28, %v12882_v27 }
 0x9e0   : > { %13743 = vmatprep.subr.bf16.mxu0 %v16021_v21  ;;  %v16044_v21 = vcombine.low %v12863_v20, %v12867_v46  ;;  %v16053_v6 = vcombine.high %v12871_v35, %v12875_v63 }
 0x9e2   : > { %13631 = vmatpush1.bf16.msra.mxu1 %v16018_v18  ;;  %v12879_v18 = vld [vmem:[#allocation8 + $0x208] sm:$0xff] }
 0x9e3   : > { %13744 = vmatpush1.bf16.msra.mxu0 %v16020_v22  ;;  %13632 = vmatprep.subr.bf16.mxu1 %v16027_v10  ;;  %v12883_v22 = vld [vmem:[#allocation8 + $0x228] sm:$0xff]  ;;  %v16050_v10 = vcombine.low %v12870_v15, %v12874_v0 }
 0x9e4   : > { %13745 = vmatprep.subr.bf16.mxu0 %v16029_v39  ;;  %v16052_v39 = vcombine.low %v12871_v35, %v12875_v63  ;;  %v16061_v47 = vcombine.high %v12879_v18, %v12883_v22  ;;  %v16060_v20 = vcombine.low %v12879_v18, %v12883_v22 }
 0x9e6   : > { %13633 = vmatpush1.bf16.msra.mxu1 %v16026_v12  ;;  %v12890_v12 = vld [vmem:[#allocation8 + $0x260] sm:$0xff] }
 0x9e7   : > { %13746 = vmatpush1.bf16.msra.mxu0 %v16028_v11  ;;  %13634 = vmatprep.subr.bf16.mxu1 %v16035_v1  ;;  %v12887_v1 = vld [vmem:[#allocation8 + $0x248] sm:$0xff] }
 0x9e8   : > { %13747 = vmatprep.subr.bf16.mxu0 %v16037_v38  ;;  %v12891_v38 = vld [vmem:[#allocation8 + $0x268] sm:$0xff] }
 0x9ea   : > { %13635 = vmatpush1.bf16.msra.mxu1 %v16034_v36 }
 0x9eb   : > { %13748 = vmatpush1.bf16.msra.mxu0 %v16036_v55  ;;  %13636 = vmatprep.subr.bf16.mxu1 %v16043_v17  ;;  %v16067_v17 = vcombine.high %v12886_v3, %v12890_v12 }
 0x9ec   : > { %13749 = vmatprep.subr.bf16.mxu0 %v16045_v40  ;;  %v16069_v40 = vcombine.high %v12887_v1, %v12891_v38 }
 0x9ee   : > { %13637 = vmatpush1.bf16.msra.mxu1 %v16042_v60  ;;  %v16066_v60 = vcombine.low %v12886_v3, %v12890_v12 }
 0x9ef   : > { %13750 = vmatpush1.bf16.msra.mxu0 %v16044_v21  ;;  %13638 = vmatprep.subr.bf16.mxu1 %v16051_v32  ;;  %v16068_v21 = vcombine.low %v12887_v1, %v12891_v38 }
 0x9f0   : > { %13751 = vmatprep.subr.bf16.mxu0 %v16053_v6 }
 0x9f2   : > { %13639 = vmatpush1.bf16.msra.mxu1 %v16050_v10 }
 0x9f3   : > { %13752 = vmatpush1.bf16.msra.mxu0 %v16052_v39  ;;  %13640 = vmatprep.subr.bf16.mxu1 %v16059_v9 }
 0x9f4   : > { %13753 = vmatprep.subr.bf16.mxu0 %v16061_v47 }
 0x9f6   : > { %13641 = vmatpush1.bf16.msra.mxu1 %v16058_v37 }
 0x9f7   : > { %13754 = vmatpush1.bf16.msra.mxu0 %v16060_v20  ;;  %13642 = vmatprep.subr.bf16.mxu1 %v16067_v17 }
 0x9f8   : > { %13755 = vmatprep.subr.bf16.mxu0 %v16069_v40 }
 0x9fa   : > { %13643 = vmatpush1.bf16.msra.mxu1 %v16066_v60 }
 0x9fb   : > { %13756 = vmatpush1.bf16.msra.mxu0 %v16068_v21 }
 0xa0c   : > { %v12456_v8 = vpop.xlane.xlu0 %12455 }
 0xa0d   : > { %v12502_v11 = vmul.f32 0.00390625, %v12456_v8 }
 0xa0e   : > { %v12459_v58 = vpop.xlane.xlu1 %12458 }
 0xa0f   : > { %v23361_v46 = vsub.f32 %v23203_v33, %v12502_v11  ;;  %v23364_v36 = vsub.f32 %v23207_v45, %v12502_v11  ;;  %v12503_v55 = vmul.f32 0.00390625, %v12459_v58  ;;  %v12853_v33 = vld [vmem:[#allocation8 + $0x138] sm:$0xff] }
 0xa11   : > { %v12550_v15 = vmul.f32 %v23361_v46, %v23361_v46  ;;  %v12551_v0 = vmul.f32 %v23364_v36, %v23364_v36  ;;  %v23371_v35 = vsub.f32 %v23211_v48, %v12503_v55  ;;  %v23374_v63 = vsub.f32 %v23214_v56, %v12503_v55 }
 0xa13   : > { %v12552_v32 = vmul.f32 %v23371_v35, %v23371_v35  ;;  %v12553_v6 = vmul.f32 %v23374_v63, %v23374_v63  ;;  %v12582_v28 = vadd.f32 %v12551_v0, %v12550_v15 }
 0xa15   : > { %12583 = vadd.xlane.f32.xlu0 %v12582_v28  ;;  %v12585_v27 = vadd.f32 %v12553_v6, %v12552_v32 }
 0xa17   : > { %12586 = vadd.xlane.f32.xlu1 %v12585_v27 }
 0xa1d   : > { %v12462_v18 = vpop.xlane.xlu0 %12461 }
 0xa1e   : > { %v12504_v22 = vmul.f32 0.00390625, %v12462_v18 }
 0xa20   : > { %v23381_v10 = vsub.f32 %v23223_v54, %v12504_v22  ;;  %v23384_v39 = vsub.f32 %v23227_v2, %v12504_v22  ;;  %v12841_v2 = vld [vmem:[#allocation8 + $0xd8] sm:$0xff] }
 0xa21   : > { %v12465_v9 = vpop.xlane.xlu0 %12464  ;;  %v12845_v54 = vld [vmem:[#allocation8 + $0xf8] sm:$0xff] }
 0xa22   : > { %v12554_v8 = vmul.f32 %v23381_v10, %v23381_v10  ;;  %v12555_v47 = vmul.f32 %v23384_v39, %v23384_v39  ;;  %v12505_v3 = vmul.f32 0.00390625, %v12465_v9 }
 0xa24   : > { %v23391_v12 = vsub.f32 %v23231_v13, %v12505_v3  ;;  %v23394_v11 = vsub.f32 %v23234_v61, %v12505_v3  ;;  %v12588_v1 = vadd.f32 %v12555_v47, %v12554_v8  ;;  %v12915_v61 = vld [vmem:[#allocation8 + $0x328] sm:$0xff]  ;;  %v12844_v13 = vld [vmem:[#allocation8 + $0xf0] sm:$0xff] }
 0xa26   : > { %v12556_v38 = vmul.f32 %v23391_v12, %v23391_v12  ;;  %v12557_v58 = vmul.f32 %v23394_v11, %v23394_v11  ;;  %12589 = vadd.xlane.f32.xlu0 %v12588_v1 }
 0xa28   : > { %v12591_v37 = vadd.f32 %v12557_v58, %v12556_v38  ;;  %v12894_v58 = vld [vmem:[#allocation8 + $0x280] sm:$0xff] }
 0xa2a   : > { %12592 = vadd.xlane.f32.xlu1 %v12591_v37  ;;  %v12898_v37 = vld [vmem:[#allocation8 + $0x2a0] sm:$0xff] }
 0xa2c   : > { %v12468_v20 = vpop.xlane.xlu0 %12467 }
 0xa2d   : > { %v12506_v55 = vmul.f32 0.00390625, %v12468_v20  ;;  %v12895_v20 = vld [vmem:[#allocation8 + $0x288] sm:$0xff] }
 0xa2e   : > { %v12471_v17 = vpop.xlane.xlu1 %12470 }
 0xa2f   : > { %v23401_v40 = vsub.f32 %v23243_v43, %v12506_v55  ;;  %v23404_v15 = vsub.f32 %v23247_v29, %v12506_v55  ;;  %v12507_v0 = vmul.f32 0.00390625, %v12471_v17  ;;  %v16074_v55 = vcombine.low %v12894_v58, %v12898_v37 }
 0xa30   : > { %v16075_v17 = vcombine.high %v12894_v58, %v12898_v37 }
 0xa31   : > { %v12558_v60 = vmul.f32 %v23401_v40, %v23401_v40  ;;  %v12559_v21 = vmul.f32 %v23404_v15, %v23404_v15  ;;  %v23411_v32 = vsub.f32 %v23251_v19, %v12507_v0  ;;  %v23414_v6 = vsub.f32 %v23254_v31, %v12507_v0  ;;  %v12899_v0 = vld [vmem:[#allocation8 + $0x2a8] sm:$0xff] }
 0xa32   : > { %13644 = vmatprep.subr.bf16.mxu1 %v16075_v17  ;;  %v16077_v58 = vcombine.high %v12895_v20, %v12899_v0  ;;  %v12914_v17 = vld [vmem:[#allocation8 + $0x320] sm:$0xff] }
 0xa33   : > { %v12560_v28 = vmul.f32 %v23411_v32, %v23411_v32  ;;  %v12561_v27 = vmul.f32 %v23414_v6, %v23414_v6  ;;  %v12594_v18 = vadd.f32 %v12559_v21, %v12558_v60  ;;  %v12902_v60 = vld [vmem:[#allocation8 + $0x2c0] sm:$0xff]  ;;  %13645 = vmatpush1.bf16.msra.mxu1 %v16074_v55 }
 0xa34   : > { %v12474_v22 = vpop.xlane.xlu0 %12473  ;;  %v12906_v21 = vld [vmem:[#allocation8 + $0x2e0] sm:$0xff]  ;;  %13757 = vmatprep.subr.bf16.mxu0 %v16077_v58 }
 0xa35   : > { %v12508_v9 = vmul.f32 0.00390625, %v12474_v22  ;;  %12595 = vadd.xlane.f32.xlu0 %v12594_v18  ;;  %v12597_v8 = vadd.f32 %v12561_v27, %v12560_v28  ;;  %v16083_v37 = vcombine.high %v12902_v60, %v12906_v21  ;;  %v16082_v19 = vcombine.low %v12902_v60, %v12906_v21  ;;  %v12918_v60 = vld [vmem:[#allocation8 + $0x340] sm:$0xff]  ;;  %v12923_v21 = vld [vmem:[#allocation8 + $0x368] sm:$0xff] }
 0xa36   : > { %v12477_v47 = vpop.xlane.xlu1 %12476 }
 0xa37   : > { %v23421_v3 = vsub.f32 %v23263_v52, %v12508_v9  ;;  %v23424_v1 = vsub.f32 %v23267_v7, %v12508_v9  ;;  %v12509_v38 = vmul.f32 0.00390625, %v12477_v47  ;;  %12598 = vadd.xlane.f32.xlu1 %v12597_v8  ;;  %v12903_v9 = vld [vmem:[#allocation8 + $0x2c8] sm:$0xff]  ;;  %v16076_v47 = vcombine.low %v12895_v20, %v12899_v0  ;;  %13646 = vmatprep.subr.bf16.mxu1 %v16083_v37  ;;  %v12910_v20 = vld [vmem:[#allocation8 + $0x300] sm:$0xff] }
 0xa38   : > { %v12907_v8 = vld [vmem:[#allocation8 + $0x2e8] sm:$0xff]  ;;  %13647 = vmatpush1.bf16.msra.mxu1 %v16082_v19  ;;  %v16090_v29 = vcombine.low %v12910_v20, %v12914_v17  ;;  %v16091_v43 = vcombine.high %v12910_v20, %v12914_v17 }
 0xa39   : > { %v12562_v28 = vmul.f32 %v23421_v3, %v23421_v3  ;;  %v12563_v27 = vmul.f32 %v23424_v1, %v23424_v1  ;;  %v23431_v18 = vsub.f32 %v23271_v59, %v12509_v38  ;;  %v23434_v22 = vsub.f32 %v23274_v23, %v12509_v38  ;;  %13758 = vmatpush1.bf16.msra.mxu0 %v16076_v47  ;;  %v12911_v0 = vld [vmem:[#allocation8 + $0x308] sm:$0xff] }
 0xa3a   : > { %v16085_v59 = vcombine.high %v12903_v9, %v12907_v8  ;;  %v16084_v23 = vcombine.low %v12903_v9, %v12907_v8  ;;  %v16093_v55 = vcombine.high %v12911_v0, %v12915_v61  ;;  %13648 = vmatprep.subr.bf16.mxu1 %v16091_v43 }
 0xa3b   : > { %v12564_v7 = vmul.f32 %v23431_v18, %v23431_v18  ;;  %v12565_v52 = vmul.f32 %v23434_v22, %v23434_v22  ;;  %v12600_v31 = vadd.f32 %v12563_v27, %v12562_v28  ;;  %v16092_v28 = vcombine.low %v12911_v0, %v12915_v61 }
 0xa3c   : > { %13759 = vmatprep.subr.bf16.mxu0 %v16085_v59  ;;  %13649 = vmatpush1.bf16.msra.mxu1 %v16090_v29 }
 0xa3d   : > { %12601 = vadd.xlane.f32.xlu0 %v12600_v31  ;;  %v12603_v38 = vadd.f32 %v12565_v52, %v12564_v7  ;;  %13760 = vmatpush1.bf16.msra.mxu0 %v16084_v23  ;;  %v12922_v31 = vld [vmem:[#allocation8 + $0x360] sm:$0xff]  ;;  %v12919_v52 = vld [vmem:[#allocation8 + $0x348] sm:$0xff] }
 0xa3e   : > { %13761 = vmatprep.subr.bf16.mxu0 %v16093_v55  ;;  %v16098_v7 = vcombine.low %v12918_v60, %v12922_v31  ;;  %v16099_v59 = vcombine.high %v12918_v60, %v12922_v31  ;;  %v16100_v19 = vcombine.low %v12919_v52, %v12923_v21  ;;  %v16101_v23 = vcombine.high %v12919_v52, %v12923_v21  ;;  %v12926_v55 = vld [vmem:[#allocation8 + $0x380] sm:$0xff]  ;;  %v12927_v31 = vld [vmem:[#allocation8 + $0x388] sm:$0xff] }
 0xa3f   : > { %12604 = vadd.xlane.f32.xlu1 %v12603_v38  ;;  %v12930_v60 = vld [vmem:[#allocation8 + $0x3a0] sm:$0xff] }
 0xa40   : > { %13650 = vmatprep.subr.bf16.mxu1 %v16099_v59  ;;  %v16106_v59 = vcombine.low %v12926_v55, %v12930_v60  ;;  %v16107_v21 = vcombine.high %v12926_v55, %v12930_v60 }
 0xa41   : > { %13762 = vmatpush1.bf16.msra.mxu0 %v16092_v28  ;;  %13651 = vmatpush1.bf16.msra.mxu1 %v16098_v7 }
 0xa42   : > { %13763 = vmatprep.subr.bf16.mxu0 %v16101_v23  ;;  %v12934_v23 = vld [vmem:[#allocation8 + $0x3c0] sm:$0xff]  ;;  %13652 = vmatprep.subr.bf16.mxu1 %v16107_v21  ;;  %v23480_v21 = vld [vmem:[#allocation8 + $0x10] sm:$0xff] }
 0xa45   : > { %13764 = vmatpush1.bf16.msra.mxu0 %v16100_v19  ;;  %v12931_v19 = vld [vmem:[#allocation8 + $0x3a8] sm:$0xff]  ;;  %13653 = vmatpush1.bf16.msra.mxu1 %v16106_v59 }
 0xa4c   : > { %v12480_v27 = vpop.xlane.xlu0 %12479 }
 0xa4d   : > { %v12510_v9 = vmul.f32 0.00390625, %v12480_v27  ;;  %v12938_v27 = vld [vmem:[#allocation8 + $0x3e0] sm:$0xff] }
 0xa4e   : > { %v12483_v8 = vpop.xlane.xlu1 %12482 }
 0xa4f   : > { %v23441_v61 = vsub.f32 %v23283_v24, %v12510_v9  ;;  %v23444_v43 = vsub.f32 %v23287_v51, %v12510_v9  ;;  %v12511_v29 = vmul.f32 0.00390625, %v12483_v8  ;;  %v16108_v8 = vcombine.low %v12927_v31, %v12931_v19  ;;  %v12939_v51 = vld [vmem:[#allocation8 + $0x3e8] sm:$0xff] }
 0xa51   : > { %v12566_v47 = vmul.f32 %v23441_v61, %v23441_v61  ;;  %v12567_v58 = vmul.f32 %v23444_v43, %v23444_v43  ;;  %v23451_v37 = vsub.f32 %v23291_v41, %v12511_v29  ;;  %v23454_v38 = vsub.f32 %v23294_v42, %v12511_v29  ;;  %v12935_v41 = vld [vmem:[#allocation8 + $0x3c8] sm:$0xff] }
 0xa52   : > { %v16109_v29 = vcombine.high %v12927_v31, %v12931_v19  ;;  %v16115_v42 = vcombine.high %v12934_v23, %v12938_v27  ;;  %v23482_v19 = vld [vmem:[#allocation8 + $0x30] sm:$0xff] }
 0xa53   : > { %v12568_v20 = vmul.f32 %v23451_v37, %v23451_v37  ;;  %v12569_v17 = vmul.f32 %v23454_v38, %v23454_v38  ;;  %v12606_v0 = vadd.f32 %v12567_v58, %v12566_v47 }
 0xa54   : > { %v12486_v28 = vpop.xlane.xlu0 %12485  ;;  %13765 = vmatprep.subr.bf16.mxu0 %v16109_v29  ;;  %13654 = vmatprep.subr.bf16.mxu1 %v16115_v42  ;;  %v23486_v42 = vld [vmem:[#allocation8 + $0x38] sm:$0xff] }
 0xa55   : > { %v12512_v52 = vmul.f32 0.00390625, %v12486_v28  ;;  %12607 = vadd.xlane.f32.xlu0 %v12606_v0  ;;  %v12609_v7 = vadd.f32 %v12569_v17, %v12568_v20  ;;  %v16114_v20 = vcombine.low %v12934_v23, %v12938_v27  ;;  %v16116_v17 = vcombine.low %v12935_v41, %v12939_v51  ;;  %13766 = vmatpush1.bf16.msra.mxu0 %v16108_v8 }
 0xa56   : > { %v12489_v9 = vpop.xlane.xlu1 %12488  ;;  %v16117_v0 = vcombine.high %v12935_v41, %v12939_v51 }
 0xa57   : > { %v23461_v47 = vsub.f32 %v23303_v25, %v12512_v52  ;;  %v23464_v58 = vsub.f32 %v23307_v4, %v12512_v52  ;;  %v12513_v28 = vmul.f32 0.00390625, %v12489_v9  ;;  %12610 = vadd.xlane.f32.xlu1 %v12609_v7  ;;  %13655 = vmatpush1.bf16.msra.mxu1 %v16114_v20  ;;  %v23484_v9 = vld [vmem:[#allocation8 + $0x18] sm:$0xff]  ;;  %v12824_v4 = vld [vmem:[#allocation8 + $0x50] sm:$0xff] }
 0xa58   : > { %13767 = vmatprep.subr.bf16.mxu0 %v16117_v0  ;;  %v16001_v0 = vcombine.high %v23484_v9, %v23486_v42 }
 0xa59   : > { %v12570_v55 = vmul.f32 %v23461_v47, %v23461_v47  ;;  %v12571_v60 = vmul.f32 %v23464_v58, %v23464_v58  ;;  %v23471_v31 = vsub.f32 %v23311_v50, %v12513_v28  ;;  %v23474_v52 = vsub.f32 %v23314_v5, %v12513_v28  ;;  %13768 = vmatpush1.bf16.msra.mxu0 %v16116_v17 }
 0xa5a   : > { %v15999_v28 = vcombine.high %v23480_v21, %v23482_v19  ;;  %13963 = vmatprep.subr.bf16.mxu0 %v16001_v0 }
 0xa5b   : > { %v12572_v7 = vmul.f32 %v23471_v31, %v23471_v31  ;;  %v12573_v51 = vmul.f32 %v23474_v52, %v23474_v52  ;;  %v12612_v41 = vadd.f32 %v12571_v60, %v12570_v55 }
 0xa5c   : > { %v12492_v59 = vpop.xlane.xlu0 %12491  ;;  %13850 = vmatprep.subr.bf16.mxu1 %v15999_v28 }
 0xa5d   : > { %12613 = vadd.xlane.f32.xlu0 %v12612_v41  ;;  %v12615_v23 = vadd.f32 %v12573_v51, %v12572_v7  ;;  %v12514_v27 = vmul.f32 0.00390625, %v12492_v59 }
 0xa5e   : > { %v12495_v8 = vpop.xlane.xlu1 %12494 }
 0xa5f   : > { %12616 = vadd.xlane.f32.xlu1 %v12615_v23  ;;  %v23497_v17 = vsub.f32 %v23323_v14, %v12514_v27  ;;  %v23500_v55 = vsub.f32 %v23327_v57, %v12514_v27  ;;  %v12515_v60 = vmul.f32 0.00390625, %v12495_v8 }
 0xa61   : > { %v12574_v7 = vmul.f32 %v23497_v17, %v23497_v17  ;;  %v12575_v51 = vmul.f32 %v23500_v55, %v23500_v55  ;;  %v23507_v41 = vsub.f32 %v23331_v62, %v12515_v60  ;;  %v23510_v59 = vsub.f32 %v23334_v34, %v12515_v60 }
 0xa63   : > { %v12576_v23 = vmul.f32 %v23507_v41, %v23507_v41  ;;  %v12577_v27 = vmul.f32 %v23510_v59, %v23510_v59  ;;  %v12618_v8 = vadd.f32 %v12575_v51, %v12574_v7 }
 0xa64   : > { %v12498_v28 = vpop.xlane.xlu0 %12497 }
 0xa65   : > { %v12516_v0 = vmul.f32 0.00390625, %v12498_v28  ;;  %12619 = vadd.xlane.f32.xlu0 %v12618_v8  ;;  %v12621_v20 = vadd.f32 %v12577_v27, %v12576_v23 }
 0xa66   : > { %v12501_v29 = vpop.xlane.xlu1 %12500 }
 0xa67   : > { %v23517_v57 = vsub.f32 %v23343_v53, %v12516_v0  ;;  %v23520_v62 = vsub.f32 %v23347_v44, %v12516_v0  ;;  %v12517_v60 = vmul.f32 0.00390625, %v12501_v29  ;;  %12622 = vadd.xlane.f32.xlu1 %v12621_v20 }
 0xa69   : > { %v12578_v34 = vmul.f32 %v23517_v57, %v23517_v57  ;;  %v12579_v14 = vmul.f32 %v23520_v62, %v23520_v62  ;;  %v23527_v7 = vsub.f32 %v23351_v49, %v12517_v60  ;;  %v23530_v51 = vsub.f32 %v23354_v26, %v12517_v60  ;;  %v12710_v60 = vld [vmem:[%s24227_s6] sm:$0x3] }
 0xa6a   : > { %v23540_v26 = vrot.slane %v12710_v60, %v25141_v30 }
 0xa6b   : > { %v12580_v23 = vmul.f32 %v23527_v7, %v23527_v7  ;;  %v12581_v27 = vmul.f32 %v23530_v51, %v23530_v51  ;;  %v12624_v29 = vadd.f32 %v12579_v14, %v12578_v34  ;;  %v23543_v14 = vrot.slane %v12710_v60, %v25142_v16  ;;  %v12754_v34 = vld [vmem:[%s24228_s7] sm:$0x3] }
 0xa6d   : > { %12625 = vadd.xlane.f32.xlu0 %v12624_v29  ;;  %v12627_v20 = vadd.f32 %v12581_v27, %v12580_v23 }
 0xa6f   : > { %12628 = vadd.xlane.f32.xlu1 %v12627_v20  ;;  %v23551_v20 = vrot.slane %v12754_v34, %v25141_v30 }
 0xaa2   : > { %v12584_v8 = vpop.xlane.xlu0 %12583 }
 0xaa3   : > { %v12630_v28 = vmul.f32 0.00390625, %v12584_v8  ;;  %v23554_v8 = vrot.slane %v12754_v34, %v25142_v16 }
 0xaa4   : > { %v12587_v0 = vpop.xlane.xlu1 %12586 }
 0xaa5   : > { %v12646_v44 = vadd.f32 1e-05, %v12630_v28  ;;  %v12631_v53 = vmul.f32 0.00390625, %v12587_v0 }
 0xaa7   : > { %17575 = vrsqrt.f32 %v12646_v44  ;;  %v12647_v49 = vadd.f32 1e-05, %v12631_v53 }
 0xaa9   : > { %17577 = vrsqrt.f32 %v12647_v49 }
 0xab1   : > { %v17576_v23 = vpop.eup %17575 }
 0xab2   : > { %v12678_v27 = vmul.f32 %v17576_v23, %v23361_v46  ;;  %v12679_v53 = vmul.f32 %v17576_v23, %v23364_v36 }
 0xab3   : > { %v12590_v44 = vpop.xlane.xlu0 %12589  ;;  %v17578_v49 = vpop.eup %17577 }
 0xab4   : > { %v12632_v29 = vmul.f32 0.00390625, %v12590_v44  ;;  %v12722_v28 = vmul.f32 %v23540_v26, %v12678_v27  ;;  %v12680_v0 = vmul.f32 %v17578_v49, %v23371_v35  ;;  %v12681_v60 = vmul.f32 %v17578_v49, %v23374_v63  ;;  %v12828_v63 = vld [vmem:[#allocation8 + $0x70] sm:$0xff]  ;;  %v12825_v49 = vld [vmem:[#allocation8 + $0x58] sm:$0xff] }
 0xab5   : > { %v12723_v5 = vmul.f32 %v23543_v14, %v12679_v53  ;;  %v12829_v53 = vld [vmem:[#allocation8 + $0x78] sm:$0xff] }
 0xab6   : > { %v12648_v46 = vadd.f32 1e-05, %v12632_v29  ;;  %v12724_v36 = vmul.f32 %v23540_v26, %v12680_v0  ;;  %v12725_v44 = vmul.f32 %v23543_v14, %v12681_v60  ;;  %v12766_v27 = vadd.f32 %v23551_v20, %v12722_v28  ;;  %v12833_v28 = vld [vmem:[#allocation8 + $0x98] sm:$0xff] }
 0xab7   : > { %v12593_v23 = vpop.xlane.xlu1 %12592  ;;  %v12767_v34 = vadd.f32 %v23554_v8, %v12723_v5  ;;  %v16007_v60 = vcombine.high %v12824_v4, %v12828_v63  ;;  %v12836_v5 = vld [vmem:[#allocation8 + $0xb0] sm:$0xff] }
 0xab8   : > { %17579 = vrsqrt.f32 %v12648_v46  ;;  %v12633_v50 = vmul.f32 0.00390625, %v12593_v23  ;;  %v12769_v25 = vadd.f32 %v23554_v8, %v12725_v44  ;;  %v12768_v35 = vadd.f32 %v23551_v20, %v12724_v36  ;;  %v12832_v23 = vld [vmem:[#allocation8 + $0x90] sm:$0xff]  ;;  %v12837_v44 = vld [vmem:[#allocation8 + $0xb8] sm:$0xff] }
 0xab9   : > { %v16009_v46 = vcombine.high %v12825_v49, %v12829_v53  ;;  %v16006_v36 = vcombine.low %v12824_v4, %v12828_v63  ;;  %v16014_v45 = vcombine.low %v12832_v23, %v12836_v5  ;;  %v16016_v4 = vcombine.low %v12833_v28, %v12837_v44 }
 0xaba   : > { %v12649_v29 = vadd.f32 1e-05, %v12633_v50  ;;  %v23566_v24 = vpack.c.bf16 %v12769_v25, %v12767_v34  ;;  %v23568_v0 = vpack.c.bf16 %v12768_v35, %v12766_v27  ;;  %v25175_v25 = vcombine.low %v23480_v21, %v23482_v19 }
 0xabb   : > { %v25176_v50 = vcombine.low %v23484_v9, %v23486_v42  ;;  %v16008_v34 = vcombine.low %v12825_v49, %v12829_v53  ;;  %v16015_v27 = vcombine.high %v12832_v23, %v12836_v5  ;;  %v16017_v35 = vcombine.high %v12833_v28, %v12837_v44  ;;  %v12848_v49 = vld [vmem:[#allocation8 + $0x110] sm:$0xff] }
 0xabc   : > { %17581 = vrsqrt.f32 %v12649_v29  ;;  %13656 = vmatprep.mubr.bf16.mxu1 %v23566_v24  ;;  %13769 = vmatprep.mubr.bf16.mxu0 %v23566_v24  ;;  %v12840_v29 = vld [vmem:[#allocation8 + $0xd0] sm:$0xff]  ;;  %v16025_v63 = vcombine.high %v12841_v2, %v12845_v54 }
 0xabd   : > { %13657 = vmatmul.mubr.bf16.vlgmr.msra.gmra.mrb[64].mxu1 %v23568_v0  ;;  %13770 = vmatmul.mubr.bf16.vlgmr.msra.gmra.mrb[192].mxu0 %v23568_v0  ;;  %v16023_v42 = vcombine.high %v12840_v29, %v12844_v13 }
 0xabe   : > { %13851 = vmatpush1.bf16.msra.mxu1 %v25175_v25  ;;  %13964 = vmatpush1.bf16.msra.mxu0 %v25176_v50  ;;  %v12849_v50 = vld [vmem:[#allocation8 + $0x118] sm:$0xff] }
 0xabf   : > { %13852 = vmatprep.subr.bf16.mxu1 %v16007_v60  ;;  %13965 = vmatprep.subr.bf16.mxu0 %v16009_v46  ;;  %v12852_v46 = vld [vmem:[#allocation8 + $0x130] sm:$0xff] }
 0xac2   : > { %v17580_v56 = vpop.eup %17579  ;;  %v12596_v48 = vpop.xlane.xlu0 %12595  ;;  %13853 = vmatpush1.bf16.msra.mxu1 %v16006_v36  ;;  %13966 = vmatpush1.bf16.msra.mxu0 %v16008_v34  ;;  %v16031_v36 = vcombine.high %v12848_v49, %v12852_v46  ;;  %v16033_v34 = vcombine.high %v12849_v50, %v12853_v33 }
 0xac3   : > { %v12682_v21 = vmul.f32 %v17580_v56, %v23381_v10  ;;  %v12683_v19 = vmul.f32 %v17580_v56, %v23384_v39  ;;  %v12634_v25 = vmul.f32 0.00390625, %v12596_v48  ;;  %13854 = vmatprep.subr.bf16.mxu1 %v16015_v27  ;;  %13967 = vmatprep.subr.bf16.mxu0 %v16017_v35  ;;  %v16022_v48 = vcombine.low %v12840_v29, %v12844_v13  ;;  %v12860_v29 = vld [vmem:[#allocation8 + $0x170] sm:$0xff] }
 0xac4   : > { %v12599_v9 = vpop.xlane.xlu1 %12598  ;;  %v16024_v39 = vcombine.low %v12841_v2, %v12845_v54  ;;  %v12856_v2 = vld [vmem:[#allocation8 + $0x150] sm:$0xff] }
 0xac5   : > { %v12650_v53 = vadd.f32 1e-05, %v12634_v25  ;;  %v12635_v60 = vmul.f32 0.00390625, %v12599_v9  ;;  %v12727_v10 = vmul.f32 %v23543_v14, %v12683_v19  ;;  %v12726_v56 = vmul.f32 %v23540_v26, %v12682_v21  ;;  %v12857_v19 = vld [vmem:[#allocation8 + $0x158] sm:$0xff] }
 0xac6   : > { %v17582_v23 = vpop.eup %17581  ;;  %13855 = vmatpush1.bf16.msra.mxu1 %v16014_v45  ;;  %13968 = vmatpush1.bf16.msra.mxu0 %v16016_v4  ;;  %v12861_v25 = vld [vmem:[#allocation8 + $0x178] sm:$0xff]  ;;  %v16030_v9 = vcombine.low %v12848_v49, %v12852_v46 }
 0xac7   : > { %v12684_v5 = vmul.f32 %v17582_v23, %v23391_v12  ;;  %v12685_v28 = vmul.f32 %v17582_v23, %v23394_v11  ;;  %17583 = vrsqrt.f32 %v12650_v53  ;;  %v12651_v44 = vadd.f32 1e-05, %v12635_v60  ;;  %13856 = vmatprep.subr.bf16.mxu1 %v16023_v42  ;;  %13969 = vmatprep.subr.bf16.mxu0 %v16025_v63  ;;  %v12869_v49 = vld [vmem:[#allocation8 + $0x1b8] sm:$0xff] }
 0xac8   : > { %v12771_v54 = vadd.f32 %v23554_v8, %v12727_v10  ;;  %v12770_v11 = vadd.f32 %v23551_v20, %v12726_v56  ;;  %v16032_v42 = vcombine.low %v12849_v50, %v12853_v33  ;;  %v16039_v10 = vcombine.high %v12856_v2, %v12860_v29  ;;  %v12865_v33 = vld [vmem:[#allocation8 + $0x198] sm:$0xff] }
 0xac9   : > { %17585 = vrsqrt.f32 %v12651_v44  ;;  %v12729_v27 = vmul.f32 %v23543_v14, %v12685_v28  ;;  %v12728_v35 = vmul.f32 %v23540_v26, %v12684_v5  ;;  %v16041_v56 = vcombine.high %v12857_v19, %v12861_v25 }
 0xaca   : > { %v12602_v21 = vpop.xlane.xlu0 %12601  ;;  %13857 = vmatpush1.bf16.msra.mxu1 %v16022_v48  ;;  %13970 = vmatpush1.bf16.msra.mxu0 %v16024_v39  ;;  %v12864_v48 = vld [vmem:[#allocation8 + $0x190] sm:$0xff]  ;;  %v16038_v50 = vcombine.low %v12856_v2, %v12860_v29  ;;  %v16040_v28 = vcombine.low %v12857_v19, %v12861_v25  ;;  %v12877_v2 = vld [vmem:[#allocation8 + $0x1f8] sm:$0xff] }
 0xacb   : > { %v12636_v13 = vmul.f32 0.00390625, %v12602_v21  ;;  %v12773_v12 = vadd.f32 %v23554_v8, %v12729_v27  ;;  %v12772_v45 = vadd.f32 %v23551_v20, %v12728_v35  ;;  %13858 = vmatprep.subr.bf16.mxu1 %v16031_v36  ;;  %13971 = vmatprep.subr.bf16.mxu0 %v16033_v34  ;;  %v12868_v39 = vld [vmem:[#allocation8 + $0x1b0] sm:$0xff]  ;;  %v16049_v35 = vcombine.high %v12865_v33, %v12869_v49 }
 0xacc   : > { %v12605_v4 = vpop.xlane.xlu1 %12604  ;;  %v16047_v34 = vcombine.high %v12864_v48, %v12868_v39  ;;  %v12872_v21 = vld [vmem:[#allocation8 + $0x1d0] sm:$0xff] }
 0xacd   : > { %v12652_v63 = vadd.f32 1e-05, %v12636_v13  ;;  %v12637_v53 = vmul.f32 0.00390625, %v12605_v4  ;;  %v23592_v60 = vpack.c.bf16 %v12773_v12, %v12771_v54  ;;  %v23594_v23 = vpack.c.bf16 %v12772_v45, %v12770_v11  ;;  %v12876_v54 = vld [vmem:[#allocation8 + $0x1f0] sm:$0xff]  ;;  %v12873_v45 = vld [vmem:[#allocation8 + $0x1d8] sm:$0xff] }
 0xace   : > { %13859 = vmatpush1.bf16.msra.mxu1 %v16030_v9  ;;  %13972 = vmatpush1.bf16.msra.mxu0 %v16032_v42  ;;  %v16055_v4 = vcombine.high %v12872_v21, %v12876_v54  ;;  %v12880_v9 = vld [vmem:[#allocation8 + $0x210] sm:$0xff] }
 0xacf   : > { %17587 = vrsqrt.f32 %v12652_v63  ;;  %v12653_v5 = vadd.f32 1e-05, %v12637_v53  ;;  %13666 = vmatprep.mubr.bf16.mxu1 %v23592_v60  ;;  %13779 = vmatprep.mubr.bf16.mxu0 %v23592_v60  ;;  %v12884_v53 = vld [vmem:[#allocation8 + $0x230] sm:$0xff] }
 0xad0   : > { %13667 = vmatmul.mubr.bf16.gmra.mrb[68].mxu1 %v23594_v23  ;;  %13780 = vmatmul.mubr.bf16.gmra.mrb[196].mxu0 %v23594_v23 }
 0xad1   : > { %v17584_v46 = vpop.eup %17583  ;;  %17589 = vrsqrt.f32 %v12653_v5  ;;  %13860 = vmatprep.subr.bf16.mxu1 %v16039_v10  ;;  %13973 = vmatprep.subr.bf16.mxu0 %v16041_v56  ;;  %v12881_v10 = vld [vmem:[#allocation8 + $0x218] sm:$0xff] }
 0xad2   : > { %v12686_v44 = vmul.f32 %v17584_v46, %v23401_v40  ;;  %v12687_v36 = vmul.f32 %v17584_v46, %v23404_v15  ;;  %13861 = vmatpush1.bf16.msra.mxu1 %v16038_v50  ;;  %13974 = vmatpush1.bf16.msra.mxu0 %v16040_v28  ;;  %v16046_v40 = vcombine.low %v12864_v48, %v12868_v39  ;;  %v12885_v56 = vld [vmem:[#allocation8 + $0x238] sm:$0xff] }
 0xad3   : > { %v17586_v27 = vpop.eup %17585  ;;  %v16048_v15 = vcombine.low %v12865_v33, %v12869_v49  ;;  %13862 = vmatprep.subr.bf16.mxu1 %v16047_v34  ;;  %13975 = vmatprep.subr.bf16.mxu0 %v16049_v35  ;;  %v16054_v39 = vcombine.low %v12872_v21, %v12876_v54  ;;  %v16056_v50 = vcombine.low %v12873_v45, %v12877_v2  ;;  %v12889_v21 = vld [vmem:[#allocation8 + $0x258] sm:$0xff] }
 0xad4   : > { %v12688_v13 = vmul.f32 %v17586_v27, %v23411_v32  ;;  %v12689_v12 = vmul.f32 %v17586_v27, %v23414_v6  ;;  %v12731_v11 = vmul.f32 %v23543_v14, %v12687_v36  ;;  %v12730_v29 = vmul.f32 %v23540_v26, %v12686_v44  ;;  %v12888_v27 = vld [vmem:[#allocation8 + $0x250] sm:$0xff]  ;;  %v12893_v54 = vld [vmem:[#allocation8 + $0x278] sm:$0xff] }
 0xad5   : > { %v16057_v32 = vcombine.high %v12873_v45, %v12877_v2  ;;  %v16063_v36 = vcombine.high %v12880_v9, %v12884_v53  ;;  %v16065_v34 = vcombine.high %v12881_v10, %v12885_v56  ;;  %v16064_v45 = vcombine.low %v12881_v10, %v12885_v56 }
 0xad6   : > { %v12733_v19 = vmul.f32 %v23543_v14, %v12689_v12  ;;  %v12732_v25 = vmul.f32 %v23540_v26, %v12688_v13  ;;  %v12775_v6 = vadd.f32 %v23554_v8, %v12731_v11  ;;  %v12774_v48 = vadd.f32 %v23551_v20, %v12730_v29  ;;  %13863 = vmatpush1.bf16.msra.mxu1 %v16046_v40  ;;  %v12896_v40 = vld [vmem:[#allocation8 + $0x290] sm:$0xff] }
 0xad7   : > { %13976 = vmatpush1.bf16.msra.mxu0 %v16048_v15  ;;  %13864 = vmatprep.subr.bf16.mxu1 %v16055_v4  ;;  %v16062_v11 = vcombine.low %v12880_v9, %v12884_v53  ;;  %v16073_v29 = vcombine.high %v12889_v21, %v12893_v54  ;;  %v12900_v4 = vld [vmem:[#allocation8 + $0x2b0] sm:$0xff]  ;;  %v12901_v9 = vld [vmem:[#allocation8 + $0x2b8] sm:$0xff]  ;;  %v16072_v10 = vcombine.low %v12889_v21, %v12893_v54 }
 0xad8   : > { %v12777_v42 = vadd.f32 %v23554_v8, %v12733_v19  ;;  %v12776_v63 = vadd.f32 %v23551_v20, %v12732_v25  ;;  %13977 = vmatprep.subr.bf16.mxu0 %v16057_v32  ;;  %v12897_v32 = vld [vmem:[#allocation8 + $0x298] sm:$0xff]  ;;  %v12912_v54 = vld [vmem:[#allocation8 + $0x310] sm:$0xff] }
 0xad9   : > { %v17588_v5 = vpop.eup %17587 }
 0xada   : > { %v12690_v33 = vmul.f32 %v17588_v5, %v23421_v3  ;;  %v12691_v49 = vmul.f32 %v17588_v5, %v23424_v1  ;;  %v23614_v46 = vpack.c.bf16 %v12777_v42, %v12775_v6  ;;  %v23616_v44 = vpack.c.bf16 %v12776_v63, %v12774_v48  ;;  %v12892_v1 = vld [vmem:[#allocation8 + $0x270] sm:$0xff]  ;;  %13865 = vmatpush1.bf16.msra.mxu1 %v16054_v39 }
 0xadb   : > { %v17590_v28 = vpop.eup %17589  ;;  %13978 = vmatpush1.bf16.msra.mxu0 %v16056_v50  ;;  %13866 = vmatprep.subr.bf16.mxu1 %v16063_v36  ;;  %v16071_v2 = vcombine.high %v12888_v27, %v12892_v1  ;;  %v16070_v53 = vcombine.low %v12888_v27, %v12892_v1  ;;  %v16079_v48 = vcombine.high %v12896_v40, %v12900_v4  ;;  %v12908_v50 = vld [vmem:[#allocation8 + $0x2f0] sm:$0xff]  ;;  %v12909_v36 = vld [vmem:[#allocation8 + $0x2f8] sm:$0xff] }
 0xadc   : > { %v12692_v35 = vmul.f32 %v17590_v28, %v23431_v18  ;;  %v12693_v13 = vmul.f32 %v17590_v28, %v23434_v22  ;;  %13676 = vmatprep.mubr.bf16.mxu1 %v23614_v46  ;;  %13789 = vmatprep.mubr.bf16.mxu0 %v23614_v46  ;;  %v12735_v3 = vmul.f32 %v23543_v14, %v12691_v49  ;;  %v12905_v28 = vld [vmem:[#allocation8 + $0x2d8] sm:$0xff] }
 0xadd   : > { %13677 = vmatmul.mubr.bf16.gmra.mrb[72].mxu1 %v23616_v44  ;;  %13790 = vmatmul.mubr.bf16.gmra.mrb[200].mxu0 %v23616_v44  ;;  %v12734_v12 = vmul.f32 %v23540_v26, %v12690_v33  ;;  %v16081_v39 = vcombine.high %v12897_v32, %v12901_v9  ;;  %v12904_v33 = vld [vmem:[#allocation8 + $0x2d0] sm:$0xff]  ;;  %v16078_v27 = vcombine.low %v12896_v40, %v12900_v4 }
 0xade   : > { %v12737_v18 = vmul.f32 %v23543_v14, %v12693_v13  ;;  %v12736_v22 = vmul.f32 %v23540_v26, %v12692_v35  ;;  %13979 = vmatprep.subr.bf16.mxu0 %v16065_v34  ;;  %v12779_v15 = vadd.f32 %v23554_v8, %v12735_v3  ;;  %13867 = vmatpush1.bf16.msra.mxu1 %v16062_v11  ;;  %v12913_v11 = vld [vmem:[#allocation8 + $0x318] sm:$0xff]  ;;  %v12924_v4 = vld [vmem:[#allocation8 + $0x370] sm:$0xff] }
 0xadf   : > { %v12778_v6 = vadd.f32 %v23551_v20, %v12734_v12  ;;  %13980 = vmatpush1.bf16.msra.mxu0 %v16064_v45  ;;  %13868 = vmatprep.subr.bf16.mxu1 %v16071_v2  ;;  %v16080_v13 = vcombine.low %v12897_v32, %v12901_v9  ;;  %v16087_v1 = vcombine.high %v12904_v33, %v12908_v50  ;;  %v12916_v12 = vld [vmem:[#allocation8 + $0x330] sm:$0xff]  ;;  %v12921_v32 = vld [vmem:[#allocation8 + $0x358] sm:$0xff] }
 0xae0   : > { %v12781_v19 = vadd.f32 %v23554_v8, %v12737_v18  ;;  %v12780_v25 = vadd.f32 %v23551_v20, %v12736_v22  ;;  %13981 = vmatprep.subr.bf16.mxu0 %v16073_v29  ;;  %v16089_v21 = vcombine.high %v12905_v28, %v12909_v36  ;;  %v12917_v18 = vld [vmem:[#allocation8 + $0x338] sm:$0xff]  ;;  %v16086_v45 = vcombine.low %v12904_v33, %v12908_v50  ;;  %v12928_v33 = vld [vmem:[#allocation8 + $0x390] sm:$0xff] }
 0xae1   : > { %v16088_v2 = vcombine.low %v12905_v28, %v12909_v36  ;;  %v16095_v40 = vcombine.high %v12912_v54, %v12916_v12  ;;  %v12925_v9 = vld [vmem:[#allocation8 + $0x378] sm:$0xff] }
 0xae2   : > { %v12608_v42 = vpop.xlane.xlu0 %12607  ;;  %v23632_v63 = vpack.c.bf16 %v12781_v19, %v12779_v15  ;;  %v23634_v5 = vpack.c.bf16 %v12780_v25, %v12778_v6  ;;  %13869 = vmatpush1.bf16.msra.mxu1 %v16070_v53  ;;  %v16097_v15 = vcombine.high %v12913_v11, %v12917_v18  ;;  %v12920_v19 = vld [vmem:[#allocation8 + $0x350] sm:$0xff]  ;;  %v16094_v53 = vcombine.low %v12912_v54, %v12916_v12  ;;  %v12929_v50 = vld [vmem:[#allocation8 + $0x398] sm:$0xff] }
 0xae3   : > { %v12638_v56 = vmul.f32 0.00390625, %v12608_v42  ;;  %13982 = vmatpush1.bf16.msra.mxu0 %v16072_v10  ;;  %13870 = vmatprep.subr.bf16.mxu1 %v16079_v48  ;;  %v16096_v10 = vcombine.low %v12913_v11, %v12917_v18  ;;  %v16103_v48 = vcombine.high %v12920_v19, %v12924_v4  ;;  %v12933_v28 = vld [vmem:[#allocation8 + $0x3b8] sm:$0xff] }
 0xae4   : > { %v12611_v49 = vpop.xlane.xlu1 %12610  ;;  %13686 = vmatprep.mubr.bf16.mxu1 %v23632_v63  ;;  %13799 = vmatprep.mubr.bf16.mxu0 %v23632_v63  ;;  %v16113_v12 = vcombine.high %v12929_v50, %v12933_v28 }
 0xae5   : > { %v12654_v34 = vadd.f32 1e-05, %v12638_v56  ;;  %v12639_v35 = vmul.f32 0.00390625, %v12611_v49  ;;  %13687 = vmatmul.mubr.bf16.gmra.mrb[76].mxu1 %v23634_v5  ;;  %13800 = vmatmul.mubr.bf16.gmra.mrb[204].mxu0 %v23634_v5  ;;  %v12932_v49 = vld [vmem:[#allocation8 + $0x3b0] sm:$0xff] }
 0xae6   : > { %13983 = vmatprep.subr.bf16.mxu0 %v16081_v39  ;;  %13871 = vmatpush1.bf16.msra.mxu1 %v16078_v27  ;;  %v16105_v39 = vcombine.high %v12921_v32, %v12925_v9  ;;  %v16111_v54 = vcombine.high %v12928_v33, %v12932_v49 }
 0xae7   : > { %17591 = vrsqrt.f32 %v12654_v34  ;;  %v12655_v3 = vadd.f32 1e-05, %v12639_v35  ;;  %13984 = vmatpush1.bf16.msra.mxu0 %v16080_v13  ;;  %13872 = vmatprep.subr.bf16.mxu1 %v16087_v1  ;;  %v16102_v13 = vcombine.low %v12920_v19, %v12924_v4  ;;  %v12937_v4 = vld [vmem:[#allocation8 + $0x3d8] sm:$0xff] }
 0xae8   : > { %13985 = vmatprep.subr.bf16.mxu0 %v16089_v21  ;;  %v16104_v21 = vcombine.low %v12921_v32, %v12925_v9  ;;  %v12941_v32 = vld [vmem:[#allocation8 + $0x3f8] sm:$0xff] }
 0xae9   : > { %17593 = vrsqrt.f32 %v12655_v3 }
 0xaea   : > { %v12614_v22 = vpop.xlane.xlu0 %12613  ;;  %13873 = vmatpush1.bf16.msra.mxu1 %v16086_v45  ;;  %v12936_v45 = vld [vmem:[#allocation8 + $0x3d0] sm:$0xff] }
 0xaeb   : > { %v12640_v29 = vmul.f32 0.00390625, %v12614_v22  ;;  %13986 = vmatpush1.bf16.msra.mxu0 %v16088_v2  ;;  %13874 = vmatprep.subr.bf16.mxu1 %v16095_v40  ;;  %v12940_v2 = vld [vmem:[#allocation8 + $0x3f0] sm:$0xff] }
 0xaec   : > { %v12617_v25 = vpop.xlane.xlu1 %12616  ;;  %13987 = vmatprep.subr.bf16.mxu0 %v16097_v15  ;;  %v16119_v9 = vcombine.high %v12936_v45, %v12940_v2 }
 0xaed   : > { %v12656_v6 = vadd.f32 1e-05, %v12640_v29  ;;  %v12641_v42 = vmul.f32 0.00390625, %v12617_v25  ;;  %v16110_v25 = vcombine.low %v12928_v33, %v12932_v49 }
 0xaee   : > { %13875 = vmatpush1.bf16.msra.mxu1 %v16094_v53 }
 0xaef   : > { %17595 = vrsqrt.f32 %v12656_v6  ;;  %v12657_v56 = vadd.f32 1e-05, %v12641_v42  ;;  %13988 = vmatpush1.bf16.msra.mxu0 %v16096_v10  ;;  %13876 = vmatprep.subr.bf16.mxu1 %v16103_v48  ;;  %v16118_v48 = vcombine.low %v12936_v45, %v12940_v2 }
 0xaf0   : > { %13989 = vmatprep.subr.bf16.mxu0 %v16105_v39  ;;  %v16121_v39 = vcombine.high %v12937_v4, %v12941_v32 }
 0xaf1   : > { %v17592_v36 = vpop.eup %17591  ;;  %17597 = vrsqrt.f32 %v12657_v56 }
 0xaf2   : > { %v12694_v34 = vmul.f32 %v17592_v36, %v23441_v61  ;;  %v12695_v35 = vmul.f32 %v17592_v36, %v23444_v43  ;;  %v12620_v27 = vpop.xlane.xlu0 %12619  ;;  %13877 = vmatpush1.bf16.msra.mxu1 %v16102_v13  ;;  %v17097_v13 = vld [vmem:[#allocation10 + $0x4] ss:$8 sps:$4 sm:$0xff]  }
 0xaf3   : > { %v17594_v3 = vpop.eup %17593  ;;  %v12642_v1 = vmul.f32 0.00390625, %v12620_v27  ;;  %13990 = vmatpush1.bf16.msra.mxu0 %v16104_v21  ;;  %13878 = vmatprep.subr.bf16.mxu1 %v16111_v54  ;;  %v16120_v27 = vcombine.low %v12937_v4, %v12941_v32 }
 0xaf4   : > { %v12696_v11 = vmul.f32 %v17594_v3, %v23451_v37  ;;  %v12697_v18 = vmul.f32 %v17594_v3, %v23454_v38  ;;  %v12623_v22 = vpop.xlane.xlu1 %12622  ;;  %v12739_v61 = vmul.f32 %v23543_v14, %v12695_v35  ;;  %v12738_v43 = vmul.f32 %v23540_v26, %v12694_v34  ;;  %13991 = vmatprep.subr.bf16.mxu0 %v16113_v12 }
 0xaf5   : > { %v12658_v29 = vadd.f32 1e-05, %v12642_v1  ;;  %v12643_v40 = vmul.f32 0.00390625, %v12623_v22  ;;  %v16112_v38 = vcombine.low %v12929_v50, %v12933_v28 }
 0xaf6   : > { %v12741_v15 = vmul.f32 %v23543_v14, %v12697_v18  ;;  %v12740_v19 = vmul.f32 %v23540_v26, %v12696_v11  ;;  %v12783_v6 = vadd.f32 %v23554_v8, %v12739_v61  ;;  %v12782_v53 = vadd.f32 %v23551_v20, %v12738_v43  ;;  %13879 = vmatpush1.bf16.msra.mxu1 %v16110_v25 }
 0xaf7   : > { %17599 = vrsqrt.f32 %v12658_v29  ;;  %v12659_v37 = vadd.f32 1e-05, %v12643_v40  ;;  %13992 = vmatpush1.bf16.msra.mxu0 %v16112_v38  ;;  %13880 = vmatprep.subr.bf16.mxu1 %v16119_v9 }
 0xaf8   : > { %v12785_v42 = vadd.f32 %v23554_v8, %v12741_v15  ;;  %v12784_v10 = vadd.f32 %v23551_v20, %v12740_v19  ;;  %13993 = vmatprep.subr.bf16.mxu0 %v16121_v39 }
 0xaf9   : > { %v17596_v56 = vpop.eup %17595  ;;  %17601 = vrsqrt.f32 %v12659_v37 }
 0xafa   : > { %v12698_v33 = vmul.f32 %v17596_v56, %v23461_v47  ;;  %v12699_v49 = vmul.f32 %v17596_v56, %v23464_v58  ;;  %v23654_v36 = vpack.c.bf16 %v12785_v42, %v12783_v6  ;;  %v23656_v50 = vpack.c.bf16 %v12784_v10, %v12782_v53  ;;  %v12626_v28 = vpop.xlane.xlu0 %12625  ;;  %13881 = vmatpush1.bf16.msra.mxu1 %v16118_v48 }
 0xafb   : > { %v17598_v34 = vpop.eup %17597  ;;  %v12644_v35 = vmul.f32 0.00390625, %v12626_v28  ;;  %13994 = vmatpush1.bf16.msra.mxu0 %v16120_v27  ;;  %15048 = vmatprep.subr.bf16.mxu1 %v17097_v13 }
 0xafc   : > { %v12700_v3 = vmul.f32 %v17598_v34, %v23471_v31  ;;  %v12701_v1 = vmul.f32 %v17598_v34, %v23474_v52  ;;  %13696 = vmatprep.mubr.bf16.mxu1 %v23654_v36  ;;  %13809 = vmatprep.mubr.bf16.mxu0 %v23654_v36  ;;  %v12629_v47 = vpop.xlane.xlu1 %12628  ;;  %v12743_v58 = vmul.f32 %v23543_v14, %v12699_v49 }
 0xafd   : > { %13697 = vmatmul.mubr.bf16.gmra.mrb[80].mxu1 %v23656_v50  ;;  %13810 = vmatmul.mubr.bf16.gmra.mrb[208].mxu0 %v23656_v50  ;;  %v12660_v21 = vadd.f32 1e-05, %v12644_v35  ;;  %v12645_v54 = vmul.f32 0.00390625, %v12629_v47  ;;  %v12742_v12 = vmul.f32 %v23540_v26, %v12698_v33  ;;  %v17112_v47 = vld [vmem:[#allocation10 + $0x54] ss:$8 sps:$4 sm:$0xff]  }
 0xafe   : > { %v12745_v11 = vmul.f32 %v23543_v14, %v12701_v1  ;;  %v12744_v31 = vmul.f32 %v23540_v26, %v12700_v3  ;;  %v12787_v18 = vadd.f32 %v23554_v8, %v12743_v58  ;;  %v17101_v3 = vld [vmem:[#allocation10 + $0x20] ss:$8 sps:$4 sm:$0xff]   ;;  %v17106_v1 = vld [vmem:[#allocation10 + $0x34] ss:$8 sps:$4 sm:$0xff]  }
 0xaff   : > { %17603 = vrsqrt.f32 %v12660_v21  ;;  %v12661_v52 = vadd.f32 1e-05, %v12645_v54  ;;  %v12786_v61 = vadd.f32 %v23551_v20, %v12742_v12  ;;  %v17113_v58 = vld [vmem:[#allocation10 + $0x60] ss:$8 sps:$4 sm:$0xff]   ;;  %v17118_v21 = vld [vmem:[#allocation10 + $0x74] ss:$8 sps:$4 sm:$0xff]  }
 0xb00   : > { %v12789_v22 = vadd.f32 %v23554_v8, %v12745_v11  ;;  %v12788_v43 = vadd.f32 %v23551_v20, %v12744_v31  ;;  %v17119_v54 = vld [vmem:[#allocation10 + $0x80] ss:$8 sps:$4 sm:$0xff]   ;;  %v17124_v12 = vld [vmem:[#allocation10 + $0x94] ss:$8 sps:$4 sm:$0xff]  }
 0xb01   : > { %v17600_v45 = vpop.eup %17599  ;;  %17605 = vrsqrt.f32 %v12661_v52  ;;  %v17125_v11 = vld [vmem:[#allocation10 + $0xa0] ss:$8 sps:$4 sm:$0xff]   ;;  %v17130_v31 = vld [vmem:[#allocation10 + $0xb4] ss:$8 sps:$4 sm:$0xff]   ;;  %v17133_v52 = vld [vmem:[#allocation10 + $0xc4] ss:$8 sps:$4 sm:$0xff]  }
 0xb02   : > { %v12702_v2 = vmul.f32 %v17600_v45, %v23497_v17  ;;  %v12703_v29 = vmul.f32 %v17600_v45, %v23500_v55  ;;  %v23674_v40 = vpack.c.bf16 %v12789_v22, %v12787_v18  ;;  %v23676_v15 = vpack.c.bf16 %v12788_v43, %v12786_v61  ;;  %v17131_v18 = vld [vmem:[#allocation10 + $0xc0] ss:$8 sps:$4 sm:$0xff]   ;;  %v17136_v22 = vld [vmem:[#allocation10 + $0xd4] ss:$8 sps:$4 sm:$0xff]   ;;  %v17134_v61 = vld [vmem:[#allocation10 + $0xd0] ss:$8 sps:$4 sm:$0xff]  }
 0xb03   : > { %v17602_v19 = vpop.eup %17601  ;;  %v17139_v43 = vld [vmem:[#allocation10 + $0xe4] ss:$8 sps:$4 sm:$0xff]   ;;  %v17137_v45 = vld [vmem:[#allocation10 + $0xe0] ss:$8 sps:$4 sm:$0xff]  }
 0xb04   : > { %v12704_v25 = vmul.f32 %v17602_v19, %v23507_v41  ;;  %v12705_v4 = vmul.f32 %v17602_v19, %v23510_v59  ;;  %13706 = vmatprep.mubr.bf16.mxu1 %v23674_v40  ;;  %13819 = vmatprep.mubr.bf16.mxu0 %v23674_v40  ;;  %v12747_v32 = vmul.f32 %v23543_v14, %v12703_v29  ;;  %v17140_v29 = vld [vmem:[#allocation10 + $0xf0] ss:$8 sps:$4 sm:$0xff]  }
 0xb05   : > { %13707 = vmatmul.mubr.bf16.gmra.mrb[84].mxu1 %v23676_v15  ;;  %13820 = vmatmul.mubr.bf16.gmra.mrb[212].mxu0 %v23676_v15  ;;  %v12746_v17 = vmul.f32 %v23540_v26, %v12702_v2  ;;  %v17142_v2 = vld [vmem:[#allocation10 + $0xf4] ss:$8 sps:$4 sm:$0xff]  }
 0xb06   : > { %v12749_v55 = vmul.f32 %v23543_v14, %v12705_v4  ;;  %v12748_v37 = vmul.f32 %v23540_v26, %v12704_v25  ;;  %v12791_v41 = vadd.f32 %v23554_v8, %v12747_v32  ;;  %v23756_v25 = vld [vmem:[%s25178_s27] sm:$0xff]  ;;  %s17785_s27 = sshll.u32 %s17875_s26, 4  ;;  %s17786_s27 = int_to_ptr.vmem [resolvable:$false] %s17785_s27 }
 0xb07   : > { %v12790_v38 = vadd.f32 %v23551_v20, %v12746_v17  ;;  %v23761_v32 = vrot.slane %v23756_v25, %v25141_v30  ;;  %s17787_s29 = scalar_lea.vmem %s17786_s27, 8192  ;;  %p17788_p12 = scmp.lt.s32.totalorder %s24173_s3, %s17786_s27 }
 0xb08   : > { %v12793_v59 = vadd.f32 %v23554_v8, %v12749_v55  ;;  %v12792_v9 = vadd.f32 %v23551_v20, %v12748_v37  ;;  %v23768_v55 = vrot.slane %v23756_v25, %v25142_v16  ;;  %p17789_p2 = scmp.lt.s32.totalorder %s17787_s29, %s17781_s9 }
 0xb09   : > { %v17604_v6 = vpop.eup %17603 }
 0xb0a   : > { %v12706_v42 = vmul.f32 %v17604_v6, %v23517_v57  ;;  %v12707_v53 = vmul.f32 %v17604_v6, %v23520_v62  ;;  %v23694_v10 = vpack.c.bf16 %v12793_v59, %v12791_v41  ;;  %v23696_v56 = vpack.c.bf16 %v12792_v9, %v12790_v38  ;;  %p17790_p1 = por %p17789_p2, %p17788_p12 }
 0xb0b   : > { %v17606_v48 = vpop.eup %17605 }
 0xb0c   : > { %v12708_v39 = vmul.f32 %v17606_v48, %v23527_v7  ;;  %v12709_v33 = vmul.f32 %v17606_v48, %v23530_v51  ;;  %13716 = vmatprep.mubr.bf16.mxu1 %v23694_v10  ;;  %13829 = vmatprep.mubr.bf16.mxu0 %v23694_v10  ;;  %v12751_v49 = vmul.f32 %v23543_v14, %v12707_v53  ;;  %p17791_p13 = pnand %p17790_p1, %p17784_p7 }
 0xb0d   : > { %13717 = vmatmul.mubr.bf16.gmra.mrb[88].mxu1 %v23696_v56  ;;  %13830 = vmatmul.mubr.bf16.gmra.mrb[216].mxu0 %v23696_v56  ;;  %v12750_v57 = vmul.f32 %v23540_v26, %v12706_v42 }
 0xb0e   : > { %v12753_v62 = vmul.f32 %v23543_v14, %v12709_v33  ;;  %v12752_v28 = vmul.f32 %v23540_v26, %v12708_v39  ;;  %v12795_v7 = vadd.f32 %v23554_v8, %v12751_v49  ;;  %v17095_v26 = vld [vmem:[#allocation10] ss:$8 sps:$4 sm:$0xff]   ;;  %v17100_v14 = vld [vmem:[#allocation10 + $0x14] ss:$8 sps:$4 sm:$0xff]  }
 0xb0f   : > { %v12794_v34 = vadd.f32 %v23551_v20, %v12750_v57 }
 0xb10   : > { %v12797_v51 = vadd.f32 %v23554_v8, %v12753_v62  ;;  %v12796_v35 = vadd.f32 %v23551_v20, %v12752_v28  ;;  %v17098_v20 = vld [vmem:[#allocation10 + $0x10] ss:$8 sps:$4 sm:$0xff]   ;;  %v17103_v8 = vld [vmem:[#allocation10 + $0x24] ss:$8 sps:$4 sm:$0xff]  }
 0xb12   : > { %v23712_v27 = vpack.c.bf16 %v12797_v51, %v12795_v7  ;;  %v23714_v13 = vpack.c.bf16 %v12796_v35, %v12794_v34 }
 0xb14   : > { %13726 = vmatprep.mubr.bf16.mxu1 %v23712_v27  ;;  %13839 = vmatprep.mubr.bf16.mxu0 %v23712_v27 }
 0xb15   : > { %13727 = vmatmul.mubr.bf16.gmra.mrb[92].mxu1 %v23714_v13  ;;  %13840 = vmatmul.mubr.bf16.gmra.mrb[220].mxu0 %v23714_v13 }
 0xb16   : > { %13882 = vmatprep.mubr.bf16.mxu1 %v23566_v24  ;;  %13995 = vmatprep.mubr.bf16.mxu0 %v23566_v24  ;;  %v17104_v24 = vld [vmem:[#allocation10 + $0x30] ss:$8 sps:$4 sm:$0xff]  }
 0xb1d   : > { %13883 = vmatmul.mubr.bf16.vlgmr.msra.gmra.mrb[96].mxu1 %v23568_v0  ;;  %13996 = vmatmul.mubr.bf16.vlgmr.msra.gmra.mrb[224].mxu0 %v23568_v0  ;;  %v17109_v0 = vld [vmem:[#allocation10 + $0x44] ss:$8 sps:$4 sm:$0xff]  }
 0xb1e   : > { %13892 = vmatprep.mubr.bf16.mxu1 %v23592_v60  ;;  %14005 = vmatprep.mubr.bf16.mxu0 %v23592_v60  ;;  %v17107_v60 = vld [vmem:[#allocation10 + $0x40] ss:$8 sps:$4 sm:$0xff]  }
 0xb1f   : > { %15049 = vmatpush1.bf16.msra.mxu1 %v17095_v26 }
 0xb20   : > { %15050 = vmatprep.subr.bf16.mxu1 %v17100_v14 }
 0xb23   : > { %15051 = vmatpush1.bf16.msra.mxu1 %v17098_v20 }
 0xb24   : > { %15052 = vmatprep.subr.bf16.mxu1 %v17103_v8 }
 0xb25   : > { %13893 = vmatmul.mubr.bf16.gmra.mrb[100].mxu1 %v23594_v23  ;;  %14006 = vmatmul.mubr.bf16.gmra.mrb[228].mxu0 %v23594_v23  ;;  %v17110_v23 = vld [vmem:[#allocation10 + $0x50] ss:$8 sps:$4 sm:$0xff]  }
 0xb26   : > { %13902 = vmatprep.mubr.bf16.mxu1 %v23614_v46  ;;  %14015 = vmatprep.mubr.bf16.mxu0 %v23614_v46  ;;  %v17115_v46 = vld [vmem:[#allocation10 + $0x64] ss:$8 sps:$4 sm:$0xff]  }
 0xb27   : > { %15053 = vmatpush1.bf16.msra.mxu1 %v17101_v3 }
 0xb28   : > { %15054 = vmatprep.subr.bf16.mxu1 %v17106_v1 }
 0xb2b   : > { %15055 = vmatpush1.bf16.msra.mxu1 %v17104_v24  ;;  %v17143_v24 = vld [vmem:[#allocation10 + $0x100] ss:$8 sps:$4 sm:$0xff]  }
 0xb2c   : > { %15056 = vmatprep.subr.bf16.mxu1 %v17109_v0  ;;  %v17148_v0 = vld [vmem:[#allocation10 + $0x114] ss:$8 sps:$4 sm:$0xff]  }
 0xb2d   : > { %13903 = vmatmul.mubr.bf16.gmra.mrb[104].mxu1 %v23616_v44  ;;  %14016 = vmatmul.mubr.bf16.gmra.mrb[232].mxu0 %v23616_v44  ;;  %v17116_v44 = vld [vmem:[#allocation10 + $0x70] ss:$8 sps:$4 sm:$0xff]  }
 0xb2e   : > { %13912 = vmatprep.mubr.bf16.mxu1 %v23632_v63  ;;  %14025 = vmatprep.mubr.bf16.mxu0 %v23632_v63  ;;  %v17121_v63 = vld [vmem:[#allocation10 + $0x84] ss:$8 sps:$4 sm:$0xff]  }
 0xb2f   : > { %15057 = vmatpush1.bf16.msra.mxu1 %v17107_v60  ;;  %v17146_v60 = vld [vmem:[#allocation10 + $0x110] ss:$8 sps:$4 sm:$0xff]  }
 0xb30   : > { %15058 = vmatprep.subr.bf16.mxu1 %v17112_v47  ;;  %v17151_v47 = vld [vmem:[#allocation10 + $0x124] ss:$8 sps:$4 sm:$0xff]  }
 0xb33   : > { %15059 = vmatpush1.bf16.msra.mxu1 %v17110_v23  ;;  %v17149_v23 = vld [vmem:[#allocation10 + $0x120] ss:$8 sps:$4 sm:$0xff]  }
 0xb34   : > { %15060 = vmatprep.subr.bf16.mxu1 %v17115_v46  ;;  %v17154_v46 = vld [vmem:[#allocation10 + $0x134] ss:$8 sps:$4 sm:$0xff]  }
 0xb35   : > { %13913 = vmatmul.mubr.bf16.gmra.mrb[108].mxu1 %v23634_v5  ;;  %14026 = vmatmul.mubr.bf16.gmra.mrb[236].mxu0 %v23634_v5  ;;  %v17122_v5 = vld [vmem:[#allocation10 + $0x90] ss:$8 sps:$4 sm:$0xff]  }
 0xb36   : > { %13922 = vmatprep.mubr.bf16.mxu1 %v23654_v36  ;;  %14035 = vmatprep.mubr.bf16.mxu0 %v23654_v36  ;;  %v17127_v36 = vld [vmem:[#allocation10 + $0xa4] ss:$8 sps:$4 sm:$0xff]  }
 0xb37   : > { %15061 = vmatpush1.bf16.msra.mxu1 %v17113_v58 }
 0xb38   : > { %15062 = vmatprep.subr.bf16.mxu1 %v17118_v21 }
 0xb3b   : > { %15063 = vmatpush1.bf16.msra.mxu1 %v17116_v44 }
 0xb3c   : > { %15064 = vmatprep.subr.bf16.mxu1 %v17121_v63 }
 0xb3d   : > { %13923 = vmatmul.mubr.bf16.gmra.mrb[112].mxu1 %v23656_v50  ;;  %14036 = vmatmul.mubr.bf16.gmra.mrb[240].mxu0 %v23656_v50  ;;  %v17128_v50 = vld [vmem:[#allocation10 + $0xb0] ss:$8 sps:$4 sm:$0xff]  }
 0xb3e   : > { %13932 = vmatprep.mubr.bf16.mxu1 %v23674_v40  ;;  %14045 = vmatprep.mubr.bf16.mxu0 %v23674_v40  ;;  %v17145_v40 = vld [vmem:[#allocation10 + $0x104] ss:$8 sps:$4 sm:$0xff]  }
 0xb3f   : > { %15065 = vmatpush1.bf16.msra.mxu1 %v17119_v54 }
 0xb40   : > { %15066 = vmatprep.subr.bf16.mxu1 %v17124_v12 }
 0xb43   : > { %15067 = vmatpush1.bf16.msra.mxu1 %v17122_v5 }
 0xb44   : > { %15068 = vmatprep.subr.bf16.mxu1 %v17127_v36 }
 0xb45   : > { %13933 = vmatmul.mubr.bf16.gmra.mrb[116].mxu1 %v23676_v15  ;;  %14046 = vmatmul.mubr.bf16.gmra.mrb[244].mxu0 %v23676_v15  ;;  %v25177_v15 = vld [vmem:[#allocation18_spill] sm:$0xff] }
 0xb46   : > { %13942 = vmatprep.mubr.bf16.mxu1 %v23694_v10  ;;  %14055 = vmatprep.mubr.bf16.mxu0 %v23694_v10  ;;  %v12954_v19 = vsub.s32 2, %v25177_v15  ;;  %v12958_v4 = vsub.s32 3, %v25177_v15 }
 0xb47   : > { %15069 = vmatpush1.bf16.msra.mxu1 %v17125_v11 }
 0xb48   : > { %15070 = vmatprep.subr.bf16.mxu1 %v17130_v31  ;;  %v23764_v17 = vrot.slane %v23756_v25, %v12954_v19  ;;  %v23771_v37 = vrot.slane %v23756_v25, %v12958_v4 }
 0xb4b   : > { %15071 = vmatpush1.bf16.msra.mxu1 %v17128_v50  ;;  %v17152_v50 = vld [vmem:[#allocation10 + $0x130] ss:$8 sps:$4 sm:$0xff]  }
 0xb4c   : > { %15072 = vmatprep.subr.bf16.mxu1 %v17133_v52 }
 0xb4d   : > { %13943 = vmatmul.mubr.bf16.gmra.mrb[120].mxu1 %v23696_v56  ;;  %14056 = vmatmul.mubr.bf16.gmra.mrb[248].mxu0 %v23696_v56 }
 0xb4e   : > { %13952 = vmatprep.mubr.bf16.mxu1 %v23712_v27  ;;  %14065 = vmatprep.mubr.bf16.mxu0 %v23712_v27 }
 0xb4f   : > { %15073 = vmatpush1.bf16.msra.mxu1 %v17131_v18 }
 0xb50   : > { %15074 = vmatprep.subr.bf16.mxu1 %v17136_v22 }
 0xb53   : > { %15075 = vmatpush1.bf16.msra.mxu1 %v17134_v61 }
 0xb54   : > { %15076 = vmatprep.subr.bf16.mxu1 %v17139_v43  ;;  %v17157_v43 = vld [vmem:[#allocation10 + $0x144] ss:$8 sps:$4 sm:$0xff]  }
 0xb55   : > { %13953 = vmatmul.mubr.bf16.gmra.mrb[124].mxu1 %v23714_v13  ;;  %14066 = vmatmul.mubr.bf16.gmra.mrb[252].mxu0 %v23714_v13 }
 0xb57   : > { %15077 = vmatpush1.bf16.msra.mxu1 %v17137_v45 }
 0xb58   : > { %15078 = vmatprep.subr.bf16.mxu1 %v17142_v2 }
 0xb5b   : > { %15079 = vmatpush1.bf16.msra.mxu1 %v17140_v29 }
 0xb5c   : > { %15161 = vmatprep.subr.bf16.mxu1 %v17145_v40 }
 0xb90   : > { %v13658_v41 = vpop.f32.mrb[64].mxu1  ;;  %v13771_v59 = vpop.f32.mrb[192].mxu0 }
 0xb91   : > { %v13659_v38 = vadd.f32 %v13658_v41, %v23761_v32  ;;  %v13772_v9 = vadd.f32 %v13771_v59, %v23764_v17  ;;  %v13660_v6 = vpop.f32.mrb[65].mxu1  ;;  %v13773_v42 = vpop.f32.mrb[193].mxu0 }
 0xb92   : > { %v13661_v53 = vadd.f32 %v13660_v6, %v23768_v55  ;;  %v13774_v10 = vadd.f32 %v13773_v42, %v23771_v37  ;;  %v13662_v56 = vpop.f32.mrb[66].mxu1  ;;  %v13775_v48 = vpop.f32.mrb[194].mxu0  ;;  %v17155_v6 = vld [vmem:[#allocation10 + $0x140] ss:$8 sps:$4 sm:$0xff]  }
 0xb93   : > { %v13663_v39 = vadd.f32 %v13662_v56, %v23761_v32  ;;  %v13776_v33 = vadd.f32 %v13775_v48, %v23764_v17  ;;  %v13664_v49 = vpop.f32.mrb[67].mxu1  ;;  %v13777_v57 = vpop.f32.mrb[195].mxu0  ;;  %v14076_v7 = vmax.f32 %v13659_v38, 0.0  ;;  %v14078_v51 = vmax.f32 %v13772_v9, 0.0 }
 0xb94   : > { %v13665_v62 = vadd.f32 %v13664_v49, %v23768_v55  ;;  %v13778_v28 = vadd.f32 %v13777_v57, %v23771_v37  ;;  %v14077_v27 = vmax.f32 %v13661_v53, 0.0  ;;  %v14079_v13 = vmax.f32 %v13774_v10, 0.0  ;;  %v17160_v10 = vld [vmem:[#allocation10 + $0x154] ss:$8 sps:$4 sm:$0xff]  }
 0xb95   : > { %v14084_v34 = vmax.f32 %v13663_v39, 0.0  ;;  %v14086_v35 = vmax.f32 %v13776_v33, 0.0  ;;  %v17158_v39 = vld [vmem:[#allocation10 + $0x150] ss:$8 sps:$4 sm:$0xff]   ;;  %v17163_v33 = vld [vmem:[#allocation10 + $0x164] ss:$8 sps:$4 sm:$0xff]  }
 0xb96   : > { %v14085_v26 = vmax.f32 %v13665_v62, 0.0  ;;  %v14087_v14 = vmax.f32 %v13778_v28, 0.0 }
 0xb97   : > { %v14204_v20 = vpack.c.bf16 %v14084_v34, %v14076_v7  ;;  %v23781_v8 = vpack.c.bf16 %v14086_v35, %v14078_v51  ;;  %v17161_v34 = vld [vmem:[#allocation10 + $0x160] ss:$8 sps:$4 sm:$0xff]  }
 0xb98   : > { %v14205_v3 = vpack.c.bf16 %v14085_v26, %v14077_v27  ;;  %v23783_v1 = vpack.c.bf16 %v14087_v14, %v14079_v13  ;;  %v17166_v14 = vld [vmem:[#allocation10 + $0x174] ss:$8 sps:$4 sm:$0xff]  }
 0xb9a   : > { %15080 = vmatprep.mubr.bf16.mxu1 %v14205_v3 }
 0xb9b   : > { %15081 = vmatmul.mubr.bf16.vlgmr.msra.gmra.mrb[128].mxu1 %v14204_v20 }
 0xb9c   : > { %15162 = vmatpush1.bf16.msra.mxu1 %v17143_v24 }
 0xb9d   : > { %15163 = vmatprep.subr.bf16.mxu1 %v17148_v0 }
 0xba0   : > { %15164 = vmatpush1.bf16.msra.mxu1 %v17146_v60 }
 0xba1   : > { %15165 = vmatprep.subr.bf16.mxu1 %v17151_v47 }
 0xba3   : > { %v13668_v58 = vpop.f32.mrb[68].mxu1  ;;  %v13781_v21 = vpop.f32.mrb[196].mxu0 }
 0xba4   : > { %v13669_v44 = vadd.f32 %v13668_v58, %v23761_v32  ;;  %v13782_v63 = vadd.f32 %v13781_v21, %v23764_v17  ;;  %v13670_v54 = vpop.f32.mrb[69].mxu1  ;;  %v13783_v12 = vpop.f32.mrb[197].mxu0  ;;  %15166 = vmatpush1.bf16.msra.mxu1 %v17149_v23 }
 0xba5   : > { %v13671_v5 = vadd.f32 %v13670_v54, %v23768_v55  ;;  %v13784_v36 = vadd.f32 %v13783_v12, %v23771_v37  ;;  %v13672_v11 = vpop.f32.mrb[70].mxu1  ;;  %v13785_v31 = vpop.f32.mrb[198].mxu0  ;;  %15167 = vmatprep.subr.bf16.mxu1 %v17154_v46 }
 0xba6   : > { %v13673_v52 = vadd.f32 %v13672_v11, %v23761_v32  ;;  %v13786_v18 = vadd.f32 %v13785_v31, %v23764_v17  ;;  %v13674_v22 = vpop.f32.mrb[71].mxu1  ;;  %v13787_v61 = vpop.f32.mrb[199].mxu0  ;;  %v14092_v29 = vmax.f32 %v13669_v44, 0.0  ;;  %v14094_v40 = vmax.f32 %v13782_v63, 0.0  ;;  %v17164_v44 = vld [vmem:[#allocation10 + $0x170] ss:$8 sps:$4 sm:$0xff]  }
 0xba7   : > { %v13675_v45 = vadd.f32 %v13674_v22, %v23768_v55  ;;  %v13788_v2 = vadd.f32 %v13787_v61, %v23771_v37  ;;  %v14093_v41 = vmax.f32 %v13671_v5, 0.0  ;;  %v14095_v59 = vmax.f32 %v13784_v36, 0.0  ;;  %v17169_v36 = vld [vmem:[#allocation10 + $0x184] ss:$8 sps:$4 sm:$0xff]  }
 0xba8   : > { %v14100_v19 = vmax.f32 %v13673_v52, 0.0  ;;  %v14102_v4 = vmax.f32 %v13786_v18, 0.0  ;;  %15168 = vmatpush1.bf16.msra.mxu1 %v17152_v50 }
 0xba9   : > { %v14101_v38 = vmax.f32 %v13675_v45, 0.0  ;;  %v14103_v9 = vmax.f32 %v13788_v2, 0.0  ;;  %15169 = vmatprep.subr.bf16.mxu1 %v17157_v43 }
 0xbaa   : > { %v14212_v42 = vpack.c.bf16 %v14100_v19, %v14092_v29  ;;  %v23793_v53 = vpack.c.bf16 %v14102_v4, %v14094_v40  ;;  %v17167_v29 = vld [vmem:[#allocation10 + $0x180] ss:$8 sps:$4 sm:$0xff]  }
 0xbab   : > { %v14213_v56 = vpack.c.bf16 %v14101_v38, %v14093_v41  ;;  %v23795_v48 = vpack.c.bf16 %v14103_v9, %v14095_v59  ;;  %v17172_v59 = vld [vmem:[#allocation10 + $0x194] ss:$8 sps:$4 sm:$0xff]  }
 0xbac   : > { %15170 = vmatpush1.bf16.msra.mxu1 %v17155_v6 }
 0xbad   : > { %15090 = vmatprep.mubr.bf16.mxu1 %v14213_v56  ;;  %15171 = vmatprep.subr.bf16.mxu1 %v17160_v10 }
 0xbae   : > { %15091 = vmatmul.mubr.bf16.gmra.mrb[132].mxu1 %v14212_v42 }
 0xbb0   : > { %v13678_v49 = vpop.f32.mrb[72].mxu1  ;;  %v13791_v57 = vpop.f32.mrb[200].mxu0  ;;  %15172 = vmatpush1.bf16.msra.mxu1 %v17158_v39 }
 0xbb1   : > { %v13679_v62 = vadd.f32 %v13678_v49, %v23761_v32  ;;  %v13792_v28 = vadd.f32 %v13791_v57, %v23764_v17  ;;  %v13680_v7 = vpop.f32.mrb[73].mxu1  ;;  %v13793_v51 = vpop.f32.mrb[201].mxu0  ;;  %15173 = vmatprep.subr.bf16.mxu1 %v17163_v33 }
 0xbb2   : > { %v13681_v35 = vadd.f32 %v13680_v7, %v23768_v55  ;;  %v13794_v27 = vadd.f32 %v13793_v51, %v23771_v37  ;;  %v13682_v13 = vpop.f32.mrb[74].mxu1  ;;  %v13795_v26 = vpop.f32.mrb[202].mxu0 }
 0xbb3   : > { %v13683_v20 = vadd.f32 %v13682_v13, %v23761_v32  ;;  %v13796_v3 = vadd.f32 %v13795_v26, %v23764_v17  ;;  %v13684_v24 = vpop.f32.mrb[75].mxu1  ;;  %v13797_v0 = vpop.f32.mrb[203].mxu0  ;;  %v14108_v23 = vmax.f32 %v13679_v62, 0.0  ;;  %v14110_v46 = vmax.f32 %v13792_v28, 0.0  ;;  %v17170_v62 = vld [vmem:[#allocation10 + $0x190] ss:$8 sps:$4 sm:$0xff]  }
 0xbb4   : > { %v13685_v60 = vadd.f32 %v13684_v24, %v23768_v55  ;;  %v13798_v47 = vadd.f32 %v13797_v0, %v23771_v37  ;;  %15174 = vmatpush1.bf16.msra.mxu1 %v17161_v34  ;;  %v14109_v63 = vmax.f32 %v13681_v35, 0.0  ;;  %v14111_v54 = vmax.f32 %v13794_v27, 0.0  ;;  %v17175_v35 = vld [vmem:[#allocation10 + $0x1a4] ss:$8 sps:$4 sm:$0xff]   ;;  %v17176_v24 = vld [vmem:[#allocation10 + $0x1b0] ss:$8 sps:$4 sm:$0xff]  }
 0xbb5   : > { %v14116_v58 = vmax.f32 %v13683_v20, 0.0  ;;  %v14118_v21 = vmax.f32 %v13796_v3, 0.0  ;;  %15175 = vmatprep.subr.bf16.mxu1 %v17166_v14  ;;  %v17173_v20 = vld [vmem:[#allocation10 + $0x1a0] ss:$8 sps:$4 sm:$0xff]   ;;  %v17178_v3 = vld [vmem:[#allocation10 + $0x1b4] ss:$8 sps:$4 sm:$0xff]  }
 0xbb6   : > { %v14117_v12 = vmax.f32 %v13685_v60, 0.0  ;;  %v14119_v5 = vmax.f32 %v13798_v47, 0.0  ;;  %v17181_v0 = vld [vmem:[#allocation10 + $0x1c4] ss:$8 sps:$4 sm:$0xff]   ;;  %v17179_v60 = vld [vmem:[#allocation10 + $0x1c0] ss:$8 sps:$4 sm:$0xff]  }
 0xbb7   : > { %v14220_v11 = vpack.c.bf16 %v14116_v58, %v14108_v23  ;;  %v23805_v31 = vpack.c.bf16 %v14118_v21, %v14110_v46  ;;  %v17184_v47 = vld [vmem:[#allocation10 + $0x1d4] ss:$8 sps:$4 sm:$0xff]   ;;  %v17182_v23 = vld [vmem:[#allocation10 + $0x1d0] ss:$8 sps:$4 sm:$0xff]   ;;  %v17187_v46 = vld [vmem:[#allocation10 + $0x1e4] ss:$8 sps:$4 sm:$0xff]  }
 0xbb8   : > { %v14221_v50 = vpack.c.bf16 %v14117_v12, %v14109_v63  ;;  %v23807_v52 = vpack.c.bf16 %v14119_v5, %v14111_v54  ;;  %v13688_v18 = vpop.f32.mrb[76].mxu1  ;;  %v13801_v22 = vpop.f32.mrb[204].mxu0  ;;  %15176 = vmatpush1.bf16.msra.mxu1 %v17164_v44  ;;  %v17185_v5 = vld [vmem:[#allocation10 + $0x1e0] ss:$8 sps:$4 sm:$0xff]  }
 0xbb9   : > { %v13689_v61 = vadd.f32 %v13688_v18, %v23761_v32  ;;  %v13802_v43 = vadd.f32 %v13801_v22, %v23764_v17  ;;  %v13690_v45 = vpop.f32.mrb[77].mxu1  ;;  %v13803_v2 = vpop.f32.mrb[205].mxu0  ;;  %15177 = vmatprep.subr.bf16.mxu1 %v17169_v36  ;;  %v17190_v22 = vld [vmem:[#allocation10 + $0x1f4] ss:$8 sps:$4 sm:$0xff]  }
 0xbba   : > { %v13691_v40 = vadd.f32 %v13690_v45, %v23768_v55  ;;  %v13804_v19 = vadd.f32 %v13803_v2, %v23771_v37  ;;  %v13692_v4 = vpop.f32.mrb[78].mxu1  ;;  %v13805_v41 = vpop.f32.mrb[206].mxu0  ;;  %15100 = vmatprep.mubr.bf16.mxu1 %v14221_v50 }
 0xbbb   : > { %v13693_v38 = vadd.f32 %v13692_v4, %v23761_v32  ;;  %v13806_v9 = vadd.f32 %v13805_v41, %v23764_v17  ;;  %v13694_v6 = vpop.f32.mrb[79].mxu1  ;;  %v13807_v42 = vpop.f32.mrb[207].mxu0  ;;  %15101 = vmatmul.mubr.bf16.gmra.mrb[136].mxu1 %v14220_v11  ;;  %v14124_v39 = vmax.f32 %v13689_v61, 0.0  ;;  %v14126_v33 = vmax.f32 %v13802_v43, 0.0 }
 0xbbc   : > { %v13695_v10 = vadd.f32 %v13694_v6, %v23768_v55  ;;  %v13808_v56 = vadd.f32 %v13807_v42, %v23771_v37  ;;  %15178 = vmatpush1.bf16.msra.mxu1 %v17167_v29  ;;  %v14125_v28 = vmax.f32 %v13691_v40, 0.0  ;;  %v14127_v7 = vmax.f32 %v13804_v19, 0.0 }
 0xbbd   : > { %v14132_v49 = vmax.f32 %v13693_v38, 0.0  ;;  %v14134_v57 = vmax.f32 %v13806_v9, 0.0  ;;  %15179 = vmatprep.subr.bf16.mxu1 %v17172_v59  ;;  %v17188_v38 = vld [vmem:[#allocation10 + $0x1f0] ss:$8 sps:$4 sm:$0xff]  }
 0xbbe   : > { %v14133_v51 = vmax.f32 %v13695_v10, 0.0  ;;  %v14135_v34 = vmax.f32 %v13808_v56, 0.0  ;;  %v17193_v56 = vld [vmem:[#allocation10 + $0x204] ss:$8 sps:$4 sm:$0xff]  }
 0xbbf   : > { %v14228_v27 = vpack.c.bf16 %v14132_v49, %v14124_v39  ;;  %v23817_v13 = vpack.c.bf16 %v14134_v57, %v14126_v33 }
 0xbc0   : > { %v14229_v26 = vpack.c.bf16 %v14133_v51, %v14125_v28  ;;  %v23819_v14 = vpack.c.bf16 %v14135_v34, %v14127_v7  ;;  %15180 = vmatpush1.bf16.msra.mxu1 %v17170_v62 }
 0xbc1   : > { %15181 = vmatprep.subr.bf16.mxu1 %v17175_v35 }
 0xbc2   : > { %15110 = vmatprep.mubr.bf16.mxu1 %v14229_v26 }
 0xbc3   : > { %15111 = vmatmul.mubr.bf16.gmra.mrb[140].mxu1 %v14228_v27 }
 0xbc4   : > { %15182 = vmatpush1.bf16.msra.mxu1 %v17173_v20 }
 0xbc5   : > { %15183 = vmatprep.subr.bf16.mxu1 %v17178_v3 }
 0xbc8   : > { %15184 = vmatpush1.bf16.msra.mxu1 %v17176_v24 }
 0xbc9   : > { %15185 = vmatprep.subr.bf16.mxu1 %v17181_v0 }
 0xbcc   : > { %15186 = vmatpush1.bf16.msra.mxu1 %v17179_v60 }
 0xbcd   : > { %15187 = vmatprep.subr.bf16.mxu1 %v17184_v47 }
 0xbd0   : > { %v13698_v58 = vpop.f32.mrb[80].mxu1  ;;  %v13811_v21 = vpop.f32.mrb[208].mxu0  ;;  %15188 = vmatpush1.bf16.msra.mxu1 %v17182_v23 }
 0xbd1   : > { %v13699_v44 = vadd.f32 %v13698_v58, %v23761_v32  ;;  %v13812_v63 = vadd.f32 %v13811_v21, %v23764_v17  ;;  %v13700_v54 = vpop.f32.mrb[81].mxu1  ;;  %v13813_v12 = vpop.f32.mrb[209].mxu0  ;;  %15189 = vmatprep.subr.bf16.mxu1 %v17187_v46 }
 0xbd2   : > { %v13701_v36 = vadd.f32 %v13700_v54, %v23768_v55  ;;  %v13814_v11 = vadd.f32 %v13813_v12, %v23771_v37  ;;  %v13702_v50 = vpop.f32.mrb[82].mxu1  ;;  %v13815_v18 = vpop.f32.mrb[210].mxu0 }
 0xbd3   : > { %v13703_v61 = vadd.f32 %v13702_v50, %v23761_v32  ;;  %v13816_v43 = vadd.f32 %v13815_v18, %v23764_v17  ;;  %v13704_v45 = vpop.f32.mrb[83].mxu1  ;;  %v13817_v2 = vpop.f32.mrb[211].mxu0  ;;  %v14140_v19 = vmax.f32 %v13699_v44, 0.0  ;;  %v14142_v4 = vmax.f32 %v13812_v63, 0.0 }
 0xbd4   : > { %v13705_v29 = vadd.f32 %v13704_v45, %v23768_v55  ;;  %v13818_v40 = vadd.f32 %v13817_v2, %v23771_v37  ;;  %15190 = vmatpush1.bf16.msra.mxu1 %v17185_v5  ;;  %v14141_v9 = vmax.f32 %v13701_v36, 0.0  ;;  %v14143_v6 = vmax.f32 %v13814_v11, 0.0 }
 0xbd5   : > { %v14148_v41 = vmax.f32 %v13703_v61, 0.0  ;;  %v14150_v59 = vmax.f32 %v13816_v43, 0.0  ;;  %15191 = vmatprep.subr.bf16.mxu1 %v17190_v22 }
 0xbd6   : > { %v14149_v42 = vmax.f32 %v13705_v29, 0.0  ;;  %v14151_v10 = vmax.f32 %v13818_v40, 0.0 }
 0xbd7   : > { %v14236_v39 = vpack.c.bf16 %v14148_v41, %v14140_v19  ;;  %v23829_v33 = vpack.c.bf16 %v14150_v59, %v14142_v4 }
 0xbd8   : > { %v14237_v49 = vpack.c.bf16 %v14149_v42, %v14141_v9  ;;  %v23831_v57 = vpack.c.bf16 %v14151_v10, %v14143_v6  ;;  %v13708_v62 = vpop.f32.mrb[84].mxu1  ;;  %v13821_v28 = vpop.f32.mrb[212].mxu0  ;;  %15192 = vmatpush1.bf16.msra.mxu1 %v17188_v38 }
 0xbd9   : > { %v13709_v7 = vadd.f32 %v13708_v62, %v23761_v32  ;;  %v13822_v51 = vadd.f32 %v13821_v28, %v23764_v17  ;;  %v13710_v34 = vpop.f32.mrb[85].mxu1  ;;  %v13823_v35 = vpop.f32.mrb[213].mxu0  ;;  %15274 = vmatprep.subr.bf16.mxu1 %v17193_v56 }
 0xbda   : > { %v13711_v27 = vadd.f32 %v13710_v34, %v23768_v55  ;;  %v13824_v26 = vadd.f32 %v13823_v35, %v23771_v37  ;;  %v13712_v20 = vpop.f32.mrb[86].mxu1  ;;  %v13825_v3 = vpop.f32.mrb[214].mxu0  ;;  %15120 = vmatprep.mubr.bf16.mxu1 %v14237_v49 }
 0xbdb   : > { %v13713_v24 = vadd.f32 %v13712_v20, %v23761_v32  ;;  %v13826_v0 = vadd.f32 %v13825_v3, %v23764_v17  ;;  %v13714_v60 = vpop.f32.mrb[87].mxu1  ;;  %v13827_v47 = vpop.f32.mrb[215].mxu0  ;;  %15121 = vmatmul.mubr.bf16.gmra.mrb[144].mxu1 %v14236_v39  ;;  %v14156_v58 = vmax.f32 %v13709_v7, 0.0  ;;  %v14158_v21 = vmax.f32 %v13822_v51, 0.0 }
 0xbdc   : > { %v13715_v23 = vadd.f32 %v13714_v60, %v23768_v55  ;;  %v13828_v46 = vadd.f32 %v13827_v47, %v23771_v37  ;;  %v14157_v54 = vmax.f32 %v13711_v27, 0.0  ;;  %v14159_v12 = vmax.f32 %v13824_v26, 0.0 }
 0xbdd   : > { %v14164_v44 = vmax.f32 %v13713_v24, 0.0  ;;  %v14166_v63 = vmax.f32 %v13826_v0, 0.0  ;;  %v12962_v20 = vsub.s32 4, %v25177_v15  ;;  %v12970_v3 = vsub.s32 6, %v25177_v15 }
 0xbde   : > { %v14165_v5 = vmax.f32 %v13715_v23, 0.0  ;;  %v14167_v36 = vmax.f32 %v13828_v46, 0.0  ;;  %v12966_v23 = vsub.s32 5, %v25177_v15  ;;  %v12974_v46 = vsub.s32 7, %v25177_v15 }
 0xbdf   : > { %v14244_v11 = vpack.c.bf16 %v14164_v44, %v14156_v58  ;;  %v23841_v50 = vpack.c.bf16 %v14166_v63, %v14158_v21  ;;  %v23868_v15 = vrot.slane %v23756_v25, %v12962_v20 }
 0xbe0   : > { %v14245_v18 = vpack.c.bf16 %v14165_v5, %v14157_v54  ;;  %v23843_v22 = vpack.c.bf16 %v14167_v36, %v14159_v12  ;;  %v13718_v61 = vpop.f32.mrb[88].mxu1  ;;  %v13831_v43 = vpop.f32.mrb[216].mxu0 }
 0xbe1   : > { %v13719_v45 = vadd.f32 %v13718_v61, %v23761_v32  ;;  %v13832_v2 = vadd.f32 %v13831_v43, %v23764_v17  ;;  %v13720_v29 = vpop.f32.mrb[89].mxu1  ;;  %v13833_v40 = vpop.f32.mrb[217].mxu0 }
 0xbe2   : > { %15130 = vmatprep.mubr.bf16.mxu1 %v14245_v18  ;;  %v13721_v19 = vadd.f32 %v13720_v29, %v23768_v55  ;;  %v13834_v4 = vadd.f32 %v13833_v40, %v23771_v37  ;;  %v13722_v41 = vpop.f32.mrb[90].mxu1  ;;  %v13835_v59 = vpop.f32.mrb[218].mxu0  ;;  %v23876_v40 = vrot.slane %v23756_v25, %v12966_v23 }
 0xbe3   : > { %15131 = vmatmul.mubr.bf16.gmra.mrb[148].mxu1 %v14244_v11  ;;  %v13723_v38 = vadd.f32 %v13722_v41, %v23761_v32  ;;  %v13836_v9 = vadd.f32 %v13835_v59, %v23764_v17  ;;  %v13724_v6 = vpop.f32.mrb[91].mxu1  ;;  %v13837_v42 = vpop.f32.mrb[219].mxu0  ;;  %v14172_v39 = vmax.f32 %v13719_v45, 0.0  ;;  %v14174_v49 = vmax.f32 %v13832_v2, 0.0 }
 0xbe4   : > { %v13725_v10 = vadd.f32 %v13724_v6, %v23768_v55  ;;  %v13838_v56 = vadd.f32 %v13837_v42, %v23771_v37  ;;  %v14173_v7 = vmax.f32 %v13721_v19, 0.0  ;;  %v14175_v51 = vmax.f32 %v13834_v4, 0.0 }
 0xbe5   : > { %v14180_v62 = vmax.f32 %v13723_v38, 0.0  ;;  %v14182_v28 = vmax.f32 %v13836_v9, 0.0  ;;  %v23871_v45 = vrot.slane %v23756_v25, %v12970_v3 }
 0xbe6   : > { %v14181_v34 = vmax.f32 %v13725_v10, 0.0  ;;  %v14183_v35 = vmax.f32 %v13838_v56, 0.0 }
 0xbe7   : > { %v14252_v27 = vpack.c.bf16 %v14180_v62, %v14172_v39  ;;  %v23853_v26 = vpack.c.bf16 %v14182_v28, %v14174_v49 }
 0xbe8   : > { %v14253_v24 = vpack.c.bf16 %v14181_v34, %v14173_v7  ;;  %v23857_v0 = vpack.c.bf16 %v14183_v35, %v14175_v51  ;;  %v13728_v60 = vpop.f32.mrb[92].mxu1  ;;  %v13841_v47 = vpop.f32.mrb[220].mxu0 }
 0xbe9   : > { %v13729_v58 = vadd.f32 %v13728_v60, %v23761_v32  ;;  %v13842_v21 = vadd.f32 %v13841_v47, %v23764_v17  ;;  %v13730_v44 = vpop.f32.mrb[93].mxu1  ;;  %v13843_v63 = vpop.f32.mrb[221].mxu0 }
 0xbea   : > { %v13731_v54 = vadd.f32 %v13730_v44, %v23768_v55  ;;  %v13844_v12 = vadd.f32 %v13843_v63, %v23771_v37  ;;  %v13732_v5 = vpop.f32.mrb[94].mxu1  ;;  %v13845_v36 = vpop.f32.mrb[222].mxu0  ;;  %15140 = vmatprep.mubr.bf16.mxu1 %v14253_v24 }
 0xbeb   : > { %v13733_v11 = vadd.f32 %v13732_v5, %v23761_v32  ;;  %v13846_v18 = vadd.f32 %v13845_v36, %v23764_v17  ;;  %v13734_v61 = vpop.f32.mrb[95].mxu1  ;;  %v13847_v43 = vpop.f32.mrb[223].mxu0  ;;  %15141 = vmatmul.mubr.bf16.gmra.mrb[152].mxu1 %v14252_v27  ;;  %v23879_v32 = vrot.slane %v23756_v25, %v12974_v46  ;;  %v14188_v17 = vmax.f32 %v13729_v58, 0.0 }
 0xbec   : > { %v13735_v2 = vadd.f32 %v13734_v61, %v23768_v55  ;;  %v13848_v29 = vadd.f32 %v13847_v43, %v23771_v37  ;;  %v14190_v19 = vmax.f32 %v13842_v21, 0.0  ;;  %v14189_v59 = vmax.f32 %v13731_v54, 0.0 }
 0xbed   : > { %v14196_v4 = vmax.f32 %v13733_v11, 0.0  ;;  %v14198_v41 = vmax.f32 %v13846_v18, 0.0  ;;  %v14191_v38 = vmax.f32 %v13844_v12, 0.0 }
 0xbee   : > { %v14197_v9 = vmax.f32 %v13735_v2, 0.0  ;;  %v14199_v6 = vmax.f32 %v13848_v29, 0.0  ;;  %v17191_v2 = vld [vmem:[#allocation10 + $0x200] ss:$8 sps:$4 sm:$0xff]  }
 0xbef   : > { %v14260_v42 = vpack.c.bf16 %v14196_v4, %v14188_v17  ;;  %v23881_v10 = vpack.c.bf16 %v14198_v41, %v14190_v19  ;;  %v17196_v4 = vld [vmem:[#allocation10 + $0x214] ss:$8 sps:$4 sm:$0xff]  }
 0xbf0   : > { %v14261_v55 = vpack.c.bf16 %v14197_v9, %v14189_v59  ;;  %v23883_v56 = vpack.c.bf16 %v14199_v6, %v14191_v38  ;;  %v13884_v37 = vpop.f32.mrb[96].mxu1  ;;  %v13997_v39 = vpop.f32.mrb[224].mxu0 }
 0xbf1   : > { %v13885_v49 = vadd.f32 %v13884_v37, %v23868_v15  ;;  %v13998_v25 = vadd.f32 %v13997_v39, %v23871_v45  ;;  %v13886_v62 = vpop.f32.mrb[97].mxu1  ;;  %v13999_v28 = vpop.f32.mrb[225].mxu0 }
 0xbf2   : > { %v13887_v7 = vadd.f32 %v13886_v62, %v23876_v40  ;;  %v14000_v51 = vadd.f32 %v13999_v28, %v23879_v32  ;;  %v13888_v34 = vpop.f32.mrb[98].mxu1  ;;  %v14001_v35 = vpop.f32.mrb[226].mxu0  ;;  %15150 = vmatprep.mubr.bf16.mxu1 %v14261_v55 }
 0xbf3   : > { %v13889_v27 = vadd.f32 %v13888_v34, %v23868_v15  ;;  %v14002_v20 = vadd.f32 %v14001_v35, %v23871_v45  ;;  %v13890_v3 = vpop.f32.mrb[99].mxu1  ;;  %v14003_v24 = vpop.f32.mrb[227].mxu0  ;;  %15151 = vmatmul.mubr.bf16.gmra.mrb[156].mxu1 %v14260_v42  ;;  %v14080_v23 = vmax.f32 %v13885_v49, 0.0  ;;  %v14082_v46 = vmax.f32 %v13998_v25, 0.0  ;;  %v17194_v25 = vld [vmem:[#allocation10 + $0x210] ss:$8 sps:$4 sm:$0xff]  }
 0xbf4   : > { %v13891_v60 = vadd.f32 %v13890_v3, %v23876_v40  ;;  %v14004_v47 = vadd.f32 %v14003_v24, %v23879_v32  ;;  %15193 = vmatprep.mubr.bf16.mxu1 %v23783_v1  ;;  %v14081_v44 = vmax.f32 %v13887_v7, 0.0  ;;  %v14083_v63 = vmax.f32 %v14000_v51, 0.0  ;;  %v17199_v34 = vld [vmem:[#allocation10 + $0x224] ss:$8 sps:$4 sm:$0xff]  }
 0xbf5   : > { %v14088_v58 = vmax.f32 %v13889_v27, 0.0  ;;  %v14090_v21 = vmax.f32 %v14002_v20, 0.0 }
 0xbf6   : > { %v14089_v54 = vmax.f32 %v13891_v60, 0.0  ;;  %v14091_v12 = vmax.f32 %v14004_v47, 0.0 }
 0xbf7   : > { %v23894_v5 = vpack.c.bf16 %v14088_v58, %v14080_v23  ;;  %v23896_v36 = vpack.c.bf16 %v14090_v21, %v14082_v46  ;;  %v17197_v46 = vld [vmem:[#allocation10 + $0x220] ss:$8 sps:$4 sm:$0xff]  }
 0xbf8   : > { %v23898_v11 = vpack.c.bf16 %v14089_v54, %v14081_v44  ;;  %v23900_v18 = vpack.c.bf16 %v14091_v12, %v14083_v63  ;;  %v13894_v61 = vpop.f32.mrb[100].mxu1  ;;  %v14007_v43 = vpop.f32.mrb[228].mxu0  ;;  %v17202_v54 = vld [vmem:[#allocation10 + $0x234] ss:$8 sps:$4 sm:$0xff]  }
 0xbf9   : > { %v13895_v1 = vadd.f32 %v13894_v61, %v23868_v15  ;;  %v14008_v29 = vadd.f32 %v14007_v43, %v23871_v45  ;;  %v13896_v17 = vpop.f32.mrb[101].mxu1  ;;  %v14009_v19 = vpop.f32.mrb[229].mxu0 }
 0xbfa   : > { %v13897_v41 = vadd.f32 %v13896_v17, %v23876_v40  ;;  %v14010_v59 = vadd.f32 %v14009_v19, %v23879_v32  ;;  %v13898_v38 = vpop.f32.mrb[102].mxu1  ;;  %v14011_v9 = vpop.f32.mrb[230].mxu0 }
 0xbfb   : > { %v13899_v6 = vadd.f32 %v13898_v38, %v23868_v15  ;;  %v14012_v42 = vadd.f32 %v14011_v9, %v23871_v45  ;;  %v13900_v55 = vpop.f32.mrb[103].mxu1  ;;  %v14013_v37 = vpop.f32.mrb[231].mxu0  ;;  %15194 = vmatmul.mubr.bf16.vlgmr.msra.gmra.mrb[128].mxu1 %v23781_v8  ;;  %v14096_v62 = vmax.f32 %v13895_v1, 0.0  ;;  %v14098_v28 = vmax.f32 %v14008_v29, 0.0 }
 0xbfc   : > { %v13901_v39 = vadd.f32 %v13900_v55, %v23876_v40  ;;  %v14014_v49 = vadd.f32 %v14013_v37, %v23879_v32  ;;  %15275 = vmatpush1.bf16.msra.mxu1 %v17191_v2  ;;  %15203 = vmatprep.mubr.bf16.mxu1 %v23795_v48  ;;  %v14097_v35 = vmax.f32 %v13897_v41, 0.0  ;;  %v14099_v27 = vmax.f32 %v14010_v59, 0.0  ;;  %v17200_v59 = vld [vmem:[#allocation10 + $0x230] ss:$8 sps:$4 sm:$0xff]   ;;  %v17205_v55 = vld [vmem:[#allocation10 + $0x244] ss:$8 sps:$4 sm:$0xff]  }
 0xbfd   : > { %v14104_v7 = vmax.f32 %v13899_v6, 0.0  ;;  %v14106_v51 = vmax.f32 %v14012_v42, 0.0  ;;  %15276 = vmatprep.subr.bf16.mxu1 %v17196_v4 }
 0xbfe   : > { %v14105_v20 = vmax.f32 %v13901_v39, 0.0  ;;  %v14107_v3 = vmax.f32 %v14014_v49, 0.0 }
 0xbff   : > { %v23912_v24 = vpack.c.bf16 %v14104_v7, %v14096_v62  ;;  %v23914_v8 = vpack.c.bf16 %v14106_v51, %v14098_v28 }
 0xc00   : > { %v23916_v60 = vpack.c.bf16 %v14105_v20, %v14097_v35  ;;  %v23918_v47 = vpack.c.bf16 %v14107_v3, %v14099_v27  ;;  %15277 = vmatpush1.bf16.msra.mxu1 %v17194_v25  ;;  %v13904_v48 = vpop.f32.mrb[104].mxu1  ;;  %v14017_v23 = vpop.f32.mrb[232].mxu0 }
 0xc01   : > { %v13905_v58 = vadd.f32 %v13904_v48, %v23868_v15  ;;  %v14018_v21 = vadd.f32 %v14017_v23, %v23871_v45  ;;  %v13906_v44 = vpop.f32.mrb[105].mxu1  ;;  %v14019_v63 = vpop.f32.mrb[233].mxu0  ;;  %15278 = vmatprep.subr.bf16.mxu1 %v17199_v34  ;;  %v17203_v34 = vld [vmem:[#allocation10 + $0x240] ss:$8 sps:$4 sm:$0xff]   ;;  %v17208_v48 = vld [vmem:[#allocation10 + $0x254] ss:$8 sps:$4 sm:$0xff]  }
 0xc02   : > { %v13907_v12 = vadd.f32 %v13906_v44, %v23876_v40  ;;  %v14020_v61 = vadd.f32 %v14019_v63, %v23879_v32  ;;  %v13908_v43 = vpop.f32.mrb[106].mxu1  ;;  %v14021_v2 = vpop.f32.mrb[234].mxu0 }
 0xc03   : > { %v13909_v1 = vadd.f32 %v13908_v43, %v23868_v15  ;;  %v14022_v29 = vadd.f32 %v14021_v2, %v23871_v45  ;;  %v13910_v17 = vpop.f32.mrb[107].mxu1  ;;  %v14023_v19 = vpop.f32.mrb[235].mxu0  ;;  %15204 = vmatmul.mubr.bf16.gmra.mrb[132].mxu1 %v23793_v53  ;;  %v14112_v38 = vmax.f32 %v13905_v58, 0.0  ;;  %v14114_v9 = vmax.f32 %v14018_v21, 0.0  ;;  %v17206_v2 = vld [vmem:[#allocation10 + $0x250] ss:$8 sps:$4 sm:$0xff]  }
 0xc04   : > { %v13911_v4 = vadd.f32 %v13910_v17, %v23876_v40  ;;  %v14024_v41 = vadd.f32 %v14023_v19, %v23879_v32  ;;  %15279 = vmatpush1.bf16.msra.mxu1 %v17197_v46  ;;  %15213 = vmatprep.mubr.bf16.mxu1 %v23807_v52  ;;  %v14113_v37 = vmax.f32 %v13907_v12, 0.0  ;;  %v14115_v39 = vmax.f32 %v14020_v61, 0.0 }
 0xc05   : > { %v14120_v6 = vmax.f32 %v13909_v1, 0.0  ;;  %v14122_v42 = vmax.f32 %v14022_v29, 0.0  ;;  %15280 = vmatprep.subr.bf16.mxu1 %v17202_v54 }
 0xc06   : > { %v14121_v49 = vmax.f32 %v13911_v4, 0.0  ;;  %v14123_v25 = vmax.f32 %v14024_v41, 0.0  ;;  %v17211_v4 = vld [vmem:[#allocation10 + $0x264] ss:$8 sps:$4 sm:$0xff]  }
 0xc07   : > { %v23930_v62 = vpack.c.bf16 %v14120_v6, %v14112_v38  ;;  %v23932_v53 = vpack.c.bf16 %v14122_v42, %v14114_v9 }
 0xc08   : > { %v23934_v28 = vpack.c.bf16 %v14121_v49, %v14113_v37  ;;  %v23936_v7 = vpack.c.bf16 %v14123_v25, %v14115_v39  ;;  %15281 = vmatpush1.bf16.msra.mxu1 %v17200_v59  ;;  %v13914_v52 = vpop.f32.mrb[108].mxu1  ;;  %v14027_v51 = vpop.f32.mrb[236].mxu0  ;;  %v17209_v39 = vld [vmem:[#allocation10 + $0x260] ss:$8 sps:$4 sm:$0xff]  }
 0xc09   : > { %v13915_v35 = vadd.f32 %v13914_v52, %v23868_v15  ;;  %v14028_v27 = vadd.f32 %v14027_v51, %v23871_v45  ;;  %v13916_v20 = vpop.f32.mrb[109].mxu1  ;;  %v14029_v3 = vpop.f32.mrb[237].mxu0  ;;  %15282 = vmatprep.subr.bf16.mxu1 %v17205_v55 }
 0xc0a   : > { %v13917_v23 = vadd.f32 %v13916_v20, %v23876_v40  ;;  %v14030_v46 = vadd.f32 %v14029_v3, %v23879_v32  ;;  %v13918_v58 = vpop.f32.mrb[110].mxu1  ;;  %v14031_v21 = vpop.f32.mrb[238].mxu0 }
 0xc0b   : > { %v13919_v44 = vadd.f32 %v13918_v58, %v23868_v15  ;;  %v14032_v63 = vadd.f32 %v14031_v21, %v23871_v45  ;;  %v13920_v54 = vpop.f32.mrb[111].mxu1  ;;  %v14033_v12 = vpop.f32.mrb[239].mxu0  ;;  %15214 = vmatmul.mubr.bf16.gmra.mrb[136].mxu1 %v23805_v31  ;;  %v14128_v1 = vmax.f32 %v13915_v35, 0.0  ;;  %v14130_v29 = vmax.f32 %v14028_v27, 0.0 }
 0xc0c   : > { %v13921_v61 = vadd.f32 %v13920_v54, %v23876_v40  ;;  %v14034_v43 = vadd.f32 %v14033_v12, %v23879_v32  ;;  %15283 = vmatpush1.bf16.msra.mxu1 %v17203_v34  ;;  %15223 = vmatprep.mubr.bf16.mxu1 %v23819_v14  ;;  %v14129_v41 = vmax.f32 %v13917_v23, 0.0  ;;  %v14131_v59 = vmax.f32 %v14030_v46, 0.0  ;;  %v17214_v34 = vld [vmem:[#allocation10 + $0x274] ss:$8 sps:$4 sm:$0xff]  }
 0xc0d   : > { %v14136_v17 = vmax.f32 %v13919_v44, 0.0  ;;  %v14138_v19 = vmax.f32 %v14032_v63, 0.0  ;;  %15284 = vmatprep.subr.bf16.mxu1 %v17208_v48  ;;  %v17212_v63 = vld [vmem:[#allocation10 + $0x270] ss:$8 sps:$4 sm:$0xff]  }
 0xc0e   : > { %v14137_v38 = vmax.f32 %v13921_v61, 0.0  ;;  %v14139_v9 = vmax.f32 %v14034_v43, 0.0 }
 0xc0f   : > { %v23948_v6 = vpack.c.bf16 %v14136_v17, %v14128_v1  ;;  %v23950_v31 = vpack.c.bf16 %v14138_v19, %v14130_v29 }
 0xc10   : > { %v23952_v42 = vpack.c.bf16 %v14137_v38, %v14129_v41  ;;  %v23954_v55 = vpack.c.bf16 %v14139_v9, %v14131_v59  ;;  %15285 = vmatpush1.bf16.msra.mxu1 %v17206_v2  ;;  %v13924_v14 = vpop.f32.mrb[112].mxu1  ;;  %v14037_v37 = vpop.f32.mrb[240].mxu0  ;;  %v17217_v2 = vld [vmem:[#allocation10 + $0x284] ss:$8 sps:$4 sm:$0xff]   ;;  %v17215_v9 = vld [vmem:[#allocation10 + $0x280] ss:$8 sps:$4 sm:$0xff]  }
 0xc11   : > { %v13925_v49 = vadd.f32 %v13924_v14, %v23868_v15  ;;  %v14038_v25 = vadd.f32 %v14037_v37, %v23871_v45  ;;  %v13926_v52 = vpop.f32.mrb[113].mxu1  ;;  %v14039_v51 = vpop.f32.mrb[241].mxu0  ;;  %15286 = vmatprep.subr.bf16.mxu1 %v17211_v4 }
 0xc12   : > { %v13927_v35 = vadd.f32 %v13926_v52, %v23876_v40  ;;  %v14040_v27 = vadd.f32 %v14039_v51, %v23879_v32  ;;  %v13928_v20 = vpop.f32.mrb[114].mxu1  ;;  %v14041_v3 = vpop.f32.mrb[242].mxu0 }
 0xc13   : > { %v13929_v48 = vadd.f32 %v13928_v20, %v23868_v15  ;;  %v14042_v23 = vadd.f32 %v14041_v3, %v23871_v45  ;;  %v13930_v46 = vpop.f32.mrb[115].mxu1  ;;  %v14043_v58 = vpop.f32.mrb[243].mxu0  ;;  %15224 = vmatmul.mubr.bf16.gmra.mrb[140].mxu1 %v23817_v13  ;;  %v14144_v54 = vmax.f32 %v13925_v49, 0.0  ;;  %v14146_v12 = vmax.f32 %v14038_v25, 0.0  ;;  %v17220_v25 = vld [vmem:[#allocation10 + $0x294] ss:$8 sps:$4 sm:$0xff]  }
 0xc14   : > { %v13931_v21 = vadd.f32 %v13930_v46, %v23876_v40  ;;  %v14044_v44 = vadd.f32 %v14043_v58, %v23879_v32  ;;  %15287 = vmatpush1.bf16.msra.mxu1 %v17209_v39  ;;  %15233 = vmatprep.mubr.bf16.mxu1 %v23831_v57  ;;  %v14145_v1 = vmax.f32 %v13927_v35, 0.0  ;;  %v14147_v29 = vmax.f32 %v14040_v27, 0.0  ;;  %v17218_v58 = vld [vmem:[#allocation10 + $0x290] ss:$8 sps:$4 sm:$0xff]  }
 0xc15   : > { %v14152_v61 = vmax.f32 %v13929_v48, 0.0  ;;  %v14154_v43 = vmax.f32 %v14042_v23, 0.0  ;;  %15288 = vmatprep.subr.bf16.mxu1 %v17214_v34 }
 0xc16   : > { %v14153_v17 = vmax.f32 %v13931_v21, 0.0  ;;  %v14155_v19 = vmax.f32 %v14044_v44, 0.0 }
 0xc17   : > { %v23966_v4 = vpack.c.bf16 %v14152_v61, %v14144_v54  ;;  %v23968_v13 = vpack.c.bf16 %v14154_v43, %v14146_v12  ;;  %v17223_v12 = vld [vmem:[#allocation10 + $0x2a4] ss:$8 sps:$4 sm:$0xff]  }
 0xc18   : > { %v23970_v41 = vpack.c.bf16 %v14153_v17, %v14145_v1  ;;  %v23972_v59 = vpack.c.bf16 %v14155_v19, %v14147_v29  ;;  %15289 = vmatpush1.bf16.msra.mxu1 %v17212_v63  ;;  %v13934_v57 = vpop.f32.mrb[116].mxu1  ;;  %v14047_v38 = vpop.f32.mrb[244].mxu0 }
 0xc19   : > { %v13935_v14 = vadd.f32 %v13934_v57, %v23868_v15  ;;  %v14048_v37 = vadd.f32 %v14047_v38, %v23871_v45  ;;  %v13936_v39 = vpop.f32.mrb[117].mxu1  ;;  %v14049_v49 = vpop.f32.mrb[245].mxu0  ;;  %15290 = vmatprep.subr.bf16.mxu1 %v17217_v2  ;;  %v17221_v38 = vld [vmem:[#allocation10 + $0x2a0] ss:$8 sps:$4 sm:$0xff]  }
 0xc1a   : > { %v13937_v52 = vadd.f32 %v13936_v39, %v23876_v40  ;;  %v14050_v51 = vadd.f32 %v14049_v49, %v23879_v32  ;;  %v13938_v34 = vpop.f32.mrb[118].mxu1  ;;  %v14051_v35 = vpop.f32.mrb[246].mxu0  ;;  %v17226_v49 = vld [vmem:[#allocation10 + $0x2b4] ss:$8 sps:$4 sm:$0xff]  }
 0xc1b   : > { %v13939_v27 = vadd.f32 %v13938_v34, %v23868_v15  ;;  %v14052_v20 = vadd.f32 %v14051_v35, %v23871_v45  ;;  %v13940_v3 = vpop.f32.mrb[119].mxu1  ;;  %v14053_v48 = vpop.f32.mrb[247].mxu0  ;;  %15234 = vmatmul.mubr.bf16.gmra.mrb[144].mxu1 %v23829_v33  ;;  %v14160_v21 = vmax.f32 %v13935_v14, 0.0  ;;  %v14162_v44 = vmax.f32 %v14048_v37, 0.0 }
 0xc1c   : > { %v13941_v23 = vadd.f32 %v13940_v3, %v23876_v40  ;;  %v14054_v46 = vadd.f32 %v14053_v48, %v23879_v32  ;;  %15291 = vmatpush1.bf16.msra.mxu1 %v17215_v9  ;;  %15243 = vmatprep.mubr.bf16.mxu1 %v23843_v22  ;;  %v14161_v61 = vmax.f32 %v13937_v52, 0.0  ;;  %v14163_v43 = vmax.f32 %v14050_v51, 0.0 }
 0xc1d   : > { %v14168_v63 = vmax.f32 %v13939_v27, 0.0  ;;  %v14170_v54 = vmax.f32 %v14052_v20, 0.0  ;;  %15292 = vmatprep.subr.bf16.mxu1 %v17220_v25 }
 0xc1e   : > { %v14169_v2 = vmax.f32 %v13941_v23, 0.0  ;;  %v14171_v1 = vmax.f32 %v14054_v46, 0.0  ;;  %v17224_v46 = vld [vmem:[#allocation10 + $0x2b0] ss:$8 sps:$4 sm:$0xff]  }
 0xc1f   : > { %v23984_v29 = vpack.c.bf16 %v14168_v63, %v14160_v21  ;;  %v23986_v33 = vpack.c.bf16 %v14170_v54, %v14162_v44  ;;  %v17229_v54 = vld [vmem:[#allocation10 + $0x2c4] ss:$8 sps:$4 sm:$0xff]  }
 0xc20   : > { %v23988_v17 = vpack.c.bf16 %v14169_v2, %v14161_v61  ;;  %v23990_v19 = vpack.c.bf16 %v14171_v1, %v14163_v43  ;;  %15293 = vmatpush1.bf16.msra.mxu1 %v17218_v58  ;;  %v13944_v22 = vpop.f32.mrb[120].mxu1  ;;  %v14057_v57 = vpop.f32.mrb[248].mxu0 }
 0xc21   : > { %v13945_v9 = vadd.f32 %v13944_v22, %v23868_v15  ;;  %v14058_v14 = vadd.f32 %v14057_v57, %v23871_v45  ;;  %v13946_v37 = vpop.f32.mrb[121].mxu1  ;;  %v14059_v39 = vpop.f32.mrb[249].mxu0  ;;  %15294 = vmatprep.subr.bf16.mxu1 %v17223_v12 }
 0xc22   : > { %v13947_v25 = vadd.f32 %v13946_v37, %v23876_v40  ;;  %v14060_v52 = vadd.f32 %v14059_v39, %v23879_v32  ;;  %v13948_v51 = vpop.f32.mrb[122].mxu1  ;;  %v14061_v34 = vpop.f32.mrb[250].mxu0 }
 0xc23   : > { %v13949_v35 = vadd.f32 %v13948_v51, %v23868_v15  ;;  %v14062_v27 = vadd.f32 %v14061_v34, %v23871_v45  ;;  %v13950_v20 = vpop.f32.mrb[123].mxu1  ;;  %v14063_v3 = vpop.f32.mrb[251].mxu0  ;;  %15244 = vmatmul.mubr.bf16.gmra.mrb[148].mxu1 %v23841_v50  ;;  %v14176_v58 = vmax.f32 %v13945_v9, 0.0  ;;  %v14178_v21 = vmax.f32 %v14058_v14, 0.0  ;;  %v17227_v9 = vld [vmem:[#allocation10 + $0x2c0] ss:$8 sps:$4 sm:$0xff]  }
 0xc24   : > { %v13951_v48 = vadd.f32 %v13950_v20, %v23876_v40  ;;  %v14064_v23 = vadd.f32 %v14063_v3, %v23879_v32  ;;  %15295 = vmatpush1.bf16.msra.mxu1 %v17221_v38  ;;  %15253 = vmatprep.mubr.bf16.mxu1 %v23857_v0  ;;  %v14177_v12 = vmax.f32 %v13947_v25, 0.0  ;;  %v14179_v61 = vmax.f32 %v14060_v52, 0.0  ;;  %v17232_v25 = vld [vmem:[#allocation10 + $0x2d4] ss:$8 sps:$4 sm:$0xff]  }
 0xc25   : > { %v14184_v44 = vmax.f32 %v13949_v35, 0.0  ;;  %v14186_v63 = vmax.f32 %v14062_v27, 0.0  ;;  %15296 = vmatprep.subr.bf16.mxu1 %v17226_v49 }
 0xc26   : > { %v14185_v43 = vmax.f32 %v13951_v48, 0.0  ;;  %v14187_v2 = vmax.f32 %v14064_v23, 0.0 }
 0xc27   : > { %v24002_v1 = vpack.c.bf16 %v14184_v44, %v14176_v58  ;;  %v24004_v50 = vpack.c.bf16 %v14186_v63, %v14178_v21  ;;  %v17230_v58 = vld [vmem:[#allocation10 + $0x2d0] ss:$8 sps:$4 sm:$0xff]  }
 0xc28   : > { %v24006_v22 = vpack.c.bf16 %v14185_v43, %v14177_v12  ;;  %v24008_v57 = vpack.c.bf16 %v14187_v2, %v14179_v61  ;;  %15297 = vmatpush1.bf16.msra.mxu1 %v17224_v46  ;;  %v13954_v0 = vpop.f32.mrb[124].mxu1  ;;  %v14067_v38 = vpop.f32.mrb[252].mxu0 }
 0xc29   : > { %v13955_v14 = vadd.f32 %v13954_v0, %v23868_v15  ;;  %v14068_v37 = vadd.f32 %v14067_v38, %v23871_v45  ;;  %v13956_v39 = vpop.f32.mrb[125].mxu1  ;;  %v14069_v49 = vpop.f32.mrb[253].mxu0  ;;  %15298 = vmatprep.subr.bf16.mxu1 %v17229_v54  ;;  %v17238_v0 = vld [vmem:[#allocation10 + $0x2f4] ss:$8 sps:$4 sm:$0xff]   ;;  %v17236_v38 = vld [vmem:[#allocation10 + $0x2f0] ss:$8 sps:$4 sm:$0xff]  }
 0xc2a   : > { %v13957_v52 = vadd.f32 %v13956_v39, %v23876_v40  ;;  %v14070_v51 = vadd.f32 %v14069_v49, %v23879_v32  ;;  %v13958_v34 = vpop.f32.mrb[126].mxu1  ;;  %v14071_v35 = vpop.f32.mrb[254].mxu0  ;;  %v17242_v39 = vld [vmem:[#allocation10 + $0x310] ss:$8 sps:$4 sm:$0xff]   ;;  %v17247_v49 = vld [vmem:[#allocation10 + $0x324] ss:$8 sps:$4 sm:$0xff]  }
 0xc2b   : > { %v13959_v27 = vadd.f32 %v13958_v34, %v23868_v15  ;;  %v14072_v20 = vadd.f32 %v14071_v35, %v23871_v45  ;;  %v13960_v3 = vpop.f32.mrb[127].mxu1  ;;  %v14073_v48 = vpop.f32.mrb[255].mxu0  ;;  %15254 = vmatmul.mubr.bf16.gmra.mrb[152].mxu1 %v23853_v26  ;;  %v14192_v21 = vmax.f32 %v13955_v14, 0.0  ;;  %v14194_v44 = vmax.f32 %v14068_v37, 0.0  ;;  %v17235_v15 = vld [vmem:[#allocation10 + $0x2e4] ss:$8 sps:$4 sm:$0xff]  }
 0xc2c   : > { %v13961_v23 = vadd.f32 %v13960_v3, %v23876_v40  ;;  %v14074_v46 = vadd.f32 %v14073_v48, %v23879_v32  ;;  %15299 = vmatpush1.bf16.msra.mxu1 %v17227_v9  ;;  %15263 = vmatprep.mubr.bf16.mxu1 %v23883_v56  ;;  %v14193_v12 = vmax.f32 %v13957_v52, 0.0  ;;  %v14195_v45 = vmax.f32 %v14070_v51, 0.0  ;;  %v17233_v56 = vld [vmem:[#allocation10 + $0x2e0] ss:$8 sps:$4 sm:$0xff]   ;;  %v17241_v9 = vld [vmem:[#allocation10 + $0x304] ss:$8 sps:$4 sm:$0xff]  }
 0xc2d   : > { %v14200_v63 = vmax.f32 %v13959_v27, 0.0  ;;  %v14202_v54 = vmax.f32 %v14072_v20, 0.0  ;;  %15300 = vmatprep.subr.bf16.mxu1 %v17232_v25  ;;  %v17239_v14 = vld [vmem:[#allocation10 + $0x300] ss:$8 sps:$4 sm:$0xff]   ;;  %v17244_v37 = vld [vmem:[#allocation10 + $0x314] ss:$8 sps:$4 sm:$0xff]  }
 0xc2e   : > { %v14201_v61 = vmax.f32 %v13961_v23, 0.0  ;;  %v14203_v43 = vmax.f32 %v14074_v46, 0.0  ;;  %v17250_v25 = vld [vmem:[#allocation10 + $0x334] ss:$8 sps:$4 sm:$0xff]   ;;  %v17253_v52 = vld [vmem:[#allocation10 + $0x344] ss:$8 sps:$4 sm:$0xff]  }
 0xc2f   : > { %v24020_v2 = vpack.c.bf16 %v14200_v63, %v14192_v21  ;;  %v24022_v26 = vpack.c.bf16 %v14202_v54, %v14194_v44  ;;  %v17256_v51 = vld [vmem:[#allocation10 + $0x354] ss:$8 sps:$4 sm:$0xff]   ;;  %v17259_v34 = vld [vmem:[#allocation10 + $0x364] ss:$8 sps:$4 sm:$0xff]  }
 0xc30   : > { %v24024_v40 = vpack.c.bf16 %v14201_v61, %v14193_v12  ;;  %v24026_v32 = vpack.c.bf16 %v14203_v43, %v14195_v45  ;;  %15301 = vmatpush1.bf16.msra.mxu1 %v17230_v58  ;;  %v17262_v35 = vld [vmem:[#allocation10 + $0x374] ss:$8 sps:$4 sm:$0xff]   ;;  %v17265_v27 = vld [vmem:[#allocation10 + $0x384] ss:$8 sps:$4 sm:$0xff]  }
 0xc31   : > { %15302 = vmatprep.subr.bf16.mxu1 %v17235_v15  ;;  %v17268_v20 = vld [vmem:[#allocation10 + $0x394] ss:$8 sps:$4 sm:$0xff]   ;;  %v17271_v3 = vld [vmem:[#allocation10 + $0x3a4] ss:$8 sps:$4 sm:$0xff]  }
 0xc32   : > { %v17274_v48 = vld [vmem:[#allocation10 + $0x3b4] ss:$8 sps:$4 sm:$0xff]   ;;  %v17277_v23 = vld [vmem:[#allocation10 + $0x3c4] ss:$8 sps:$4 sm:$0xff]  }
 0xc33   : > { %15264 = vmatmul.mubr.bf16.gmra.mrb[156].mxu1 %v23881_v10  ;;  %v17245_v10 = vld [vmem:[#allocation10 + $0x320] ss:$8 sps:$4 sm:$0xff]   ;;  %v17280_v46 = vld [vmem:[#allocation10 + $0x3d4] ss:$8 sps:$4 sm:$0xff]   ;;  %v17283_v58 = vld [vmem:[#allocation10 + $0x3e4] ss:$8 sps:$4 sm:$0xff]  }
 0xc34   : > { %15303 = vmatpush1.bf16.msra.mxu1 %v17233_v56  ;;  %15306 = vmatprep.mubr.bf16.mxu1 %v23898_v11  ;;  %v17248_v11 = vld [vmem:[#allocation10 + $0x330] ss:$8 sps:$4 sm:$0xff]   ;;  %v17286_v21 = vld [vmem:[#allocation10 + $0x3f4] ss:$8 sps:$4 sm:$0xff]   ;;  %v25184_v43 = vld [vmem:[#allocation74_spill] sm:$0xff] }
 0xc35   : > { %15304 = vmatprep.subr.bf16.mxu1 %v17238_v0  ;;  %v25183_v44 = vld [vmem:[#allocation32_spill] sm:$0xff] }
 0xc38   : > { %15305 = vmatpush1.bf16.msra.mxu1 %v17236_v38  ;;  %v25186_v38 = vld [vmem:[#allocation26_spill] sm:$0xff] }
 0xc39   : > { %15387 = vmatprep.subr.bf16.mxu1 %v17241_v9 }
 0xc3b   : > { %15307 = vmatmul.mubr.bf16.vlgmr.msra.gmra.mrb[128].mxu1 %v23894_v5  ;;  %v17251_v5 = vld [vmem:[#allocation10 + $0x340] ss:$8 sps:$4 sm:$0xff]  }
 0xc3c   : > { %15388 = vmatpush1.bf16.msra.mxu1 %v17239_v14  ;;  %15316 = vmatprep.mubr.bf16.mxu1 %v23916_v60  ;;  %v17254_v60 = vld [vmem:[#allocation10 + $0x350] ss:$8 sps:$4 sm:$0xff]  }
 0xc3d   : > { %15389 = vmatprep.subr.bf16.mxu1 %v17244_v37  ;;  %v25187_v14 = vld [vmem:[#allocation76_spill] sm:$0xff] }
 0xc40   : > { %15390 = vmatpush1.bf16.msra.mxu1 %v17242_v39 }
 0xc41   : > { %15391 = vmatprep.subr.bf16.mxu1 %v17247_v49 }
 0xc43   : > { %15317 = vmatmul.mubr.bf16.gmra.mrb[132].mxu1 %v23912_v24  ;;  %v17257_v24 = vld [vmem:[#allocation10 + $0x360] ss:$8 sps:$4 sm:$0xff]  }
 0xc44   : > { %15392 = vmatpush1.bf16.msra.mxu1 %v17245_v10  ;;  %15326 = vmatprep.mubr.bf16.mxu1 %v23934_v28  ;;  %v17260_v28 = vld [vmem:[#allocation10 + $0x370] ss:$8 sps:$4 sm:$0xff]  }
 0xc45   : > { %15393 = vmatprep.subr.bf16.mxu1 %v17250_v25 }
 0xc48   : > { %15394 = vmatpush1.bf16.msra.mxu1 %v17248_v11 }
 0xc49   : > { %15395 = vmatprep.subr.bf16.mxu1 %v17253_v52  ;;  %v25188_v52 = vld [vmem:[#allocation57_spill] sm:$0xff] }
 0xc4b   : > { %15327 = vmatmul.mubr.bf16.gmra.mrb[136].mxu1 %v23930_v62  ;;  %v17263_v62 = vld [vmem:[#allocation10 + $0x380] ss:$8 sps:$4 sm:$0xff]  }
 0xc4c   : > { %15396 = vmatpush1.bf16.msra.mxu1 %v17251_v5  ;;  %15336 = vmatprep.mubr.bf16.mxu1 %v23952_v42  ;;  %v17266_v42 = vld [vmem:[#allocation10 + $0x390] ss:$8 sps:$4 sm:$0xff]  }
 0xc4d   : > { %15397 = vmatprep.subr.bf16.mxu1 %v17256_v51 }
 0xc50   : > { %15398 = vmatpush1.bf16.msra.mxu1 %v17254_v60 }
 0xc51   : > { %15399 = vmatprep.subr.bf16.mxu1 %v17259_v34  ;;  %v25189_v34 = vld [vmem:[#allocation56_spill] sm:$0xff] }
 0xc53   : > { %15337 = vmatmul.mubr.bf16.gmra.mrb[140].mxu1 %v23948_v6  ;;  %v17269_v6 = vld [vmem:[#allocation10 + $0x3a0] ss:$8 sps:$4 sm:$0xff]  }
 0xc54   : > { %15400 = vmatpush1.bf16.msra.mxu1 %v17257_v24  ;;  %15346 = vmatprep.mubr.bf16.mxu1 %v23970_v41  ;;  %v17272_v41 = vld [vmem:[#allocation10 + $0x3b0] ss:$8 sps:$4 sm:$0xff]  }
 0xc55   : > { %15401 = vmatprep.subr.bf16.mxu1 %v17262_v35 }
 0xc58   : > { %15402 = vmatpush1.bf16.msra.mxu1 %v17260_v28  ;;  %v25190_v28 = vld [vmem:[#allocation54_spill] sm:$0xff] }
 0xc59   : > { %15403 = vmatprep.subr.bf16.mxu1 %v17265_v27 }
 0xc5b   : > { %15347 = vmatmul.mubr.bf16.gmra.mrb[144].mxu1 %v23966_v4  ;;  %v17275_v4 = vld [vmem:[#allocation10 + $0x3c0] ss:$8 sps:$4 sm:$0xff]  }
 0xc5c   : > { %15404 = vmatpush1.bf16.msra.mxu1 %v17263_v62  ;;  %15356 = vmatprep.mubr.bf16.mxu1 %v23988_v17  ;;  %v17278_v17 = vld [vmem:[#allocation10 + $0x3d0] ss:$8 sps:$4 sm:$0xff]   ;;  %v25191_v62 = vld [vmem:[#allocation55_spill] sm:$0xff] }
 0xc5d   : > { %15405 = vmatprep.subr.bf16.mxu1 %v17268_v20 }
 0xc60   : > { %15406 = vmatpush1.bf16.msra.mxu1 %v17266_v42 }
 0xc61   : > { %15407 = vmatprep.subr.bf16.mxu1 %v17271_v3 }
 0xc63   : > { %15357 = vmatmul.mubr.bf16.gmra.mrb[148].mxu1 %v23984_v29  ;;  %v17281_v29 = vld [vmem:[#allocation10 + $0x3e0] ss:$8 sps:$4 sm:$0xff]  }
 0xc64   : > { %15408 = vmatpush1.bf16.msra.mxu1 %v17269_v6  ;;  %15366 = vmatprep.mubr.bf16.mxu1 %v24006_v22  ;;  %v17284_v22 = vld [vmem:[#allocation10 + $0x3f0] ss:$8 sps:$4 sm:$0xff]  }
 0xc65   : > { %15409 = vmatprep.subr.bf16.mxu1 %v17274_v48 }
 0xc68   : > { %15410 = vmatpush1.bf16.msra.mxu1 %v17272_v41 }
 0xc69   : > { %15411 = vmatprep.subr.bf16.mxu1 %v17277_v23  ;;  %v25192_v23 = vld [vmem:[#allocation36_spill] sm:$0xff] }
 0xc6b   : > { %15367 = vmatmul.mubr.bf16.gmra.mrb[152].mxu1 %v24002_v1  ;;  %v25181_v1 = vld [vmem:[#allocation89_spill] sm:$0xff] }
 0xc6c   : > { %15412 = vmatpush1.bf16.msra.mxu1 %v17275_v4  ;;  %15376 = vmatprep.mubr.bf16.mxu1 %v24024_v40 }
 0xc6d   : > { %15413 = vmatprep.subr.bf16.mxu1 %v17280_v46 }
 0xc70   : > { %15414 = vmatpush1.bf16.msra.mxu1 %v17278_v17 }
 0xc71   : > { %15415 = vmatprep.subr.bf16.mxu1 %v17283_v58  ;;  %v25193_v58 = vld [vmem:[#allocation34_spill] sm:$0xff] }
 0xc73   : > { %15377 = vmatmul.mubr.bf16.gmra.mrb[156].mxu1 %v24020_v2 }
 0xc74   : > { %15416 = vmatpush1.bf16.msra.mxu1 %v17281_v29  ;;  %15419 = vmatprep.mubr.bf16.mxu1 %v23900_v18 }
 0xc75   : > { %15417 = vmatprep.subr.bf16.mxu1 %v17286_v21 }
 0xc78   : > { %15418 = vmatpush1.bf16.msra.mxu1 %v17284_v22  ;;  %v25194_v22 = vld [vmem:[#allocation40_spill] sm:$0xff] }
 0xc7b   : > { %15420 = vmatmul.mubr.bf16.vlgmr.msra.gmra.mrb[128].mxu1 %v23896_v36  ;;  %v14396_v36 = vld [vmem:[%s25179_s16] sm:$0x3] }
 0xc7c   : > { %15429 = vmatprep.mubr.bf16.mxu1 %v23918_v47  ;;  %v24065_v18 = vrot.slane %v14396_v36, %v25141_v30 }
 0xc83   : > { %15430 = vmatmul.mubr.bf16.gmra.mrb[132].mxu1 %v23914_v8  ;;  %v24068_v8 = vrot.slane %v14396_v36, %v25142_v16  ;;  %v25182_v16 = vld [vmem:[#allocation88_spill] sm:$0xff] }
 0xc84   : > { %15439 = vmatprep.mubr.bf16.mxu1 %v23936_v7 }
 0xc8b   : > { %15440 = vmatmul.mubr.bf16.gmra.mrb[136].mxu1 %v23932_v53 }
 0xc8c   : > { %15449 = vmatprep.mubr.bf16.mxu1 %v23954_v55 }
 0xc93   : > { %15450 = vmatmul.mubr.bf16.gmra.mrb[140].mxu1 %v23950_v31 }
 0xc94   : > { %15459 = vmatprep.mubr.bf16.mxu1 %v23972_v59 }
 0xc9b   : > { %15460 = vmatmul.mubr.bf16.gmra.mrb[144].mxu1 %v23968_v13  ;;  %v25180_v13 = vld [vmem:[#allocation53_spill] sm:$0xff] }
 0xc9c   : > { %15469 = vmatprep.mubr.bf16.mxu1 %v23990_v19 }
 0xca3   : > { %15470 = vmatmul.mubr.bf16.gmra.mrb[148].mxu1 %v23986_v33 }
 0xca4   : > { %15479 = vmatprep.mubr.bf16.mxu1 %v24008_v57 }
 0xcab   : > { %15480 = vmatmul.mubr.bf16.gmra.mrb[152].mxu1 %v24004_v50 }
 0xcac   : > { %15489 = vmatprep.mubr.bf16.mxu1 %v24026_v32  ;;  %v25185_v32 = vld [vmem:[#allocation22_spill] sm:$0xff] }
 0xcb3   : > { %15490 = vmatmul.mubr.bf16.gmra.mrb[156].mxu1 %v24022_v26 }
 0xd4e   : > { %v15421_v47 = vpop.f32.mrb[128].mxu1 }
 0xd4f   : > { %v16641_v53 = vadd.f32 %v15421_v47, %v24065_v18  ;;  %v15423_v7 = vpop.f32.mrb[129].mxu1  ;;  %v25195_v47 = vld [vmem:[#allocation73_spill] sm:$0xff] }
 0xd50   : > { %v16642_v31 = vadd.f32 %v15423_v7, %v24068_v8  ;;  %v15425_v55 = vpop.f32.mrb[130].mxu1 }
 0xd51   : > { %v15500_v59 = vadd.f32 %v16641_v53, %v25180_v13  ;;  %v16643_v33 = vadd.f32 %v15425_v55, %v24065_v18  ;;  %v15427_v19 = vpop.f32.mrb[131].mxu1 }
 0xd52   : > { %v15501_v50 = vadd.f32 %v16642_v31, %v25181_v1  ;;  %v16644_v30 = vadd.f32 %v15427_v19, %v24068_v8 }
 0xd53   : > { %15532 = vst [vmem:[%s24078_s28] sm:$0xff] %v15500_v59  ;;  %v15502_v57 = vadd.f32 %v16643_v33, %v25182_v16  ;;  %v25196_v33 = vld [vmem:[#allocation72_spill] sm:$0xff] }
 0xd54   : > { %15533 = vst [vmem:[%s24078_s28 + $0x8] sm:$0xff] %v15501_v50  ;;  %v15503_v63 = vadd.f32 %v16644_v30, %v25183_v44  ;;  %v25197_v30 = vld [vmem:[#allocation23_spill] sm:$0xff] }
 0xd55   : > { %15534 = vst [vmem:[%s24078_s28 + $0x10] sm:$0xff] %v15502_v57  ;;  %v25198_v44 = vld [vmem:[#allocation43_spill] sm:$0xff] }
 0xd56   : > { %15535 = vst [vmem:[%s24078_s28 + $0x18] sm:$0xff] %v15503_v63  ;;  %v15431_v54 = vpop.f32.mrb[132].mxu1 }
 0xd57   : > { %v16645_v15 = vadd.f32 %v15431_v54, %v24065_v18  ;;  %v15433_v12 = vpop.f32.mrb[133].mxu1  ;;  %v25199_v54 = vld [vmem:[#allocation69_spill] sm:$0xff] }
 0xd58   : > { %v16646_v45 = vadd.f32 %v15433_v12, %v24068_v8  ;;  %v15435_v61 = vpop.f32.mrb[134].mxu1 }
 0xd59   : > { %v15504_v2 = vadd.f32 %v16645_v15, %v25184_v43  ;;  %v16647_v26 = vadd.f32 %v15435_v61, %v24065_v18  ;;  %v15437_v40 = vpop.f32.mrb[135].mxu1 }
 0xd5a   : > { %v15505_v56 = vadd.f32 %v16646_v45, %v25185_v32  ;;  %v16648_v0 = vadd.f32 %v15437_v40, %v24068_v8 }
 0xd5b   : > { %15536 = vst [vmem:[%s24078_s28 + $0x20] sm:$0xff] %v15504_v2  ;;  %v15506_v9 = vadd.f32 %v16647_v26, %v25186_v38  ;;  %v25200_v26 = vld [vmem:[#allocation68_spill] sm:$0xff] }
 0xd5c   : > { %15537 = vst [vmem:[%s24078_s28 + $0x28] sm:$0xff] %v15505_v56  ;;  %v15507_v37 = vadd.f32 %v16648_v0, %v25187_v14  ;;  %v25201_v0 = vld [vmem:[#allocation71_spill] sm:$0xff]  ;;  %v25202_v14 = vld [vmem:[#allocation48_spill] sm:$0xff] }
 0xd5d   : > { %15538 = vst [vmem:[%s24078_s28 + $0x30] sm:$0xff] %v15506_v9 }
 0xd5e   : > { %15539 = vst [vmem:[%s24078_s28 + $0x38] sm:$0xff] %v15507_v37  ;;  %v15441_v39 = vpop.f32.mrb[136].mxu1 }
 0xd5f   : > { %v16649_v49 = vadd.f32 %v15441_v39, %v24065_v18  ;;  %v15443_v10 = vpop.f32.mrb[137].mxu1  ;;  %v25203_v39 = vld [vmem:[#allocation49_spill] sm:$0xff] }
 0xd60   : > { %v16650_v25 = vadd.f32 %v15443_v10, %v24068_v8  ;;  %v15445_v11 = vpop.f32.mrb[138].mxu1 }
 0xd61   : > { %v15508_v5 = vadd.f32 %v16649_v49, %v25188_v52  ;;  %v16651_v51 = vadd.f32 %v15445_v11, %v24065_v18  ;;  %v15447_v60 = vpop.f32.mrb[139].mxu1 }
 0xd62   : > { %v15509_v24 = vadd.f32 %v16650_v25, %v25189_v34  ;;  %v16652_v35 = vadd.f32 %v15447_v60, %v24068_v8 }
 0xd63   : > { %15540 = vst [vmem:[%s24078_s28 + $0x40] sm:$0xff] %v15508_v5  ;;  %v15510_v27 = vadd.f32 %v16651_v51, %v25190_v28  ;;  %v25204_v51 = vld [vmem:[#allocation70_spill] sm:$0xff] }
 0xd64   : > { %15541 = vst [vmem:[%s24078_s28 + $0x48] sm:$0xff] %v15509_v24  ;;  %v15511_v20 = vadd.f32 %v16652_v35, %v25191_v62  ;;  %v25205_v35 = vld [vmem:[#allocation50_spill] sm:$0xff]  ;;  %v25206_v62 = vld [vmem:[#allocation21_spill] sm:$0xff] }
 0xd65   : > { %15542 = vst [vmem:[%s24078_s28 + $0x50] sm:$0xff] %v15510_v27 }
 0xd66   : > { %15543 = vst [vmem:[%s24078_s28 + $0x58] sm:$0xff] %v15511_v20  ;;  %v15451_v42 = vpop.f32.mrb[140].mxu1 }
 0xd67   : > { %v16653_v3 = vadd.f32 %v15451_v42, %v24065_v18  ;;  %v15453_v6 = vpop.f32.mrb[141].mxu1  ;;  %v25207_v42 = vld [vmem:[#allocation75_spill] sm:$0xff] }
 0xd68   : > { %v16654_v48 = vadd.f32 %v15453_v6, %v24068_v8  ;;  %v15455_v41 = vpop.f32.mrb[142].mxu1 }
 0xd69   : > { %v15512_v4 = vadd.f32 %v16653_v3, %v25192_v23  ;;  %v16655_v46 = vadd.f32 %v15455_v41, %v24065_v18  ;;  %v15457_v17 = vpop.f32.mrb[143].mxu1 }
 0xd6a   : > { %v15513_v29 = vadd.f32 %v16654_v48, %v25193_v58  ;;  %v16656_v21 = vadd.f32 %v15457_v17, %v24068_v8 }
 0xd6b   : > { %15544 = vst [vmem:[%s24078_s28 + $0x60] sm:$0xff] %v15512_v4  ;;  %v15514_v36 = vadd.f32 %v16655_v46, %v25194_v22  ;;  %v25208_v46 = vld [vmem:[#allocation25_spill] sm:$0xff] }
 0xd6c   : > { %15545 = vst [vmem:[%s24078_s28 + $0x68] sm:$0xff] %v15513_v29  ;;  %v15515_v53 = vadd.f32 %v16656_v21, %v25195_v47  ;;  %v25209_v21 = vld [vmem:[#allocation24_spill] sm:$0xff]  ;;  %v25210_v47 = vld [vmem:[#allocation82_spill] sm:$0xff] }
 0xd6d   : > { %15546 = vst [vmem:[%s24078_s28 + $0x70] sm:$0xff] %v15514_v36 }
 0xd6e   : > { %15547 = vst [vmem:[%s24078_s28 + $0x78] sm:$0xff] %v15515_v53  ;;  %v15461_v7 = vpop.f32.mrb[144].mxu1 }
 0xd6f   : > { %v16657_v31 = vadd.f32 %v15461_v7, %v24065_v18  ;;  %v15463_v55 = vpop.f32.mrb[145].mxu1 }
 0xd70   : > { %v16658_v13 = vadd.f32 %v15463_v55, %v24068_v8  ;;  %v15465_v59 = vpop.f32.mrb[146].mxu1 }
 0xd71   : > { %v15516_v19 = vadd.f32 %v16657_v31, %v25196_v33  ;;  %v16659_v1 = vadd.f32 %v15465_v59, %v24065_v18  ;;  %v15467_v50 = vpop.f32.mrb[147].mxu1 }
 0xd72   : > { %v15517_v16 = vadd.f32 %v16658_v13, %v25197_v30  ;;  %v16660_v57 = vadd.f32 %v15467_v50, %v24068_v8 }
 0xd73   : > { %15548 = vst [vmem:[%s24078_s28 + $0x80] sm:$0xff] %v15516_v19  ;;  %v15518_v63 = vadd.f32 %v16659_v1, %v25198_v44 }
 0xd74   : > { %15549 = vst [vmem:[%s24078_s28 + $0x88] sm:$0xff] %v15517_v16  ;;  %v15519_v15 = vadd.f32 %v16660_v57, %v25199_v54 }
 0xd75   : > { %15550 = vst [vmem:[%s24078_s28 + $0x90] sm:$0xff] %v15518_v63 }
 0xd76   : > { %15551 = vst [vmem:[%s24078_s28 + $0x98] sm:$0xff] %v15519_v15  ;;  %v15471_v12 = vpop.f32.mrb[148].mxu1 }
 0xd77   : > { %v16661_v45 = vadd.f32 %v15471_v12, %v24065_v18  ;;  %v15473_v61 = vpop.f32.mrb[149].mxu1 }
 0xd78   : > { %v16662_v43 = vadd.f32 %v15473_v61, %v24068_v8  ;;  %v15475_v2 = vpop.f32.mrb[150].mxu1 }
 0xd79   : > { %v15520_v40 = vadd.f32 %v16661_v45, %v25200_v26  ;;  %v16663_v32 = vadd.f32 %v15475_v2, %v24065_v18  ;;  %v15477_v56 = vpop.f32.mrb[151].mxu1 }
 0xd7a   : > { %v15521_v38 = vadd.f32 %v16662_v43, %v25201_v0  ;;  %v16664_v9 = vadd.f32 %v15477_v56, %v24068_v8 }
 0xd7b   : > { %15552 = vst [vmem:[%s24078_s28 + $0xa0] sm:$0xff] %v15520_v40  ;;  %v15522_v37 = vadd.f32 %v16663_v32, %v25202_v14 }
 0xd7c   : > { %15553 = vst [vmem:[%s24078_s28 + $0xa8] sm:$0xff] %v15521_v38  ;;  %v15523_v49 = vadd.f32 %v16664_v9, %v25203_v39 }
 0xd7d   : > { %15554 = vst [vmem:[%s24078_s28 + $0xb0] sm:$0xff] %v15522_v37 }
 0xd7e   : > { %15555 = vst [vmem:[%s24078_s28 + $0xb8] sm:$0xff] %v15523_v49  ;;  %v15481_v10 = vpop.f32.mrb[152].mxu1 }
 0xd7f   : > { %v16665_v25 = vadd.f32 %v15481_v10, %v24065_v18  ;;  %v15483_v11 = vpop.f32.mrb[153].mxu1 }
 0xd80   : > { %v16666_v52 = vadd.f32 %v15483_v11, %v24068_v8  ;;  %v15485_v5 = vpop.f32.mrb[154].mxu1 }
 0xd81   : > { %v15524_v60 = vadd.f32 %v16665_v25, %v25204_v51  ;;  %v16667_v34 = vadd.f32 %v15485_v5, %v24065_v18  ;;  %v15487_v24 = vpop.f32.mrb[155].mxu1 }
 0xd82   : > { %v15525_v28 = vadd.f32 %v16666_v52, %v25205_v35  ;;  %v16668_v27 = vadd.f32 %v15487_v24, %v24068_v8 }
 0xd83   : > { %15556 = vst [vmem:[%s24078_s28 + $0xc0] sm:$0xff] %v15524_v60  ;;  %v15526_v20 = vadd.f32 %v16667_v34, %v25206_v62 }
 0xd84   : > { %15557 = vst [vmem:[%s24078_s28 + $0xc8] sm:$0xff] %v15525_v28  ;;  %v15527_v3 = vadd.f32 %v16668_v27, %v25207_v42 }
 0xd85   : > { %15558 = vst [vmem:[%s24078_s28 + $0xd0] sm:$0xff] %v15526_v20 }
 0xd86   : > { %15559 = vst [vmem:[%s24078_s28 + $0xd8] sm:$0xff] %v15527_v3  ;;  %v15491_v6 = vpop.f32.mrb[156].mxu1 }
 0xd87   : > { %v16669_v48 = vadd.f32 %v15491_v6, %v24065_v18  ;;  %v15493_v41 = vpop.f32.mrb[157].mxu1 }
 0xd88   : > { %v16670_v23 = vadd.f32 %v15493_v41, %v24068_v8  ;;  %v15495_v4 = vpop.f32.mrb[158].mxu1 }
 0xd89   : > { %v15528_v17 = vadd.f32 %v16669_v48, %v25208_v46  ;;  %v16671_v58 = vadd.f32 %v15495_v4, %v24065_v18  ;;  %v15497_v29 = vpop.f32.mrb[159].mxu1  ;;  %v25213_v18 = vld [vmem:[#allocation79_spill] sm:$0xff] }
 0xd8a   : > { %v15529_v22 = vadd.f32 %v16670_v23, %v25209_v21  ;;  %v16672_v36 = vadd.f32 %v15497_v29, %v24068_v8 }
 0xd8b   : > { %15560 = vst [vmem:[%s24078_s28 + $0xe0] sm:$0xff] %v15528_v17  ;;  %v15530_v53 = vadd.f32 %v16671_v58, %v25210_v47 }
 0xd8c   : > { %15561 = vst [vmem:[%s24078_s28 + $0xe8] sm:$0xff] %v15529_v22  ;;  %v15531_v7 = vadd.f32 %v16672_v36, %v25213_v18 }
 0xd8d   : > { %15562 = vst [vmem:[%s24078_s28 + $0xf0] sm:$0xff] %v15530_v53 }
 0xd8e   : > { %15563 = vst [vmem:[%s24078_s28 + $0xf8] sm:$0xff] %v15531_v7 }
 0xd8f   : > { %17794 = shalt.err (!%p17791_p13)
}
 0xd90   : > { %s17795_s17 = scalar_lea.hbm %s24171_s14, 4096  ;;  %s17799_s11 = scalar_lea.hbm %s25212_s12, 8192 }
 0xd91   : > { %p17796_p9 = scmp.ne.s32.totalorder %s24171_s14, %s17795_s17  ;;  %p17800_p4 = scmp.lt.u32.totalorder %s24171_s14, %s25212_s12 }
 0xd92   : > { %p17801_p8 = scmp.lt.u32.totalorder %s17799_s11, %s17795_s17  ;;  %p17803_p3 = scmp.lt.u32.totalorder %s17795_s17, %s24171_s14 }
 0xd93   : > { %p17797_p0 = pnand %p17796_p9, %p18099_p10 }
 0xd94   : > { %p17802_p6 = por %p17801_p8, %p17800_p4 }
 0xd95   : > { %p17798_p11 = pneg %p17797_p0 }
 0xd96   : > { %p17804_p5 = por %p17803_p3, %p17802_p6 }
 0xd98   : > { %p17805_p7 = pnand %p17804_p5, %p17798_p11 }
 0xd9a   : > { %17808 = shalt.err (!%p17805_p7)
}
 0xd9b   : > { %s17876_s21 = smov 256   ;;  %s17877_s9 = smov 16  }
 0xd9c   : > { %16819 = dma.vmem_to_hbm [thread:$0]  (%p18099_p10), %s24173_s3, 4096, %s24171_s14, %s15565_s25, %s17876_s21, %s17876_s21, %s17877_s9  }
 0xd9d PF: > { %s25214_s26 = sld [smem:[#allocation16_spill]]  ;;  %s25215_s27 = sld [smem:[#allocation17_spill]] }
 0xd9e   : > { %p25217_p2 = scmp.ge.s32.totalorder %s17855_s24, 2 }
 0xda3   : > { %s15593_s29 = sand.u32 1, %s25214_s26   ;;  %p25216_p12 = scmp.ne.s32.totalorder %s25215_s27, 0 }
 0xda4   : > { %s15594_s17 = scalar_lea.sflag [#allocation4], %s15593_s29 }
 0xda5   : > { %p16839_p1 = pnand %p25217_p2, %p25216_p12 }
 0xda7   : > { %17838 = dma.done.wait (!%p16839_p1), %s15594_s17, 4096  }
 0xda8   : > { %17840 = vsyncadd (!%p16839_p1), %s15594_s17, 4294963200  ;;  %p27_p13 = scmp.ge.s32.totalorder %s18089_s30, 4   ;;  %s25218_s21 = smov %s17847_s22 }
 0xda9   : > { %s25219_s22 = smov %s17851_s23  ;;  %s25220_s23 = smov %s18105_s20 }
 0xdaa   : > { %s25221_s24 = smov %s18089_s30  ;;  %29 = sbr.rel (!%p27_p13) target bundleno = 12 (0xc), region = 129 }
 0xdb1   :  { %15599 = vsyncpa [#allocation3], 1 }
 0xdb2   :  { %15601 = vsyncpa [#allocation3 + $0x1], 1 }
 0xdb3   :  { %15602 = vsyncpa [#allocation6], 1 }
 0xdb4   :  { %15603 = vsyncpa [#allocation9], 1 }
 0xdb5   :  { %15604 = vsyncpa [#allocation4], 1 }
 0xdb6   :  { %15606 = vsyncpa [#allocation4 + $0x1], 1 }

</bundles_post_ra>
